<compile_context>
chip_gen: v6e
topology: v6e:2x2x1
jax: 0.10.0
libtpu: 0.0.40
codegen_flags: <defaults>
</compile_context>

<pallas_src>
import math
import functools
from typing import NamedTuple

import jax
import jax.numpy as jnp
from jax.experimental import pallas as pl
from jax.experimental.pallas import tpu as pltpu

BN_EPS = 1e-5
ACT_DTYPE = jnp.bfloat16            # inter-layer activation storage dtype
MXU_DTYPE = jnp.bfloat16            # matmul operand dtype (f32 accumulation)
LANE = 128                          # all conv outputs padded to this lane width
TILE_M = 1024                       # row tile (sweepable: 512 / 1024 / 2048)
VMEM_BUDGET = 20 * 1024 * 1024      # conservative working-set cap (v7x-safe)
VMEM_LIMIT = 32 * 1024 * 1024       # scoped VMEM limit handed to Mosaic


def _round_up(x, m):
    return ((x + m - 1) // m) * m


def _tile_rows(M, row_bytes):
    """Row tile: as large as possible (fewer grid steps), VMEM-capped, and with
    a v7x megacore guard so grids with M >= 1024 have at least 2 blocks."""
    tm = min(TILE_M, M)
    if M >= 1024:
        # Guarantee >= 2 row blocks so dimension_semantics=("parallel",) can
        # shard the grid across both TensorCores on v7x (no-op on v5e/v6e).
        tm = min(tm, _round_up(-(-M // 2), 128))
    while tm >= 512 and 2 * tm * row_bytes > VMEM_BUDGET:
        tm //= 2
    return tm


# ----------------------------------------------------------------------------
# Pallas kernels
# ----------------------------------------------------------------------------
def _matmul_bn_kernel(x_ref, w_ref, b_ref, o_ref, *, relu):
    # (tm, K)bf16 @ (K, 128)bf16 on the MXU with f32 accumulation, then the
    # folded BN shift (+ optional ReLU) in f32 on the VPU. 128-lane output
    # block -> unmasked, lane-dense store.
    acc = jnp.dot(x_ref[...], w_ref[...], preferred_element_type=jnp.float32)
    acc = acc + b_ref[...]
    if relu:
        acc = jnp.maximum(acc, 0.0)
    o_ref[...] = acc.astype(o_ref.dtype)


def _matmul_bn_res_kernel(x_ref, w_ref, b_ref, r_ref, o_ref, *, relu):
    acc = jnp.dot(x_ref[...], w_ref[...], preferred_element_type=jnp.float32)
    acc = acc + b_ref[...] + r_ref[...].astype(jnp.float32)
    if relu:
        acc = jnp.maximum(acc, 0.0)
    o_ref[...] = acc.astype(o_ref.dtype)


# ----------------------------------------------------------------------------
# Pallas wrapper
# ----------------------------------------------------------------------------
def fused_matmul(x2d, w2d, shift, residual2d=None, relu=True, out_dtype=ACT_DTYPE):
    """out = relu?( (x2d @ w2d) + shift (+ residual2d) ), row-tiled on the MXU.

    w2d / shift / residual2d are lane-padded to a multiple of 128 columns, so
    every output store is an unmasked, lane-dense vst (perf review item #1)."""
    M, K = x2d.shape
    _, Cp = w2d.shape
    assert Cp % LANE == 0, Cp
    x2d = x2d.astype(MXU_DTYPE)
    w2d = w2d.astype(MXU_DTYPE)
    b2 = shift.reshape(1, Cp).astype(jnp.float32)

    row_bytes = K * 2 + Cp * jnp.dtype(out_dtype).itemsize
    if residual2d is not None:
        residual2d = residual2d.astype(ACT_DTYPE)
        row_bytes += Cp * 2
    tm = _tile_rows(M, row_bytes)

    in_specs = [
        pl.BlockSpec((tm, K), lambda i: (i, 0)),
        pl.BlockSpec((K, Cp), lambda i: (0, 0)),   # weight resident across grid
        pl.BlockSpec((1, Cp), lambda i: (0, 0)),
    ]
    args = [x2d, w2d, b2]
    if residual2d is not None:
        in_specs.append(pl.BlockSpec((tm, Cp), lambda i: (i, 0)))
        args.append(residual2d)
        kernel = functools.partial(_matmul_bn_res_kernel, relu=relu)
    else:
        kernel = functools.partial(_matmul_bn_kernel, relu=relu)

    return pl.pallas_call(
        kernel,
        out_shape=jax.ShapeDtypeStruct((M, Cp), out_dtype),
        grid=(pl.cdiv(M, tm),),                    # ragged last block OK (none here)
        in_specs=in_specs,
        out_specs=pl.BlockSpec((tm, Cp), lambda i: (i, 0)),
        compiler_params=pltpu.CompilerParams(
            dimension_semantics=("parallel",),
            vmem_limit_bytes=VMEM_LIMIT,
        ),
    )(*args)


# ----------------------------------------------------------------------------
# Pooling (XLA reshape+reduce, fused under jit — perf review item #2: the
# stacked-window Pallas pool materialized a full activation round trip)
# ----------------------------------------------------------------------------
def pool2d(x, size, op):
    """kernel=stride=size pooling (max or avg), NHWC, lane-padded activations.
    Pad lanes are exactly zero, so max/mean keep them zero."""
    N, H, W, C = x.shape
    Ho, Wo = H // size, W // size
    xr = x[:, :Ho * size, :Wo * size, :].reshape(N, Ho, size, Wo, size, C)
    if op == "max":
        return jnp.max(xr, axis=(2, 4))
    return jnp.mean(xr.astype(jnp.float32), axis=(2, 4)).astype(x.dtype)


# ----------------------------------------------------------------------------
# im2col glue + conv/BN/ReLU layer
# ----------------------------------------------------------------------------
class Act(NamedTuple):
    x: jax.Array   # (N, H, W, LANE) lane-padded activation; pad lanes are zero
    c: int         # true channel count


def _im2col(x, KH, KW, stride, padding):
    N, H, W, Cin = x.shape
    xp = jnp.pad(x, ((0, 0), (padding, padding), (padding, padding), (0, 0)))
    Ho = (H + 2 * padding - KH) // stride + 1
    Wo = (W + 2 * padding - KW) // stride + 1
    patches = []
    for kh in range(KH):
        for kw in range(KW):
            sl = jax.lax.slice(
                xp,
                (0, kh, kw, 0),
                (N, kh + (Ho - 1) * stride + 1, kw + (Wo - 1) * stride + 1, Cin),
                (1, stride, stride, 1),
            )
            patches.append(sl)
    patches = jnp.concatenate(patches, axis=-1)   # (N, Ho, Wo, KH*KW*Cin), bf16
    return patches.reshape(N * Ho * Wo, KH * KW * Cin), N, Ho, Wo


def conv_bn(x, p, stride, padding, relu=True, residual=None):
    """Conv2d(bias=False) + BatchNorm(eval, folded) [+res] [+ReLU] -> padded Act.

    `x` is (N, H, W, >=Cin); only the first Cin channels are used, so both
    lane-padded activations and exact-width concats can be passed directly.
    The channel slice + pad + per-tap slices + concat fuse into one XLA
    fusion producing the compact (M, KH*KW*Cin) patch operand."""
    kh, kw, cin, cout = p["kh"], p["kw"], p["cin"], p["cout"]
    x2d, N, Ho, Wo = _im2col(x[..., :cin].astype(ACT_DTYPE), kh, kw, stride, padding)
    res2d = residual.x.reshape(N * Ho * Wo, LANE) if residual is not None else None
    out2d = fused_matmul(x2d, p["w"], p["shift"], residual2d=res2d, relu=relu)
    return Act(out2d.reshape(N, Ho, Wo, LANE), cout)


# ----------------------------------------------------------------------------
# Parameter initialization (mirrors the PyTorch module __init__; BN folded,
# output channels lane-padded to 128 with zero weight columns / zero shift)
# ----------------------------------------------------------------------------
def init_conv_bn(key, kh, kw, cin, cout):
    assert cout <= LANE
    n = kh * kw * cout
    w = jax.random.normal(key, (kh, kw, cin, cout), jnp.float32) * math.sqrt(2.0 / n)
    # BatchNorm eval mode: weight=1, bias=0, running_mean=0, running_var=1.
    scale = 1.0 / math.sqrt(1.0 + BN_EPS)
    w2d = (w * scale).reshape(kh * kw * cin, cout)
    w2d = jnp.pad(w2d, ((0, 0), (0, LANE - cout))).astype(MXU_DTYPE)
    shift = jnp.zeros((LANE,), jnp.float32)
    return {"w": w2d, "shift": shift, "kh": kh, "kw": kw, "cin": cin, "cout": cout}


def init_basic_block(key, inplanes, planes):
    k1, k2 = jax.random.split(key)
    return {"conv1": init_conv_bn(k1, 3, 3, inplanes, planes),
            "conv2": init_conv_bn(k2, 3, 3, planes, planes)}


def init_conv_level(key, cin, cout, convs):
    ks = jax.random.split(key, convs)
    layers = []
    for i in range(convs):
        layers.append(init_conv_bn(ks[i], 3, 3, cin if i == 0 else cout, cout))
    return layers


def init_tree(key, levels, in_ch, out_ch, stride=1, level_root=False,
              root_dim=0, root_residual=False):
    if root_dim == 0:
        root_dim = 2 * out_ch
    if level_root:
        root_dim += in_ch
    k1, k2, k3, k4 = jax.random.split(key, 4)
    p = {"levels": levels, "level_root": level_root, "stride": stride,
         "root_residual": root_residual}
    if levels == 1:
        p["tree1"] = init_basic_block(k1, in_ch, out_ch)
        p["tree1_stride"] = stride
        p["tree2"] = init_basic_block(k2, out_ch, out_ch)
        p["root"] = init_conv_bn(k3, 1, 1, root_dim, out_ch)
    else:
        p["tree1"] = init_tree(k1, levels - 1, in_ch, out_ch, stride,
                               False, 0, root_residual)
        p["tree2"] = init_tree(k2, levels - 1, out_ch, out_ch, 1,
                               False, root_dim + out_ch, root_residual)
    if in_ch != out_ch:
        p["project"] = init_conv_bn(k4, 1, 1, in_ch, out_ch)
    return p


def init_dla(key, levels, channels, num_classes):
    ks = jax.random.split(key, 9)
    params = {}
    params["base"] = init_conv_bn(ks[0], 7, 7, 3, channels[0])
    params["level0"] = init_conv_level(ks[1], channels[0], channels[0], levels[0])
    params["level1"] = init_conv_level(ks[2], channels[0], channels[1], levels[1])
    params["level2"] = init_tree(ks[3], levels[2], channels[1], channels[2], 2, False)
    params["level3"] = init_tree(ks[4], levels[3], channels[2], channels[3], 2, True)
    params["level4"] = init_tree(ks[5], levels[4], channels[3], channels[4], 2, True)
    params["level5"] = init_tree(ks[6], levels[5], channels[4], channels[5], 2, True)
    # fc: 1x1 conv with bias (PyTorch init loop also re-inits its weight)
    assert num_classes <= LANE
    n = 1 * 1 * num_classes
    fc_w = jax.random.normal(ks[7], (channels[5], num_classes), jnp.float32) \
        * math.sqrt(2.0 / n)
    bound = 1.0 / math.sqrt(channels[5])
    fc_b = jax.random.uniform(ks[8], (num_classes,), jnp.float32, -bound, bound)
    params["fc"] = {"w": jnp.pad(fc_w, ((0, 0), (0, LANE - num_classes))),
                    "b": jnp.pad(fc_b, (0, LANE - num_classes))}
    return params


# ----------------------------------------------------------------------------
# Forward pass (mirrors DLA / Tree / BasicBlock / Root semantics)
# ----------------------------------------------------------------------------
def basic_block_fwd(p, a, stride, residual=None):
    if residual is None:
        residual = a
    out = conv_bn(a.x, p["conv1"], stride, 1, relu=True)
    out = conv_bn(out.x, p["conv2"], 1, 1, relu=True, residual=residual)  # add,relu
    return out


def conv_level_fwd(layers, a, stride):
    for i, p in enumerate(layers):
        a = conv_bn(a.x, p, stride=stride if i == 0 else 1, padding=1, relu=True)
    return a


def tree_fwd(p, a, children=None):
    children = [] if children is None else children
    bottom = Act(pool2d(a.x, p["stride"], "max"), a.c) if p["stride"] > 1 else a
    if p["level_root"]:
        children.append(bottom)
    if p["levels"] == 1:
        residual = (conv_bn(bottom.x, p["project"], 1, 0, relu=False)
                    if "project" in p else bottom)
        x1 = basic_block_fwd(p["tree1"], a, p["tree1_stride"], residual=residual)
        x2 = basic_block_fwd(p["tree2"], x1, 1, residual=None)
        # Root: conv(cat([x2, x1, *children])) + bn [+ x2] + relu
        cat = jnp.concatenate([x2.x[..., :x2.c], x1.x[..., :x1.c]]
                              + [ch.x[..., :ch.c] for ch in children], axis=-1)
        res = x2 if p["root_residual"] else None
        out = conv_bn(cat, p["root"], 1, 0, relu=True, residual=res)
    else:
        # The parent-supplied residual is overwritten inside the child Tree in
        # the PyTorch reference, so it is not computed/passed here.
        x1 = tree_fwd(p["tree1"], a)
        children.append(x1)
        out = tree_fwd(p["tree2"], x1, children=children)
    return out


def dla_forward(params, x_nchw, pool_size, num_classes):
    x = jnp.transpose(x_nchw, (0, 2, 3, 1)).astype(ACT_DTYPE)  # NCHW -> NHWC, bf16
    a = conv_bn(x, params["base"], stride=1, padding=3, relu=True)
    a = conv_level_fwd(params["level0"], a, stride=1)
    a = conv_level_fwd(params["level1"], a, stride=2)
    a = tree_fwd(params["level2"], a)
    a = tree_fwd(params["level3"], a)
    a = tree_fwd(params["level4"], a)
    a = tree_fwd(params["level5"], a)
    pooled = pool2d(a.x, pool_size, "avg")                      # AvgPool2d(pool_size)
    N, Ho, Wo, _ = pooled.shape
    x2d = pooled[..., :a.c].reshape(N * Ho * Wo, a.c)
    logits_p = fused_matmul(x2d, params["fc"]["w"], params["fc"]["b"],
                            relu=False, out_dtype=jnp.float32)  # (M, 128) f32
    logits = logits_p[:, :num_classes].reshape(N, Ho, Wo, num_classes)
    # match PyTorch x.view(N, -1) on the NCHW fc output
    logits = logits.transpose(0, 3, 1, 2).reshape(N, -1)
    return logits


# ----------------------------------------------------------------------------
if __name__ == "__main__":
    # Small dla34-like configuration.
    levels = [1, 1, 1, 2, 2, 1]
    channels = [4, 8, 16, 32, 32, 64]
    num_classes = 10
    pool_size = 2            # input 64x64 -> final 2x2 feature map -> 1x1 pooled

    key = jax.random.PRNGKey(0)
    pkey, xkey = jax.random.split(key)
    params = init_dla(pkey, levels, channels, num_classes)

    x = jax.random.normal(xkey, (2, 3, 64, 64), jnp.float32)  # NCHW like PyTorch

    # jit the full forward; params are closed over so the tree/level config
    # (Python ints/bools) stays static and all XLA glue fuses into one program.
    fwd = jax.jit(lambda inp: dla_forward(params, inp, pool_size, num_classes))
    out = jax.block_until_ready(fwd(x))

    assert out.shape == (2, num_classes), out.shape
    assert bool(jnp.all(jnp.isfinite(out)))
    print("KERNEL_OK")
</pallas_src>

<mosaic_0001>
module attributes {stable_mosaic.version = 11 : i64} {
  func.func @_matmul_bn_kernel(%arg0: i32, %arg1: memref<1024x147xbf16, #tpu.memory_space<vmem>>, %arg2: memref<147x128xbf16, #tpu.memory_space<vmem>>, %arg3: memref<1x128xf32, #tpu.memory_space<vmem>>, %arg4: memref<1024x128xbf16, #tpu.memory_space<vmem>>) attributes {dimension_semantics = [#tpu.dimension_semantics<parallel>], iteration_bounds = array<i64: 8>, scalar_prefetch = 0 : i64, scratch_operands = 0 : i64, tpu.core_type = #tpu.core_type<tc>, window_params = [{transform_indices = @transform_0, window_bounds = array<i64: 1024, 147>}, {pipeline_mode = #tpu.pipeline_mode<synchronous>, transform_indices = @transform_1, window_bounds = array<i64: 147, 128>}, {pipeline_mode = #tpu.pipeline_mode<synchronous>, transform_indices = @transform_2, window_bounds = array<i64: 1, 128>}, {transform_indices = @transform_3, window_bounds = array<i64: 1024, 128>}]} {
    %c0 = arith.constant 0 : index
    %c0_0 = arith.constant 0 : index
    %0 = vector.load %arg1[%c0, %c0_0] : memref<1024x147xbf16, #tpu.memory_space<vmem>>, vector<1024x147xbf16>
    %c0_1 = arith.constant 0 : index
    %c0_2 = arith.constant 0 : index
    %1 = vector.load %arg2[%c0_1, %c0_2] : memref<147x128xbf16, #tpu.memory_space<vmem>>, vector<147x128xbf16>
    %cst = arith.constant dense<0.000000e+00> : vector<1024x128xf32>
    %2 = tpu.matmul %0, %1, %cst {dimension_numbers = #tpu.dot_dimension_numbers<[1], [0], [0], [1], [0, 0, 1, 1], [], []>} : vector<1024x147xbf16>, vector<147x128xbf16>, vector<1024x128xf32> -> vector<1024x128xf32>
    %c0_3 = arith.constant 0 : index
    %c0_4 = arith.constant 0 : index
    %3 = vector.load %arg3[%c0_3, %c0_4] : memref<1x128xf32, #tpu.memory_space<vmem>>, vector<1x128xf32>
    %4 = vector.broadcast %3 : vector<1x128xf32> to vector<1024x128xf32>
    %5 = arith.addf %2, %4 : vector<1024x128xf32>
    %cst_5 = arith.constant 0.000000e+00 : f32
    %6 = vector.broadcast %cst_5 : f32 to vector<1024x128xf32>
    %7 = arith.maximumf %5, %6 : vector<1024x128xf32>
    %8 = arith.truncf %7 : vector<1024x128xf32> to vector<1024x128xbf16>
    %c0_6 = arith.constant 0 : index
    %c0_7 = arith.constant 0 : index
    %9 = vector.load %arg4[%c0_6, %c0_7] : memref<1024x128xbf16, #tpu.memory_space<vmem>>, vector<1024x128xbf16>
    tpu.vector_store %arg4[%c0_6, %c0_7], %8 {strides = array<i32>} : memref<1024x128xbf16, #tpu.memory_space<vmem>>, vector<1024x128xbf16>,
    return
  }
  func.func @transform_0(%arg0: i32) -> (i32, i32) {
    %c0_i32 = arith.constant 0 : i32
    %c0_i32_0 = arith.constant 0 : i32
    return %arg0, %c0_i32 : i32, i32
  }
  func.func @transform_1(%arg0: i32) -> (i32, i32) {
    %c0_i32 = arith.constant 0 : i32
    %c0_i32_0 = arith.constant 0 : i32
    %c0_i32_1 = arith.constant 0 : i32
    return %c0_i32, %c0_i32_0 : i32, i32
  }
  func.func @transform_2(%arg0: i32) -> (i32, i32) {
    %c0_i32 = arith.constant 0 : i32
    %c0_i32_0 = arith.constant 0 : i32
    %c0_i32_1 = arith.constant 0 : i32
    return %c0_i32, %c0_i32_0 : i32, i32
  }
  func.func @transform_3(%arg0: i32) -> (i32, i32) {
    %c0_i32 = arith.constant 0 : i32
    %c0_i32_0 = arith.constant 0 : i32
    return %arg0, %c0_i32 : i32, i32
  }
}

module attributes {stable_mosaic.version = 11 : i64} {
  func.func @_matmul_bn_kernel(%arg0: i32, %arg1: memref<1024x36xbf16, #tpu.memory_space<vmem>>, %arg2: memref<36x128xbf16, #tpu.memory_space<vmem>>, %arg3: memref<1x128xf32, #tpu.memory_space<vmem>>, %arg4: memref<1024x128xbf16, #tpu.memory_space<vmem>>) attributes {dimension_semantics = [#tpu.dimension_semantics<parallel>], iteration_bounds = array<i64: 8>, scalar_prefetch = 0 : i64, scratch_operands = 0 : i64, tpu.core_type = #tpu.core_type<tc>, window_params = [{transform_indices = @transform_0, window_bounds = array<i64: 1024, 36>}, {pipeline_mode = #tpu.pipeline_mode<synchronous>, transform_indices = @transform_1, window_bounds = array<i64: 36, 128>}, {pipeline_mode = #tpu.pipeline_mode<synchronous>, transform_indices = @transform_2, window_bounds = array<i64: 1, 128>}, {transform_indices = @transform_3, window_bounds = array<i64: 1024, 128>}]} {
    %c0 = arith.constant 0 : index
    %c0_0 = arith.constant 0 : index
    %0 = vector.load %arg1[%c0, %c0_0] : memref<1024x36xbf16, #tpu.memory_space<vmem>>, vector<1024x36xbf16>
    %c0_1 = arith.constant 0 : index
    %c0_2 = arith.constant 0 : index
    %1 = vector.load %arg2[%c0_1, %c0_2] : memref<36x128xbf16, #tpu.memory_space<vmem>>, vector<36x128xbf16>
    %cst = arith.constant dense<0.000000e+00> : vector<1024x128xf32>
    %2 = tpu.matmul %0, %1, %cst {dimension_numbers = #tpu.dot_dimension_numbers<[1], [0], [0], [1], [0, 0, 1, 1], [], []>} : vector<1024x36xbf16>, vector<36x128xbf16>, vector<1024x128xf32> -> vector<1024x128xf32>
    %c0_3 = arith.constant 0 : index
    %c0_4 = arith.constant 0 : index
    %3 = vector.load %arg3[%c0_3, %c0_4] : memref<1x128xf32, #tpu.memory_space<vmem>>, vector<1x128xf32>
    %4 = vector.broadcast %3 : vector<1x128xf32> to vector<1024x128xf32>
    %5 = arith.addf %2, %4 : vector<1024x128xf32>
    %cst_5 = arith.constant 0.000000e+00 : f32
    %6 = vector.broadcast %cst_5 : f32 to vector<1024x128xf32>
    %7 = arith.maximumf %5, %6 : vector<1024x128xf32>
    %8 = arith.truncf %7 : vector<1024x128xf32> to vector<1024x128xbf16>
    %c0_6 = arith.constant 0 : index
    %c0_7 = arith.constant 0 : index
    %9 = vector.load %arg4[%c0_6, %c0_7] : memref<1024x128xbf16, #tpu.memory_space<vmem>>, vector<1024x128xbf16>
    tpu.vector_store %arg4[%c0_6, %c0_7], %8 {strides = array<i32>} : memref<1024x128xbf16, #tpu.memory_space<vmem>>, vector<1024x128xbf16>,
    return
  }
  func.func @transform_0(%arg0: i32) -> (i32, i32) {
    %c0_i32 = arith.constant 0 : i32
    %c0_i32_0 = arith.constant 0 : i32
    return %arg0, %c0_i32 : i32, i32
  }
  func.func @transform_1(%arg0: i32) -> (i32, i32) {
    %c0_i32 = arith.constant 0 : i32
    %c0_i32_0 = arith.constant 0 : i32
    %c0_i32_1 = arith.constant 0 : i32
    return %c0_i32, %c0_i32_0 : i32, i32
  }
  func.func @transform_2(%arg0: i32) -> (i32, i32) {
    %c0_i32 = arith.constant 0 : i32
    %c0_i32_0 = arith.constant 0 : i32
    %c0_i32_1 = arith.constant 0 : i32
    return %c0_i32, %c0_i32_0 : i32, i32
  }
  func.func @transform_3(%arg0: i32) -> (i32, i32) {
    %c0_i32 = arith.constant 0 : i32
    %c0_i32_0 = arith.constant 0 : i32
    return %arg0, %c0_i32 : i32, i32
  }
}

module attributes {stable_mosaic.version = 11 : i64} {
  func.func @_matmul_bn_kernel(%arg0: i32, %arg1: memref<1024x36xbf16, #tpu.memory_space<vmem>>, %arg2: memref<36x128xbf16, #tpu.memory_space<vmem>>, %arg3: memref<1x128xf32, #tpu.memory_space<vmem>>, %arg4: memref<1024x128xbf16, #tpu.memory_space<vmem>>) attributes {dimension_semantics = [#tpu.dimension_semantics<parallel>], iteration_bounds = array<i64: 2>, scalar_prefetch = 0 : i64, scratch_operands = 0 : i64, tpu.core_type = #tpu.core_type<tc>, window_params = [{transform_indices = @transform_0, window_bounds = array<i64: 1024, 36>}, {pipeline_mode = #tpu.pipeline_mode<synchronous>, transform_indices = @transform_1, window_bounds = array<i64: 36, 128>}, {pipeline_mode = #tpu.pipeline_mode<synchronous>, transform_indices = @transform_2, window_bounds = array<i64: 1, 128>}, {transform_indices = @transform_3, window_bounds = array<i64: 1024, 128>}]} {
    %c0 = arith.constant 0 : index
    %c0_0 = arith.constant 0 : index
    %0 = vector.load %arg1[%c0, %c0_0] : memref<1024x36xbf16, #tpu.memory_space<vmem>>, vector<1024x36xbf16>
    %c0_1 = arith.constant 0 : index
    %c0_2 = arith.constant 0 : index
    %1 = vector.load %arg2[%c0_1, %c0_2] : memref<36x128xbf16, #tpu.memory_space<vmem>>, vector<36x128xbf16>
    %cst = arith.constant dense<0.000000e+00> : vector<1024x128xf32>
    %2 = tpu.matmul %0, %1, %cst {dimension_numbers = #tpu.dot_dimension_numbers<[1], [0], [0], [1], [0, 0, 1, 1], [], []>} : vector<1024x36xbf16>, vector<36x128xbf16>, vector<1024x128xf32> -> vector<1024x128xf32>
    %c0_3 = arith.constant 0 : index
    %c0_4 = arith.constant 0 : index
    %3 = vector.load %arg3[%c0_3, %c0_4] : memref<1x128xf32, #tpu.memory_space<vmem>>, vector<1x128xf32>
    %4 = vector.broadcast %3 : vector<1x128xf32> to vector<1024x128xf32>
    %5 = arith.addf %2, %4 : vector<1024x128xf32>
    %cst_5 = arith.constant 0.000000e+00 : f32
    %6 = vector.broadcast %cst_5 : f32 to vector<1024x128xf32>
    %7 = arith.maximumf %5, %6 : vector<1024x128xf32>
    %8 = arith.truncf %7 : vector<1024x128xf32> to vector<1024x128xbf16>
    %c0_6 = arith.constant 0 : index
    %c0_7 = arith.constant 0 : index
    %9 = vector.load %arg4[%c0_6, %c0_7] : memref<1024x128xbf16, #tpu.memory_space<vmem>>, vector<1024x128xbf16>
    tpu.vector_store %arg4[%c0_6, %c0_7], %8 {strides = array<i32>} : memref<1024x128xbf16, #tpu.memory_space<vmem>>, vector<1024x128xbf16>,
    return
  }
  func.func @transform_0(%arg0: i32) -> (i32, i32) {
    %c0_i32 = arith.constant 0 : i32
    %c0_i32_0 = arith.constant 0 : i32
    return %arg0, %c0_i32 : i32, i32
  }
  func.func @transform_1(%arg0: i32) -> (i32, i32) {
    %c0_i32 = arith.constant 0 : i32
    %c0_i32_0 = arith.constant 0 : i32
    %c0_i32_1 = arith.constant 0 : i32
    return %c0_i32, %c0_i32_0 : i32, i32
  }
  func.func @transform_2(%arg0: i32) -> (i32, i32) {
    %c0_i32 = arith.constant 0 : i32
    %c0_i32_0 = arith.constant 0 : i32
    %c0_i32_1 = arith.constant 0 : i32
    return %c0_i32, %c0_i32_0 : i32, i32
  }
  func.func @transform_3(%arg0: i32) -> (i32, i32) {
    %c0_i32 = arith.constant 0 : i32
    %c0_i32_0 = arith.constant 0 : i32
    return %arg0, %c0_i32 : i32, i32
  }
}

module attributes {stable_mosaic.version = 11 : i64} {
  func.func @_matmul_bn_kernel(%arg0: i32, %arg1: memref<512x8xbf16, #tpu.memory_space<vmem>>, %arg2: memref<8x128xbf16, #tpu.memory_space<vmem>>, %arg3: memref<1x128xf32, #tpu.memory_space<vmem>>, %arg4: memref<512x128xbf16, #tpu.memory_space<vmem>>) attributes {dimension_semantics = [#tpu.dimension_semantics<parallel>], iteration_bounds = array<i64: 1>, scalar_prefetch = 0 : i64, scratch_operands = 0 : i64, tpu.core_type = #tpu.core_type<tc>, window_params = [{transform_indices = @transform_0, window_bounds = array<i64: 512, 8>}, {pipeline_mode = #tpu.pipeline_mode<synchronous>, transform_indices = @transform_1, window_bounds = array<i64: 8, 128>}, {pipeline_mode = #tpu.pipeline_mode<synchronous>, transform_indices = @transform_2, window_bounds = array<i64: 1, 128>}, {transform_indices = @transform_3, window_bounds = array<i64: 512, 128>}]} {
    %c0 = arith.constant 0 : index
    %c0_0 = arith.constant 0 : index
    %0 = vector.load %arg1[%c0, %c0_0] : memref<512x8xbf16, #tpu.memory_space<vmem>>, vector<512x8xbf16>
    %c0_1 = arith.constant 0 : index
    %c0_2 = arith.constant 0 : index
    %1 = vector.load %arg2[%c0_1, %c0_2] : memref<8x128xbf16, #tpu.memory_space<vmem>>, vector<8x128xbf16>
    %cst = arith.constant dense<0.000000e+00> : vector<512x128xf32>
    %2 = tpu.matmul %0, %1, %cst {dimension_numbers = #tpu.dot_dimension_numbers<[1], [0], [0], [1], [0, 0, 1, 1], [], []>} : vector<512x8xbf16>, vector<8x128xbf16>, vector<512x128xf32> -> vector<512x128xf32>
    %c0_3 = arith.constant 0 : index
    %c0_4 = arith.constant 0 : index
    %3 = vector.load %arg3[%c0_3, %c0_4] : memref<1x128xf32, #tpu.memory_space<vmem>>, vector<1x128xf32>
    %4 = vector.broadcast %3 : vector<1x128xf32> to vector<512x128xf32>
    %5 = arith.addf %2, %4 : vector<512x128xf32>
    %6 = arith.truncf %5 : vector<512x128xf32> to vector<512x128xbf16>
    %c0_5 = arith.constant 0 : index
    %c0_6 = arith.constant 0 : index
    %7 = vector.load %arg4[%c0_5, %c0_6] : memref<512x128xbf16, #tpu.memory_space<vmem>>, vector<512x128xbf16>
    tpu.vector_store %arg4[%c0_5, %c0_6], %6 {strides = array<i32>} : memref<512x128xbf16, #tpu.memory_space<vmem>>, vector<512x128xbf16>,
    return
  }
  func.func @transform_0(%arg0: i32) -> (i32, i32) {
    %c0_i32 = arith.constant 0 : i32
    %c0_i32_0 = arith.constant 0 : i32
    return %arg0, %c0_i32 : i32, i32
  }
  func.func @transform_1(%arg0: i32) -> (i32, i32) {
    %c0_i32 = arith.constant 0 : i32
    %c0_i32_0 = arith.constant 0 : i32
    %c0_i32_1 = arith.constant 0 : i32
    return %c0_i32, %c0_i32_0 : i32, i32
  }
  func.func @transform_2(%arg0: i32) -> (i32, i32) {
    %c0_i32 = arith.constant 0 : i32
    %c0_i32_0 = arith.constant 0 : i32
    %c0_i32_1 = arith.constant 0 : i32
    return %c0_i32, %c0_i32_0 : i32, i32
  }
  func.func @transform_3(%arg0: i32) -> (i32, i32) {
    %c0_i32 = arith.constant 0 : i32
    %c0_i32_0 = arith.constant 0 : i32
    return %arg0, %c0_i32 : i32, i32
  }
}

module attributes {stable_mosaic.version = 11 : i64} {
  func.func @_matmul_bn_kernel(%arg0: i32, %arg1: memref<512x72xbf16, #tpu.memory_space<vmem>>, %arg2: memref<72x128xbf16, #tpu.memory_space<vmem>>, %arg3: memref<1x128xf32, #tpu.memory_space<vmem>>, %arg4: memref<512x128xbf16, #tpu.memory_space<vmem>>) attributes {dimension_semantics = [#tpu.dimension_semantics<parallel>], iteration_bounds = array<i64: 1>, scalar_prefetch = 0 : i64, scratch_operands = 0 : i64, tpu.core_type = #tpu.core_type<tc>, window_params = [{transform_indices = @transform_0, window_bounds = array<i64: 512, 72>}, {pipeline_mode = #tpu.pipeline_mode<synchronous>, transform_indices = @transform_1, window_bounds = array<i64: 72, 128>}, {pipeline_mode = #tpu.pipeline_mode<synchronous>, transform_indices = @transform_2, window_bounds = array<i64: 1, 128>}, {transform_indices = @transform_3, window_bounds = array<i64: 512, 128>}]} {
    %c0 = arith.constant 0 : index
    %c0_0 = arith.constant 0 : index
    %0 = vector.load %arg1[%c0, %c0_0] : memref<512x72xbf16, #tpu.memory_space<vmem>>, vector<512x72xbf16>
    %c0_1 = arith.constant 0 : index
    %c0_2 = arith.constant 0 : index
    %1 = vector.load %arg2[%c0_1, %c0_2] : memref<72x128xbf16, #tpu.memory_space<vmem>>, vector<72x128xbf16>
    %cst = arith.constant dense<0.000000e+00> : vector<512x128xf32>
    %2 = tpu.matmul %0, %1, %cst {dimension_numbers = #tpu.dot_dimension_numbers<[1], [0], [0], [1], [0, 0, 1, 1], [], []>} : vector<512x72xbf16>, vector<72x128xbf16>, vector<512x128xf32> -> vector<512x128xf32>
    %c0_3 = arith.constant 0 : index
    %c0_4 = arith.constant 0 : index
    %3 = vector.load %arg3[%c0_3, %c0_4] : memref<1x128xf32, #tpu.memory_space<vmem>>, vector<1x128xf32>
    %4 = vector.broadcast %3 : vector<1x128xf32> to vector<512x128xf32>
    %5 = arith.addf %2, %4 : vector<512x128xf32>
    %cst_5 = arith.constant 0.000000e+00 : f32
    %6 = vector.broadcast %cst_5 : f32 to vector<512x128xf32>
    %7 = arith.maximumf %5, %6 : vector<512x128xf32>
    %8 = arith.truncf %7 : vector<512x128xf32> to vector<512x128xbf16>
    %c0_6 = arith.constant 0 : index
    %c0_7 = arith.constant 0 : index
    %9 = vector.load %arg4[%c0_6, %c0_7] : memref<512x128xbf16, #tpu.memory_space<vmem>>, vector<512x128xbf16>
    tpu.vector_store %arg4[%c0_6, %c0_7], %8 {strides = array<i32>} : memref<512x128xbf16, #tpu.memory_space<vmem>>, vector<512x128xbf16>,
    return
  }
  func.func @transform_0(%arg0: i32) -> (i32, i32) {
    %c0_i32 = arith.constant 0 : i32
    %c0_i32_0 = arith.constant 0 : i32
    return %arg0, %c0_i32 : i32, i32
  }
  func.func @transform_1(%arg0: i32) -> (i32, i32) {
    %c0_i32 = arith.constant 0 : i32
    %c0_i32_0 = arith.constant 0 : i32
    %c0_i32_1 = arith.constant 0 : i32
    return %c0_i32, %c0_i32_0 : i32, i32
  }
  func.func @transform_2(%arg0: i32) -> (i32, i32) {
    %c0_i32 = arith.constant 0 : i32
    %c0_i32_0 = arith.constant 0 : i32
    %c0_i32_1 = arith.constant 0 : i32
    return %c0_i32, %c0_i32_0 : i32, i32
  }
  func.func @transform_3(%arg0: i32) -> (i32, i32) {
    %c0_i32 = arith.constant 0 : i32
    %c0_i32_0 = arith.constant 0 : i32
    return %arg0, %c0_i32 : i32, i32
  }
}

module attributes {stable_mosaic.version = 11 : i64} {
  func.func @_matmul_bn_res_kernel(%arg0: i32, %arg1: memref<512x144xbf16, #tpu.memory_space<vmem>>, %arg2: memref<144x128xbf16, #tpu.memory_space<vmem>>, %arg3: memref<1x128xf32, #tpu.memory_space<vmem>>, %arg4: memref<512x128xbf16, #tpu.memory_space<vmem>>, %arg5: memref<512x128xbf16, #tpu.memory_space<vmem>>) attributes {dimension_semantics = [#tpu.dimension_semantics<parallel>], iteration_bounds = array<i64: 1>, scalar_prefetch = 0 : i64, scratch_operands = 0 : i64, tpu.core_type = #tpu.core_type<tc>, window_params = [{transform_indices = @transform_0, window_bounds = array<i64: 512, 144>}, {pipeline_mode = #tpu.pipeline_mode<synchronous>, transform_indices = @transform_1, window_bounds = array<i64: 144, 128>}, {pipeline_mode = #tpu.pipeline_mode<synchronous>, transform_indices = @transform_2, window_bounds = array<i64: 1, 128>}, {transform_indices = @transform_3, window_bounds = array<i64: 512, 128>}, {transform_indices = @transform_4, window_bounds = array<i64: 512, 128>}]} {
    %c0 = arith.constant 0 : index
    %c0_0 = arith.constant 0 : index
    %0 = vector.load %arg1[%c0, %c0_0] : memref<512x144xbf16, #tpu.memory_space<vmem>>, vector<512x144xbf16>
    %c0_1 = arith.constant 0 : index
    %c0_2 = arith.constant 0 : index
    %1 = vector.load %arg2[%c0_1, %c0_2] : memref<144x128xbf16, #tpu.memory_space<vmem>>, vector<144x128xbf16>
    %cst = arith.constant dense<0.000000e+00> : vector<512x128xf32>
    %2 = tpu.matmul %0, %1, %cst {dimension_numbers = #tpu.dot_dimension_numbers<[1], [0], [0], [1], [0, 0, 1, 1], [], []>} : vector<512x144xbf16>, vector<144x128xbf16>, vector<512x128xf32> -> vector<512x128xf32>
    %c0_3 = arith.constant 0 : index
    %c0_4 = arith.constant 0 : index
    %3 = vector.load %arg3[%c0_3, %c0_4] : memref<1x128xf32, #tpu.memory_space<vmem>>, vector<1x128xf32>
    %4 = vector.broadcast %3 : vector<1x128xf32> to vector<512x128xf32>
    %5 = arith.addf %2, %4 : vector<512x128xf32>
    %c0_5 = arith.constant 0 : index
    %c0_6 = arith.constant 0 : index
    %6 = vector.load %arg4[%c0_5, %c0_6] : memref<512x128xbf16, #tpu.memory_space<vmem>>, vector<512x128xbf16>
    %7 = arith.extf %6 : vector<512x128xbf16> to vector<512x128xf32>
    %8 = arith.addf %5, %7 : vector<512x128xf32>
    %cst_7 = arith.constant 0.000000e+00 : f32
    %9 = vector.broadcast %cst_7 : f32 to vector<512x128xf32>
    %10 = arith.maximumf %8, %9 : vector<512x128xf32>
    %11 = arith.truncf %10 : vector<512x128xf32> to vector<512x128xbf16>
    %c0_8 = arith.constant 0 : index
    %c0_9 = arith.constant 0 : index
    %12 = vector.load %arg5[%c0_8, %c0_9] : memref<512x128xbf16, #tpu.memory_space<vmem>>, vector<512x128xbf16>
    tpu.vector_store %arg5[%c0_8, %c0_9], %11 {strides = array<i32>} : memref<512x128xbf16, #tpu.memory_space<vmem>>, vector<512x128xbf16>,
    return
  }
  func.func @transform_0(%arg0: i32) -> (i32, i32) {
    %c0_i32 = arith.constant 0 : i32
    %c0_i32_0 = arith.constant 0 : i32
    return %arg0, %c0_i32 : i32, i32
  }
  func.func @transform_1(%arg0: i32) -> (i32, i32) {
    %c0_i32 = arith.constant 0 : i32
    %c0_i32_0 = arith.constant 0 : i32
    %c0_i32_1 = arith.constant 0 : i32
    return %c0_i32, %c0_i32_0 : i32, i32
  }
  func.func @transform_2(%arg0: i32) -> (i32, i32) {
    %c0_i32 = arith.constant 0 : i32
    %c0_i32_0 = arith.constant 0 : i32
    %c0_i32_1 = arith.constant 0 : i32
    return %c0_i32, %c0_i32_0 : i32, i32
  }
  func.func @transform_3(%arg0: i32) -> (i32, i32) {
    %c0_i32 = arith.constant 0 : i32
    %c0_i32_0 = arith.constant 0 : i32
    return %arg0, %c0_i32 : i32, i32
  }
  func.func @transform_4(%arg0: i32) -> (i32, i32) {
    %c0_i32 = arith.constant 0 : i32
    %c0_i32_0 = arith.constant 0 : i32
    return %arg0, %c0_i32 : i32, i32
  }
}

module attributes {stable_mosaic.version = 11 : i64} {
  func.func @_matmul_bn_kernel(%arg0: i32, %arg1: memref<512x144xbf16, #tpu.memory_space<vmem>>, %arg2: memref<144x128xbf16, #tpu.memory_space<vmem>>, %arg3: memref<1x128xf32, #tpu.memory_space<vmem>>, %arg4: memref<512x128xbf16, #tpu.memory_space<vmem>>) attributes {dimension_semantics = [#tpu.dimension_semantics<parallel>], iteration_bounds = array<i64: 1>, scalar_prefetch = 0 : i64, scratch_operands = 0 : i64, tpu.core_type = #tpu.core_type<tc>, window_params = [{transform_indices = @transform_0, window_bounds = array<i64: 512, 144>}, {pipeline_mode = #tpu.pipeline_mode<synchronous>, transform_indices = @transform_1, window_bounds = array<i64: 144, 128>}, {pipeline_mode = #tpu.pipeline_mode<synchronous>, transform_indices = @transform_2, window_bounds = array<i64: 1, 128>}, {transform_indices = @transform_3, window_bounds = array<i64: 512, 128>}]} {
    %c0 = arith.constant 0 : index
    %c0_0 = arith.constant 0 : index
    %0 = vector.load %arg1[%c0, %c0_0] : memref<512x144xbf16, #tpu.memory_space<vmem>>, vector<512x144xbf16>
    %c0_1 = arith.constant 0 : index
    %c0_2 = arith.constant 0 : index
    %1 = vector.load %arg2[%c0_1, %c0_2] : memref<144x128xbf16, #tpu.memory_space<vmem>>, vector<144x128xbf16>
    %cst = arith.constant dense<0.000000e+00> : vector<512x128xf32>
    %2 = tpu.matmul %0, %1, %cst {dimension_numbers = #tpu.dot_dimension_numbers<[1], [0], [0], [1], [0, 0, 1, 1], [], []>} : vector<512x144xbf16>, vector<144x128xbf16>, vector<512x128xf32> -> vector<512x128xf32>
    %c0_3 = arith.constant 0 : index
    %c0_4 = arith.constant 0 : index
    %3 = vector.load %arg3[%c0_3, %c0_4] : memref<1x128xf32, #tpu.memory_space<vmem>>, vector<1x128xf32>
    %4 = vector.broadcast %3 : vector<1x128xf32> to vector<512x128xf32>
    %5 = arith.addf %2, %4 : vector<512x128xf32>
    %cst_5 = arith.constant 0.000000e+00 : f32
    %6 = vector.broadcast %cst_5 : f32 to vector<512x128xf32>
    %7 = arith.maximumf %5, %6 : vector<512x128xf32>
    %8 = arith.truncf %7 : vector<512x128xf32> to vector<512x128xbf16>
    %c0_6 = arith.constant 0 : index
    %c0_7 = arith.constant 0 : index
    %9 = vector.load %arg4[%c0_6, %c0_7] : memref<512x128xbf16, #tpu.memory_space<vmem>>, vector<512x128xbf16>
    tpu.vector_store %arg4[%c0_6, %c0_7], %8 {strides = array<i32>} : memref<512x128xbf16, #tpu.memory_space<vmem>>, vector<512x128xbf16>,
    return
  }
  func.func @transform_0(%arg0: i32) -> (i32, i32) {
    %c0_i32 = arith.constant 0 : i32
    %c0_i32_0 = arith.constant 0 : i32
    return %arg0, %c0_i32 : i32, i32
  }
  func.func @transform_1(%arg0: i32) -> (i32, i32) {
    %c0_i32 = arith.constant 0 : i32
    %c0_i32_0 = arith.constant 0 : i32
    %c0_i32_1 = arith.constant 0 : i32
    return %c0_i32, %c0_i32_0 : i32, i32
  }
  func.func @transform_2(%arg0: i32) -> (i32, i32) {
    %c0_i32 = arith.constant 0 : i32
    %c0_i32_0 = arith.constant 0 : i32
    %c0_i32_1 = arith.constant 0 : i32
    return %c0_i32, %c0_i32_0 : i32, i32
  }
  func.func @transform_3(%arg0: i32) -> (i32, i32) {
    %c0_i32 = arith.constant 0 : i32
    %c0_i32_0 = arith.constant 0 : i32
    return %arg0, %c0_i32 : i32, i32
  }
}

module attributes {stable_mosaic.version = 11 : i64} {
  func.func @_matmul_bn_kernel(%arg0: i32, %arg1: memref<512x32xbf16, #tpu.memory_space<vmem>>, %arg2: memref<32x128xbf16, #tpu.memory_space<vmem>>, %arg3: memref<1x128xf32, #tpu.memory_space<vmem>>, %arg4: memref<512x128xbf16, #tpu.memory_space<vmem>>) attributes {dimension_semantics = [#tpu.dimension_semantics<parallel>], iteration_bounds = array<i64: 1>, scalar_prefetch = 0 : i64, scratch_operands = 0 : i64, tpu.core_type = #tpu.core_type<tc>, window_params = [{transform_indices = @transform_0, window_bounds = array<i64: 512, 32>}, {pipeline_mode = #tpu.pipeline_mode<synchronous>, transform_indices = @transform_1, window_bounds = array<i64: 32, 128>}, {pipeline_mode = #tpu.pipeline_mode<synchronous>, transform_indices = @transform_2, window_bounds = array<i64: 1, 128>}, {transform_indices = @transform_3, window_bounds = array<i64: 512, 128>}]} {
    %c0 = arith.constant 0 : index
    %c0_0 = arith.constant 0 : index
    %0 = vector.load %arg1[%c0, %c0_0] : memref<512x32xbf16, #tpu.memory_space<vmem>>, vector<512x32xbf16>
    %c0_1 = arith.constant 0 : index
    %c0_2 = arith.constant 0 : index
    %1 = vector.load %arg2[%c0_1, %c0_2] : memref<32x128xbf16, #tpu.memory_space<vmem>>, vector<32x128xbf16>
    %cst = arith.constant dense<0.000000e+00> : vector<512x128xf32>
    %2 = tpu.matmul %0, %1, %cst {dimension_numbers = #tpu.dot_dimension_numbers<[1], [0], [0], [1], [0, 0, 1, 1], [], []>} : vector<512x32xbf16>, vector<32x128xbf16>, vector<512x128xf32> -> vector<512x128xf32>
    %c0_3 = arith.constant 0 : index
    %c0_4 = arith.constant 0 : index
    %3 = vector.load %arg3[%c0_3, %c0_4] : memref<1x128xf32, #tpu.memory_space<vmem>>, vector<1x128xf32>
    %4 = vector.broadcast %3 : vector<1x128xf32> to vector<512x128xf32>
    %5 = arith.addf %2, %4 : vector<512x128xf32>
    %cst_5 = arith.constant 0.000000e+00 : f32
    %6 = vector.broadcast %cst_5 : f32 to vector<512x128xf32>
    %7 = arith.maximumf %5, %6 : vector<512x128xf32>
    %8 = arith.truncf %7 : vector<512x128xf32> to vector<512x128xbf16>
    %c0_6 = arith.constant 0 : index
    %c0_7 = arith.constant 0 : index
    %9 = vector.load %arg4[%c0_6, %c0_7] : memref<512x128xbf16, #tpu.memory_space<vmem>>, vector<512x128xbf16>
    tpu.vector_store %arg4[%c0_6, %c0_7], %8 {strides = array<i32>} : memref<512x128xbf16, #tpu.memory_space<vmem>>, vector<512x128xbf16>,
    return
  }
  func.func @transform_0(%arg0: i32) -> (i32, i32) {
    %c0_i32 = arith.constant 0 : i32
    %c0_i32_0 = arith.constant 0 : i32
    return %arg0, %c0_i32 : i32, i32
  }
  func.func @transform_1(%arg0: i32) -> (i32, i32) {
    %c0_i32 = arith.constant 0 : i32
    %c0_i32_0 = arith.constant 0 : i32
    %c0_i32_1 = arith.constant 0 : i32
    return %c0_i32, %c0_i32_0 : i32, i32
  }
  func.func @transform_2(%arg0: i32) -> (i32, i32) {
    %c0_i32 = arith.constant 0 : i32
    %c0_i32_0 = arith.constant 0 : i32
    %c0_i32_1 = arith.constant 0 : i32
    return %c0_i32, %c0_i32_0 : i32, i32
  }
  func.func @transform_3(%arg0: i32) -> (i32, i32) {
    %c0_i32 = arith.constant 0 : i32
    %c0_i32_0 = arith.constant 0 : i32
    return %arg0, %c0_i32 : i32, i32
  }
}

module attributes {stable_mosaic.version = 11 : i64} {
  func.func @_matmul_bn_kernel(%arg0: i32, %arg1: memref<128x16xbf16, #tpu.memory_space<vmem>>, %arg2: memref<16x128xbf16, #tpu.memory_space<vmem>>, %arg3: memref<1x128xf32, #tpu.memory_space<vmem>>, %arg4: memref<128x128xbf16, #tpu.memory_space<vmem>>) attributes {dimension_semantics = [#tpu.dimension_semantics<parallel>], iteration_bounds = array<i64: 1>, scalar_prefetch = 0 : i64, scratch_operands = 0 : i64, tpu.core_type = #tpu.core_type<tc>, window_params = [{transform_indices = @transform_0, window_bounds = array<i64: 128, 16>}, {pipeline_mode = #tpu.pipeline_mode<synchronous>, transform_indices = @transform_1, window_bounds = array<i64: 16, 128>}, {pipeline_mode = #tpu.pipeline_mode<synchronous>, transform_indices = @transform_2, window_bounds = array<i64: 1, 128>}, {transform_indices = @transform_3, window_bounds = array<i64: 128, 128>}]} {
    %c0 = arith.constant 0 : index
    %c0_0 = arith.constant 0 : index
    %0 = vector.load %arg1[%c0, %c0_0] : memref<128x16xbf16, #tpu.memory_space<vmem>>, vector<128x16xbf16>
    %c0_1 = arith.constant 0 : index
    %c0_2 = arith.constant 0 : index
    %1 = vector.load %arg2[%c0_1, %c0_2] : memref<16x128xbf16, #tpu.memory_space<vmem>>, vector<16x128xbf16>
    %cst = arith.constant dense<0.000000e+00> : vector<128x128xf32>
    %2 = tpu.matmul %0, %1, %cst {dimension_numbers = #tpu.dot_dimension_numbers<[1], [0], [0], [1], [0, 0, 1, 1], [], []>} : vector<128x16xbf16>, vector<16x128xbf16>, vector<128x128xf32> -> vector<128x128xf32>
    %c0_3 = arith.constant 0 : index
    %c0_4 = arith.constant 0 : index
    %3 = vector.load %arg3[%c0_3, %c0_4] : memref<1x128xf32, #tpu.memory_space<vmem>>, vector<1x128xf32>
    %4 = vector.broadcast %3 : vector<1x128xf32> to vector<128x128xf32>
    %5 = arith.addf %2, %4 : vector<128x128xf32>
    %6 = arith.truncf %5 : vector<128x128xf32> to vector<128x128xbf16>
    %c0_5 = arith.constant 0 : index
    %c0_6 = arith.constant 0 : index
    %7 = vector.load %arg4[%c0_5, %c0_6] : memref<128x128xbf16, #tpu.memory_space<vmem>>, vector<128x128xbf16>
    tpu.vector_store %arg4[%c0_5, %c0_6], %6 {strides = array<i32>} : memref<128x128xbf16, #tpu.memory_space<vmem>>, vector<128x128xbf16>,
    return
  }
  func.func @transform_0(%arg0: i32) -> (i32, i32) {
    %c0_i32 = arith.constant 0 : i32
    %c0_i32_0 = arith.constant 0 : i32
    return %arg0, %c0_i32 : i32, i32
  }
  func.func @transform_1(%arg0: i32) -> (i32, i32) {
    %c0_i32 = arith.constant 0 : i32
    %c0_i32_0 = arith.constant 0 : i32
    %c0_i32_1 = arith.constant 0 : i32
    return %c0_i32, %c0_i32_0 : i32, i32
  }
  func.func @transform_2(%arg0: i32) -> (i32, i32) {
    %c0_i32 = arith.constant 0 : i32
    %c0_i32_0 = arith.constant 0 : i32
    %c0_i32_1 = arith.constant 0 : i32
    return %c0_i32, %c0_i32_0 : i32, i32
  }
  func.func @transform_3(%arg0: i32) -> (i32, i32) {
    %c0_i32 = arith.constant 0 : i32
    %c0_i32_0 = arith.constant 0 : i32
    return %arg0, %c0_i32 : i32, i32
  }
}

module attributes {stable_mosaic.version = 11 : i64} {
  func.func @_matmul_bn_kernel(%arg0: i32, %arg1: memref<128x144xbf16, #tpu.memory_space<vmem>>, %arg2: memref<144x128xbf16, #tpu.memory_space<vmem>>, %arg3: memref<1x128xf32, #tpu.memory_space<vmem>>, %arg4: memref<128x128xbf16, #tpu.memory_space<vmem>>) attributes {dimension_semantics = [#tpu.dimension_semantics<parallel>], iteration_bounds = array<i64: 1>, scalar_prefetch = 0 : i64, scratch_operands = 0 : i64, tpu.core_type = #tpu.core_type<tc>, window_params = [{transform_indices = @transform_0, window_bounds = array<i64: 128, 144>}, {pipeline_mode = #tpu.pipeline_mode<synchronous>, transform_indices = @transform_1, window_bounds = array<i64: 144, 128>}, {pipeline_mode = #tpu.pipeline_mode<synchronous>, transform_indices = @transform_2, window_bounds = array<i64: 1, 128>}, {transform_indices = @transform_3, window_bounds = array<i64: 128, 128>}]} {
    %c0 = arith.constant 0 : index
    %c0_0 = arith.constant 0 : index
    %0 = vector.load %arg1[%c0, %c0_0] : memref<128x144xbf16, #tpu.memory_space<vmem>>, vector<128x144xbf16>
    %c0_1 = arith.constant 0 : index
    %c0_2 = arith.constant 0 : index
    %1 = vector.load %arg2[%c0_1, %c0_2] : memref<144x128xbf16, #tpu.memory_space<vmem>>, vector<144x128xbf16>
    %cst = arith.constant dense<0.000000e+00> : vector<128x128xf32>
    %2 = tpu.matmul %0, %1, %cst {dimension_numbers = #tpu.dot_dimension_numbers<[1], [0], [0], [1], [0, 0, 1, 1], [], []>} : vector<128x144xbf16>, vector<144x128xbf16>, vector<128x128xf32> -> vector<128x128xf32>
    %c0_3 = arith.constant 0 : index
    %c0_4 = arith.constant 0 : index
    %3 = vector.load %arg3[%c0_3, %c0_4] : memref<1x128xf32, #tpu.memory_space<vmem>>, vector<1x128xf32>
    %4 = vector.broadcast %3 : vector<1x128xf32> to vector<128x128xf32>
    %5 = arith.addf %2, %4 : vector<128x128xf32>
    %cst_5 = arith.constant 0.000000e+00 : f32
    %6 = vector.broadcast %cst_5 : f32 to vector<128x128xf32>
    %7 = arith.maximumf %5, %6 : vector<128x128xf32>
    %8 = arith.truncf %7 : vector<128x128xf32> to vector<128x128xbf16>
    %c0_6 = arith.constant 0 : index
    %c0_7 = arith.constant 0 : index
    %9 = vector.load %arg4[%c0_6, %c0_7] : memref<128x128xbf16, #tpu.memory_space<vmem>>, vector<128x128xbf16>
    tpu.vector_store %arg4[%c0_6, %c0_7], %8 {strides = array<i32>} : memref<128x128xbf16, #tpu.memory_space<vmem>>, vector<128x128xbf16>,
    return
  }
  func.func @transform_0(%arg0: i32) -> (i32, i32) {
    %c0_i32 = arith.constant 0 : i32
    %c0_i32_0 = arith.constant 0 : i32
    return %arg0, %c0_i32 : i32, i32
  }
  func.func @transform_1(%arg0: i32) -> (i32, i32) {
    %c0_i32 = arith.constant 0 : i32
    %c0_i32_0 = arith.constant 0 : i32
    %c0_i32_1 = arith.constant 0 : i32
    return %c0_i32, %c0_i32_0 : i32, i32
  }
  func.func @transform_2(%arg0: i32) -> (i32, i32) {
    %c0_i32 = arith.constant 0 : i32
    %c0_i32_0 = arith.constant 0 : i32
    %c0_i32_1 = arith.constant 0 : i32
    return %c0_i32, %c0_i32_0 : i32, i32
  }
  func.func @transform_3(%arg0: i32) -> (i32, i32) {
    %c0_i32 = arith.constant 0 : i32
    %c0_i32_0 = arith.constant 0 : i32
    return %arg0, %c0_i32 : i32, i32
  }
}

module attributes {stable_mosaic.version = 11 : i64} {
  func.func @_matmul_bn_kernel(%arg0: i32, %arg1: memref<128x288xbf16, #tpu.memory_space<vmem>>, %arg2: memref<288x128xbf16, #tpu.memory_space<vmem>>, %arg3: memref<1x128xf32, #tpu.memory_space<vmem>>, %arg4: memref<128x128xbf16, #tpu.memory_space<vmem>>) attributes {dimension_semantics = [#tpu.dimension_semantics<parallel>], iteration_bounds = array<i64: 1>, scalar_prefetch = 0 : i64, scratch_operands = 0 : i64, tpu.core_type = #tpu.core_type<tc>, window_params = [{transform_indices = @transform_0, window_bounds = array<i64: 128, 288>}, {pipeline_mode = #tpu.pipeline_mode<synchronous>, transform_indices = @transform_1, window_bounds = array<i64: 288, 128>}, {pipeline_mode = #tpu.pipeline_mode<synchronous>, transform_indices = @transform_2, window_bounds = array<i64: 1, 128>}, {transform_indices = @transform_3, window_bounds = array<i64: 128, 128>}]} {
    %c0 = arith.constant 0 : index
    %c0_0 = arith.constant 0 : index
    %0 = vector.load %arg1[%c0, %c0_0] : memref<128x288xbf16, #tpu.memory_space<vmem>>, vector<128x288xbf16>
    %c0_1 = arith.constant 0 : index
    %c0_2 = arith.constant 0 : index
    %1 = vector.load %arg2[%c0_1, %c0_2] : memref<288x128xbf16, #tpu.memory_space<vmem>>, vector<288x128xbf16>
    %cst = arith.constant dense<0.000000e+00> : vector<128x128xf32>
    %2 = tpu.matmul %0, %1, %cst {dimension_numbers = #tpu.dot_dimension_numbers<[1], [0], [0], [1], [0, 0, 1, 1], [], []>} : vector<128x288xbf16>, vector<288x128xbf16>, vector<128x128xf32> -> vector<128x128xf32>
    %c0_3 = arith.constant 0 : index
    %c0_4 = arith.constant 0 : index
    %3 = vector.load %arg3[%c0_3, %c0_4] : memref<1x128xf32, #tpu.memory_space<vmem>>, vector<1x128xf32>
    %4 = vector.broadcast %3 : vector<1x128xf32> to vector<128x128xf32>
    %5 = arith.addf %2, %4 : vector<128x128xf32>
    %cst_5 = arith.constant 0.000000e+00 : f32
    %6 = vector.broadcast %cst_5 : f32 to vector<128x128xf32>
    %7 = arith.maximumf %5, %6 : vector<128x128xf32>
    %8 = arith.truncf %7 : vector<128x128xf32> to vector<128x128xbf16>
    %c0_6 = arith.constant 0 : index
    %c0_7 = arith.constant 0 : index
    %9 = vector.load %arg4[%c0_6, %c0_7] : memref<128x128xbf16, #tpu.memory_space<vmem>>, vector<128x128xbf16>
    tpu.vector_store %arg4[%c0_6, %c0_7], %8 {strides = array<i32>} : memref<128x128xbf16, #tpu.memory_space<vmem>>, vector<128x128xbf16>,
    return
  }
  func.func @transform_0(%arg0: i32) -> (i32, i32) {
    %c0_i32 = arith.constant 0 : i32
    %c0_i32_0 = arith.constant 0 : i32
    return %arg0, %c0_i32 : i32, i32
  }
  func.func @transform_1(%arg0: i32) -> (i32, i32) {
    %c0_i32 = arith.constant 0 : i32
    %c0_i32_0 = arith.constant 0 : i32
    %c0_i32_1 = arith.constant 0 : i32
    return %c0_i32, %c0_i32_0 : i32, i32
  }
  func.func @transform_2(%arg0: i32) -> (i32, i32) {
    %c0_i32 = arith.constant 0 : i32
    %c0_i32_0 = arith.constant 0 : i32
    %c0_i32_1 = arith.constant 0 : i32
    return %c0_i32, %c0_i32_0 : i32, i32
  }
  func.func @transform_3(%arg0: i32) -> (i32, i32) {
    %c0_i32 = arith.constant 0 : i32
    %c0_i32_0 = arith.constant 0 : i32
    return %arg0, %c0_i32 : i32, i32
  }
}

module attributes {stable_mosaic.version = 11 : i64} {
  func.func @_matmul_bn_res_kernel(%arg0: i32, %arg1: memref<128x288xbf16, #tpu.memory_space<vmem>>, %arg2: memref<288x128xbf16, #tpu.memory_space<vmem>>, %arg3: memref<1x128xf32, #tpu.memory_space<vmem>>, %arg4: memref<128x128xbf16, #tpu.memory_space<vmem>>, %arg5: memref<128x128xbf16, #tpu.memory_space<vmem>>) attributes {dimension_semantics = [#tpu.dimension_semantics<parallel>], iteration_bounds = array<i64: 1>, scalar_prefetch = 0 : i64, scratch_operands = 0 : i64, tpu.core_type = #tpu.core_type<tc>, window_params = [{transform_indices = @transform_0, window_bounds = array<i64: 128, 288>}, {pipeline_mode = #tpu.pipeline_mode<synchronous>, transform_indices = @transform_1, window_bounds = array<i64: 288, 128>}, {pipeline_mode = #tpu.pipeline_mode<synchronous>, transform_indices = @transform_2, window_bounds = array<i64: 1, 128>}, {transform_indices = @transform_3, window_bounds = array<i64: 128, 128>}, {transform_indices = @transform_4, window_bounds = array<i64: 128, 128>}]} {
    %c0 = arith.constant 0 : index
    %c0_0 = arith.constant 0 : index
    %0 = vector.load %arg1[%c0, %c0_0] : memref<128x288xbf16, #tpu.memory_space<vmem>>, vector<128x288xbf16>
    %c0_1 = arith.constant 0 : index
    %c0_2 = arith.constant 0 : index
    %1 = vector.load %arg2[%c0_1, %c0_2] : memref<288x128xbf16, #tpu.memory_space<vmem>>, vector<288x128xbf16>
    %cst = arith.constant dense<0.000000e+00> : vector<128x128xf32>
    %2 = tpu.matmul %0, %1, %cst {dimension_numbers = #tpu.dot_dimension_numbers<[1], [0], [0], [1], [0, 0, 1, 1], [], []>} : vector<128x288xbf16>, vector<288x128xbf16>, vector<128x128xf32> -> vector<128x128xf32>
    %c0_3 = arith.constant 0 : index
    %c0_4 = arith.constant 0 : index
    %3 = vector.load %arg3[%c0_3, %c0_4] : memref<1x128xf32, #tpu.memory_space<vmem>>, vector<1x128xf32>
    %4 = vector.broadcast %3 : vector<1x128xf32> to vector<128x128xf32>
    %5 = arith.addf %2, %4 : vector<128x128xf32>
    %c0_5 = arith.constant 0 : index
    %c0_6 = arith.constant 0 : index
    %6 = vector.load %arg4[%c0_5, %c0_6] : memref<128x128xbf16, #tpu.memory_space<vmem>>, vector<128x128xbf16>
    %7 = arith.extf %6 : vector<128x128xbf16> to vector<128x128xf32>
    %8 = arith.addf %5, %7 : vector<128x128xf32>
    %cst_7 = arith.constant 0.000000e+00 : f32
    %9 = vector.broadcast %cst_7 : f32 to vector<128x128xf32>
    %10 = arith.maximumf %8, %9 : vector<128x128xf32>
    %11 = arith.truncf %10 : vector<128x128xf32> to vector<128x128xbf16>
    %c0_8 = arith.constant 0 : index
    %c0_9 = arith.constant 0 : index
    %12 = vector.load %arg5[%c0_8, %c0_9] : memref<128x128xbf16, #tpu.memory_space<vmem>>, vector<128x128xbf16>
    tpu.vector_store %arg5[%c0_8, %c0_9], %11 {strides = array<i32>} : memref<128x128xbf16, #tpu.memory_space<vmem>>, vector<128x128xbf16>,
    return
  }
  func.func @transform_0(%arg0: i32) -> (i32, i32) {
    %c0_i32 = arith.constant 0 : i32
    %c0_i32_0 = arith.constant 0 : i32
    return %arg0, %c0_i32 : i32, i32
  }
  func.func @transform_1(%arg0: i32) -> (i32, i32) {
    %c0_i32 = arith.constant 0 : i32
    %c0_i32_0 = arith.constant 0 : i32
    %c0_i32_1 = arith.constant 0 : i32
    return %c0_i32, %c0_i32_0 : i32, i32
  }
  func.func @transform_2(%arg0: i32) -> (i32, i32) {
    %c0_i32 = arith.constant 0 : i32
    %c0_i32_0 = arith.constant 0 : i32
    %c0_i32_1 = arith.constant 0 : i32
    return %c0_i32, %c0_i32_0 : i32, i32
  }
  func.func @transform_3(%arg0: i32) -> (i32, i32) {
    %c0_i32 = arith.constant 0 : i32
    %c0_i32_0 = arith.constant 0 : i32
    return %arg0, %c0_i32 : i32, i32
  }
  func.func @transform_4(%arg0: i32) -> (i32, i32) {
    %c0_i32 = arith.constant 0 : i32
    %c0_i32_0 = arith.constant 0 : i32
    return %arg0, %c0_i32 : i32, i32
  }
}

module attributes {stable_mosaic.version = 11 : i64} {
  func.func @_matmul_bn_kernel(%arg0: i32, %arg1: memref<128x64xbf16, #tpu.memory_space<vmem>>, %arg2: memref<64x128xbf16, #tpu.memory_space<vmem>>, %arg3: memref<1x128xf32, #tpu.memory_space<vmem>>, %arg4: memref<128x128xbf16, #tpu.memory_space<vmem>>) attributes {dimension_semantics = [#tpu.dimension_semantics<parallel>], iteration_bounds = array<i64: 1>, scalar_prefetch = 0 : i64, scratch_operands = 0 : i64, tpu.core_type = #tpu.core_type<tc>, window_params = [{transform_indices = @transform_0, window_bounds = array<i64: 128, 64>}, {pipeline_mode = #tpu.pipeline_mode<synchronous>, transform_indices = @transform_1, window_bounds = array<i64: 64, 128>}, {pipeline_mode = #tpu.pipeline_mode<synchronous>, transform_indices = @transform_2, window_bounds = array<i64: 1, 128>}, {transform_indices = @transform_3, window_bounds = array<i64: 128, 128>}]} {
    %c0 = arith.constant 0 : index
    %c0_0 = arith.constant 0 : index
    %0 = vector.load %arg1[%c0, %c0_0] : memref<128x64xbf16, #tpu.memory_space<vmem>>, vector<128x64xbf16>
    %c0_1 = arith.constant 0 : index
    %c0_2 = arith.constant 0 : index
    %1 = vector.load %arg2[%c0_1, %c0_2] : memref<64x128xbf16, #tpu.memory_space<vmem>>, vector<64x128xbf16>
    %cst = arith.constant dense<0.000000e+00> : vector<128x128xf32>
    %2 = tpu.matmul %0, %1, %cst {dimension_numbers = #tpu.dot_dimension_numbers<[1], [0], [0], [1], [0, 0, 1, 1], [], []>} : vector<128x64xbf16>, vector<64x128xbf16>, vector<128x128xf32> -> vector<128x128xf32>
    %c0_3 = arith.constant 0 : index
    %c0_4 = arith.constant 0 : index
    %3 = vector.load %arg3[%c0_3, %c0_4] : memref<1x128xf32, #tpu.memory_space<vmem>>, vector<1x128xf32>
    %4 = vector.broadcast %3 : vector<1x128xf32> to vector<128x128xf32>
    %5 = arith.addf %2, %4 : vector<128x128xf32>
    %cst_5 = arith.constant 0.000000e+00 : f32
    %6 = vector.broadcast %cst_5 : f32 to vector<128x128xf32>
    %7 = arith.maximumf %5, %6 : vector<128x128xf32>
    %8 = arith.truncf %7 : vector<128x128xf32> to vector<128x128xbf16>
    %c0_6 = arith.constant 0 : index
    %c0_7 = arith.constant 0 : index
    %9 = vector.load %arg4[%c0_6, %c0_7] : memref<128x128xbf16, #tpu.memory_space<vmem>>, vector<128x128xbf16>
    tpu.vector_store %arg4[%c0_6, %c0_7], %8 {strides = array<i32>} : memref<128x128xbf16, #tpu.memory_space<vmem>>, vector<128x128xbf16>,
    return
  }
  func.func @transform_0(%arg0: i32) -> (i32, i32) {
    %c0_i32 = arith.constant 0 : i32
    %c0_i32_0 = arith.constant 0 : i32
    return %arg0, %c0_i32 : i32, i32
  }
  func.func @transform_1(%arg0: i32) -> (i32, i32) {
    %c0_i32 = arith.constant 0 : i32
    %c0_i32_0 = arith.constant 0 : i32
    %c0_i32_1 = arith.constant 0 : i32
    return %c0_i32, %c0_i32_0 : i32, i32
  }
  func.func @transform_2(%arg0: i32) -> (i32, i32) {
    %c0_i32 = arith.constant 0 : i32
    %c0_i32_0 = arith.constant 0 : i32
    %c0_i32_1 = arith.constant 0 : i32
    return %c0_i32, %c0_i32_0 : i32, i32
  }
  func.func @transform_3(%arg0: i32) -> (i32, i32) {
    %c0_i32 = arith.constant 0 : i32
    %c0_i32_0 = arith.constant 0 : i32
    return %arg0, %c0_i32 : i32, i32
  }
}

module attributes {stable_mosaic.version = 11 : i64} {
  func.func @_matmul_bn_kernel(%arg0: i32, %arg1: memref<128x112xbf16, #tpu.memory_space<vmem>>, %arg2: memref<112x128xbf16, #tpu.memory_space<vmem>>, %arg3: memref<1x128xf32, #tpu.memory_space<vmem>>, %arg4: memref<128x128xbf16, #tpu.memory_space<vmem>>) attributes {dimension_semantics = [#tpu.dimension_semantics<parallel>], iteration_bounds = array<i64: 1>, scalar_prefetch = 0 : i64, scratch_operands = 0 : i64, tpu.core_type = #tpu.core_type<tc>, window_params = [{transform_indices = @transform_0, window_bounds = array<i64: 128, 112>}, {pipeline_mode = #tpu.pipeline_mode<synchronous>, transform_indices = @transform_1, window_bounds = array<i64: 112, 128>}, {pipeline_mode = #tpu.pipeline_mode<synchronous>, transform_indices = @transform_2, window_bounds = array<i64: 1, 128>}, {transform_indices = @transform_3, window_bounds = array<i64: 128, 128>}]} {
    %c0 = arith.constant 0 : index
    %c0_0 = arith.constant 0 : index
    %0 = vector.load %arg1[%c0, %c0_0] : memref<128x112xbf16, #tpu.memory_space<vmem>>, vector<128x112xbf16>
    %c0_1 = arith.constant 0 : index
    %c0_2 = arith.constant 0 : index
    %1 = vector.load %arg2[%c0_1, %c0_2] : memref<112x128xbf16, #tpu.memory_space<vmem>>, vector<112x128xbf16>
    %cst = arith.constant dense<0.000000e+00> : vector<128x128xf32>
    %2 = tpu.matmul %0, %1, %cst {dimension_numbers = #tpu.dot_dimension_numbers<[1], [0], [0], [1], [0, 0, 1, 1], [], []>} : vector<128x112xbf16>, vector<112x128xbf16>, vector<128x128xf32> -> vector<128x128xf32>
    %c0_3 = arith.constant 0 : index
    %c0_4 = arith.constant 0 : index
    %3 = vector.load %arg3[%c0_3, %c0_4] : memref<1x128xf32, #tpu.memory_space<vmem>>, vector<1x128xf32>
    %4 = vector.broadcast %3 : vector<1x128xf32> to vector<128x128xf32>
    %5 = arith.addf %2, %4 : vector<128x128xf32>
    %cst_5 = arith.constant 0.000000e+00 : f32
    %6 = vector.broadcast %cst_5 : f32 to vector<128x128xf32>
    %7 = arith.maximumf %5, %6 : vector<128x128xf32>
    %8 = arith.truncf %7 : vector<128x128xf32> to vector<128x128xbf16>
    %c0_6 = arith.constant 0 : index
    %c0_7 = arith.constant 0 : index
    %9 = vector.load %arg4[%c0_6, %c0_7] : memref<128x128xbf16, #tpu.memory_space<vmem>>, vector<128x128xbf16>
    tpu.vector_store %arg4[%c0_6, %c0_7], %8 {strides = array<i32>} : memref<128x128xbf16, #tpu.memory_space<vmem>>, vector<128x128xbf16>,
    return
  }
  func.func @transform_0(%arg0: i32) -> (i32, i32) {
    %c0_i32 = arith.constant 0 : i32
    %c0_i32_0 = arith.constant 0 : i32
    return %arg0, %c0_i32 : i32, i32
  }
  func.func @transform_1(%arg0: i32) -> (i32, i32) {
    %c0_i32 = arith.constant 0 : i32
    %c0_i32_0 = arith.constant 0 : i32
    %c0_i32_1 = arith.constant 0 : i32
    return %c0_i32, %c0_i32_0 : i32, i32
  }
  func.func @transform_2(%arg0: i32) -> (i32, i32) {
    %c0_i32 = arith.constant 0 : i32
    %c0_i32_0 = arith.constant 0 : i32
    %c0_i32_1 = arith.constant 0 : i32
    return %c0_i32, %c0_i32_0 : i32, i32
  }
  func.func @transform_3(%arg0: i32) -> (i32, i32) {
    %c0_i32 = arith.constant 0 : i32
    %c0_i32_0 = arith.constant 0 : i32
    return %arg0, %c0_i32 : i32, i32
  }
}

module attributes {stable_mosaic.version = 11 : i64} {
  func.func @_matmul_bn_kernel(%arg0: i32, %arg1: memref<32x288xbf16, #tpu.memory_space<vmem>>, %arg2: memref<288x128xbf16, #tpu.memory_space<vmem>>, %arg3: memref<1x128xf32, #tpu.memory_space<vmem>>, %arg4: memref<32x128xbf16, #tpu.memory_space<vmem>>) attributes {dimension_semantics = [#tpu.dimension_semantics<parallel>], iteration_bounds = array<i64: 1>, scalar_prefetch = 0 : i64, scratch_operands = 0 : i64, tpu.core_type = #tpu.core_type<tc>, window_params = [{transform_indices = @transform_0, window_bounds = array<i64: 32, 288>}, {pipeline_mode = #tpu.pipeline_mode<synchronous>, transform_indices = @transform_1, window_bounds = array<i64: 288, 128>}, {pipeline_mode = #tpu.pipeline_mode<synchronous>, transform_indices = @transform_2, window_bounds = array<i64: 1, 128>}, {transform_indices = @transform_3, window_bounds = array<i64: 32, 128>}]} {
    %c0 = arith.constant 0 : index
    %c0_0 = arith.constant 0 : index
    %0 = vector.load %arg1[%c0, %c0_0] : memref<32x288xbf16, #tpu.memory_space<vmem>>, vector<32x288xbf16>
    %c0_1 = arith.constant 0 : index
    %c0_2 = arith.constant 0 : index
    %1 = vector.load %arg2[%c0_1, %c0_2] : memref<288x128xbf16, #tpu.memory_space<vmem>>, vector<288x128xbf16>
    %cst = arith.constant dense<0.000000e+00> : vector<32x128xf32>
    %2 = tpu.matmul %0, %1, %cst {dimension_numbers = #tpu.dot_dimension_numbers<[1], [0], [0], [1], [0, 0, 1, 1], [], []>} : vector<32x288xbf16>, vector<288x128xbf16>, vector<32x128xf32> -> vector<32x128xf32>
    %c0_3 = arith.constant 0 : index
    %c0_4 = arith.constant 0 : index
    %3 = vector.load %arg3[%c0_3, %c0_4] : memref<1x128xf32, #tpu.memory_space<vmem>>, vector<1x128xf32>
    %4 = vector.broadcast %3 : vector<1x128xf32> to vector<32x128xf32>
    %5 = arith.addf %2, %4 : vector<32x128xf32>
    %cst_5 = arith.constant 0.000000e+00 : f32
    %6 = vector.broadcast %cst_5 : f32 to vector<32x128xf32>
    %7 = arith.maximumf %5, %6 : vector<32x128xf32>
    %8 = arith.truncf %7 : vector<32x128xf32> to vector<32x128xbf16>
    %c0_6 = arith.constant 0 : index
    %c0_7 = arith.constant 0 : index
    %9 = vector.load %arg4[%c0_6, %c0_7] : memref<32x128xbf16, #tpu.memory_space<vmem>>, vector<32x128xbf16>
    tpu.vector_store %arg4[%c0_6, %c0_7], %8 {strides = array<i32>} : memref<32x128xbf16, #tpu.memory_space<vmem>>, vector<32x128xbf16>,
    return
  }
  func.func @transform_0(%arg0: i32) -> (i32, i32) {
    %c0_i32 = arith.constant 0 : i32
    %c0_i32_0 = arith.constant 0 : i32
    return %arg0, %c0_i32 : i32, i32
  }
  func.func @transform_1(%arg0: i32) -> (i32, i32) {
    %c0_i32 = arith.constant 0 : i32
    %c0_i32_0 = arith.constant 0 : i32
    %c0_i32_1 = arith.constant 0 : i32
    return %c0_i32, %c0_i32_0 : i32, i32
  }
  func.func @transform_2(%arg0: i32) -> (i32, i32) {
    %c0_i32 = arith.constant 0 : i32
    %c0_i32_0 = arith.constant 0 : i32
    %c0_i32_1 = arith.constant 0 : i32
    return %c0_i32, %c0_i32_0 : i32, i32
  }
  func.func @transform_3(%arg0: i32) -> (i32, i32) {
    %c0_i32 = arith.constant 0 : i32
    %c0_i32_0 = arith.constant 0 : i32
    return %arg0, %c0_i32 : i32, i32
  }
}

module attributes {stable_mosaic.version = 11 : i64} {
  func.func @_matmul_bn_res_kernel(%arg0: i32, %arg1: memref<32x288xbf16, #tpu.memory_space<vmem>>, %arg2: memref<288x128xbf16, #tpu.memory_space<vmem>>, %arg3: memref<1x128xf32, #tpu.memory_space<vmem>>, %arg4: memref<32x128xbf16, #tpu.memory_space<vmem>>, %arg5: memref<32x128xbf16, #tpu.memory_space<vmem>>) attributes {dimension_semantics = [#tpu.dimension_semantics<parallel>], iteration_bounds = array<i64: 1>, scalar_prefetch = 0 : i64, scratch_operands = 0 : i64, tpu.core_type = #tpu.core_type<tc>, window_params = [{transform_indices = @transform_0, window_bounds = array<i64: 32, 288>}, {pipeline_mode = #tpu.pipeline_mode<synchronous>, transform_indices = @transform_1, window_bounds = array<i64: 288, 128>}, {pipeline_mode = #tpu.pipeline_mode<synchronous>, transform_indices = @transform_2, window_bounds = array<i64: 1, 128>}, {transform_indices = @transform_3, window_bounds = array<i64: 32, 128>}, {transform_indices = @transform_4, window_bounds = array<i64: 32, 128>}]} {
    %c0 = arith.constant 0 : index
    %c0_0 = arith.constant 0 : index
    %0 = vector.load %arg1[%c0, %c0_0] : memref<32x288xbf16, #tpu.memory_space<vmem>>, vector<32x288xbf16>
    %c0_1 = arith.constant 0 : index
    %c0_2 = arith.constant 0 : index
    %1 = vector.load %arg2[%c0_1, %c0_2] : memref<288x128xbf16, #tpu.memory_space<vmem>>, vector<288x128xbf16>
    %cst = arith.constant dense<0.000000e+00> : vector<32x128xf32>
    %2 = tpu.matmul %0, %1, %cst {dimension_numbers = #tpu.dot_dimension_numbers<[1], [0], [0], [1], [0, 0, 1, 1], [], []>} : vector<32x288xbf16>, vector<288x128xbf16>, vector<32x128xf32> -> vector<32x128xf32>
    %c0_3 = arith.constant 0 : index
    %c0_4 = arith.constant 0 : index
    %3 = vector.load %arg3[%c0_3, %c0_4] : memref<1x128xf32, #tpu.memory_space<vmem>>, vector<1x128xf32>
    %4 = vector.broadcast %3 : vector<1x128xf32> to vector<32x128xf32>
    %5 = arith.addf %2, %4 : vector<32x128xf32>
    %c0_5 = arith.constant 0 : index
    %c0_6 = arith.constant 0 : index
    %6 = vector.load %arg4[%c0_5, %c0_6] : memref<32x128xbf16, #tpu.memory_space<vmem>>, vector<32x128xbf16>
    %7 = arith.extf %6 : vector<32x128xbf16> to vector<32x128xf32>
    %8 = arith.addf %5, %7 : vector<32x128xf32>
    %cst_7 = arith.constant 0.000000e+00 : f32
    %9 = vector.broadcast %cst_7 : f32 to vector<32x128xf32>
    %10 = arith.maximumf %8, %9 : vector<32x128xf32>
    %11 = arith.truncf %10 : vector<32x128xf32> to vector<32x128xbf16>
    %c0_8 = arith.constant 0 : index
    %c0_9 = arith.constant 0 : index
    %12 = vector.load %arg5[%c0_8, %c0_9] : memref<32x128xbf16, #tpu.memory_space<vmem>>, vector<32x128xbf16>
    tpu.vector_store %arg5[%c0_8, %c0_9], %11 {strides = array<i32>} : memref<32x128xbf16, #tpu.memory_space<vmem>>, vector<32x128xbf16>,
    return
  }
  func.func @transform_0(%arg0: i32) -> (i32, i32) {
    %c0_i32 = arith.constant 0 : i32
    %c0_i32_0 = arith.constant 0 : i32
    return %arg0, %c0_i32 : i32, i32
  }
  func.func @transform_1(%arg0: i32) -> (i32, i32) {
    %c0_i32 = arith.constant 0 : i32
    %c0_i32_0 = arith.constant 0 : i32
    %c0_i32_1 = arith.constant 0 : i32
    return %c0_i32, %c0_i32_0 : i32, i32
  }
  func.func @transform_2(%arg0: i32) -> (i32, i32) {
    %c0_i32 = arith.constant 0 : i32
    %c0_i32_0 = arith.constant 0 : i32
    %c0_i32_1 = arith.constant 0 : i32
    return %c0_i32, %c0_i32_0 : i32, i32
  }
  func.func @transform_3(%arg0: i32) -> (i32, i32) {
    %c0_i32 = arith.constant 0 : i32
    %c0_i32_0 = arith.constant 0 : i32
    return %arg0, %c0_i32 : i32, i32
  }
  func.func @transform_4(%arg0: i32) -> (i32, i32) {
    %c0_i32 = arith.constant 0 : i32
    %c0_i32_0 = arith.constant 0 : i32
    return %arg0, %c0_i32 : i32, i32
  }
}

module attributes {stable_mosaic.version = 11 : i64} {
  func.func @_matmul_bn_kernel(%arg0: i32, %arg1: memref<32x64xbf16, #tpu.memory_space<vmem>>, %arg2: memref<64x128xbf16, #tpu.memory_space<vmem>>, %arg3: memref<1x128xf32, #tpu.memory_space<vmem>>, %arg4: memref<32x128xbf16, #tpu.memory_space<vmem>>) attributes {dimension_semantics = [#tpu.dimension_semantics<parallel>], iteration_bounds = array<i64: 1>, scalar_prefetch = 0 : i64, scratch_operands = 0 : i64, tpu.core_type = #tpu.core_type<tc>, window_params = [{transform_indices = @transform_0, window_bounds = array<i64: 32, 64>}, {pipeline_mode = #tpu.pipeline_mode<synchronous>, transform_indices = @transform_1, window_bounds = array<i64: 64, 128>}, {pipeline_mode = #tpu.pipeline_mode<synchronous>, transform_indices = @transform_2, window_bounds = array<i64: 1, 128>}, {transform_indices = @transform_3, window_bounds = array<i64: 32, 128>}]} {
    %c0 = arith.constant 0 : index
    %c0_0 = arith.constant 0 : index
    %0 = vector.load %arg1[%c0, %c0_0] : memref<32x64xbf16, #tpu.memory_space<vmem>>, vector<32x64xbf16>
    %c0_1 = arith.constant 0 : index
    %c0_2 = arith.constant 0 : index
    %1 = vector.load %arg2[%c0_1, %c0_2] : memref<64x128xbf16, #tpu.memory_space<vmem>>, vector<64x128xbf16>
    %cst = arith.constant dense<0.000000e+00> : vector<32x128xf32>
    %2 = tpu.matmul %0, %1, %cst {dimension_numbers = #tpu.dot_dimension_numbers<[1], [0], [0], [1], [0, 0, 1, 1], [], []>} : vector<32x64xbf16>, vector<64x128xbf16>, vector<32x128xf32> -> vector<32x128xf32>
    %c0_3 = arith.constant 0 : index
    %c0_4 = arith.constant 0 : index
    %3 = vector.load %arg3[%c0_3, %c0_4] : memref<1x128xf32, #tpu.memory_space<vmem>>, vector<1x128xf32>
    %4 = vector.broadcast %3 : vector<1x128xf32> to vector<32x128xf32>
    %5 = arith.addf %2, %4 : vector<32x128xf32>
    %cst_5 = arith.constant 0.000000e+00 : f32
    %6 = vector.broadcast %cst_5 : f32 to vector<32x128xf32>
    %7 = arith.maximumf %5, %6 : vector<32x128xf32>
    %8 = arith.truncf %7 : vector<32x128xf32> to vector<32x128xbf16>
    %c0_6 = arith.constant 0 : index
    %c0_7 = arith.constant 0 : index
    %9 = vector.load %arg4[%c0_6, %c0_7] : memref<32x128xbf16, #tpu.memory_space<vmem>>, vector<32x128xbf16>
    tpu.vector_store %arg4[%c0_6, %c0_7], %8 {strides = array<i32>} : memref<32x128xbf16, #tpu.memory_space<vmem>>, vector<32x128xbf16>,
    return
  }
  func.func @transform_0(%arg0: i32) -> (i32, i32) {
    %c0_i32 = arith.constant 0 : i32
    %c0_i32_0 = arith.constant 0 : i32
    return %arg0, %c0_i32 : i32, i32
  }
  func.func @transform_1(%arg0: i32) -> (i32, i32) {
    %c0_i32 = arith.constant 0 : i32
    %c0_i32_0 = arith.constant 0 : i32
    %c0_i32_1 = arith.constant 0 : i32
    return %c0_i32, %c0_i32_0 : i32, i32
  }
  func.func @transform_2(%arg0: i32) -> (i32, i32) {
    %c0_i32 = arith.constant 0 : i32
    %c0_i32_0 = arith.constant 0 : i32
    %c0_i32_1 = arith.constant 0 : i32
    return %c0_i32, %c0_i32_0 : i32, i32
  }
  func.func @transform_3(%arg0: i32) -> (i32, i32) {
    %c0_i32 = arith.constant 0 : i32
    %c0_i32_0 = arith.constant 0 : i32
    return %arg0, %c0_i32 : i32, i32
  }
}

module attributes {stable_mosaic.version = 11 : i64} {
  func.func @_matmul_bn_kernel(%arg0: i32, %arg1: memref<32x128xbf16, #tpu.memory_space<vmem>>, %arg2: memref<128x128xbf16, #tpu.memory_space<vmem>>, %arg3: memref<1x128xf32, #tpu.memory_space<vmem>>, %arg4: memref<32x128xbf16, #tpu.memory_space<vmem>>) attributes {dimension_semantics = [#tpu.dimension_semantics<parallel>], iteration_bounds = array<i64: 1>, scalar_prefetch = 0 : i64, scratch_operands = 0 : i64, tpu.core_type = #tpu.core_type<tc>, window_params = [{transform_indices = @transform_0, window_bounds = array<i64: 32, 128>}, {pipeline_mode = #tpu.pipeline_mode<synchronous>, transform_indices = @transform_1, window_bounds = array<i64: 128, 128>}, {pipeline_mode = #tpu.pipeline_mode<synchronous>, transform_indices = @transform_2, window_bounds = array<i64: 1, 128>}, {transform_indices = @transform_3, window_bounds = array<i64: 32, 128>}]} {
    %c0 = arith.constant 0 : index
    %c0_0 = arith.constant 0 : index
    %0 = vector.load %arg1[%c0, %c0_0] : memref<32x128xbf16, #tpu.memory_space<vmem>>, vector<32x128xbf16>
    %c0_1 = arith.constant 0 : index
    %c0_2 = arith.constant 0 : index
    %1 = vector.load %arg2[%c0_1, %c0_2] : memref<128x128xbf16, #tpu.memory_space<vmem>>, vector<128x128xbf16>
    %cst = arith.constant dense<0.000000e+00> : vector<32x128xf32>
    %2 = tpu.matmul %0, %1, %cst {dimension_numbers = #tpu.dot_dimension_numbers<[1], [0], [0], [1], [0, 0, 1, 1], [], []>} : vector<32x128xbf16>, vector<128x128xbf16>, vector<32x128xf32> -> vector<32x128xf32>
    %c0_3 = arith.constant 0 : index
    %c0_4 = arith.constant 0 : index
    %3 = vector.load %arg3[%c0_3, %c0_4] : memref<1x128xf32, #tpu.memory_space<vmem>>, vector<1x128xf32>
    %4 = vector.broadcast %3 : vector<1x128xf32> to vector<32x128xf32>
    %5 = arith.addf %2, %4 : vector<32x128xf32>
    %cst_5 = arith.constant 0.000000e+00 : f32
    %6 = vector.broadcast %cst_5 : f32 to vector<32x128xf32>
    %7 = arith.maximumf %5, %6 : vector<32x128xf32>
    %8 = arith.truncf %7 : vector<32x128xf32> to vector<32x128xbf16>
    %c0_6 = arith.constant 0 : index
    %c0_7 = arith.constant 0 : index
    %9 = vector.load %arg4[%c0_6, %c0_7] : memref<32x128xbf16, #tpu.memory_space<vmem>>, vector<32x128xbf16>
    tpu.vector_store %arg4[%c0_6, %c0_7], %8 {strides = array<i32>} : memref<32x128xbf16, #tpu.memory_space<vmem>>, vector<32x128xbf16>,
    return
  }
  func.func @transform_0(%arg0: i32) -> (i32, i32) {
    %c0_i32 = arith.constant 0 : i32
    %c0_i32_0 = arith.constant 0 : i32
    return %arg0, %c0_i32 : i32, i32
  }
  func.func @transform_1(%arg0: i32) -> (i32, i32) {
    %c0_i32 = arith.constant 0 : i32
    %c0_i32_0 = arith.constant 0 : i32
    %c0_i32_1 = arith.constant 0 : i32
    return %c0_i32, %c0_i32_0 : i32, i32
  }
  func.func @transform_2(%arg0: i32) -> (i32, i32) {
    %c0_i32 = arith.constant 0 : i32
    %c0_i32_0 = arith.constant 0 : i32
    %c0_i32_1 = arith.constant 0 : i32
    return %c0_i32, %c0_i32_0 : i32, i32
  }
  func.func @transform_3(%arg0: i32) -> (i32, i32) {
    %c0_i32 = arith.constant 0 : i32
    %c0_i32_0 = arith.constant 0 : i32
    return %arg0, %c0_i32 : i32, i32
  }
}

module attributes {stable_mosaic.version = 11 : i64} {
  func.func @_matmul_bn_kernel(%arg0: i32, %arg1: memref<8x32xbf16, #tpu.memory_space<vmem>>, %arg2: memref<32x128xbf16, #tpu.memory_space<vmem>>, %arg3: memref<1x128xf32, #tpu.memory_space<vmem>>, %arg4: memref<8x128xbf16, #tpu.memory_space<vmem>>) attributes {dimension_semantics = [#tpu.dimension_semantics<parallel>], iteration_bounds = array<i64: 1>, scalar_prefetch = 0 : i64, scratch_operands = 0 : i64, tpu.core_type = #tpu.core_type<tc>, window_params = [{transform_indices = @transform_0, window_bounds = array<i64: 8, 32>}, {pipeline_mode = #tpu.pipeline_mode<synchronous>, transform_indices = @transform_1, window_bounds = array<i64: 32, 128>}, {pipeline_mode = #tpu.pipeline_mode<synchronous>, transform_indices = @transform_2, window_bounds = array<i64: 1, 128>}, {transform_indices = @transform_3, window_bounds = array<i64: 8, 128>}]} {
    %c0 = arith.constant 0 : index
    %c0_0 = arith.constant 0 : index
    %0 = vector.load %arg1[%c0, %c0_0] : memref<8x32xbf16, #tpu.memory_space<vmem>>, vector<8x32xbf16>
    %c0_1 = arith.constant 0 : index
    %c0_2 = arith.constant 0 : index
    %1 = vector.load %arg2[%c0_1, %c0_2] : memref<32x128xbf16, #tpu.memory_space<vmem>>, vector<32x128xbf16>
    %cst = arith.constant dense<0.000000e+00> : vector<8x128xf32>
    %2 = tpu.matmul %0, %1, %cst {dimension_numbers = #tpu.dot_dimension_numbers<[1], [0], [0], [1], [0, 0, 1, 1], [], []>} : vector<8x32xbf16>, vector<32x128xbf16>, vector<8x128xf32> -> vector<8x128xf32>
    %c0_3 = arith.constant 0 : index
    %c0_4 = arith.constant 0 : index
    %3 = vector.load %arg3[%c0_3, %c0_4] : memref<1x128xf32, #tpu.memory_space<vmem>>, vector<1x128xf32>
    %4 = vector.broadcast %3 : vector<1x128xf32> to vector<8x128xf32>
    %5 = arith.addf %2, %4 : vector<8x128xf32>
    %6 = arith.truncf %5 : vector<8x128xf32> to vector<8x128xbf16>
    %c0_5 = arith.constant 0 : index
    %c0_6 = arith.constant 0 : index
    %7 = vector.load %arg4[%c0_5, %c0_6] : memref<8x128xbf16, #tpu.memory_space<vmem>>, vector<8x128xbf16>
    tpu.vector_store %arg4[%c0_5, %c0_6], %6 {strides = array<i32>} : memref<8x128xbf16, #tpu.memory_space<vmem>>, vector<8x128xbf16>,
    return
  }
  func.func @transform_0(%arg0: i32) -> (i32, i32) {
    %c0_i32 = arith.constant 0 : i32
    %c0_i32_0 = arith.constant 0 : i32
    return %arg0, %c0_i32 : i32, i32
  }
  func.func @transform_1(%arg0: i32) -> (i32, i32) {
    %c0_i32 = arith.constant 0 : i32
    %c0_i32_0 = arith.constant 0 : i32
    %c0_i32_1 = arith.constant 0 : i32
    return %c0_i32, %c0_i32_0 : i32, i32
  }
  func.func @transform_2(%arg0: i32) -> (i32, i32) {
    %c0_i32 = arith.constant 0 : i32
    %c0_i32_0 = arith.constant 0 : i32
    %c0_i32_1 = arith.constant 0 : i32
    return %c0_i32, %c0_i32_0 : i32, i32
  }
  func.func @transform_3(%arg0: i32) -> (i32, i32) {
    %c0_i32 = arith.constant 0 : i32
    %c0_i32_0 = arith.constant 0 : i32
    return %arg0, %c0_i32 : i32, i32
  }
}

module attributes {stable_mosaic.version = 11 : i64} {
  func.func @_matmul_bn_kernel(%arg0: i32, %arg1: memref<8x288xbf16, #tpu.memory_space<vmem>>, %arg2: memref<288x128xbf16, #tpu.memory_space<vmem>>, %arg3: memref<1x128xf32, #tpu.memory_space<vmem>>, %arg4: memref<8x128xbf16, #tpu.memory_space<vmem>>) attributes {dimension_semantics = [#tpu.dimension_semantics<parallel>], iteration_bounds = array<i64: 1>, scalar_prefetch = 0 : i64, scratch_operands = 0 : i64, tpu.core_type = #tpu.core_type<tc>, window_params = [{transform_indices = @transform_0, window_bounds = array<i64: 8, 288>}, {pipeline_mode = #tpu.pipeline_mode<synchronous>, transform_indices = @transform_1, window_bounds = array<i64: 288, 128>}, {pipeline_mode = #tpu.pipeline_mode<synchronous>, transform_indices = @transform_2, window_bounds = array<i64: 1, 128>}, {transform_indices = @transform_3, window_bounds = array<i64: 8, 128>}]} {
    %c0 = arith.constant 0 : index
    %c0_0 = arith.constant 0 : index
    %0 = vector.load %arg1[%c0, %c0_0] : memref<8x288xbf16, #tpu.memory_space<vmem>>, vector<8x288xbf16>
    %c0_1 = arith.constant 0 : index
    %c0_2 = arith.constant 0 : index
    %1 = vector.load %arg2[%c0_1, %c0_2] : memref<288x128xbf16, #tpu.memory_space<vmem>>, vector<288x128xbf16>
    %cst = arith.constant dense<0.000000e+00> : vector<8x128xf32>
    %2 = tpu.matmul %0, %1, %cst {dimension_numbers = #tpu.dot_dimension_numbers<[1], [0], [0], [1], [0, 0, 1, 1], [], []>} : vector<8x288xbf16>, vector<288x128xbf16>, vector<8x128xf32> -> vector<8x128xf32>
    %c0_3 = arith.constant 0 : index
    %c0_4 = arith.constant 0 : index
    %3 = vector.load %arg3[%c0_3, %c0_4] : memref<1x128xf32, #tpu.memory_space<vmem>>, vector<1x128xf32>
    %4 = vector.broadcast %3 : vector<1x128xf32> to vector<8x128xf32>
    %5 = arith.addf %2, %4 : vector<8x128xf32>
    %cst_5 = arith.constant 0.000000e+00 : f32
    %6 = vector.broadcast %cst_5 : f32 to vector<8x128xf32>
    %7 = arith.maximumf %5, %6 : vector<8x128xf32>
    %8 = arith.truncf %7 : vector<8x128xf32> to vector<8x128xbf16>
    %c0_6 = arith.constant 0 : index
    %c0_7 = arith.constant 0 : index
    %9 = vector.load %arg4[%c0_6, %c0_7] : memref<8x128xbf16, #tpu.memory_space<vmem>>, vector<8x128xbf16>
    tpu.vector_store %arg4[%c0_6, %c0_7], %8 {strides = array<i32>} : memref<8x128xbf16, #tpu.memory_space<vmem>>, vector<8x128xbf16>,
    return
  }
  func.func @transform_0(%arg0: i32) -> (i32, i32) {
    %c0_i32 = arith.constant 0 : i32
    %c0_i32_0 = arith.constant 0 : i32
    return %arg0, %c0_i32 : i32, i32
  }
  func.func @transform_1(%arg0: i32) -> (i32, i32) {
    %c0_i32 = arith.constant 0 : i32
    %c0_i32_0 = arith.constant 0 : i32
    %c0_i32_1 = arith.constant 0 : i32
    return %c0_i32, %c0_i32_0 : i32, i32
  }
  func.func @transform_2(%arg0: i32) -> (i32, i32) {
    %c0_i32 = arith.constant 0 : i32
    %c0_i32_0 = arith.constant 0 : i32
    %c0_i32_1 = arith.constant 0 : i32
    return %c0_i32, %c0_i32_0 : i32, i32
  }
  func.func @transform_3(%arg0: i32) -> (i32, i32) {
    %c0_i32 = arith.constant 0 : i32
    %c0_i32_0 = arith.constant 0 : i32
    return %arg0, %c0_i32 : i32, i32
  }
}

module attributes {stable_mosaic.version = 11 : i64} {
  func.func @_matmul_bn_res_kernel(%arg0: i32, %arg1: memref<8x576xbf16, #tpu.memory_space<vmem>>, %arg2: memref<576x128xbf16, #tpu.memory_space<vmem>>, %arg3: memref<1x128xf32, #tpu.memory_space<vmem>>, %arg4: memref<8x128xbf16, #tpu.memory_space<vmem>>, %arg5: memref<8x128xbf16, #tpu.memory_space<vmem>>) attributes {dimension_semantics = [#tpu.dimension_semantics<parallel>], iteration_bounds = array<i64: 1>, scalar_prefetch = 0 : i64, scratch_operands = 0 : i64, tpu.core_type = #tpu.core_type<tc>, window_params = [{transform_indices = @transform_0, window_bounds = array<i64: 8, 576>}, {pipeline_mode = #tpu.pipeline_mode<synchronous>, transform_indices = @transform_1, window_bounds = array<i64: 576, 128>}, {pipeline_mode = #tpu.pipeline_mode<synchronous>, transform_indices = @transform_2, window_bounds = array<i64: 1, 128>}, {transform_indices = @transform_3, window_bounds = array<i64: 8, 128>}, {transform_indices = @transform_4, window_bounds = array<i64: 8, 128>}]} {
    %c0 = arith.constant 0 : index
    %c0_0 = arith.constant 0 : index
    %0 = vector.load %arg1[%c0, %c0_0] : memref<8x576xbf16, #tpu.memory_space<vmem>>, vector<8x576xbf16>
    %c0_1 = arith.constant 0 : index
    %c0_2 = arith.constant 0 : index
    %1 = vector.load %arg2[%c0_1, %c0_2] : memref<576x128xbf16, #tpu.memory_space<vmem>>, vector<576x128xbf16>
    %cst = arith.constant dense<0.000000e+00> : vector<8x128xf32>
    %2 = tpu.matmul %0, %1, %cst {dimension_numbers = #tpu.dot_dimension_numbers<[1], [0], [0], [1], [0, 0, 1, 1], [], []>} : vector<8x576xbf16>, vector<576x128xbf16>, vector<8x128xf32> -> vector<8x128xf32>
    %c0_3 = arith.constant 0 : index
    %c0_4 = arith.constant 0 : index
    %3 = vector.load %arg3[%c0_3, %c0_4] : memref<1x128xf32, #tpu.memory_space<vmem>>, vector<1x128xf32>
    %4 = vector.broadcast %3 : vector<1x128xf32> to vector<8x128xf32>
    %5 = arith.addf %2, %4 : vector<8x128xf32>
    %c0_5 = arith.constant 0 : index
    %c0_6 = arith.constant 0 : index
    %6 = vector.load %arg4[%c0_5, %c0_6] : memref<8x128xbf16, #tpu.memory_space<vmem>>, vector<8x128xbf16>
    %7 = arith.extf %6 : vector<8x128xbf16> to vector<8x128xf32>
    %8 = arith.addf %5, %7 : vector<8x128xf32>
    %cst_7 = arith.constant 0.000000e+00 : f32
    %9 = vector.broadcast %cst_7 : f32 to vector<8x128xf32>
    %10 = arith.maximumf %8, %9 : vector<8x128xf32>
    %11 = arith.truncf %10 : vector<8x128xf32> to vector<8x128xbf16>
    %c0_8 = arith.constant 0 : index
    %c0_9 = arith.constant 0 : index
    %12 = vector.load %arg5[%c0_8, %c0_9] : memref<8x128xbf16, #tpu.memory_space<vmem>>, vector<8x128xbf16>
    tpu.vector_store %arg5[%c0_8, %c0_9], %11 {strides = array<i32>} : memref<8x128xbf16, #tpu.memory_space<vmem>>, vector<8x128xbf16>,
    return
  }
  func.func @transform_0(%arg0: i32) -> (i32, i32) {
    %c0_i32 = arith.constant 0 : i32
    %c0_i32_0 = arith.constant 0 : i32
    return %arg0, %c0_i32 : i32, i32
  }
  func.func @transform_1(%arg0: i32) -> (i32, i32) {
    %c0_i32 = arith.constant 0 : i32
    %c0_i32_0 = arith.constant 0 : i32
    %c0_i32_1 = arith.constant 0 : i32
    return %c0_i32, %c0_i32_0 : i32, i32
  }
  func.func @transform_2(%arg0: i32) -> (i32, i32) {
    %c0_i32 = arith.constant 0 : i32
    %c0_i32_0 = arith.constant 0 : i32
    %c0_i32_1 = arith.constant 0 : i32
    return %c0_i32, %c0_i32_0 : i32, i32
  }
  func.func @transform_3(%arg0: i32) -> (i32, i32) {
    %c0_i32 = arith.constant 0 : i32
    %c0_i32_0 = arith.constant 0 : i32
    return %arg0, %c0_i32 : i32, i32
  }
  func.func @transform_4(%arg0: i32) -> (i32, i32) {
    %c0_i32 = arith.constant 0 : i32
    %c0_i32_0 = arith.constant 0 : i32
    return %arg0, %c0_i32 : i32, i32
  }
}

module attributes {stable_mosaic.version = 11 : i64} {
  func.func @_matmul_bn_kernel(%arg0: i32, %arg1: memref<8x576xbf16, #tpu.memory_space<vmem>>, %arg2: memref<576x128xbf16, #tpu.memory_space<vmem>>, %arg3: memref<1x128xf32, #tpu.memory_space<vmem>>, %arg4: memref<8x128xbf16, #tpu.memory_space<vmem>>) attributes {dimension_semantics = [#tpu.dimension_semantics<parallel>], iteration_bounds = array<i64: 1>, scalar_prefetch = 0 : i64, scratch_operands = 0 : i64, tpu.core_type = #tpu.core_type<tc>, window_params = [{transform_indices = @transform_0, window_bounds = array<i64: 8, 576>}, {pipeline_mode = #tpu.pipeline_mode<synchronous>, transform_indices = @transform_1, window_bounds = array<i64: 576, 128>}, {pipeline_mode = #tpu.pipeline_mode<synchronous>, transform_indices = @transform_2, window_bounds = array<i64: 1, 128>}, {transform_indices = @transform_3, window_bounds = array<i64: 8, 128>}]} {
    %c0 = arith.constant 0 : index
    %c0_0 = arith.constant 0 : index
    %0 = vector.load %arg1[%c0, %c0_0] : memref<8x576xbf16, #tpu.memory_space<vmem>>, vector<8x576xbf16>
    %c0_1 = arith.constant 0 : index
    %c0_2 = arith.constant 0 : index
    %1 = vector.load %arg2[%c0_1, %c0_2] : memref<576x128xbf16, #tpu.memory_space<vmem>>, vector<576x128xbf16>
    %cst = arith.constant dense<0.000000e+00> : vector<8x128xf32>
    %2 = tpu.matmul %0, %1, %cst {dimension_numbers = #tpu.dot_dimension_numbers<[1], [0], [0], [1], [0, 0, 1, 1], [], []>} : vector<8x576xbf16>, vector<576x128xbf16>, vector<8x128xf32> -> vector<8x128xf32>
    %c0_3 = arith.constant 0 : index
    %c0_4 = arith.constant 0 : index
    %3 = vector.load %arg3[%c0_3, %c0_4] : memref<1x128xf32, #tpu.memory_space<vmem>>, vector<1x128xf32>
    %4 = vector.broadcast %3 : vector<1x128xf32> to vector<8x128xf32>
    %5 = arith.addf %2, %4 : vector<8x128xf32>
    %cst_5 = arith.constant 0.000000e+00 : f32
    %6 = vector.broadcast %cst_5 : f32 to vector<8x128xf32>
    %7 = arith.maximumf %5, %6 : vector<8x128xf32>
    %8 = arith.truncf %7 : vector<8x128xf32> to vector<8x128xbf16>
    %c0_6 = arith.constant 0 : index
    %c0_7 = arith.constant 0 : index
    %9 = vector.load %arg4[%c0_6, %c0_7] : memref<8x128xbf16, #tpu.memory_space<vmem>>, vector<8x128xbf16>
    tpu.vector_store %arg4[%c0_6, %c0_7], %8 {strides = array<i32>} : memref<8x128xbf16, #tpu.memory_space<vmem>>, vector<8x128xbf16>,
    return
  }
  func.func @transform_0(%arg0: i32) -> (i32, i32) {
    %c0_i32 = arith.constant 0 : i32
    %c0_i32_0 = arith.constant 0 : i32
    return %arg0, %c0_i32 : i32, i32
  }
  func.func @transform_1(%arg0: i32) -> (i32, i32) {
    %c0_i32 = arith.constant 0 : i32
    %c0_i32_0 = arith.constant 0 : i32
    %c0_i32_1 = arith.constant 0 : i32
    return %c0_i32, %c0_i32_0 : i32, i32
  }
  func.func @transform_2(%arg0: i32) -> (i32, i32) {
    %c0_i32 = arith.constant 0 : i32
    %c0_i32_0 = arith.constant 0 : i32
    %c0_i32_1 = arith.constant 0 : i32
    return %c0_i32, %c0_i32_0 : i32, i32
  }
  func.func @transform_3(%arg0: i32) -> (i32, i32) {
    %c0_i32 = arith.constant 0 : i32
    %c0_i32_0 = arith.constant 0 : i32
    return %arg0, %c0_i32 : i32, i32
  }
}

module attributes {stable_mosaic.version = 11 : i64} {
  func.func @_matmul_bn_kernel(%arg0: i32, %arg1: memref<8x160xbf16, #tpu.memory_space<vmem>>, %arg2: memref<160x128xbf16, #tpu.memory_space<vmem>>, %arg3: memref<1x128xf32, #tpu.memory_space<vmem>>, %arg4: memref<8x128xbf16, #tpu.memory_space<vmem>>) attributes {dimension_semantics = [#tpu.dimension_semantics<parallel>], iteration_bounds = array<i64: 1>, scalar_prefetch = 0 : i64, scratch_operands = 0 : i64, tpu.core_type = #tpu.core_type<tc>, window_params = [{transform_indices = @transform_0, window_bounds = array<i64: 8, 160>}, {pipeline_mode = #tpu.pipeline_mode<synchronous>, transform_indices = @transform_1, window_bounds = array<i64: 160, 128>}, {pipeline_mode = #tpu.pipeline_mode<synchronous>, transform_indices = @transform_2, window_bounds = array<i64: 1, 128>}, {transform_indices = @transform_3, window_bounds = array<i64: 8, 128>}]} {
    %c0 = arith.constant 0 : index
    %c0_0 = arith.constant 0 : index
    %0 = vector.load %arg1[%c0, %c0_0] : memref<8x160xbf16, #tpu.memory_space<vmem>>, vector<8x160xbf16>
    %c0_1 = arith.constant 0 : index
    %c0_2 = arith.constant 0 : index
    %1 = vector.load %arg2[%c0_1, %c0_2] : memref<160x128xbf16, #tpu.memory_space<vmem>>, vector<160x128xbf16>
    %cst = arith.constant dense<0.000000e+00> : vector<8x128xf32>
    %2 = tpu.matmul %0, %1, %cst {dimension_numbers = #tpu.dot_dimension_numbers<[1], [0], [0], [1], [0, 0, 1, 1], [], []>} : vector<8x160xbf16>, vector<160x128xbf16>, vector<8x128xf32> -> vector<8x128xf32>
    %c0_3 = arith.constant 0 : index
    %c0_4 = arith.constant 0 : index
    %3 = vector.load %arg3[%c0_3, %c0_4] : memref<1x128xf32, #tpu.memory_space<vmem>>, vector<1x128xf32>
    %4 = vector.broadcast %3 : vector<1x128xf32> to vector<8x128xf32>
    %5 = arith.addf %2, %4 : vector<8x128xf32>
    %cst_5 = arith.constant 0.000000e+00 : f32
    %6 = vector.broadcast %cst_5 : f32 to vector<8x128xf32>
    %7 = arith.maximumf %5, %6 : vector<8x128xf32>
    %8 = arith.truncf %7 : vector<8x128xf32> to vector<8x128xbf16>
    %c0_6 = arith.constant 0 : index
    %c0_7 = arith.constant 0 : index
    %9 = vector.load %arg4[%c0_6, %c0_7] : memref<8x128xbf16, #tpu.memory_space<vmem>>, vector<8x128xbf16>
    tpu.vector_store %arg4[%c0_6, %c0_7], %8 {strides = array<i32>} : memref<8x128xbf16, #tpu.memory_space<vmem>>, vector<8x128xbf16>,
    return
  }
  func.func @transform_0(%arg0: i32) -> (i32, i32) {
    %c0_i32 = arith.constant 0 : i32
    %c0_i32_0 = arith.constant 0 : i32
    return %arg0, %c0_i32 : i32, i32
  }
  func.func @transform_1(%arg0: i32) -> (i32, i32) {
    %c0_i32 = arith.constant 0 : i32
    %c0_i32_0 = arith.constant 0 : i32
    %c0_i32_1 = arith.constant 0 : i32
    return %c0_i32, %c0_i32_0 : i32, i32
  }
  func.func @transform_2(%arg0: i32) -> (i32, i32) {
    %c0_i32 = arith.constant 0 : i32
    %c0_i32_0 = arith.constant 0 : i32
    %c0_i32_1 = arith.constant 0 : i32
    return %c0_i32, %c0_i32_0 : i32, i32
  }
  func.func @transform_3(%arg0: i32) -> (i32, i32) {
    %c0_i32 = arith.constant 0 : i32
    %c0_i32_0 = arith.constant 0 : i32
    return %arg0, %c0_i32 : i32, i32
  }
}

module attributes {stable_mosaic.version = 11 : i64} {
  func.func @_matmul_bn_kernel(%arg0: i32, %arg1: memref<2x64xbf16, #tpu.memory_space<vmem>>, %arg2: memref<64x128xbf16, #tpu.memory_space<vmem>>, %arg3: memref<1x128xf32, #tpu.memory_space<vmem>>, %arg4: memref<2x128xf32, #tpu.memory_space<vmem>>) attributes {dimension_semantics = [#tpu.dimension_semantics<parallel>], iteration_bounds = array<i64: 1>, scalar_prefetch = 0 : i64, scratch_operands = 0 : i64, tpu.core_type = #tpu.core_type<tc>, window_params = [{transform_indices = @transform_0, window_bounds = array<i64: 2, 64>}, {pipeline_mode = #tpu.pipeline_mode<synchronous>, transform_indices = @transform_1, window_bounds = array<i64: 64, 128>}, {pipeline_mode = #tpu.pipeline_mode<synchronous>, transform_indices = @transform_2, window_bounds = array<i64: 1, 128>}, {transform_indices = @transform_3, window_bounds = array<i64: 2, 128>}]} {
    %c0 = arith.constant 0 : index
    %c0_0 = arith.constant 0 : index
    %0 = vector.load %arg1[%c0, %c0_0] : memref<2x64xbf16, #tpu.memory_space<vmem>>, vector<2x64xbf16>
    %c0_1 = arith.constant 0 : index
    %c0_2 = arith.constant 0 : index
    %1 = vector.load %arg2[%c0_1, %c0_2] : memref<64x128xbf16, #tpu.memory_space<vmem>>, vector<64x128xbf16>
    %cst = arith.constant dense<0.000000e+00> : vector<2x128xf32>
    %2 = tpu.matmul %0, %1, %cst {dimension_numbers = #tpu.dot_dimension_numbers<[1], [0], [0], [1], [0, 0, 1, 1], [], []>} : vector<2x64xbf16>, vector<64x128xbf16>, vector<2x128xf32> -> vector<2x128xf32>
    %c0_3 = arith.constant 0 : index
    %c0_4 = arith.constant 0 : index
    %3 = vector.load %arg3[%c0_3, %c0_4] : memref<1x128xf32, #tpu.memory_space<vmem>>, vector<1x128xf32>
    %4 = vector.broadcast %3 : vector<1x128xf32> to vector<2x128xf32>
    %5 = arith.addf %2, %4 : vector<2x128xf32>
    %c0_5 = arith.constant 0 : index
    %c0_6 = arith.constant 0 : index
    %6 = vector.load %arg4[%c0_5, %c0_6] : memref<2x128xf32, #tpu.memory_space<vmem>>, vector<2x128xf32>
    tpu.vector_store %arg4[%c0_5, %c0_6], %5 {strides = array<i32>} : memref<2x128xf32, #tpu.memory_space<vmem>>, vector<2x128xf32>,
    return
  }
  func.func @transform_0(%arg0: i32) -> (i32, i32) {
    %c0_i32 = arith.constant 0 : i32
    %c0_i32_0 = arith.constant 0 : i32
    return %arg0, %c0_i32 : i32, i32
  }
  func.func @transform_1(%arg0: i32) -> (i32, i32) {
    %c0_i32 = arith.constant 0 : i32
    %c0_i32_0 = arith.constant 0 : i32
    %c0_i32_1 = arith.constant 0 : i32
    return %c0_i32, %c0_i32_0 : i32, i32
  }
  func.func @transform_2(%arg0: i32) -> (i32, i32) {
    %c0_i32 = arith.constant 0 : i32
    %c0_i32_0 = arith.constant 0 : i32
    %c0_i32_1 = arith.constant 0 : i32
    return %c0_i32, %c0_i32_0 : i32, i32
  }
  func.func @transform_3(%arg0: i32) -> (i32, i32) {
    %c0_i32 = arith.constant 0 : i32
    %c0_i32_0 = arith.constant 0 : i32
    return %arg0, %c0_i32 : i32, i32
  }
}

</mosaic_0001>

<bundles_post_ra>
// kernel: _lambda_.37
= control target key start
LH: loop header
LB: loop body
LE: loop exit
PB: predicated region body
PF: predicated region fallthrough
CT: control target
= control target key end

     0   :  { %s3652_s12 = smov 0   ;;  %s4101_s0 = inlined_call_operand.vmem [shape: bf16[8192,147], index: 0, kind: input, shape index: {}]   ;;  %s4102_s1 = inlined_call_operand.vmem [shape: bf16[147,128], index: 1, kind: input, shape index: {}]   ;;  %s4103_s2 = inlined_call_operand.vmem [shape: f32[1,128], index: 2, kind: input, shape index: {}]   ;;  %s4104_s3 = inlined_call_operand.vmem [shape: bf16[8192,128], index: 3, kind: output, shape index: {}]  }
   0x1 LB: > { %s2534_s13 = sadd.s32 4294967295, %s3628_s12   ;;  %p2538_p0 = scmp.ge.s32.totalorder %s3628_s12, 1  ;;  %s3628_s12 = sphi %s3652_s12, %s13_s12  }
   0x2   : > { %p139_p1 = scmp.lt.s32.totalorder %s3628_s12, 9 }
   0x4   : > { %p140_p2 = pnand %p2538_p0, %p139_p1 }
   0x5   : > { %s2539_s20 = sshll.u32 (!%p140_p2), %s2534_s13, 7 }
   0x6   : > { %143 = sbr.rel (%p140_p2) target bundleno = 504 (0x1f8), region = 32  ;;  %p165_p3 = scmp.lt.s32.totalorder (!%p140_p2), %s2539_s20, 1023 }
   0xb   : > { %v3419_v0 = vld [vmem:[%s4102_s1 + $0x38] sm:$0xff]   ;;  %v3630_v1 = vmov 0   ;;  %v3420_v2 = vld [vmem:[%s4102_s1 + $0x30] sm:$0xff]   ;;  %v3421_v3 = vld [vmem:[%s4102_s1 + $0x28] sm:$0xff]   ;;  %s4106_s20 = smov (!%p165_p3, %s2539_s20), 1023  ;;  %vm965_vm0 = vcmask 154624  }
   0xc   : > { %1165 = vmatprep.subr.bf16.mxu0 %v3630_v1  ;;  %3389 = vmatprep.subr.bf16.mxu1 %v3630_v1  ;;  %v3422_v4 = vld [vmem:[%s4102_s1 + $0x20] sm:$0xff]   ;;  %s2877_s23 = sshll.u32 %s4106_s20, 3  ;;  %v3423_v5 = vld [vmem:[%s4102_s1 + $0x18] sm:$0xff]   ;;  %v3424_v8 = vld [vmem:[%s4102_s1 + $0x10] sm:$0xff]   ;;  %vm1158_vm1 = vcmask 1040384   ;;  %vm1159_vm2 = vcmask 1041408  }
   0xd   : > { %1166 = vmatpush1.bf16.msra.mxu0 %v3419_v0  ;;  %3399 = vmatpush1.bf16.msra.mxu1 %v3419_v0  ;;  %s3678_s26 = scalar_lea.vmem %s4101_s0, %s2877_s23  ;;  %v3425_v9 = vld [vmem:[%s4102_s1 + $0x8] sm:$0xff]   ;;  %v3631_v10 = vmov 65535   ;;  %v3426_v12 = vld [vmem:[%s4102_s1] sm:$0xff]   ;;  %s2543_s15 = sshll.u32 %s4106_s20, 2 }
   0xe   : > { %1167 = vmatprep.subr.bf16.mxu0 %v3630_v1  ;;  %3390 = vmatprep.subr.bf16.mxu1 %v3630_v1  ;;  %v3431_v6 = vld [vmem:[%s3678_s26 + $0x4] ss:$8 sps:$4 sm:$0xff]   ;;  %v1160_v11 = vsel %vm1158_vm1, 4294967295, %v3631_v10  ;;  %v3427_v13 = vld [vmem:[%s4102_s1 + $0x48] ss:$0 sps:$4 sm:$0x33]   ;;  %s3869_s18 = scalar_lea.vmem %s4104_s3, %s2543_s15 }
   0xf   : > { %v3434_v7 = vld [vmem:[%s3678_s26 + $0x204] ss:$8 sps:$4 sm:$0xff]   ;;  %2683 = vmatprep.mubr.msk.bf16.mxu0 %vm965_vm0, %v3431_v6  ;;  %v1161_v14 = vsel %vm1159_vm2, %v1160_v11, 0  ;;  %v3429_v17 = vld [vmem:[%s3678_s26] ss:$8 sps:$4 sm:$0xff]  }
  0x10   : > { %2715 = vmatprep.mubr.msk.bf16.mxu1 %vm965_vm0, %v3434_v7  ;;  %v1163_v15 = vand.u32 %v3427_v13, %v1161_v14  ;;  %v3428_v16 = vld [vmem:[%s4102_s1 + $0x40] sm:$0xff]   ;;  %v3435_v19 = vld [vmem:[%s3678_s26 + $0x14] ss:$8 sps:$4 sm:$0xff]   ;;  %v3439_v21 = vld [vmem:[%s3678_s26 + $0x10] ss:$8 sps:$4 sm:$0xff]  }
  0x11   : > { %1168 = vmatpush1.bf16.msra.mxu0 %v3420_v2  ;;  %3400 = vmatpush1.bf16.msra.mxu1 %v3420_v2  ;;  %v3432_v18 = vld [vmem:[%s3678_s26 + $0x200] ss:$8 sps:$4 sm:$0xff]   ;;  %v3437_v20 = vld [vmem:[%s3678_s26 + $0x214] ss:$8 sps:$4 sm:$0xff]   ;;  %v3440_v22 = vld [vmem:[%s3678_s26 + $0x210] ss:$8 sps:$4 sm:$0xff]  }
  0x12   : > { %1169 = vmatprep.subr.bf16.mxu0 %v3630_v1  ;;  %3391 = vmatprep.subr.bf16.mxu1 %v3630_v1  ;;  %v3441_v23 = vld [vmem:[%s3678_s26 + $0x24] ss:$8 sps:$4 sm:$0xff]   ;;  %v3445_v25 = vld [vmem:[%s3678_s26 + $0x20] ss:$8 sps:$4 sm:$0xff]   ;;  %v3447_v27 = vld [vmem:[%s3678_s26 + $0x34] ss:$8 sps:$4 sm:$0xff]  }
  0x13   : > { %v3443_v24 = vld [vmem:[%s3678_s26 + $0x224] ss:$8 sps:$4 sm:$0xff]   ;;  %v3446_v26 = vld [vmem:[%s3678_s26 + $0x220] ss:$8 sps:$4 sm:$0xff]   ;;  %v3449_v28 = vld [vmem:[%s3678_s26 + $0x234] ss:$8 sps:$4 sm:$0xff]  }
  0x14   : > { %v3451_v29 = vld [vmem:[%s3678_s26 + $0x30] ss:$8 sps:$4 sm:$0xff]   ;;  %v3453_v31 = vld [vmem:[%s3678_s26 + $0x44] ss:$8 sps:$4 sm:$0xff]   ;;  %v3457_v33 = vld [vmem:[%s3678_s26 + $0x40] ss:$8 sps:$4 sm:$0xff]  }
  0x15   : > { %1170 = vmatpush1.bf16.msra.mxu0 %v3421_v3  ;;  %3401 = vmatpush1.bf16.msra.mxu1 %v3421_v3  ;;  %v3452_v30 = vld [vmem:[%s3678_s26 + $0x230] ss:$8 sps:$4 sm:$0xff]   ;;  %v3455_v32 = vld [vmem:[%s3678_s26 + $0x244] ss:$8 sps:$4 sm:$0xff]   ;;  %v3458_v34 = vld [vmem:[%s3678_s26 + $0x240] ss:$8 sps:$4 sm:$0xff]  }
  0x16   : > { %1171 = vmatprep.subr.bf16.mxu0 %v3630_v1  ;;  %3392 = vmatprep.subr.bf16.mxu1 %v3630_v1  ;;  %v3459_v35 = vld [vmem:[%s3678_s26 + $0x54] ss:$8 sps:$4 sm:$0xff]   ;;  %v3463_v37 = vld [vmem:[%s3678_s26 + $0x50] ss:$8 sps:$4 sm:$0xff]   ;;  %v3465_v39 = vld [vmem:[%s3678_s26 + $0x64] ss:$8 sps:$4 sm:$0xff]  }
  0x17   : > { %v3461_v36 = vld [vmem:[%s3678_s26 + $0x254] ss:$8 sps:$4 sm:$0xff]   ;;  %v3464_v38 = vld [vmem:[%s3678_s26 + $0x250] ss:$8 sps:$4 sm:$0xff]   ;;  %v3467_v40 = vld [vmem:[%s3678_s26 + $0x264] ss:$8 sps:$4 sm:$0xff]  }
  0x18   : > { %v3469_v41 = vld [vmem:[%s3678_s26 + $0x60] ss:$8 sps:$4 sm:$0xff]   ;;  %v3471_v43 = vld [vmem:[%s3678_s26 + $0x74] ss:$8 sps:$4 sm:$0xff]   ;;  %v3475_v45 = vld [vmem:[%s3678_s26 + $0x70] ss:$8 sps:$4 sm:$0xff]  }
  0x19   : > { %1172 = vmatpush1.bf16.msra.mxu0 %v3422_v4  ;;  %3402 = vmatpush1.bf16.msra.mxu1 %v3422_v4  ;;  %v3470_v42 = vld [vmem:[%s3678_s26 + $0x260] ss:$8 sps:$4 sm:$0xff]   ;;  %v3473_v44 = vld [vmem:[%s3678_s26 + $0x274] ss:$8 sps:$4 sm:$0xff]   ;;  %v3476_v46 = vld [vmem:[%s3678_s26 + $0x270] ss:$8 sps:$4 sm:$0xff]  }
  0x1a   : > { %1173 = vmatprep.subr.bf16.mxu0 %v3630_v1  ;;  %3393 = vmatprep.subr.bf16.mxu1 %v3630_v1  ;;  %v3477_v47 = vld [vmem:[%s3678_s26 + $0x84] ss:$8 sps:$4 sm:$0xff]   ;;  %v3481_v49 = vld [vmem:[%s3678_s26 + $0x80] ss:$8 sps:$4 sm:$0xff]   ;;  %v3483_v51 = vld [vmem:[%s3678_s26 + $0x94] ss:$8 sps:$4 sm:$0xff]  }
  0x1b   : > { %v3479_v48 = vld [vmem:[%s3678_s26 + $0x284] ss:$8 sps:$4 sm:$0xff]   ;;  %v3482_v50 = vld [vmem:[%s3678_s26 + $0x280] ss:$8 sps:$4 sm:$0xff]   ;;  %v3485_v52 = vld [vmem:[%s3678_s26 + $0x294] ss:$8 sps:$4 sm:$0xff]  }
  0x1c   : > { %v3487_v53 = vld [vmem:[%s3678_s26 + $0x90] ss:$8 sps:$4 sm:$0xff]   ;;  %v3489_v55 = vld [vmem:[%s3678_s26 + $0xa4] ss:$8 sps:$4 sm:$0xff]   ;;  %v3493_v57 = vld [vmem:[%s3678_s26 + $0xa0] ss:$8 sps:$4 sm:$0xff]  }
  0x1d   : > { %1174 = vmatpush1.bf16.msra.mxu0 %v3423_v5  ;;  %3403 = vmatpush1.bf16.msra.mxu1 %v3423_v5  ;;  %v3488_v54 = vld [vmem:[%s3678_s26 + $0x290] ss:$8 sps:$4 sm:$0xff]   ;;  %v3491_v56 = vld [vmem:[%s3678_s26 + $0x2a4] ss:$8 sps:$4 sm:$0xff]   ;;  %v3494_v58 = vld [vmem:[%s3678_s26 + $0x2a0] ss:$8 sps:$4 sm:$0xff]  }
  0x1e   : > { %1175 = vmatprep.subr.bf16.mxu0 %v3630_v1  ;;  %3394 = vmatprep.subr.bf16.mxu1 %v3630_v1  ;;  %v3495_v59 = vld [vmem:[%s3678_s26 + $0xb4] ss:$8 sps:$4 sm:$0xff]   ;;  %v3499_v61 = vld [vmem:[%s3678_s26 + $0xb0] ss:$8 sps:$4 sm:$0xff]   ;;  %v3501_v63 = vld [vmem:[%s3678_s26 + $0xc4] ss:$8 sps:$4 sm:$0xff]  }
  0x1f   : > { %v3497_v60 = vld [vmem:[%s3678_s26 + $0x2b4] ss:$8 sps:$4 sm:$0xff]   ;;  %v3500_v62 = vld [vmem:[%s3678_s26 + $0x2b0] ss:$8 sps:$4 sm:$0xff]   ;;  %v3503_v0 = vld [vmem:[%s3678_s26 + $0x2c4] ss:$8 sps:$4 sm:$0xff]  }
  0x20   : > { %v3506_v2 = vld [vmem:[%s3678_s26 + $0x2c0] ss:$8 sps:$4 sm:$0xff]   ;;  %v3507_v3 = vld [vmem:[%s3678_s26 + $0xd4] ss:$8 sps:$4 sm:$0xff]   ;;  %v3511_v5 = vld [vmem:[%s3678_s26 + $0xd0] ss:$8 sps:$4 sm:$0xff]  }
  0x21   : > { %1176 = vmatpush1.bf16.msra.mxu0 %v3424_v8  ;;  %3404 = vmatpush1.bf16.msra.mxu1 %v3424_v8  ;;  %v3509_v4 = vld [vmem:[%s3678_s26 + $0x2d4] ss:$8 sps:$4 sm:$0xff]   ;;  %v3512_v6 = vld [vmem:[%s3678_s26 + $0x2d0] ss:$8 sps:$4 sm:$0xff]   ;;  %v3513_v7 = vld [vmem:[%s3678_s26 + $0xe4] ss:$8 sps:$4 sm:$0xff]  }
  0x22   : > { %1177 = vmatprep.subr.bf16.mxu0 %v3630_v1  ;;  %3395 = vmatprep.subr.bf16.mxu1 %v3630_v1  ;;  %v3515_v8 = vld [vmem:[%s3678_s26 + $0x2e4] ss:$8 sps:$4 sm:$0xff]   ;;  %v3518_v10 = vld [vmem:[%s3678_s26 + $0x2e0] ss:$8 sps:$4 sm:$0xff]   ;;  %v3519_v11 = vld [vmem:[%s3678_s26 + $0xf4] ss:$8 sps:$4 sm:$0xff]  }
  0x23   : > { %v3523_v13 = vld [vmem:[%s3678_s26 + $0xf0] ss:$8 sps:$4 sm:$0xff]  }
  0x24   : > { %v3524_v14 = vld [vmem:[%s3678_s26 + $0x2f0] ss:$8 sps:$4 sm:$0xff]  }
  0x25   : > { %1178 = vmatpush1.bf16.msra.mxu0 %v3425_v9  ;;  %3405 = vmatpush1.bf16.msra.mxu1 %v3425_v9  ;;  %v3517_v9 = vld [vmem:[%s3678_s26 + $0xe0] ss:$8 sps:$4 sm:$0xff]  }
  0x26   : > { %1179 = vmatprep.subr.bf16.mxu0 %v3630_v1  ;;  %3396 = vmatprep.subr.bf16.mxu1 %v3630_v1 }
  0x29   : > { %1180 = vmatpush1.bf16.msra.mxu0 %v3426_v12  ;;  %3406 = vmatpush1.bf16.msra.mxu1 %v3426_v12  ;;  %v3521_v12 = vld [vmem:[%s3678_s26 + $0x2f4] ss:$8 sps:$4 sm:$0xff]  }
  0x2a   : > { %1193 = vmatprep.subr.bf16.mxu0 %v3630_v1  ;;  %3397 = vmatprep.subr.bf16.mxu1 %v3630_v1 }
  0x2d   : > { %1194 = vmatpush2.bf16.msra.mxu0 %v1163_v15  ;;  %3407 = vmatpush2.bf16.msra.mxu1 %v1163_v15  ;;  %v3525_v15 = vld [vmem:[%s3678_s26 + $0x104] ss:$8 sps:$4 sm:$0xff]  }
  0x2e   : > { %1195 = vmatprep.subr.bf16.mxu0 %v3630_v1  ;;  %3398 = vmatprep.subr.bf16.mxu1 %v3630_v1  ;;  %v3505_v1 = vld [vmem:[%s3678_s26 + $0xc0] ss:$8 sps:$4 sm:$0xff]  }
  0x31   : > { %1196 = vmatpush2.bf16.msra.mxu0 %v3428_v16  ;;  %3408 = vmatpush2.bf16.msra.mxu1 %v3428_v16  ;;  %v3527_v16 = vld [vmem:[%s3678_s26 + $0x304] ss:$8 sps:$4 sm:$0xff]  }
  0x34   : > { %1198 = vmatmul.mubr.bf16.vlgmr.msra.gmra.mxu0 %v3429_v17  ;;  %1454 = vmatmul.mubr.bf16.vlgmr.msra.gmra.mxu1 %v3432_v18  ;;  %v3529_v17 = vld [vmem:[%s3678_s26 + $0x100] ss:$8 sps:$4 sm:$0xff]  }
  0x35   : > { %2684 = vmatprep.mubr.msk.bf16.mxu0 %vm965_vm0, %v3435_v19  ;;  %2716 = vmatprep.mubr.msk.bf16.mxu1 %vm965_vm0, %v3437_v20  ;;  %v3530_v18 = vld [vmem:[%s3678_s26 + $0x300] ss:$8 sps:$4 sm:$0xff]   ;;  %v3531_v19 = vld [vmem:[%s3678_s26 + $0x114] ss:$8 sps:$4 sm:$0xff]  }
  0x36   : > { %v3533_v20 = vld [vmem:[%s3678_s26 + $0x314] ss:$8 sps:$4 sm:$0xff]  }
  0x3c   : > { %1206 = vmatmul.mubr.bf16.gmra.mxu0 %v3439_v21  ;;  %1462 = vmatmul.mubr.bf16.gmra.mxu1 %v3440_v22  ;;  %v3535_v21 = vld [vmem:[%s3678_s26 + $0x110] ss:$8 sps:$4 sm:$0xff]  }
  0x3d   : > { %2685 = vmatprep.mubr.msk.bf16.mxu0 %vm965_vm0, %v3441_v23  ;;  %2717 = vmatprep.mubr.msk.bf16.mxu1 %vm965_vm0, %v3443_v24  ;;  %v3536_v22 = vld [vmem:[%s3678_s26 + $0x310] ss:$8 sps:$4 sm:$0xff]   ;;  %v3537_v23 = vld [vmem:[%s3678_s26 + $0x124] ss:$8 sps:$4 sm:$0xff]  }
  0x3e   : > { %v3539_v24 = vld [vmem:[%s3678_s26 + $0x324] ss:$8 sps:$4 sm:$0xff]  }
  0x44   : > { %1214 = vmatmul.mubr.bf16.gmra.mxu0 %v3445_v25  ;;  %1470 = vmatmul.mubr.bf16.gmra.mxu1 %v3446_v26  ;;  %v3541_v25 = vld [vmem:[%s3678_s26 + $0x120] ss:$8 sps:$4 sm:$0xff]  }
  0x45   : > { %2686 = vmatprep.mubr.msk.bf16.mxu0 %vm965_vm0, %v3447_v27  ;;  %2718 = vmatprep.mubr.msk.bf16.mxu1 %vm965_vm0, %v3449_v28  ;;  %v3542_v26 = vld [vmem:[%s3678_s26 + $0x320] ss:$8 sps:$4 sm:$0xff]   ;;  %v3543_v27 = vld [vmem:[%s3678_s26 + $0x134] ss:$8 sps:$4 sm:$0xff]  }
  0x46   : > { %v3545_v28 = vld [vmem:[%s3678_s26 + $0x334] ss:$8 sps:$4 sm:$0xff]  }
  0x4c   : > { %1222 = vmatmul.mubr.bf16.gmra.mxu0 %v3451_v29  ;;  %1478 = vmatmul.mubr.bf16.gmra.mxu1 %v3452_v30  ;;  %v3547_v29 = vld [vmem:[%s3678_s26 + $0x130] ss:$8 sps:$4 sm:$0xff]  }
  0x4d   : > { %2687 = vmatprep.mubr.msk.bf16.mxu0 %vm965_vm0, %v3453_v31  ;;  %2719 = vmatprep.mubr.msk.bf16.mxu1 %vm965_vm0, %v3455_v32  ;;  %v3548_v30 = vld [vmem:[%s3678_s26 + $0x330] ss:$8 sps:$4 sm:$0xff]   ;;  %v3549_v31 = vld [vmem:[%s3678_s26 + $0x144] ss:$8 sps:$4 sm:$0xff]  }
  0x4e   : > { %v3551_v32 = vld [vmem:[%s3678_s26 + $0x344] ss:$8 sps:$4 sm:$0xff]  }
  0x54   : > { %1230 = vmatmul.mubr.bf16.gmra.mxu0 %v3457_v33  ;;  %1486 = vmatmul.mubr.bf16.gmra.mxu1 %v3458_v34  ;;  %v3553_v33 = vld [vmem:[%s3678_s26 + $0x140] ss:$8 sps:$4 sm:$0xff]  }
  0x55   : > { %2688 = vmatprep.mubr.msk.bf16.mxu0 %vm965_vm0, %v3459_v35  ;;  %2720 = vmatprep.mubr.msk.bf16.mxu1 %vm965_vm0, %v3461_v36  ;;  %v3554_v34 = vld [vmem:[%s3678_s26 + $0x340] ss:$8 sps:$4 sm:$0xff]   ;;  %v3555_v35 = vld [vmem:[%s3678_s26 + $0x154] ss:$8 sps:$4 sm:$0xff]  }
  0x56   : > { %v3557_v36 = vld [vmem:[%s3678_s26 + $0x354] ss:$8 sps:$4 sm:$0xff]  }
  0x5c   : > { %1238 = vmatmul.mubr.bf16.gmra.mxu0 %v3463_v37  ;;  %1494 = vmatmul.mubr.bf16.gmra.mxu1 %v3464_v38  ;;  %v3559_v37 = vld [vmem:[%s3678_s26 + $0x150] ss:$8 sps:$4 sm:$0xff]  }
  0x5d   : > { %2689 = vmatprep.mubr.msk.bf16.mxu0 %vm965_vm0, %v3465_v39  ;;  %2721 = vmatprep.mubr.msk.bf16.mxu1 %vm965_vm0, %v3467_v40  ;;  %v3560_v38 = vld [vmem:[%s3678_s26 + $0x350] ss:$8 sps:$4 sm:$0xff]   ;;  %v3561_v39 = vld [vmem:[%s3678_s26 + $0x164] ss:$8 sps:$4 sm:$0xff]  }
  0x5e   : > { %v3563_v40 = vld [vmem:[%s3678_s26 + $0x364] ss:$8 sps:$4 sm:$0xff]  }
  0x64   : > { %1246 = vmatmul.mubr.bf16.gmra.mxu0 %v3469_v41  ;;  %1502 = vmatmul.mubr.bf16.gmra.mxu1 %v3470_v42  ;;  %v3565_v41 = vld [vmem:[%s3678_s26 + $0x160] ss:$8 sps:$4 sm:$0xff]  }
  0x65   : > { %2690 = vmatprep.mubr.msk.bf16.mxu0 %vm965_vm0, %v3471_v43  ;;  %2722 = vmatprep.mubr.msk.bf16.mxu1 %vm965_vm0, %v3473_v44  ;;  %v3566_v42 = vld [vmem:[%s3678_s26 + $0x360] ss:$8 sps:$4 sm:$0xff]   ;;  %v3567_v43 = vld [vmem:[%s3678_s26 + $0x174] ss:$8 sps:$4 sm:$0xff]  }
  0x66   : > { %v3569_v44 = vld [vmem:[%s3678_s26 + $0x374] ss:$8 sps:$4 sm:$0xff]  }
  0x6c   : > { %1254 = vmatmul.mubr.bf16.gmra.mxu0 %v3475_v45  ;;  %1510 = vmatmul.mubr.bf16.gmra.mxu1 %v3476_v46  ;;  %v3571_v45 = vld [vmem:[%s3678_s26 + $0x170] ss:$8 sps:$4 sm:$0xff]  }
  0x6d   : > { %2691 = vmatprep.mubr.msk.bf16.mxu0 %vm965_vm0, %v3477_v47  ;;  %2723 = vmatprep.mubr.msk.bf16.mxu1 %vm965_vm0, %v3479_v48  ;;  %v3572_v46 = vld [vmem:[%s3678_s26 + $0x370] ss:$8 sps:$4 sm:$0xff]   ;;  %v3573_v47 = vld [vmem:[%s3678_s26 + $0x184] ss:$8 sps:$4 sm:$0xff]  }
  0x6e   : > { %v3575_v48 = vld [vmem:[%s3678_s26 + $0x384] ss:$8 sps:$4 sm:$0xff]  }
  0x74   : > { %1262 = vmatmul.mubr.bf16.gmra.mxu0 %v3481_v49  ;;  %1518 = vmatmul.mubr.bf16.gmra.mxu1 %v3482_v50  ;;  %v3577_v49 = vld [vmem:[%s3678_s26 + $0x180] ss:$8 sps:$4 sm:$0xff]  }
  0x75   : > { %2692 = vmatprep.mubr.msk.bf16.mxu0 %vm965_vm0, %v3483_v51  ;;  %2724 = vmatprep.mubr.msk.bf16.mxu1 %vm965_vm0, %v3485_v52  ;;  %v3578_v50 = vld [vmem:[%s3678_s26 + $0x380] ss:$8 sps:$4 sm:$0xff]   ;;  %v3579_v51 = vld [vmem:[%s3678_s26 + $0x194] ss:$8 sps:$4 sm:$0xff]  }
  0x76   : > { %v3581_v52 = vld [vmem:[%s3678_s26 + $0x394] ss:$8 sps:$4 sm:$0xff]  }
  0x7c   : > { %1270 = vmatmul.mubr.bf16.gmra.mxu0 %v3487_v53  ;;  %1526 = vmatmul.mubr.bf16.gmra.mxu1 %v3488_v54  ;;  %v3853_v53 = vld [vmem:[%s4103_s2] ss:$0 sm:$0xff] }
  0x7d   : > { %2693 = vmatprep.mubr.msk.bf16.mxu0 %vm965_vm0, %v3489_v55  ;;  %2725 = vmatprep.mubr.msk.bf16.mxu1 %vm965_vm0, %v3491_v56 }
  0x84   : > { %1278 = vmatmul.mubr.bf16.gmra.mxu0 %v3493_v57  ;;  %1534 = vmatmul.mubr.bf16.gmra.mxu1 %v3494_v58 }
  0x85   : > { %2694 = vmatprep.mubr.msk.bf16.mxu0 %vm965_vm0, %v3495_v59  ;;  %2726 = vmatprep.mubr.msk.bf16.mxu1 %vm965_vm0, %v3497_v60 }
  0x8c   : > { %1286 = vmatmul.mubr.bf16.gmra.mxu0 %v3499_v61  ;;  %1542 = vmatmul.mubr.bf16.gmra.mxu1 %v3500_v62  ;;  %v3583_v62 = vld [vmem:[%s3678_s26 + $0x190] ss:$8 sps:$4 sm:$0xff]  }
  0x8d   : > { %2695 = vmatprep.mubr.msk.bf16.mxu0 %vm965_vm0, %v3501_v63  ;;  %2727 = vmatprep.mubr.msk.bf16.mxu1 %vm965_vm0, %v3503_v0  ;;  %v3584_v63 = vld [vmem:[%s3678_s26 + $0x390] ss:$8 sps:$4 sm:$0xff]  }
  0x94   : > { %1294 = vmatmul.mubr.bf16.gmra.mxu0 %v3505_v1  ;;  %1550 = vmatmul.mubr.bf16.gmra.mxu1 %v3506_v2  ;;  %v3585_v2 = vld [vmem:[%s3678_s26 + $0x1a4] ss:$8 sps:$4 sm:$0xff]  }
  0x95   : > { %2696 = vmatprep.mubr.msk.bf16.mxu0 %vm965_vm0, %v3507_v3  ;;  %2728 = vmatprep.mubr.msk.bf16.mxu1 %vm965_vm0, %v3509_v4 }
  0x9c   : > { %1302 = vmatmul.mubr.bf16.gmra.mxu0 %v3511_v5  ;;  %1558 = vmatmul.mubr.bf16.gmra.mxu1 %v3512_v6  ;;  %v3587_v5 = vld [vmem:[%s3678_s26 + $0x3a4] ss:$8 sps:$4 sm:$0xff]  }
  0x9d   : > { %2697 = vmatprep.mubr.msk.bf16.mxu0 %vm965_vm0, %v3513_v7  ;;  %2729 = vmatprep.mubr.msk.bf16.mxu1 %vm965_vm0, %v3515_v8 }
  0xa4   : > { %1310 = vmatmul.mubr.bf16.gmra.mxu0 %v3517_v9  ;;  %1566 = vmatmul.mubr.bf16.gmra.mxu1 %v3518_v10 }
  0xa5   : > { %2698 = vmatprep.mubr.msk.bf16.mxu0 %vm965_vm0, %v3519_v11  ;;  %2730 = vmatprep.mubr.msk.bf16.mxu1 %vm965_vm0, %v3521_v12 }
  0xac   : > { %1318 = vmatmul.mubr.bf16.gmra.mxu0 %v3523_v13  ;;  %1574 = vmatmul.mubr.bf16.gmra.mxu1 %v3524_v14 }
  0xad   : > { %2699 = vmatprep.mubr.msk.bf16.mxu0 %vm965_vm0, %v3525_v15  ;;  %2731 = vmatprep.mubr.msk.bf16.mxu1 %vm965_vm0, %v3527_v16 }
  0xb4   : > { %1326 = vmatmul.mubr.bf16.gmra.mxu0 %v3529_v17  ;;  %1582 = vmatmul.mubr.bf16.gmra.mxu1 %v3530_v18 }
  0xb5   : > { %2700 = vmatprep.mubr.msk.bf16.mxu0 %vm965_vm0, %v3531_v19  ;;  %2732 = vmatprep.mubr.msk.bf16.mxu1 %vm965_vm0, %v3533_v20  ;;  %v3589_v20 = vld [vmem:[%s3678_s26 + $0x1a0] ss:$8 sps:$4 sm:$0xff]  }
  0xbc   : > { %1334 = vmatmul.mubr.bf16.gmra.mxu0 %v3535_v21  ;;  %1590 = vmatmul.mubr.bf16.gmra.mxu1 %v3536_v22  ;;  %v3590_v21 = vld [vmem:[%s3678_s26 + $0x3a0] ss:$8 sps:$4 sm:$0xff]  }
  0xbd   : > { %2701 = vmatprep.mubr.msk.bf16.mxu0 %vm965_vm0, %v3537_v23  ;;  %2733 = vmatprep.mubr.msk.bf16.mxu1 %vm965_vm0, %v3539_v24  ;;  %v3591_v24 = vld [vmem:[%s3678_s26 + $0x1b4] ss:$8 sps:$4 sm:$0xff]  }
  0xc4   : > { %1342 = vmatmul.mubr.bf16.gmra.mxu0 %v3541_v25  ;;  %1598 = vmatmul.mubr.bf16.gmra.mxu1 %v3542_v26 }
  0xc5   : > { %2702 = vmatprep.mubr.msk.bf16.mxu0 %vm965_vm0, %v3543_v27  ;;  %2734 = vmatprep.mubr.msk.bf16.mxu1 %vm965_vm0, %v3545_v28  ;;  %v3593_v27 = vld [vmem:[%s3678_s26 + $0x3b4] ss:$8 sps:$4 sm:$0xff]  }
  0xcc   : > { %1350 = vmatmul.mubr.bf16.gmra.mxu0 %v3547_v29  ;;  %1606 = vmatmul.mubr.bf16.gmra.mxu1 %v3548_v30 }
  0xcd   : > { %2703 = vmatprep.mubr.msk.bf16.mxu0 %vm965_vm0, %v3549_v31  ;;  %2735 = vmatprep.mubr.msk.bf16.mxu1 %vm965_vm0, %v3551_v32 }
  0xd4   : > { %1358 = vmatmul.mubr.bf16.gmra.mxu0 %v3553_v33  ;;  %1614 = vmatmul.mubr.bf16.gmra.mxu1 %v3554_v34 }
  0xd5   : > { %2704 = vmatprep.mubr.msk.bf16.mxu0 %vm965_vm0, %v3555_v35  ;;  %2736 = vmatprep.mubr.msk.bf16.mxu1 %vm965_vm0, %v3557_v36 }
  0xdc   : > { %1366 = vmatmul.mubr.bf16.gmra.mxu0 %v3559_v37  ;;  %1622 = vmatmul.mubr.bf16.gmra.mxu1 %v3560_v38 }
  0xdd   : > { %2705 = vmatprep.mubr.msk.bf16.mxu0 %vm965_vm0, %v3561_v39  ;;  %2737 = vmatprep.mubr.msk.bf16.mxu1 %vm965_vm0, %v3563_v40 }
  0xe4   : > { %1374 = vmatmul.mubr.bf16.gmra.mxu0 %v3565_v41  ;;  %1630 = vmatmul.mubr.bf16.gmra.mxu1 %v3566_v42  ;;  %v3595_v42 = vld [vmem:[%s3678_s26 + $0x1b0] ss:$8 sps:$4 sm:$0xff]  }
  0xe5   : > { %2706 = vmatprep.mubr.msk.bf16.mxu0 %vm965_vm0, %v3567_v43  ;;  %2738 = vmatprep.mubr.msk.bf16.mxu1 %vm965_vm0, %v3569_v44  ;;  %v3596_v43 = vld [vmem:[%s3678_s26 + $0x3b0] ss:$8 sps:$4 sm:$0xff]  }
  0xec   : > { %1382 = vmatmul.mubr.bf16.gmra.mxu0 %v3571_v45  ;;  %1638 = vmatmul.mubr.bf16.gmra.mxu1 %v3572_v46  ;;  %v3597_v46 = vld [vmem:[%s3678_s26 + $0x1c4] ss:$8 sps:$4 sm:$0xff]  }
  0xed   : > { %2707 = vmatprep.mubr.msk.bf16.mxu0 %vm965_vm0, %v3573_v47  ;;  %2739 = vmatprep.mubr.msk.bf16.mxu1 %vm965_vm0, %v3575_v48 }
  0xf4   : > { %v1199_v54 = vpop.f32.mrf.mxu0  ;;  %1390 = vmatmul.mubr.bf16.gmra.mxu0 %v3577_v49  ;;  %v1455_v55 = vpop.f32.mrf.mxu1  ;;  %1646 = vmatmul.mubr.bf16.gmra.mxu1 %v3578_v50  ;;  %v3599_v49 = vld [vmem:[%s3678_s26 + $0x3c4] ss:$8 sps:$4 sm:$0xff]  }
  0xf5   : > { %2708 = vmatprep.mubr.msk.bf16.mxu0 %vm965_vm0, %v3579_v51  ;;  %2740 = vmatprep.mubr.msk.bf16.mxu1 %vm965_vm0, %v3581_v52  ;;  %v1200_v58 = vadd.f32 %v3853_v53, %v1199_v54  ;;  %v1456_v59 = vadd.f32 %v3853_v53, %v1455_v55 }
  0xf6   : > { %v1201_v56 = vpop.f32.mrf.mxu0  ;;  %v1457_v57 = vpop.f32.mrf.mxu1 }
  0xf7   : > { %v1710_v6 = vmax.f32 %v1200_v58, 0.0  ;;  %v1774_v7 = vmax.f32 %v1456_v59, 0.0 }
  0xf8   : > { %v1202_v60 = vpop.f32.mrf.mxu0  ;;  %v1458_v61 = vpop.f32.mrf.mxu1 }
  0xf9   : > { %v1203_v0 = vadd.f32 %v3853_v53, %v1202_v60  ;;  %v1459_v1 = vadd.f32 %v3853_v53, %v1458_v61 }
  0xfa   : > { %v1204_v3 = vpop.f32.mrf.mxu0  ;;  %v1460_v4 = vpop.f32.mrf.mxu1 }
  0xfb   : > { %v1711_v8 = vmax.f32 %v1203_v0, 0.0  ;;  %v1775_v9 = vmax.f32 %v1459_v1, 0.0  ;;  %v3601_v1 = vld [vmem:[%s3678_s26 + $0x1c0] ss:$8 sps:$4 sm:$0xff]  }
  0xfc   : > { %v1207_v10 = vpop.f32.mrf.mxu0  ;;  %1398 = vmatmul.mubr.bf16.gmra.mxu0 %v3583_v62  ;;  %v1463_v11 = vpop.f32.mrf.mxu1  ;;  %1654 = vmatmul.mubr.bf16.gmra.mxu1 %v3584_v63 }
  0xfd   : > { %v3009_v12 = vpack.c.bf16 %v1711_v8, %v1710_v6  ;;  %v3169_v13 = vpack.c.bf16 %v1775_v9, %v1774_v7  ;;  %2709 = vmatprep.mubr.msk.bf16.mxu0 %vm965_vm0, %v3585_v2  ;;  %2741 = vmatprep.mubr.msk.bf16.mxu1 %vm965_vm0, %v3587_v5  ;;  %v1208_v16 = vadd.f32 %v3853_v53, %v1207_v10  ;;  %v3602_v2 = vld [vmem:[%s3678_s26 + $0x3c0] ss:$8 sps:$4 sm:$0xff]   ;;  %v3603_v5 = vld [vmem:[%s3678_s26 + $0x1d4] ss:$8 sps:$4 sm:$0xff]  }
  0xfe   : > { %v1209_v14 = vpop.f32.mrf.mxu0  ;;  %v1465_v15 = vpop.f32.mrf.mxu1  ;;  %v1464_v17 = vadd.f32 %v3853_v53, %v1463_v11  ;;  %v3605_v8 = vld [vmem:[%s3678_s26 + $0x3d4] ss:$8 sps:$4 sm:$0xff]  }
  0xff   : > { %3010 = vst [vmem:[%s3869_s18] sm:$0xff] %v3009_v12   ;;  %3357 = vst [vmem:[%s3869_s18 + $0x100] sm:$0xff] %v3169_v13   ;;  %v1712_v28 = vmax.f32 %v1208_v16, 0.0 }
 0x100   : > { %v1210_v18 = vpop.f32.mrf.mxu0  ;;  %v1466_v19 = vpop.f32.mrf.mxu1  ;;  %v1776_v29 = vmax.f32 %v1464_v17, 0.0 }
 0x101   : > { %v1211_v22 = vadd.f32 %v3853_v53, %v1210_v18  ;;  %v1467_v23 = vadd.f32 %v3853_v53, %v1466_v19 }
 0x102   : > { %v1212_v25 = vpop.f32.mrf.mxu0  ;;  %v1468_v26 = vpop.f32.mrf.mxu1 }
 0x103   : > { %v1713_v30 = vmax.f32 %v1211_v22, 0.0  ;;  %v1777_v31 = vmax.f32 %v1467_v23, 0.0  ;;  %v3607_v23 = vld [vmem:[%s3678_s26 + $0x1d0] ss:$8 sps:$4 sm:$0xff]  }
 0x104   : > { %v1215_v32 = vpop.f32.mrf.mxu0  ;;  %1406 = vmatmul.mubr.bf16.gmra.mxu0 %v3589_v20  ;;  %v1471_v33 = vpop.f32.mrf.mxu1  ;;  %1662 = vmatmul.mubr.bf16.gmra.mxu1 %v3590_v21 }
 0x105   : > { %v3014_v34 = vpack.c.bf16 %v1713_v30, %v1712_v28  ;;  %v3174_v35 = vpack.c.bf16 %v1777_v31, %v1776_v29  ;;  %2710 = vmatprep.mubr.msk.bf16.mxu0 %vm965_vm0, %v3591_v24  ;;  %2742 = vmatprep.mubr.msk.bf16.mxu1 %vm965_vm0, %v3593_v27  ;;  %v1216_v38 = vadd.f32 %v3853_v53, %v1215_v32  ;;  %v3608_v24 = vld [vmem:[%s3678_s26 + $0x3d0] ss:$8 sps:$4 sm:$0xff]   ;;  %v3609_v27 = vld [vmem:[%s3678_s26 + $0x1e4] ss:$8 sps:$4 sm:$0xff]  }
 0x106   : > { %v1217_v36 = vpop.f32.mrf.mxu0  ;;  %v1473_v37 = vpop.f32.mrf.mxu1  ;;  %v1472_v39 = vadd.f32 %v3853_v53, %v1471_v33  ;;  %v3611_v30 = vld [vmem:[%s3678_s26 + $0x3e4] ss:$8 sps:$4 sm:$0xff]  }
 0x107   : > { %3326 = vst [vmem:[%s3869_s18 + $0x8] sm:$0xff] %v3014_v34   ;;  %3358 = vst [vmem:[%s3869_s18 + $0x108] sm:$0xff] %v3174_v35   ;;  %v1714_v50 = vmax.f32 %v1216_v38, 0.0 }
 0x108   : > { %v1218_v40 = vpop.f32.mrf.mxu0  ;;  %v1474_v41 = vpop.f32.mrf.mxu1  ;;  %v1778_v51 = vmax.f32 %v1472_v39, 0.0 }
 0x109   : > { %v1219_v44 = vadd.f32 %v3853_v53, %v1218_v40  ;;  %v1475_v45 = vadd.f32 %v3853_v53, %v1474_v41 }
 0x10a   : > { %v1220_v47 = vpop.f32.mrf.mxu0  ;;  %v1476_v48 = vpop.f32.mrf.mxu1 }
 0x10b   : > { %v1715_v52 = vmax.f32 %v1219_v44, 0.0  ;;  %v1779_v54 = vmax.f32 %v1475_v45, 0.0  ;;  %v3613_v45 = vld [vmem:[%s3678_s26 + $0x1e0] ss:$8 sps:$4 sm:$0xff]  }
 0x10c   : > { %v1223_v55 = vpop.f32.mrf.mxu0  ;;  %1414 = vmatmul.mubr.bf16.gmra.mxu0 %v3595_v42  ;;  %v1479_v56 = vpop.f32.mrf.mxu1  ;;  %1670 = vmatmul.mubr.bf16.gmra.mxu1 %v3596_v43 }
 0x10d   : > { %v3019_v57 = vpack.c.bf16 %v1715_v52, %v1714_v50  ;;  %v3179_v58 = vpack.c.bf16 %v1779_v54, %v1778_v51  ;;  %2711 = vmatprep.mubr.msk.bf16.mxu0 %vm965_vm0, %v3597_v46  ;;  %2743 = vmatprep.mubr.msk.bf16.mxu1 %vm965_vm0, %v3599_v49  ;;  %v1224_v61 = vadd.f32 %v3853_v53, %v1223_v55  ;;  %v3614_v46 = vld [vmem:[%s3678_s26 + $0x3e0] ss:$8 sps:$4 sm:$0xff]   ;;  %v3615_v49 = vld [vmem:[%s3678_s26 + $0x1f4] ss:$8 sps:$4 sm:$0xff]  }
 0x10e   : > { %v1225_v59 = vpop.f32.mrf.mxu0  ;;  %v1481_v60 = vpop.f32.mrf.mxu1  ;;  %v1480_v62 = vadd.f32 %v3853_v53, %v1479_v56  ;;  %v3617_v52 = vld [vmem:[%s3678_s26 + $0x3f4] ss:$8 sps:$4 sm:$0xff]  }
 0x10f   : > { %3327 = vst [vmem:[%s3869_s18 + $0x10] sm:$0xff] %v3019_v57   ;;  %3359 = vst [vmem:[%s3869_s18 + $0x110] sm:$0xff] %v3179_v58   ;;  %v1716_v9 = vmax.f32 %v1224_v61, 0.0 }
 0x110   : > { %v1226_v63 = vpop.f32.mrf.mxu0  ;;  %v1482_v0 = vpop.f32.mrf.mxu1  ;;  %v1780_v10 = vmax.f32 %v1480_v62, 0.0 }
 0x111   : > { %v1227_v3 = vadd.f32 %v3853_v53, %v1226_v63  ;;  %v1483_v4 = vadd.f32 %v3853_v53, %v1482_v0 }
 0x112   : > { %v1228_v6 = vpop.f32.mrf.mxu0  ;;  %v1484_v7 = vpop.f32.mrf.mxu1 }
 0x113   : > { %v1717_v11 = vmax.f32 %v1227_v3, 0.0  ;;  %v1781_v12 = vmax.f32 %v1483_v4, 0.0  ;;  %v3619_v4 = vld [vmem:[%s3678_s26 + $0x1f0] ss:$8 sps:$4 sm:$0xff]  }
 0x114   : > { %v1231_v13 = vpop.f32.mrf.mxu0  ;;  %1422 = vmatmul.mubr.bf16.gmra.mxu0 %v3601_v1  ;;  %v1487_v14 = vpop.f32.mrf.mxu1  ;;  %1678 = vmatmul.mubr.bf16.gmra.mxu1 %v3602_v2 }
 0x115   : > { %v3024_v15 = vpack.c.bf16 %v1717_v11, %v1716_v9  ;;  %v3184_v16 = vpack.c.bf16 %v1781_v12, %v1780_v10  ;;  %2712 = vmatprep.mubr.msk.bf16.mxu0 %vm965_vm0, %v3603_v5  ;;  %2744 = vmatprep.mubr.msk.bf16.mxu1 %vm965_vm0, %v3605_v8  ;;  %v1232_v19 = vadd.f32 %v3853_v53, %v1231_v13  ;;  %v3620_v5 = vld [vmem:[%s3678_s26 + $0x3f0] ss:$8 sps:$4 sm:$0xff]  }
 0x116   : > { %v1233_v17 = vpop.f32.mrf.mxu0  ;;  %v1489_v18 = vpop.f32.mrf.mxu1  ;;  %v1488_v20 = vadd.f32 %v3853_v53, %v1487_v14 }
 0x117   : > { %3328 = vst [vmem:[%s3869_s18 + $0x18] sm:$0xff] %v3024_v15   ;;  %3360 = vst [vmem:[%s3869_s18 + $0x118] sm:$0xff] %v3184_v16   ;;  %v1718_v31 = vmax.f32 %v1232_v19, 0.0 }
 0x118   : > { %v1234_v21 = vpop.f32.mrf.mxu0  ;;  %v1490_v22 = vpop.f32.mrf.mxu1  ;;  %v1782_v32 = vmax.f32 %v1488_v20, 0.0 }
 0x119   : > { %v1235_v25 = vadd.f32 %v3853_v53, %v1234_v21  ;;  %v1491_v26 = vadd.f32 %v3853_v53, %v1490_v22 }
 0x11a   : > { %v1236_v28 = vpop.f32.mrf.mxu0  ;;  %v1492_v29 = vpop.f32.mrf.mxu1 }
 0x11b   : > { %v1719_v33 = vmax.f32 %v1235_v25, 0.0  ;;  %v1783_v34 = vmax.f32 %v1491_v26, 0.0 }
 0x11c   : > { %v1239_v35 = vpop.f32.mrf.mxu0  ;;  %1430 = vmatmul.mubr.bf16.gmra.mxu0 %v3607_v23  ;;  %v1495_v36 = vpop.f32.mrf.mxu1  ;;  %1686 = vmatmul.mubr.bf16.gmra.mxu1 %v3608_v24 }
 0x11d   : > { %v3029_v37 = vpack.c.bf16 %v1719_v33, %v1718_v31  ;;  %v3189_v38 = vpack.c.bf16 %v1783_v34, %v1782_v32  ;;  %2713 = vmatprep.mubr.msk.bf16.mxu0 %vm965_vm0, %v3609_v27  ;;  %2745 = vmatprep.mubr.msk.bf16.mxu1 %vm965_vm0, %v3611_v30  ;;  %v1240_v41 = vadd.f32 %v3853_v53, %v1239_v35 }
 0x11e   : > { %v1241_v39 = vpop.f32.mrf.mxu0  ;;  %v1497_v40 = vpop.f32.mrf.mxu1  ;;  %v1496_v42 = vadd.f32 %v3853_v53, %v1495_v36 }
 0x11f   : > { %3329 = vst [vmem:[%s3869_s18 + $0x20] sm:$0xff] %v3029_v37   ;;  %3361 = vst [vmem:[%s3869_s18 + $0x120] sm:$0xff] %v3189_v38   ;;  %v1720_v54 = vmax.f32 %v1240_v41, 0.0 }
 0x120   : > { %v1242_v43 = vpop.f32.mrf.mxu0  ;;  %v1498_v44 = vpop.f32.mrf.mxu1  ;;  %v1784_v55 = vmax.f32 %v1496_v42, 0.0 }
 0x121   : > { %v1243_v47 = vadd.f32 %v3853_v53, %v1242_v43  ;;  %v1499_v48 = vadd.f32 %v3853_v53, %v1498_v44 }
 0x122   : > { %v1244_v50 = vpop.f32.mrf.mxu0  ;;  %v1500_v51 = vpop.f32.mrf.mxu1 }
 0x123   : > { %v1721_v56 = vmax.f32 %v1243_v47, 0.0  ;;  %v1785_v57 = vmax.f32 %v1499_v48, 0.0 }
 0x124   : > { %v1247_v58 = vpop.f32.mrf.mxu0  ;;  %1438 = vmatmul.mubr.bf16.gmra.mxu0 %v3613_v45  ;;  %v1503_v59 = vpop.f32.mrf.mxu1  ;;  %1694 = vmatmul.mubr.bf16.gmra.mxu1 %v3614_v46 }
 0x125   : > { %v3034_v60 = vpack.c.bf16 %v1721_v56, %v1720_v54  ;;  %v3194_v61 = vpack.c.bf16 %v1785_v57, %v1784_v55  ;;  %2714 = vmatprep.mubr.msk.bf16.mxu0 %vm965_vm0, %v3615_v49  ;;  %2746 = vmatprep.mubr.msk.bf16.mxu1 %vm965_vm0, %v3617_v52  ;;  %v1248_v0 = vadd.f32 %v3853_v53, %v1247_v58 }
 0x126   : > { %v1249_v62 = vpop.f32.mrf.mxu0  ;;  %v1505_v63 = vpop.f32.mrf.mxu1  ;;  %v1504_v1 = vadd.f32 %v3853_v53, %v1503_v59 }
 0x127   : > { %3330 = vst [vmem:[%s3869_s18 + $0x28] sm:$0xff] %v3034_v60   ;;  %3362 = vst [vmem:[%s3869_s18 + $0x128] sm:$0xff] %v3194_v61   ;;  %v1722_v10 = vmax.f32 %v1248_v0, 0.0 }
 0x128   : > { %v1250_v2 = vpop.f32.mrf.mxu0  ;;  %v1506_v3 = vpop.f32.mrf.mxu1  ;;  %v1786_v11 = vmax.f32 %v1504_v1, 0.0 }
 0x129   : > { %v1251_v6 = vadd.f32 %v3853_v53, %v1250_v2  ;;  %v1507_v7 = vadd.f32 %v3853_v53, %v1506_v3 }
 0x12a   : > { %v1252_v8 = vpop.f32.mrf.mxu0  ;;  %v1508_v9 = vpop.f32.mrf.mxu1 }
 0x12b   : > { %v1723_v12 = vmax.f32 %v1251_v6, 0.0  ;;  %v1787_v13 = vmax.f32 %v1507_v7, 0.0 }
 0x12c   : > { %v1255_v14 = vpop.f32.mrf.mxu0  ;;  %1446 = vmatmul.mubr.bf16.gmra.mxu0 %v3619_v4  ;;  %v1511_v15 = vpop.f32.mrf.mxu1  ;;  %1702 = vmatmul.mubr.bf16.gmra.mxu1 %v3620_v5 }
 0x12d   : > { %v3039_v16 = vpack.c.bf16 %v1723_v12, %v1722_v10  ;;  %v3199_v17 = vpack.c.bf16 %v1787_v13, %v1786_v11  ;;  %v1256_v20 = vadd.f32 %v3853_v53, %v1255_v14  ;;  %v1512_v21 = vadd.f32 %v3853_v53, %v1511_v15 }
 0x12e   : > { %v1257_v18 = vpop.f32.mrf.mxu0  ;;  %v1513_v19 = vpop.f32.mrf.mxu1 }
 0x12f   : > { %3331 = vst [vmem:[%s3869_s18 + $0x30] sm:$0xff] %v3039_v16   ;;  %3363 = vst [vmem:[%s3869_s18 + $0x130] sm:$0xff] %v3199_v17   ;;  %v1724_v28 = vmax.f32 %v1256_v20, 0.0  ;;  %v1788_v29 = vmax.f32 %v1512_v21, 0.0 }
 0x130   : > { %v1258_v22 = vpop.f32.mrf.mxu0  ;;  %v1514_v23 = vpop.f32.mrf.mxu1 }
 0x131   : > { %v1259_v24 = vadd.f32 %v3853_v53, %v1258_v22  ;;  %v1515_v25 = vadd.f32 %v3853_v53, %v1514_v23 }
 0x132   : > { %v1260_v26 = vpop.f32.mrf.mxu0  ;;  %v1516_v27 = vpop.f32.mrf.mxu1 }
 0x133   : > { %v1725_v30 = vmax.f32 %v1259_v24, 0.0  ;;  %v1789_v31 = vmax.f32 %v1515_v25, 0.0 }
 0x134   : > { %v1263_v32 = vpop.f32.mrf.mxu0  ;;  %v1519_v33 = vpop.f32.mrf.mxu1 }
 0x135   : > { %v3044_v34 = vpack.c.bf16 %v1725_v30, %v1724_v28  ;;  %v3204_v35 = vpack.c.bf16 %v1789_v31, %v1788_v29  ;;  %v1264_v38 = vadd.f32 %v3853_v53, %v1263_v32  ;;  %v1520_v39 = vadd.f32 %v3853_v53, %v1519_v33 }
 0x136   : > { %v1265_v36 = vpop.f32.mrf.mxu0  ;;  %v1521_v37 = vpop.f32.mrf.mxu1 }
 0x137   : > { %3332 = vst [vmem:[%s3869_s18 + $0x38] sm:$0xff] %v3044_v34   ;;  %3364 = vst [vmem:[%s3869_s18 + $0x138] sm:$0xff] %v3204_v35   ;;  %v1726_v46 = vmax.f32 %v1264_v38, 0.0  ;;  %v1790_v47 = vmax.f32 %v1520_v39, 0.0 }
 0x138   : > { %v1266_v40 = vpop.f32.mrf.mxu0  ;;  %v1522_v41 = vpop.f32.mrf.mxu1 }
 0x139   : > { %v1267_v42 = vadd.f32 %v3853_v53, %v1266_v40  ;;  %v1523_v43 = vadd.f32 %v3853_v53, %v1522_v41 }
 0x13a   : > { %v1268_v44 = vpop.f32.mrf.mxu0  ;;  %v1524_v45 = vpop.f32.mrf.mxu1 }
 0x13b   : > { %v1727_v48 = vmax.f32 %v1267_v42, 0.0  ;;  %v1791_v49 = vmax.f32 %v1523_v43, 0.0 }
 0x13c   : > { %v1271_v50 = vpop.f32.mrf.mxu0  ;;  %v1527_v51 = vpop.f32.mrf.mxu1 }
 0x13d   : > { %v3049_v52 = vpack.c.bf16 %v1727_v48, %v1726_v46  ;;  %v3209_v54 = vpack.c.bf16 %v1791_v49, %v1790_v47  ;;  %v1272_v57 = vadd.f32 %v3853_v53, %v1271_v50  ;;  %v1528_v58 = vadd.f32 %v3853_v53, %v1527_v51 }
 0x13e   : > { %v1273_v55 = vpop.f32.mrf.mxu0  ;;  %v1529_v56 = vpop.f32.mrf.mxu1 }
 0x13f   : > { %3333 = vst [vmem:[%s3869_s18 + $0x40] sm:$0xff] %v3049_v52   ;;  %3365 = vst [vmem:[%s3869_s18 + $0x140] sm:$0xff] %v3209_v54   ;;  %v1728_v1 = vmax.f32 %v1272_v57, 0.0  ;;  %v1792_v2 = vmax.f32 %v1528_v58, 0.0 }
 0x140   : > { %v1274_v59 = vpop.f32.mrf.mxu0  ;;  %v1530_v60 = vpop.f32.mrf.mxu1 }
 0x141   : > { %v1275_v61 = vadd.f32 %v3853_v53, %v1274_v59  ;;  %v1531_v62 = vadd.f32 %v3853_v53, %v1530_v60 }
 0x142   : > { %v1276_v63 = vpop.f32.mrf.mxu0  ;;  %v1532_v0 = vpop.f32.mrf.mxu1 }
 0x143   : > { %v1729_v3 = vmax.f32 %v1275_v61, 0.0  ;;  %v1793_v4 = vmax.f32 %v1531_v62, 0.0 }
 0x144   : > { %v1279_v5 = vpop.f32.mrf.mxu0  ;;  %v1535_v6 = vpop.f32.mrf.mxu1 }
 0x145   : > { %v3054_v7 = vpack.c.bf16 %v1729_v3, %v1728_v1  ;;  %v3214_v8 = vpack.c.bf16 %v1793_v4, %v1792_v2  ;;  %v1280_v11 = vadd.f32 %v3853_v53, %v1279_v5  ;;  %v1536_v12 = vadd.f32 %v3853_v53, %v1535_v6 }
 0x146   : > { %v1281_v9 = vpop.f32.mrf.mxu0  ;;  %v1537_v10 = vpop.f32.mrf.mxu1 }
 0x147   : > { %3334 = vst [vmem:[%s3869_s18 + $0x48] sm:$0xff] %v3054_v7   ;;  %3366 = vst [vmem:[%s3869_s18 + $0x148] sm:$0xff] %v3214_v8   ;;  %v1730_v19 = vmax.f32 %v1280_v11, 0.0  ;;  %v1794_v20 = vmax.f32 %v1536_v12, 0.0 }
 0x148   : > { %v1282_v13 = vpop.f32.mrf.mxu0  ;;  %v1538_v14 = vpop.f32.mrf.mxu1 }
 0x149   : > { %v1283_v15 = vadd.f32 %v3853_v53, %v1282_v13  ;;  %v1539_v16 = vadd.f32 %v3853_v53, %v1538_v14 }
 0x14a   : > { %v1284_v17 = vpop.f32.mrf.mxu0  ;;  %v1540_v18 = vpop.f32.mrf.mxu1 }
 0x14b   : > { %v1731_v21 = vmax.f32 %v1283_v15, 0.0  ;;  %v1795_v22 = vmax.f32 %v1539_v16, 0.0 }
 0x14c   : > { %v1287_v23 = vpop.f32.mrf.mxu0  ;;  %v1543_v24 = vpop.f32.mrf.mxu1 }
 0x14d   : > { %v3059_v25 = vpack.c.bf16 %v1731_v21, %v1730_v19  ;;  %v3219_v26 = vpack.c.bf16 %v1795_v22, %v1794_v20  ;;  %v1288_v29 = vadd.f32 %v3853_v53, %v1287_v23  ;;  %v1544_v30 = vadd.f32 %v3853_v53, %v1543_v24 }
 0x14e   : > { %v1289_v27 = vpop.f32.mrf.mxu0  ;;  %v1545_v28 = vpop.f32.mrf.mxu1 }
 0x14f   : > { %3335 = vst [vmem:[%s3869_s18 + $0x50] sm:$0xff] %v3059_v25   ;;  %3367 = vst [vmem:[%s3869_s18 + $0x150] sm:$0xff] %v3219_v26   ;;  %v1732_v37 = vmax.f32 %v1288_v29, 0.0  ;;  %v1796_v38 = vmax.f32 %v1544_v30, 0.0 }
 0x150   : > { %v1290_v31 = vpop.f32.mrf.mxu0  ;;  %v1546_v32 = vpop.f32.mrf.mxu1 }
 0x151   : > { %v1291_v33 = vadd.f32 %v3853_v53, %v1290_v31  ;;  %v1547_v34 = vadd.f32 %v3853_v53, %v1546_v32 }
 0x152   : > { %v1292_v35 = vpop.f32.mrf.mxu0  ;;  %v1548_v36 = vpop.f32.mrf.mxu1 }
 0x153   : > { %v1733_v39 = vmax.f32 %v1291_v33, 0.0  ;;  %v1797_v40 = vmax.f32 %v1547_v34, 0.0 }
 0x154   : > { %v1295_v41 = vpop.f32.mrf.mxu0  ;;  %v1551_v42 = vpop.f32.mrf.mxu1 }
 0x155   : > { %v3064_v43 = vpack.c.bf16 %v1733_v39, %v1732_v37  ;;  %v3224_v44 = vpack.c.bf16 %v1797_v40, %v1796_v38  ;;  %v1296_v47 = vadd.f32 %v3853_v53, %v1295_v41  ;;  %v1552_v48 = vadd.f32 %v3853_v53, %v1551_v42 }
 0x156   : > { %v1297_v45 = vpop.f32.mrf.mxu0  ;;  %v1553_v46 = vpop.f32.mrf.mxu1 }
 0x157   : > { %3336 = vst [vmem:[%s3869_s18 + $0x58] sm:$0xff] %v3064_v43   ;;  %3368 = vst [vmem:[%s3869_s18 + $0x158] sm:$0xff] %v3224_v44   ;;  %v1734_v56 = vmax.f32 %v1296_v47, 0.0  ;;  %v1798_v57 = vmax.f32 %v1552_v48, 0.0 }
 0x158   : > { %v1298_v49 = vpop.f32.mrf.mxu0  ;;  %v1554_v50 = vpop.f32.mrf.mxu1 }
 0x159   : > { %v1299_v51 = vadd.f32 %v3853_v53, %v1298_v49  ;;  %v1555_v52 = vadd.f32 %v3853_v53, %v1554_v50 }
 0x15a   : > { %v1300_v54 = vpop.f32.mrf.mxu0  ;;  %v1556_v55 = vpop.f32.mrf.mxu1 }
 0x15b   : > { %v1735_v58 = vmax.f32 %v1299_v51, 0.0  ;;  %v1799_v59 = vmax.f32 %v1555_v52, 0.0 }
 0x15c   : > { %v1303_v60 = vpop.f32.mrf.mxu0  ;;  %v1559_v61 = vpop.f32.mrf.mxu1 }
 0x15d   : > { %v3069_v62 = vpack.c.bf16 %v1735_v58, %v1734_v56  ;;  %v3229_v63 = vpack.c.bf16 %v1799_v59, %v1798_v57  ;;  %v1304_v2 = vadd.f32 %v3853_v53, %v1303_v60  ;;  %v1560_v3 = vadd.f32 %v3853_v53, %v1559_v61 }
 0x15e   : > { %v1305_v0 = vpop.f32.mrf.mxu0  ;;  %v1561_v1 = vpop.f32.mrf.mxu1 }
 0x15f   : > { %3337 = vst [vmem:[%s3869_s18 + $0x60] sm:$0xff] %v3069_v62   ;;  %3369 = vst [vmem:[%s3869_s18 + $0x160] sm:$0xff] %v3229_v63   ;;  %v1736_v10 = vmax.f32 %v1304_v2, 0.0  ;;  %v1800_v11 = vmax.f32 %v1560_v3, 0.0 }
 0x160   : > { %v1306_v4 = vpop.f32.mrf.mxu0  ;;  %v1562_v5 = vpop.f32.mrf.mxu1 }
 0x161   : > { %v1307_v6 = vadd.f32 %v3853_v53, %v1306_v4  ;;  %v1563_v7 = vadd.f32 %v3853_v53, %v1562_v5 }
 0x162   : > { %v1308_v8 = vpop.f32.mrf.mxu0  ;;  %v1564_v9 = vpop.f32.mrf.mxu1 }
 0x163   : > { %v1737_v12 = vmax.f32 %v1307_v6, 0.0  ;;  %v1801_v13 = vmax.f32 %v1563_v7, 0.0 }
 0x164   : > { %v1311_v14 = vpop.f32.mrf.mxu0  ;;  %v1567_v15 = vpop.f32.mrf.mxu1 }
 0x165   : > { %v3074_v16 = vpack.c.bf16 %v1737_v12, %v1736_v10  ;;  %v3234_v17 = vpack.c.bf16 %v1801_v13, %v1800_v11  ;;  %v1312_v20 = vadd.f32 %v3853_v53, %v1311_v14  ;;  %v1568_v21 = vadd.f32 %v3853_v53, %v1567_v15 }
 0x166   : > { %v1313_v18 = vpop.f32.mrf.mxu0  ;;  %v1569_v19 = vpop.f32.mrf.mxu1 }
 0x167   : > { %3338 = vst [vmem:[%s3869_s18 + $0x68] sm:$0xff] %v3074_v16   ;;  %3370 = vst [vmem:[%s3869_s18 + $0x168] sm:$0xff] %v3234_v17   ;;  %v1738_v28 = vmax.f32 %v1312_v20, 0.0  ;;  %v1802_v29 = vmax.f32 %v1568_v21, 0.0 }
 0x168   : > { %v1314_v22 = vpop.f32.mrf.mxu0  ;;  %v1570_v23 = vpop.f32.mrf.mxu1 }
 0x169   : > { %v1315_v24 = vadd.f32 %v3853_v53, %v1314_v22  ;;  %v1571_v25 = vadd.f32 %v3853_v53, %v1570_v23 }
 0x16a   : > { %v1316_v26 = vpop.f32.mrf.mxu0  ;;  %v1572_v27 = vpop.f32.mrf.mxu1 }
 0x16b   : > { %v1739_v30 = vmax.f32 %v1315_v24, 0.0  ;;  %v1803_v31 = vmax.f32 %v1571_v25, 0.0 }
 0x16c   : > { %v1319_v32 = vpop.f32.mrf.mxu0  ;;  %v1575_v33 = vpop.f32.mrf.mxu1 }
 0x16d   : > { %v3079_v34 = vpack.c.bf16 %v1739_v30, %v1738_v28  ;;  %v3239_v35 = vpack.c.bf16 %v1803_v31, %v1802_v29  ;;  %v1320_v38 = vadd.f32 %v3853_v53, %v1319_v32  ;;  %v1576_v39 = vadd.f32 %v3853_v53, %v1575_v33 }
 0x16e   : > { %v1321_v36 = vpop.f32.mrf.mxu0  ;;  %v1577_v37 = vpop.f32.mrf.mxu1 }
 0x16f   : > { %3339 = vst [vmem:[%s3869_s18 + $0x70] sm:$0xff] %v3079_v34   ;;  %3371 = vst [vmem:[%s3869_s18 + $0x170] sm:$0xff] %v3239_v35   ;;  %v1740_v46 = vmax.f32 %v1320_v38, 0.0  ;;  %v1804_v47 = vmax.f32 %v1576_v39, 0.0 }
 0x170   : > { %v1322_v40 = vpop.f32.mrf.mxu0  ;;  %v1578_v41 = vpop.f32.mrf.mxu1 }
 0x171   : > { %v1323_v42 = vadd.f32 %v3853_v53, %v1322_v40  ;;  %v1579_v43 = vadd.f32 %v3853_v53, %v1578_v41 }
 0x172   : > { %v1324_v44 = vpop.f32.mrf.mxu0  ;;  %v1580_v45 = vpop.f32.mrf.mxu1 }
 0x173   : > { %v1741_v48 = vmax.f32 %v1323_v42, 0.0  ;;  %v1805_v49 = vmax.f32 %v1579_v43, 0.0 }
 0x174   : > { %v1327_v50 = vpop.f32.mrf.mxu0  ;;  %v1583_v51 = vpop.f32.mrf.mxu1 }
 0x175   : > { %v3084_v52 = vpack.c.bf16 %v1741_v48, %v1740_v46  ;;  %v3244_v54 = vpack.c.bf16 %v1805_v49, %v1804_v47  ;;  %v1328_v57 = vadd.f32 %v3853_v53, %v1327_v50  ;;  %v1584_v58 = vadd.f32 %v3853_v53, %v1583_v51 }
 0x176   : > { %v1329_v55 = vpop.f32.mrf.mxu0  ;;  %v1585_v56 = vpop.f32.mrf.mxu1 }
 0x177   : > { %3340 = vst [vmem:[%s3869_s18 + $0x78] sm:$0xff] %v3084_v52   ;;  %3372 = vst [vmem:[%s3869_s18 + $0x178] sm:$0xff] %v3244_v54   ;;  %v1742_v1 = vmax.f32 %v1328_v57, 0.0  ;;  %v1806_v2 = vmax.f32 %v1584_v58, 0.0 }
 0x178   : > { %v1330_v59 = vpop.f32.mrf.mxu0  ;;  %v1586_v60 = vpop.f32.mrf.mxu1 }
 0x179   : > { %v1331_v61 = vadd.f32 %v3853_v53, %v1330_v59  ;;  %v1587_v62 = vadd.f32 %v3853_v53, %v1586_v60 }
 0x17a   : > { %v1332_v63 = vpop.f32.mrf.mxu0  ;;  %v1588_v0 = vpop.f32.mrf.mxu1 }
 0x17b   : > { %v1743_v3 = vmax.f32 %v1331_v61, 0.0  ;;  %v1807_v4 = vmax.f32 %v1587_v62, 0.0 }
 0x17c   : > { %v1335_v5 = vpop.f32.mrf.mxu0  ;;  %v1591_v6 = vpop.f32.mrf.mxu1 }
 0x17d   : > { %v3089_v7 = vpack.c.bf16 %v1743_v3, %v1742_v1  ;;  %v3249_v8 = vpack.c.bf16 %v1807_v4, %v1806_v2  ;;  %v1336_v11 = vadd.f32 %v3853_v53, %v1335_v5  ;;  %v1592_v12 = vadd.f32 %v3853_v53, %v1591_v6 }
 0x17e   : > { %v1337_v9 = vpop.f32.mrf.mxu0  ;;  %v1593_v10 = vpop.f32.mrf.mxu1 }
 0x17f   : > { %3341 = vst [vmem:[%s3869_s18 + $0x80] sm:$0xff] %v3089_v7   ;;  %3373 = vst [vmem:[%s3869_s18 + $0x180] sm:$0xff] %v3249_v8   ;;  %v1744_v19 = vmax.f32 %v1336_v11, 0.0  ;;  %v1808_v20 = vmax.f32 %v1592_v12, 0.0 }
 0x180   : > { %v1338_v13 = vpop.f32.mrf.mxu0  ;;  %v1594_v14 = vpop.f32.mrf.mxu1 }
 0x181   : > { %v1339_v15 = vadd.f32 %v3853_v53, %v1338_v13  ;;  %v1595_v16 = vadd.f32 %v3853_v53, %v1594_v14 }
 0x182   : > { %v1340_v17 = vpop.f32.mrf.mxu0  ;;  %v1596_v18 = vpop.f32.mrf.mxu1 }
 0x183   : > { %v1745_v21 = vmax.f32 %v1339_v15, 0.0  ;;  %v1809_v22 = vmax.f32 %v1595_v16, 0.0 }
 0x184   : > { %v1343_v23 = vpop.f32.mrf.mxu0  ;;  %v1599_v24 = vpop.f32.mrf.mxu1 }
 0x185   : > { %v3094_v25 = vpack.c.bf16 %v1745_v21, %v1744_v19  ;;  %v3254_v26 = vpack.c.bf16 %v1809_v22, %v1808_v20  ;;  %v1344_v29 = vadd.f32 %v3853_v53, %v1343_v23  ;;  %v1600_v30 = vadd.f32 %v3853_v53, %v1599_v24 }
 0x186   : > { %v1345_v27 = vpop.f32.mrf.mxu0  ;;  %v1601_v28 = vpop.f32.mrf.mxu1 }
 0x187   : > { %3342 = vst [vmem:[%s3869_s18 + $0x88] sm:$0xff] %v3094_v25   ;;  %3374 = vst [vmem:[%s3869_s18 + $0x188] sm:$0xff] %v3254_v26   ;;  %v1746_v37 = vmax.f32 %v1344_v29, 0.0  ;;  %v1810_v38 = vmax.f32 %v1600_v30, 0.0 }
 0x188   : > { %v1346_v31 = vpop.f32.mrf.mxu0  ;;  %v1602_v32 = vpop.f32.mrf.mxu1 }
 0x189   : > { %v1347_v33 = vadd.f32 %v3853_v53, %v1346_v31  ;;  %v1603_v34 = vadd.f32 %v3853_v53, %v1602_v32 }
 0x18a   : > { %v1348_v35 = vpop.f32.mrf.mxu0  ;;  %v1604_v36 = vpop.f32.mrf.mxu1 }
 0x18b   : > { %v1747_v39 = vmax.f32 %v1347_v33, 0.0  ;;  %v1811_v40 = vmax.f32 %v1603_v34, 0.0 }
 0x18c   : > { %v1351_v41 = vpop.f32.mrf.mxu0  ;;  %v1607_v42 = vpop.f32.mrf.mxu1 }
 0x18d   : > { %v3099_v43 = vpack.c.bf16 %v1747_v39, %v1746_v37  ;;  %v3259_v44 = vpack.c.bf16 %v1811_v40, %v1810_v38  ;;  %v1352_v47 = vadd.f32 %v3853_v53, %v1351_v41  ;;  %v1608_v48 = vadd.f32 %v3853_v53, %v1607_v42 }
 0x18e   : > { %v1353_v45 = vpop.f32.mrf.mxu0  ;;  %v1609_v46 = vpop.f32.mrf.mxu1 }
 0x18f   : > { %3343 = vst [vmem:[%s3869_s18 + $0x90] sm:$0xff] %v3099_v43   ;;  %3375 = vst [vmem:[%s3869_s18 + $0x190] sm:$0xff] %v3259_v44   ;;  %v1748_v56 = vmax.f32 %v1352_v47, 0.0  ;;  %v1812_v57 = vmax.f32 %v1608_v48, 0.0 }
 0x190   : > { %v1354_v49 = vpop.f32.mrf.mxu0  ;;  %v1610_v50 = vpop.f32.mrf.mxu1 }
 0x191   : > { %v1355_v51 = vadd.f32 %v3853_v53, %v1354_v49  ;;  %v1611_v52 = vadd.f32 %v3853_v53, %v1610_v50 }
 0x192   : > { %v1356_v54 = vpop.f32.mrf.mxu0  ;;  %v1612_v55 = vpop.f32.mrf.mxu1 }
 0x193   : > { %v1749_v58 = vmax.f32 %v1355_v51, 0.0  ;;  %v1813_v59 = vmax.f32 %v1611_v52, 0.0 }
 0x194   : > { %v1359_v60 = vpop.f32.mrf.mxu0  ;;  %v1615_v61 = vpop.f32.mrf.mxu1 }
 0x195   : > { %v3104_v62 = vpack.c.bf16 %v1749_v58, %v1748_v56  ;;  %v3264_v63 = vpack.c.bf16 %v1813_v59, %v1812_v57  ;;  %v1360_v2 = vadd.f32 %v3853_v53, %v1359_v60  ;;  %v1616_v3 = vadd.f32 %v3853_v53, %v1615_v61  ;;  %v4042_v57 = vld [vmem:[%s4103_s2] ss:$0 sm:$0xff] }
 0x196   : > { %v1361_v0 = vpop.f32.mrf.mxu0  ;;  %v1617_v1 = vpop.f32.mrf.mxu1 }
 0x197   : > { %3344 = vst [vmem:[%s3869_s18 + $0x98] sm:$0xff] %v3104_v62   ;;  %3376 = vst [vmem:[%s3869_s18 + $0x198] sm:$0xff] %v3264_v63   ;;  %v1750_v10 = vmax.f32 %v1360_v2, 0.0  ;;  %v1814_v11 = vmax.f32 %v1616_v3, 0.0 }
 0x198   : > { %v1362_v4 = vpop.f32.mrf.mxu0  ;;  %v1618_v5 = vpop.f32.mrf.mxu1 }
 0x199   : > { %v1363_v6 = vadd.f32 %v3853_v53, %v1362_v4  ;;  %v1619_v7 = vadd.f32 %v3853_v53, %v1618_v5 }
 0x19a   : > { %v1364_v8 = vpop.f32.mrf.mxu0  ;;  %v1620_v9 = vpop.f32.mrf.mxu1 }
 0x19b   : > { %v1751_v12 = vmax.f32 %v1363_v6, 0.0  ;;  %v1815_v13 = vmax.f32 %v1619_v7, 0.0 }
 0x19c   : > { %v1367_v14 = vpop.f32.mrf.mxu0  ;;  %v1623_v15 = vpop.f32.mrf.mxu1 }
 0x19d   : > { %v3109_v16 = vpack.c.bf16 %v1751_v12, %v1750_v10  ;;  %v3269_v17 = vpack.c.bf16 %v1815_v13, %v1814_v11  ;;  %v1368_v20 = vadd.f32 %v3853_v53, %v1367_v14  ;;  %v1624_v21 = vadd.f32 %v3853_v53, %v1623_v15 }
 0x19e   : > { %v1369_v18 = vpop.f32.mrf.mxu0  ;;  %v1625_v19 = vpop.f32.mrf.mxu1 }
 0x19f   : > { %3345 = vst [vmem:[%s3869_s18 + $0xa0] sm:$0xff] %v3109_v16   ;;  %3377 = vst [vmem:[%s3869_s18 + $0x1a0] sm:$0xff] %v3269_v17   ;;  %v1752_v28 = vmax.f32 %v1368_v20, 0.0  ;;  %v1816_v29 = vmax.f32 %v1624_v21, 0.0 }
 0x1a0   : > { %v1370_v22 = vpop.f32.mrf.mxu0  ;;  %v1626_v23 = vpop.f32.mrf.mxu1 }
 0x1a1   : > { %v1371_v24 = vadd.f32 %v3853_v53, %v1370_v22  ;;  %v1627_v25 = vadd.f32 %v3853_v53, %v1626_v23 }
 0x1a2   : > { %v1372_v26 = vpop.f32.mrf.mxu0  ;;  %v1628_v27 = vpop.f32.mrf.mxu1 }
 0x1a3   : > { %v1753_v30 = vmax.f32 %v1371_v24, 0.0  ;;  %v1817_v31 = vmax.f32 %v1627_v25, 0.0 }
 0x1a4   : > { %v1375_v32 = vpop.f32.mrf.mxu0  ;;  %v1631_v33 = vpop.f32.mrf.mxu1 }
 0x1a5   : > { %v3114_v34 = vpack.c.bf16 %v1753_v30, %v1752_v28  ;;  %v3274_v35 = vpack.c.bf16 %v1817_v31, %v1816_v29  ;;  %v1376_v38 = vadd.f32 %v3853_v53, %v1375_v32  ;;  %v1632_v39 = vadd.f32 %v3853_v53, %v1631_v33 }
 0x1a6   : > { %v1377_v36 = vpop.f32.mrf.mxu0  ;;  %v1633_v37 = vpop.f32.mrf.mxu1 }
 0x1a7   : > { %3346 = vst [vmem:[%s3869_s18 + $0xa8] sm:$0xff] %v3114_v34   ;;  %3378 = vst [vmem:[%s3869_s18 + $0x1a8] sm:$0xff] %v3274_v35   ;;  %v1754_v46 = vmax.f32 %v1376_v38, 0.0  ;;  %v1818_v47 = vmax.f32 %v1632_v39, 0.0 }
 0x1a8   : > { %v1378_v40 = vpop.f32.mrf.mxu0  ;;  %v1634_v41 = vpop.f32.mrf.mxu1 }
 0x1a9   : > { %v1379_v42 = vadd.f32 %v3853_v53, %v1378_v40  ;;  %v1635_v43 = vadd.f32 %v3853_v53, %v1634_v41 }
 0x1aa   : > { %v1380_v44 = vpop.f32.mrf.mxu0  ;;  %v1636_v45 = vpop.f32.mrf.mxu1 }
 0x1ab   : > { %v1755_v48 = vmax.f32 %v1379_v42, 0.0  ;;  %v1819_v49 = vmax.f32 %v1635_v43, 0.0 }
 0x1ac   : > { %v1383_v50 = vpop.f32.mrf.mxu0  ;;  %v1639_v51 = vpop.f32.mrf.mxu1 }
 0x1ad   : > { %v3119_v52 = vpack.c.bf16 %v1755_v48, %v1754_v46  ;;  %v3279_v54 = vpack.c.bf16 %v1819_v49, %v1818_v47  ;;  %v1384_v53 = vadd.f32 %v4042_v57, %v1383_v50  ;;  %v1640_v58 = vadd.f32 %v4042_v57, %v1639_v51 }
 0x1ae   : > { %v1385_v55 = vpop.f32.mrf.mxu0  ;;  %v1641_v56 = vpop.f32.mrf.mxu1 }
 0x1af   : > { %3347 = vst [vmem:[%s3869_s18 + $0xb0] sm:$0xff] %v3119_v52   ;;  %3379 = vst [vmem:[%s3869_s18 + $0x1b0] sm:$0xff] %v3279_v54   ;;  %v1756_v1 = vmax.f32 %v1384_v53, 0.0  ;;  %v1820_v2 = vmax.f32 %v1640_v58, 0.0 }
 0x1b0   : > { %v1386_v59 = vpop.f32.mrf.mxu0  ;;  %v1642_v60 = vpop.f32.mrf.mxu1 }
 0x1b1   : > { %v1387_v61 = vadd.f32 %v4042_v57, %v1386_v59  ;;  %v1643_v62 = vadd.f32 %v4042_v57, %v1642_v60 }
 0x1b2   : > { %v1388_v63 = vpop.f32.mrf.mxu0  ;;  %v1644_v0 = vpop.f32.mrf.mxu1 }
 0x1b3   : > { %v1757_v3 = vmax.f32 %v1387_v61, 0.0  ;;  %v1821_v4 = vmax.f32 %v1643_v62, 0.0 }
 0x1b4   : > { %v1391_v5 = vpop.f32.mrf.mxu0  ;;  %v1647_v6 = vpop.f32.mrf.mxu1 }
 0x1b5   : > { %v3124_v7 = vpack.c.bf16 %v1757_v3, %v1756_v1  ;;  %v3284_v8 = vpack.c.bf16 %v1821_v4, %v1820_v2  ;;  %v1392_v11 = vadd.f32 %v4042_v57, %v1391_v5  ;;  %v1648_v12 = vadd.f32 %v4042_v57, %v1647_v6 }
 0x1b6   : > { %v1393_v9 = vpop.f32.mrf.mxu0  ;;  %v1649_v10 = vpop.f32.mrf.mxu1 }
 0x1b7   : > { %3348 = vst [vmem:[%s3869_s18 + $0xb8] sm:$0xff] %v3124_v7   ;;  %3380 = vst [vmem:[%s3869_s18 + $0x1b8] sm:$0xff] %v3284_v8   ;;  %v1758_v19 = vmax.f32 %v1392_v11, 0.0  ;;  %v1822_v20 = vmax.f32 %v1648_v12, 0.0 }
 0x1b8   : > { %v1394_v13 = vpop.f32.mrf.mxu0  ;;  %v1650_v14 = vpop.f32.mrf.mxu1 }
 0x1b9   : > { %v1395_v15 = vadd.f32 %v4042_v57, %v1394_v13  ;;  %v1651_v16 = vadd.f32 %v4042_v57, %v1650_v14 }
 0x1ba   : > { %v1396_v17 = vpop.f32.mrf.mxu0  ;;  %v1652_v18 = vpop.f32.mrf.mxu1 }
 0x1bb   : > { %v1759_v21 = vmax.f32 %v1395_v15, 0.0  ;;  %v1823_v22 = vmax.f32 %v1651_v16, 0.0 }
 0x1bc   : > { %v1399_v23 = vpop.f32.mrf.mxu0  ;;  %v1655_v24 = vpop.f32.mrf.mxu1 }
 0x1bd   : > { %v3129_v25 = vpack.c.bf16 %v1759_v21, %v1758_v19  ;;  %v3289_v26 = vpack.c.bf16 %v1823_v22, %v1822_v20  ;;  %v1400_v29 = vadd.f32 %v4042_v57, %v1399_v23  ;;  %v1656_v30 = vadd.f32 %v4042_v57, %v1655_v24 }
 0x1be   : > { %v1401_v27 = vpop.f32.mrf.mxu0  ;;  %v1657_v28 = vpop.f32.mrf.mxu1 }
 0x1bf   : > { %3349 = vst [vmem:[%s3869_s18 + $0xc0] sm:$0xff] %v3129_v25   ;;  %3381 = vst [vmem:[%s3869_s18 + $0x1c0] sm:$0xff] %v3289_v26   ;;  %v1760_v37 = vmax.f32 %v1400_v29, 0.0  ;;  %v1824_v38 = vmax.f32 %v1656_v30, 0.0 }
 0x1c0   : > { %v1402_v31 = vpop.f32.mrf.mxu0  ;;  %v1658_v32 = vpop.f32.mrf.mxu1 }
 0x1c1   : > { %v1403_v33 = vadd.f32 %v4042_v57, %v1402_v31  ;;  %v1659_v34 = vadd.f32 %v4042_v57, %v1658_v32 }
 0x1c2   : > { %v1404_v35 = vpop.f32.mrf.mxu0  ;;  %v1660_v36 = vpop.f32.mrf.mxu1 }
 0x1c3   : > { %v1761_v39 = vmax.f32 %v1403_v33, 0.0  ;;  %v1825_v40 = vmax.f32 %v1659_v34, 0.0 }
 0x1c4   : > { %v1407_v41 = vpop.f32.mrf.mxu0  ;;  %v1663_v42 = vpop.f32.mrf.mxu1 }
 0x1c5   : > { %v3134_v43 = vpack.c.bf16 %v1761_v39, %v1760_v37  ;;  %v3294_v44 = vpack.c.bf16 %v1825_v40, %v1824_v38  ;;  %v1408_v47 = vadd.f32 %v4042_v57, %v1407_v41  ;;  %v1664_v48 = vadd.f32 %v4042_v57, %v1663_v42 }
 0x1c6   : > { %v1409_v45 = vpop.f32.mrf.mxu0  ;;  %v1665_v46 = vpop.f32.mrf.mxu1 }
 0x1c7   : > { %3350 = vst [vmem:[%s3869_s18 + $0xc8] sm:$0xff] %v3134_v43   ;;  %3382 = vst [vmem:[%s3869_s18 + $0x1c8] sm:$0xff] %v3294_v44   ;;  %v1762_v56 = vmax.f32 %v1408_v47, 0.0  ;;  %v1826_v53 = vmax.f32 %v1664_v48, 0.0 }
 0x1c8   : > { %v1410_v49 = vpop.f32.mrf.mxu0  ;;  %v1666_v50 = vpop.f32.mrf.mxu1 }
 0x1c9   : > { %v1411_v51 = vadd.f32 %v4042_v57, %v1410_v49  ;;  %v1667_v52 = vadd.f32 %v4042_v57, %v1666_v50 }
 0x1ca   : > { %v1412_v54 = vpop.f32.mrf.mxu0  ;;  %v1668_v55 = vpop.f32.mrf.mxu1 }
 0x1cb   : > { %v1763_v58 = vmax.f32 %v1411_v51, 0.0  ;;  %v1827_v59 = vmax.f32 %v1667_v52, 0.0 }
 0x1cc   : > { %v1415_v60 = vpop.f32.mrf.mxu0  ;;  %v1671_v61 = vpop.f32.mrf.mxu1 }
 0x1cd   : > { %v3139_v62 = vpack.c.bf16 %v1763_v58, %v1762_v56  ;;  %v3299_v63 = vpack.c.bf16 %v1827_v59, %v1826_v53  ;;  %v1416_v2 = vadd.f32 %v4042_v57, %v1415_v60  ;;  %v1672_v3 = vadd.f32 %v4042_v57, %v1671_v61 }
 0x1ce   : > { %v1417_v0 = vpop.f32.mrf.mxu0  ;;  %v1673_v1 = vpop.f32.mrf.mxu1 }
 0x1cf   : > { %3351 = vst [vmem:[%s3869_s18 + $0xd0] sm:$0xff] %v3139_v62   ;;  %3383 = vst [vmem:[%s3869_s18 + $0x1d0] sm:$0xff] %v3299_v63   ;;  %v1764_v10 = vmax.f32 %v1416_v2, 0.0  ;;  %v1828_v11 = vmax.f32 %v1672_v3, 0.0 }
 0x1d0   : > { %v1418_v4 = vpop.f32.mrf.mxu0  ;;  %v1674_v5 = vpop.f32.mrf.mxu1 }
 0x1d1   : > { %v1419_v6 = vadd.f32 %v4042_v57, %v1418_v4  ;;  %v1675_v7 = vadd.f32 %v4042_v57, %v1674_v5 }
 0x1d2   : > { %v1420_v8 = vpop.f32.mrf.mxu0  ;;  %v1676_v9 = vpop.f32.mrf.mxu1 }
 0x1d3   : > { %v1765_v12 = vmax.f32 %v1419_v6, 0.0  ;;  %v1829_v13 = vmax.f32 %v1675_v7, 0.0 }
 0x1d4   : > { %v1423_v14 = vpop.f32.mrf.mxu0  ;;  %v1679_v15 = vpop.f32.mrf.mxu1 }
 0x1d5   : > { %v3144_v16 = vpack.c.bf16 %v1765_v12, %v1764_v10  ;;  %v3304_v17 = vpack.c.bf16 %v1829_v13, %v1828_v11  ;;  %v1424_v20 = vadd.f32 %v4042_v57, %v1423_v14  ;;  %v1680_v21 = vadd.f32 %v4042_v57, %v1679_v15 }
 0x1d6   : > { %v1425_v18 = vpop.f32.mrf.mxu0  ;;  %v1681_v19 = vpop.f32.mrf.mxu1 }
 0x1d7   : > { %3352 = vst [vmem:[%s3869_s18 + $0xd8] sm:$0xff] %v3144_v16   ;;  %3384 = vst [vmem:[%s3869_s18 + $0x1d8] sm:$0xff] %v3304_v17   ;;  %v1766_v28 = vmax.f32 %v1424_v20, 0.0  ;;  %v1830_v29 = vmax.f32 %v1680_v21, 0.0 }
 0x1d8   : > { %v1426_v22 = vpop.f32.mrf.mxu0  ;;  %v1682_v23 = vpop.f32.mrf.mxu1 }
 0x1d9   : > { %v1427_v24 = vadd.f32 %v4042_v57, %v1426_v22  ;;  %v1683_v25 = vadd.f32 %v4042_v57, %v1682_v23 }
 0x1da   : > { %v1428_v26 = vpop.f32.mrf.mxu0  ;;  %v1684_v27 = vpop.f32.mrf.mxu1 }
 0x1db   : > { %v1767_v30 = vmax.f32 %v1427_v24, 0.0  ;;  %v1831_v31 = vmax.f32 %v1683_v25, 0.0 }
 0x1dc   : > { %v1431_v32 = vpop.f32.mrf.mxu0  ;;  %v1687_v33 = vpop.f32.mrf.mxu1 }
 0x1dd   : > { %v3149_v34 = vpack.c.bf16 %v1767_v30, %v1766_v28  ;;  %v3309_v35 = vpack.c.bf16 %v1831_v31, %v1830_v29  ;;  %v1432_v38 = vadd.f32 %v4042_v57, %v1431_v32  ;;  %v1688_v39 = vadd.f32 %v4042_v57, %v1687_v33 }
 0x1de   : > { %v1433_v36 = vpop.f32.mrf.mxu0  ;;  %v1689_v37 = vpop.f32.mrf.mxu1 }
 0x1df   : > { %3353 = vst [vmem:[%s3869_s18 + $0xe0] sm:$0xff] %v3149_v34   ;;  %3385 = vst [vmem:[%s3869_s18 + $0x1e0] sm:$0xff] %v3309_v35   ;;  %v1768_v46 = vmax.f32 %v1432_v38, 0.0  ;;  %v1832_v47 = vmax.f32 %v1688_v39, 0.0 }
 0x1e0   : > { %v1434_v40 = vpop.f32.mrf.mxu0  ;;  %v1690_v41 = vpop.f32.mrf.mxu1 }
 0x1e1   : > { %v1435_v42 = vadd.f32 %v4042_v57, %v1434_v40  ;;  %v1691_v43 = vadd.f32 %v4042_v57, %v1690_v41 }
 0x1e2   : > { %v1436_v44 = vpop.f32.mrf.mxu0  ;;  %v1692_v45 = vpop.f32.mrf.mxu1 }
 0x1e3   : > { %v1769_v48 = vmax.f32 %v1435_v42, 0.0  ;;  %v1833_v49 = vmax.f32 %v1691_v43, 0.0 }
 0x1e4   : > { %v1439_v50 = vpop.f32.mrf.mxu0  ;;  %v1695_v51 = vpop.f32.mrf.mxu1 }
 0x1e5   : > { %v3154_v52 = vpack.c.bf16 %v1769_v48, %v1768_v46  ;;  %v3314_v54 = vpack.c.bf16 %v1833_v49, %v1832_v47  ;;  %v1440_v53 = vadd.f32 %v4042_v57, %v1439_v50  ;;  %v1696_v58 = vadd.f32 %v4042_v57, %v1695_v51 }
 0x1e6   : > { %v1441_v55 = vpop.f32.mrf.mxu0  ;;  %v1697_v56 = vpop.f32.mrf.mxu1 }
 0x1e7   : > { %3354 = vst [vmem:[%s3869_s18 + $0xe8] sm:$0xff] %v3154_v52   ;;  %3386 = vst [vmem:[%s3869_s18 + $0x1e8] sm:$0xff] %v3314_v54   ;;  %v1770_v1 = vmax.f32 %v1440_v53, 0.0  ;;  %v1834_v2 = vmax.f32 %v1696_v58, 0.0 }
 0x1e8   : > { %v1442_v59 = vpop.f32.mrf.mxu0  ;;  %v1698_v60 = vpop.f32.mrf.mxu1 }
 0x1e9   : > { %v1443_v61 = vadd.f32 %v4042_v57, %v1442_v59  ;;  %v1699_v62 = vadd.f32 %v4042_v57, %v1698_v60 }
 0x1ea   : > { %v1444_v63 = vpop.f32.mrf.mxu0  ;;  %v1700_v0 = vpop.f32.mrf.mxu1 }
 0x1eb   : > { %v1771_v3 = vmax.f32 %v1443_v61, 0.0  ;;  %v1835_v4 = vmax.f32 %v1699_v62, 0.0 }
 0x1ec   : > { %v1447_v5 = vpop.f32.mrf.mxu0  ;;  %v1703_v6 = vpop.f32.mrf.mxu1 }
 0x1ed   : > { %v3159_v7 = vpack.c.bf16 %v1771_v3, %v1770_v1  ;;  %v3319_v8 = vpack.c.bf16 %v1835_v4, %v1834_v2  ;;  %v1448_v11 = vadd.f32 %v4042_v57, %v1447_v5  ;;  %v1704_v12 = vadd.f32 %v4042_v57, %v1703_v6 }
 0x1ee   : > { %v1449_v9 = vpop.f32.mrf.mxu0  ;;  %v1705_v10 = vpop.f32.mrf.mxu1 }
 0x1ef   : > { %3355 = vst [vmem:[%s3869_s18 + $0xf0] sm:$0xff] %v3159_v7   ;;  %3387 = vst [vmem:[%s3869_s18 + $0x1f0] sm:$0xff] %v3319_v8   ;;  %v1772_v19 = vmax.f32 %v1448_v11, 0.0  ;;  %v1836_v20 = vmax.f32 %v1704_v12, 0.0 }
 0x1f0   : > { %v1450_v13 = vpop.f32.mrf.mxu0  ;;  %v1706_v14 = vpop.f32.mrf.mxu1 }
 0x1f1   : > { %v1451_v15 = vadd.f32 %v4042_v57, %v1450_v13  ;;  %v1707_v16 = vadd.f32 %v4042_v57, %v1706_v14 }
 0x1f2   : > { %v1452_v17 = vpop.f32.mrf.mxu0  ;;  %v1708_v18 = vpop.f32.mrf.mxu1 }
 0x1f3   : > { %v1773_v21 = vmax.f32 %v1451_v15, 0.0  ;;  %v1837_v22 = vmax.f32 %v1707_v16, 0.0 }
 0x1f5   : > { %v3164_v23 = vpack.c.bf16 %v1773_v21, %v1772_v19  ;;  %v3324_v24 = vpack.c.bf16 %v1837_v22, %v1836_v20 }
 0x1f7   : > { %3356 = vst [vmem:[%s3869_s18 + $0xf8] sm:$0xff] %v3164_v23   ;;  %3388 = vst [vmem:[%s3869_s18 + $0x1f8] sm:$0xff] %v3324_v24  }
 0x1f8 PF: > { %s13_s12 = sadd.s32 1, %s3628_s12  }
 0x1f9   : > { %p10_p4 = scmp.ge.s32.totalorder %s13_s12, 10  }
 0x1fb   :  { %12 = sbr.rel (!%p10_p4) target bundleno = 1 (0x1), region = 62 }

// kernel: _lambda_.38
= control target key start
LH: loop header
LB: loop body
LE: loop exit
PB: predicated region body
PF: predicated region fallthrough
CT: control target
= control target key end

     0   :  { %s3310_s12 = smov 0   ;;  %s3672_s0 = inlined_call_operand.vmem [shape: bf16[8192,36], index: 0, kind: input, shape index: {}]   ;;  %s3673_s1 = inlined_call_operand.vmem [shape: bf16[36,128], index: 1, kind: input, shape index: {}]   ;;  %s3674_s2 = inlined_call_operand.vmem [shape: f32[1,128], index: 2, kind: input, shape index: {}]   ;;  %s3675_s3 = inlined_call_operand.vmem [shape: bf16[8192,128], index: 3, kind: output, shape index: {}]  }
   0x1 LB: > { %s2216_s13 = sadd.s32 4294967295, %s3288_s12   ;;  %p2220_p0 = scmp.ge.s32.totalorder %s3288_s12, 1  ;;  %s3288_s12 = sphi %s3310_s12, %s13_s12  }
   0x2   : > { %p138_p1 = scmp.lt.s32.totalorder %s3288_s12, 9 }
   0x4   : > { %p139_p2 = pnand %p2220_p0, %p138_p1 }
   0x5   : > { %s2221_s18 = sshll.u32 (!%p139_p2), %s2216_s13, 7 }
   0x6   : > { %142 = sbr.rel (%p139_p2) target bundleno = 350 (0x15e), region = 32  ;;  %p163_p3 = scmp.lt.s32.totalorder (!%p139_p2), %s2221_s18, 1023 }
   0xb   : > { %v3215_v0 = vld [vmem:[%s3673_s1 + $0x10] ss:$0 sps:$4 sm:$0x33]   ;;  %vm843_vm0 = vcmask 1041408   ;;  %v3216_v1 = vld [vmem:[%s3673_s1 + $0x8] sm:$0xff]   ;;  %v3217_v3 = vld [vmem:[%s3673_s1] sm:$0xff]  }
   0xc   : > { %3205 = vmatprep.subr.msk.bf16.mxu0 %vm843_vm0, %v3215_v0  ;;  %3206 = vmatprep.subr.msk.bf16.mxu1 %vm843_vm0, %v3215_v0  ;;  %v845_v2 = vsel %vm843_vm0, %v3215_v0, 0  ;;  %s3677_s18 = smov (!%p163_p3, %s2221_s18), 1023  ;;  %vm650_vm1 = vcmask 293888  }
   0xd   : > { %3066 = vmatpush3.bf16.msra.mxu0 %v845_v2  ;;  %3202 = vmatpush3.bf16.msra.mxu1 %v845_v2  ;;  %s2222_s21 = sshll.u32 %s3677_s18, 2 }
   0xe   : > { %3067 = vmatprep.subr.bf16.mxu0 %v3216_v1  ;;  %3200 = vmatprep.subr.bf16.mxu1 %v3216_v1  ;;  %s3335_s24 = scalar_lea.vmem %s3672_s0, %s2222_s21  ;;  %s3483_s29 = scalar_lea.vmem %s3675_s3, %s2222_s21 }
   0xf   : > { %v3218_v4 = vld [vmem:[%s3335_s24] sm:$0xff]   ;;  %v3220_v6 = vld [vmem:[%s3335_s24 + $0x8] sm:$0xff]   ;;  %v3222_v8 = vld [vmem:[%s3335_s24 + $0x10] sm:$0xff]  }
  0x10   : > { %v3219_v5 = vld [vmem:[%s3335_s24 + $0x100] sm:$0xff]   ;;  %3071 = vmatprep.mubr.msk.bf16.mxu0 %vm650_vm1, %v3218_v4  ;;  %v3221_v7 = vld [vmem:[%s3335_s24 + $0x108] sm:$0xff]   ;;  %v3223_v9 = vld [vmem:[%s3335_s24 + $0x110] sm:$0xff]  }
  0x11   : > { %3068 = vmatpush3.bf16.msra.mxu0 %v3216_v1  ;;  %3203 = vmatpush3.bf16.msra.mxu1 %v3216_v1  ;;  %v3224_v10 = vld [vmem:[%s3335_s24 + $0x18] sm:$0xff]   ;;  %v3226_v12 = vld [vmem:[%s3335_s24 + $0x20] sm:$0xff]   ;;  %v3228_v14 = vld [vmem:[%s3335_s24 + $0x28] sm:$0xff]  }
  0x12   : > { %3069 = vmatprep.subr.bf16.mxu0 %v3217_v3  ;;  %3201 = vmatprep.subr.bf16.mxu1 %v3217_v3  ;;  %v3225_v11 = vld [vmem:[%s3335_s24 + $0x118] sm:$0xff]   ;;  %v3227_v13 = vld [vmem:[%s3335_s24 + $0x120] sm:$0xff]   ;;  %v3229_v15 = vld [vmem:[%s3335_s24 + $0x128] sm:$0xff]  }
  0x13   : > { %3135 = vmatprep.mubr.msk.bf16.mxu1 %vm650_vm1, %v3219_v5  ;;  %v3230_v16 = vld [vmem:[%s3335_s24 + $0x30] sm:$0xff]   ;;  %v3232_v18 = vld [vmem:[%s3335_s24 + $0x38] sm:$0xff]   ;;  %v3234_v20 = vld [vmem:[%s3335_s24 + $0x40] sm:$0xff]  }
  0x14   : > { %v3231_v17 = vld [vmem:[%s3335_s24 + $0x130] sm:$0xff]   ;;  %v3233_v19 = vld [vmem:[%s3335_s24 + $0x138] sm:$0xff]   ;;  %v3235_v21 = vld [vmem:[%s3335_s24 + $0x140] sm:$0xff]  }
  0x15   : > { %3070 = vmatpush3.bf16.msra.mxu0 %v3217_v3  ;;  %3204 = vmatpush3.bf16.msra.mxu1 %v3217_v3  ;;  %v3236_v22 = vld [vmem:[%s3335_s24 + $0x48] sm:$0xff]   ;;  %v3238_v24 = vld [vmem:[%s3335_s24 + $0x50] sm:$0xff]   ;;  %v3240_v26 = vld [vmem:[%s3335_s24 + $0x58] sm:$0xff]  }
  0x16   : > { %v3237_v23 = vld [vmem:[%s3335_s24 + $0x148] sm:$0xff]   ;;  %v3239_v25 = vld [vmem:[%s3335_s24 + $0x150] sm:$0xff]   ;;  %v3241_v27 = vld [vmem:[%s3335_s24 + $0x158] sm:$0xff]  }
  0x17   : > { %v3242_v28 = vld [vmem:[%s3335_s24 + $0x60] sm:$0xff]   ;;  %v3244_v30 = vld [vmem:[%s3335_s24 + $0x68] sm:$0xff]   ;;  %v3246_v32 = vld [vmem:[%s3335_s24 + $0x70] sm:$0xff]  }
  0x18   : > { %3072 = vmatmul.mubr.msk.bf16.vlgmr.msra.gmra.mxu0 %vm650_vm1, %v3220_v6  ;;  %3136 = vmatmul.mubr.msk.bf16.vlgmr.msra.gmra.mxu1 %vm650_vm1, %v3221_v7  ;;  %v3243_v29 = vld [vmem:[%s3335_s24 + $0x160] sm:$0xff]   ;;  %v3245_v31 = vld [vmem:[%s3335_s24 + $0x168] sm:$0xff]   ;;  %v3247_v33 = vld [vmem:[%s3335_s24 + $0x170] sm:$0xff]  }
  0x19   : > { %3075 = vmatprep.mubr.msk.bf16.mxu0 %vm650_vm1, %v3222_v8  ;;  %3139 = vmatprep.mubr.msk.bf16.mxu1 %vm650_vm1, %v3223_v9  ;;  %v3248_v34 = vld [vmem:[%s3335_s24 + $0x78] sm:$0xff]   ;;  %v3250_v36 = vld [vmem:[%s3335_s24 + $0x80] sm:$0xff]   ;;  %v3252_v38 = vld [vmem:[%s3335_s24 + $0x88] sm:$0xff]  }
  0x1a   : > { %v3249_v35 = vld [vmem:[%s3335_s24 + $0x178] sm:$0xff]   ;;  %v3251_v37 = vld [vmem:[%s3335_s24 + $0x180] sm:$0xff]   ;;  %v3253_v39 = vld [vmem:[%s3335_s24 + $0x188] sm:$0xff]  }
  0x1b   : > { %v3254_v40 = vld [vmem:[%s3335_s24 + $0x90] sm:$0xff]   ;;  %v3256_v42 = vld [vmem:[%s3335_s24 + $0x98] sm:$0xff]   ;;  %v3258_v44 = vld [vmem:[%s3335_s24 + $0xa0] sm:$0xff]  }
  0x1c   : > { %v3255_v41 = vld [vmem:[%s3335_s24 + $0x190] sm:$0xff]   ;;  %v3257_v43 = vld [vmem:[%s3335_s24 + $0x198] sm:$0xff]   ;;  %v3259_v45 = vld [vmem:[%s3335_s24 + $0x1a0] sm:$0xff]  }
  0x1d   : > { %v3260_v46 = vld [vmem:[%s3335_s24 + $0xa8] sm:$0xff]   ;;  %v3262_v48 = vld [vmem:[%s3335_s24 + $0xb0] sm:$0xff]   ;;  %v3264_v50 = vld [vmem:[%s3335_s24 + $0xb8] sm:$0xff]  }
  0x1e   : > { %v3261_v47 = vld [vmem:[%s3335_s24 + $0x1a8] sm:$0xff]   ;;  %v3263_v49 = vld [vmem:[%s3335_s24 + $0x1b0] sm:$0xff]   ;;  %v3265_v51 = vld [vmem:[%s3335_s24 + $0x1b8] sm:$0xff]  }
  0x1f   : > { %v3266_v52 = vld [vmem:[%s3335_s24 + $0xc0] sm:$0xff]   ;;  %v3268_v54 = vld [vmem:[%s3335_s24 + $0xc8] sm:$0xff]   ;;  %v3270_v56 = vld [vmem:[%s3335_s24 + $0xd0] sm:$0xff]  }
  0x20   : > { %3076 = vmatmul.mubr.msk.bf16.gmra.mxu0 %vm650_vm1, %v3224_v10  ;;  %3140 = vmatmul.mubr.msk.bf16.gmra.mxu1 %vm650_vm1, %v3225_v11  ;;  %v3267_v53 = vld [vmem:[%s3335_s24 + $0x1c0] sm:$0xff]   ;;  %v3269_v55 = vld [vmem:[%s3335_s24 + $0x1c8] sm:$0xff]   ;;  %v3271_v57 = vld [vmem:[%s3335_s24 + $0x1d0] sm:$0xff]  }
  0x21   : > { %3079 = vmatprep.mubr.msk.bf16.mxu0 %vm650_vm1, %v3226_v12  ;;  %3143 = vmatprep.mubr.msk.bf16.mxu1 %vm650_vm1, %v3227_v13  ;;  %v3272_v58 = vld [vmem:[%s3335_s24 + $0xd8] sm:$0xff]   ;;  %v3274_v60 = vld [vmem:[%s3335_s24 + $0xe0] sm:$0xff]   ;;  %v3276_v62 = vld [vmem:[%s3335_s24 + $0xe8] sm:$0xff]  }
  0x22   : > { %v3273_v59 = vld [vmem:[%s3335_s24 + $0x1d8] sm:$0xff]   ;;  %v3275_v61 = vld [vmem:[%s3335_s24 + $0x1e0] sm:$0xff]   ;;  %v3277_v63 = vld [vmem:[%s3335_s24 + $0x1e8] sm:$0xff]  }
  0x23   : > { %v3278_v0 = vld [vmem:[%s3335_s24 + $0xf0] sm:$0xff]   ;;  %v3280_v2 = vld [vmem:[%s3335_s24 + $0xf8] sm:$0xff]   ;;  %v3468_v4 = vld [vmem:[%s3674_s2] ss:$0 sm:$0xff] }
  0x24   : > { %v3279_v1 = vld [vmem:[%s3335_s24 + $0x1f0] sm:$0xff]   ;;  %v3281_v3 = vld [vmem:[%s3335_s24 + $0x1f8] sm:$0xff]  }
  0x28   : > { %3080 = vmatmul.mubr.msk.bf16.gmra.mxu0 %vm650_vm1, %v3228_v14  ;;  %3144 = vmatmul.mubr.msk.bf16.gmra.mxu1 %vm650_vm1, %v3229_v15 }
  0x29   : > { %3083 = vmatprep.mubr.msk.bf16.mxu0 %vm650_vm1, %v3230_v16  ;;  %3147 = vmatprep.mubr.msk.bf16.mxu1 %vm650_vm1, %v3231_v17 }
  0x30   : > { %3084 = vmatmul.mubr.msk.bf16.gmra.mxu0 %vm650_vm1, %v3232_v18  ;;  %3148 = vmatmul.mubr.msk.bf16.gmra.mxu1 %vm650_vm1, %v3233_v19 }
  0x31   : > { %3087 = vmatprep.mubr.msk.bf16.mxu0 %vm650_vm1, %v3234_v20  ;;  %3151 = vmatprep.mubr.msk.bf16.mxu1 %vm650_vm1, %v3235_v21 }
  0x38   : > { %3088 = vmatmul.mubr.msk.bf16.gmra.mxu0 %vm650_vm1, %v3236_v22  ;;  %3152 = vmatmul.mubr.msk.bf16.gmra.mxu1 %vm650_vm1, %v3237_v23 }
  0x39   : > { %3091 = vmatprep.mubr.msk.bf16.mxu0 %vm650_vm1, %v3238_v24  ;;  %3155 = vmatprep.mubr.msk.bf16.mxu1 %vm650_vm1, %v3239_v25 }
  0x40   : > { %3092 = vmatmul.mubr.msk.bf16.gmra.mxu0 %vm650_vm1, %v3240_v26  ;;  %3156 = vmatmul.mubr.msk.bf16.gmra.mxu1 %vm650_vm1, %v3241_v27 }
  0x41   : > { %3095 = vmatprep.mubr.msk.bf16.mxu0 %vm650_vm1, %v3242_v28  ;;  %3159 = vmatprep.mubr.msk.bf16.mxu1 %vm650_vm1, %v3243_v29 }
  0x48   : > { %3096 = vmatmul.mubr.msk.bf16.gmra.mxu0 %vm650_vm1, %v3244_v30  ;;  %3160 = vmatmul.mubr.msk.bf16.gmra.mxu1 %vm650_vm1, %v3245_v31 }
  0x49   : > { %3099 = vmatprep.mubr.msk.bf16.mxu0 %vm650_vm1, %v3246_v32  ;;  %3163 = vmatprep.mubr.msk.bf16.mxu1 %vm650_vm1, %v3247_v33 }
  0x50   : > { %3100 = vmatmul.mubr.msk.bf16.gmra.mxu0 %vm650_vm1, %v3248_v34  ;;  %3164 = vmatmul.mubr.msk.bf16.gmra.mxu1 %vm650_vm1, %v3249_v35 }
  0x51   : > { %3103 = vmatprep.mubr.msk.bf16.mxu0 %vm650_vm1, %v3250_v36  ;;  %3167 = vmatprep.mubr.msk.bf16.mxu1 %vm650_vm1, %v3251_v37 }
  0x58   : > { %3104 = vmatmul.mubr.msk.bf16.gmra.mxu0 %vm650_vm1, %v3252_v38  ;;  %3168 = vmatmul.mubr.msk.bf16.gmra.mxu1 %vm650_vm1, %v3253_v39 }
  0x59   : > { %3107 = vmatprep.mubr.msk.bf16.mxu0 %vm650_vm1, %v3254_v40  ;;  %3171 = vmatprep.mubr.msk.bf16.mxu1 %vm650_vm1, %v3255_v41 }
  0x60   : > { %3108 = vmatmul.mubr.msk.bf16.gmra.mxu0 %vm650_vm1, %v3256_v42  ;;  %3172 = vmatmul.mubr.msk.bf16.gmra.mxu1 %vm650_vm1, %v3257_v43 }
  0x61   : > { %3111 = vmatprep.mubr.msk.bf16.mxu0 %vm650_vm1, %v3258_v44  ;;  %3175 = vmatprep.mubr.msk.bf16.mxu1 %vm650_vm1, %v3259_v45 }
  0x68   : > { %3112 = vmatmul.mubr.msk.bf16.gmra.mxu0 %vm650_vm1, %v3260_v46  ;;  %3176 = vmatmul.mubr.msk.bf16.gmra.mxu1 %vm650_vm1, %v3261_v47 }
  0x69   : > { %3115 = vmatprep.mubr.msk.bf16.mxu0 %vm650_vm1, %v3262_v48  ;;  %3179 = vmatprep.mubr.msk.bf16.mxu1 %vm650_vm1, %v3263_v49 }
  0x70   : > { %3116 = vmatmul.mubr.msk.bf16.gmra.mxu0 %vm650_vm1, %v3264_v50  ;;  %3180 = vmatmul.mubr.msk.bf16.gmra.mxu1 %vm650_vm1, %v3265_v51 }
  0x71   : > { %3119 = vmatprep.mubr.msk.bf16.mxu0 %vm650_vm1, %v3266_v52  ;;  %3183 = vmatprep.mubr.msk.bf16.mxu1 %vm650_vm1, %v3267_v53 }
  0x78   : > { %3120 = vmatmul.mubr.msk.bf16.gmra.mxu0 %vm650_vm1, %v3268_v54  ;;  %3184 = vmatmul.mubr.msk.bf16.gmra.mxu1 %vm650_vm1, %v3269_v55 }
  0x79   : > { %3123 = vmatprep.mubr.msk.bf16.mxu0 %vm650_vm1, %v3270_v56  ;;  %3187 = vmatprep.mubr.msk.bf16.mxu1 %vm650_vm1, %v3271_v57 }
  0x80   : > { %3124 = vmatmul.mubr.msk.bf16.gmra.mxu0 %vm650_vm1, %v3272_v58  ;;  %3188 = vmatmul.mubr.msk.bf16.gmra.mxu1 %vm650_vm1, %v3273_v59 }
  0x81   : > { %3127 = vmatprep.mubr.msk.bf16.mxu0 %vm650_vm1, %v3274_v60  ;;  %3191 = vmatprep.mubr.msk.bf16.mxu1 %vm650_vm1, %v3275_v61 }
  0x88   : > { %3128 = vmatmul.mubr.msk.bf16.gmra.mxu0 %vm650_vm1, %v3276_v62  ;;  %3192 = vmatmul.mubr.msk.bf16.gmra.mxu1 %vm650_vm1, %v3277_v63 }
  0x89   : > { %3131 = vmatprep.mubr.msk.bf16.mxu0 %vm650_vm1, %v3278_v0  ;;  %3195 = vmatprep.mubr.msk.bf16.mxu1 %vm650_vm1, %v3279_v1 }
  0x90   : > { %3132 = vmatmul.mubr.msk.bf16.gmra.mxu0 %vm650_vm1, %v3280_v2  ;;  %3196 = vmatmul.mubr.msk.bf16.gmra.mxu1 %vm650_vm1, %v3281_v3 }
  0xd8   : > { %v3073_v5 = vpop.f32.mrf.mxu0  ;;  %v3137_v6 = vpop.f32.mrf.mxu1 }
  0xd9   : > { %v890_v7 = vadd.f32 %v3073_v5, %v3468_v4  ;;  %v1146_v8 = vadd.f32 %v3137_v6, %v3468_v4 }
  0xda   : > { %v881_v9 = vpop.f32.mrf.mxu0  ;;  %v1137_v10 = vpop.f32.mrf.mxu1 }
  0xdb   : > { %v882_v11 = vadd.f32 %v3468_v4, %v881_v9  ;;  %v1138_v12 = vadd.f32 %v3468_v4, %v1137_v10  ;;  %v1394_v17 = vmax.f32 %v890_v7, 0.0  ;;  %v1458_v18 = vmax.f32 %v1146_v8, 0.0 }
  0xdc   : > { %v3074_v13 = vpop.f32.mrf.mxu0  ;;  %v3138_v14 = vpop.f32.mrf.mxu1 }
  0xdd   : > { %v893_v15 = vadd.f32 %v3074_v13, %v3468_v4  ;;  %v1149_v16 = vadd.f32 %v3138_v14, %v3468_v4  ;;  %v1392_v25 = vmax.f32 %v882_v11, 0.0  ;;  %v1456_v26 = vmax.f32 %v1138_v12, 0.0 }
  0xde   : > { %v884_v19 = vpop.f32.mrf.mxu0  ;;  %v1140_v20 = vpop.f32.mrf.mxu1 }
  0xdf   : > { %v1395_v21 = vmax.f32 %v893_v15, 0.0  ;;  %v1459_v22 = vmax.f32 %v1149_v16, 0.0  ;;  %v885_v23 = vadd.f32 %v3468_v4, %v884_v19  ;;  %v1141_v24 = vadd.f32 %v3468_v4, %v1140_v20 }
  0xe0   : > { %v3077_v27 = vpop.f32.mrf.mxu0  ;;  %v3141_v28 = vpop.f32.mrf.mxu1 }
  0xe1   : > { %v2623_v29 = vpack.c.bf16 %v1395_v21, %v1394_v17  ;;  %v2783_v30 = vpack.c.bf16 %v1459_v22, %v1458_v18  ;;  %v1393_v31 = vmax.f32 %v885_v23, 0.0  ;;  %v1457_v32 = vmax.f32 %v1141_v24, 0.0 }
  0xe2   : > { %v906_v33 = vadd.f32 %v3077_v27, %v3468_v4  ;;  %v1162_v34 = vadd.f32 %v3141_v28, %v3468_v4  ;;  %v897_v35 = vpop.f32.mrf.mxu0  ;;  %v1153_v36 = vpop.f32.mrf.mxu1 }
  0xe3   : > { %2935 = vst [vmem:[%s3483_s29 + $0x8] sm:$0xff] %v2623_v29   ;;  %2967 = vst [vmem:[%s3483_s29 + $0x108] sm:$0xff] %v2783_v30   ;;  %v2618_v37 = vpack.c.bf16 %v1393_v31, %v1392_v25  ;;  %v2778_v38 = vpack.c.bf16 %v1457_v32, %v1456_v26  ;;  %v898_v39 = vadd.f32 %v3468_v4, %v897_v35 }
  0xe4   : > { %v1154_v40 = vadd.f32 %v3468_v4, %v1153_v36  ;;  %v3078_v41 = vpop.f32.mrf.mxu0  ;;  %v3142_v42 = vpop.f32.mrf.mxu1  ;;  %v1398_v45 = vmax.f32 %v906_v33, 0.0  ;;  %v1462_v46 = vmax.f32 %v1162_v34, 0.0 }
  0xe5   : > { %2619 = vst [vmem:[%s3483_s29] sm:$0xff] %v2618_v37   ;;  %2966 = vst [vmem:[%s3483_s29 + $0x100] sm:$0xff] %v2778_v38   ;;  %v909_v43 = vadd.f32 %v3078_v41, %v3468_v4  ;;  %v1165_v44 = vadd.f32 %v3142_v42, %v3468_v4  ;;  %v1396_v53 = vmax.f32 %v898_v39, 0.0 }
  0xe6   : > { %v900_v47 = vpop.f32.mrf.mxu0  ;;  %v1156_v48 = vpop.f32.mrf.mxu1  ;;  %v1460_v54 = vmax.f32 %v1154_v40, 0.0 }
  0xe7   : > { %v1399_v49 = vmax.f32 %v909_v43, 0.0  ;;  %v1463_v50 = vmax.f32 %v1165_v44, 0.0  ;;  %v901_v51 = vadd.f32 %v3468_v4, %v900_v47  ;;  %v1157_v52 = vadd.f32 %v3468_v4, %v1156_v48 }
  0xe8   : > { %v3081_v55 = vpop.f32.mrf.mxu0  ;;  %v3145_v56 = vpop.f32.mrf.mxu1 }
  0xe9   : > { %v2633_v57 = vpack.c.bf16 %v1399_v49, %v1398_v45  ;;  %v2793_v58 = vpack.c.bf16 %v1463_v50, %v1462_v46  ;;  %v1397_v59 = vmax.f32 %v901_v51, 0.0  ;;  %v1461_v60 = vmax.f32 %v1157_v52, 0.0 }
  0xea   : > { %v922_v61 = vadd.f32 %v3081_v55, %v3468_v4  ;;  %v1178_v62 = vadd.f32 %v3145_v56, %v3468_v4  ;;  %v913_v63 = vpop.f32.mrf.mxu0  ;;  %v1169_v0 = vpop.f32.mrf.mxu1 }
  0xeb   : > { %2937 = vst [vmem:[%s3483_s29 + $0x18] sm:$0xff] %v2633_v57   ;;  %2969 = vst [vmem:[%s3483_s29 + $0x118] sm:$0xff] %v2793_v58   ;;  %v2628_v1 = vpack.c.bf16 %v1397_v59, %v1396_v53  ;;  %v2788_v2 = vpack.c.bf16 %v1461_v60, %v1460_v54  ;;  %v914_v3 = vadd.f32 %v3468_v4, %v913_v63 }
  0xec   : > { %v1170_v5 = vadd.f32 %v3468_v4, %v1169_v0  ;;  %v3082_v6 = vpop.f32.mrf.mxu0  ;;  %v3146_v7 = vpop.f32.mrf.mxu1  ;;  %v1402_v10 = vmax.f32 %v922_v61, 0.0  ;;  %v1466_v11 = vmax.f32 %v1178_v62, 0.0 }
  0xed   : > { %2936 = vst [vmem:[%s3483_s29 + $0x10] sm:$0xff] %v2628_v1   ;;  %2968 = vst [vmem:[%s3483_s29 + $0x110] sm:$0xff] %v2788_v2   ;;  %v925_v8 = vadd.f32 %v3082_v6, %v3468_v4  ;;  %v1181_v9 = vadd.f32 %v3146_v7, %v3468_v4  ;;  %v1400_v18 = vmax.f32 %v914_v3, 0.0 }
  0xee   : > { %v916_v12 = vpop.f32.mrf.mxu0  ;;  %v1172_v13 = vpop.f32.mrf.mxu1  ;;  %v1464_v19 = vmax.f32 %v1170_v5, 0.0 }
  0xef   : > { %v1403_v14 = vmax.f32 %v925_v8, 0.0  ;;  %v1467_v15 = vmax.f32 %v1181_v9, 0.0  ;;  %v917_v16 = vadd.f32 %v3468_v4, %v916_v12  ;;  %v1173_v17 = vadd.f32 %v3468_v4, %v1172_v13 }
  0xf0   : > { %v3085_v20 = vpop.f32.mrf.mxu0  ;;  %v3149_v21 = vpop.f32.mrf.mxu1 }
  0xf1   : > { %v2643_v22 = vpack.c.bf16 %v1403_v14, %v1402_v10  ;;  %v2803_v23 = vpack.c.bf16 %v1467_v15, %v1466_v11  ;;  %v1401_v24 = vmax.f32 %v917_v16, 0.0  ;;  %v1465_v25 = vmax.f32 %v1173_v17, 0.0 }
  0xf2   : > { %v938_v26 = vadd.f32 %v3085_v20, %v3468_v4  ;;  %v1194_v27 = vadd.f32 %v3149_v21, %v3468_v4  ;;  %v929_v28 = vpop.f32.mrf.mxu0  ;;  %v1185_v29 = vpop.f32.mrf.mxu1 }
  0xf3   : > { %2939 = vst [vmem:[%s3483_s29 + $0x28] sm:$0xff] %v2643_v22   ;;  %2971 = vst [vmem:[%s3483_s29 + $0x128] sm:$0xff] %v2803_v23   ;;  %v2638_v30 = vpack.c.bf16 %v1401_v24, %v1400_v18  ;;  %v2798_v31 = vpack.c.bf16 %v1465_v25, %v1464_v19  ;;  %v930_v32 = vadd.f32 %v3468_v4, %v929_v28 }
  0xf4   : > { %v1186_v33 = vadd.f32 %v3468_v4, %v1185_v29  ;;  %v3086_v34 = vpop.f32.mrf.mxu0  ;;  %v3150_v35 = vpop.f32.mrf.mxu1  ;;  %v1406_v38 = vmax.f32 %v938_v26, 0.0  ;;  %v1470_v39 = vmax.f32 %v1194_v27, 0.0 }
  0xf5   : > { %2938 = vst [vmem:[%s3483_s29 + $0x20] sm:$0xff] %v2638_v30   ;;  %2970 = vst [vmem:[%s3483_s29 + $0x120] sm:$0xff] %v2798_v31   ;;  %v941_v36 = vadd.f32 %v3086_v34, %v3468_v4  ;;  %v1197_v37 = vadd.f32 %v3150_v35, %v3468_v4  ;;  %v1404_v46 = vmax.f32 %v930_v32, 0.0 }
  0xf6   : > { %v932_v40 = vpop.f32.mrf.mxu0  ;;  %v1188_v41 = vpop.f32.mrf.mxu1  ;;  %v1468_v47 = vmax.f32 %v1186_v33, 0.0 }
  0xf7   : > { %v1407_v42 = vmax.f32 %v941_v36, 0.0  ;;  %v1471_v43 = vmax.f32 %v1197_v37, 0.0  ;;  %v933_v44 = vadd.f32 %v3468_v4, %v932_v40  ;;  %v1189_v45 = vadd.f32 %v3468_v4, %v1188_v41 }
  0xf8   : > { %v3089_v48 = vpop.f32.mrf.mxu0  ;;  %v3153_v49 = vpop.f32.mrf.mxu1 }
  0xf9   : > { %v2653_v50 = vpack.c.bf16 %v1407_v42, %v1406_v38  ;;  %v2813_v51 = vpack.c.bf16 %v1471_v43, %v1470_v39  ;;  %v1405_v52 = vmax.f32 %v933_v44, 0.0  ;;  %v1469_v53 = vmax.f32 %v1189_v45, 0.0 }
  0xfa   : > { %v954_v54 = vadd.f32 %v3089_v48, %v3468_v4  ;;  %v1210_v55 = vadd.f32 %v3153_v49, %v3468_v4  ;;  %v945_v56 = vpop.f32.mrf.mxu0  ;;  %v1201_v57 = vpop.f32.mrf.mxu1 }
  0xfb   : > { %2941 = vst [vmem:[%s3483_s29 + $0x38] sm:$0xff] %v2653_v50   ;;  %2973 = vst [vmem:[%s3483_s29 + $0x138] sm:$0xff] %v2813_v51   ;;  %v2648_v58 = vpack.c.bf16 %v1405_v52, %v1404_v46  ;;  %v2808_v59 = vpack.c.bf16 %v1469_v53, %v1468_v47  ;;  %v946_v60 = vadd.f32 %v3468_v4, %v945_v56 }
  0xfc   : > { %v1202_v61 = vadd.f32 %v3468_v4, %v1201_v57  ;;  %v3090_v62 = vpop.f32.mrf.mxu0  ;;  %v3154_v63 = vpop.f32.mrf.mxu1  ;;  %v1410_v2 = vmax.f32 %v954_v54, 0.0  ;;  %v1474_v3 = vmax.f32 %v1210_v55, 0.0 }
  0xfd   : > { %2940 = vst [vmem:[%s3483_s29 + $0x30] sm:$0xff] %v2648_v58   ;;  %2972 = vst [vmem:[%s3483_s29 + $0x130] sm:$0xff] %v2808_v59   ;;  %v957_v0 = vadd.f32 %v3090_v62, %v3468_v4  ;;  %v1213_v1 = vadd.f32 %v3154_v63, %v3468_v4  ;;  %v1408_v11 = vmax.f32 %v946_v60, 0.0 }
  0xfe   : > { %v948_v5 = vpop.f32.mrf.mxu0  ;;  %v1204_v6 = vpop.f32.mrf.mxu1  ;;  %v1472_v12 = vmax.f32 %v1202_v61, 0.0 }
  0xff   : > { %v1411_v7 = vmax.f32 %v957_v0, 0.0  ;;  %v1475_v8 = vmax.f32 %v1213_v1, 0.0  ;;  %v949_v9 = vadd.f32 %v3468_v4, %v948_v5  ;;  %v1205_v10 = vadd.f32 %v3468_v4, %v1204_v6 }
 0x100   : > { %v3093_v13 = vpop.f32.mrf.mxu0  ;;  %v3157_v14 = vpop.f32.mrf.mxu1 }
 0x101   : > { %v2663_v15 = vpack.c.bf16 %v1411_v7, %v1410_v2  ;;  %v2823_v16 = vpack.c.bf16 %v1475_v8, %v1474_v3  ;;  %v1409_v17 = vmax.f32 %v949_v9, 0.0  ;;  %v1473_v18 = vmax.f32 %v1205_v10, 0.0 }
 0x102   : > { %v970_v19 = vadd.f32 %v3093_v13, %v3468_v4  ;;  %v1226_v20 = vadd.f32 %v3157_v14, %v3468_v4  ;;  %v961_v21 = vpop.f32.mrf.mxu0  ;;  %v1217_v22 = vpop.f32.mrf.mxu1 }
 0x103   : > { %2943 = vst [vmem:[%s3483_s29 + $0x48] sm:$0xff] %v2663_v15   ;;  %2975 = vst [vmem:[%s3483_s29 + $0x148] sm:$0xff] %v2823_v16   ;;  %v2658_v23 = vpack.c.bf16 %v1409_v17, %v1408_v11  ;;  %v2818_v24 = vpack.c.bf16 %v1473_v18, %v1472_v12  ;;  %v962_v25 = vadd.f32 %v3468_v4, %v961_v21 }
 0x104   : > { %v1218_v26 = vadd.f32 %v3468_v4, %v1217_v22  ;;  %v3094_v27 = vpop.f32.mrf.mxu0  ;;  %v3158_v28 = vpop.f32.mrf.mxu1  ;;  %v1414_v31 = vmax.f32 %v970_v19, 0.0  ;;  %v1478_v32 = vmax.f32 %v1226_v20, 0.0 }
 0x105   : > { %2942 = vst [vmem:[%s3483_s29 + $0x40] sm:$0xff] %v2658_v23   ;;  %2974 = vst [vmem:[%s3483_s29 + $0x140] sm:$0xff] %v2818_v24   ;;  %v973_v29 = vadd.f32 %v3094_v27, %v3468_v4  ;;  %v1229_v30 = vadd.f32 %v3158_v28, %v3468_v4  ;;  %v1412_v39 = vmax.f32 %v962_v25, 0.0 }
 0x106   : > { %v964_v33 = vpop.f32.mrf.mxu0  ;;  %v1220_v34 = vpop.f32.mrf.mxu1  ;;  %v1476_v40 = vmax.f32 %v1218_v26, 0.0 }
 0x107   : > { %v1415_v35 = vmax.f32 %v973_v29, 0.0  ;;  %v1479_v36 = vmax.f32 %v1229_v30, 0.0  ;;  %v965_v37 = vadd.f32 %v3468_v4, %v964_v33  ;;  %v1221_v38 = vadd.f32 %v3468_v4, %v1220_v34 }
 0x108   : > { %v3097_v41 = vpop.f32.mrf.mxu0  ;;  %v3161_v42 = vpop.f32.mrf.mxu1 }
 0x109   : > { %v2673_v43 = vpack.c.bf16 %v1415_v35, %v1414_v31  ;;  %v2833_v44 = vpack.c.bf16 %v1479_v36, %v1478_v32  ;;  %v1413_v45 = vmax.f32 %v965_v37, 0.0  ;;  %v1477_v46 = vmax.f32 %v1221_v38, 0.0 }
 0x10a   : > { %v986_v47 = vadd.f32 %v3097_v41, %v3468_v4  ;;  %v1242_v48 = vadd.f32 %v3161_v42, %v3468_v4  ;;  %v977_v49 = vpop.f32.mrf.mxu0  ;;  %v1233_v50 = vpop.f32.mrf.mxu1 }
 0x10b   : > { %2945 = vst [vmem:[%s3483_s29 + $0x58] sm:$0xff] %v2673_v43   ;;  %2977 = vst [vmem:[%s3483_s29 + $0x158] sm:$0xff] %v2833_v44   ;;  %v2668_v51 = vpack.c.bf16 %v1413_v45, %v1412_v39  ;;  %v2828_v52 = vpack.c.bf16 %v1477_v46, %v1476_v40  ;;  %v978_v53 = vadd.f32 %v3468_v4, %v977_v49 }
 0x10c   : > { %v1234_v54 = vadd.f32 %v3468_v4, %v1233_v50  ;;  %v3098_v55 = vpop.f32.mrf.mxu0  ;;  %v3162_v56 = vpop.f32.mrf.mxu1  ;;  %v1418_v59 = vmax.f32 %v986_v47, 0.0  ;;  %v1482_v60 = vmax.f32 %v1242_v48, 0.0 }
 0x10d   : > { %2944 = vst [vmem:[%s3483_s29 + $0x50] sm:$0xff] %v2668_v51   ;;  %2976 = vst [vmem:[%s3483_s29 + $0x150] sm:$0xff] %v2828_v52   ;;  %v989_v57 = vadd.f32 %v3098_v55, %v3468_v4  ;;  %v1245_v58 = vadd.f32 %v3162_v56, %v3468_v4  ;;  %v1416_v3 = vmax.f32 %v978_v53, 0.0 }
 0x10e   : > { %v980_v61 = vpop.f32.mrf.mxu0  ;;  %v1236_v62 = vpop.f32.mrf.mxu1  ;;  %v1480_v5 = vmax.f32 %v1234_v54, 0.0 }
 0x10f   : > { %v1419_v63 = vmax.f32 %v989_v57, 0.0  ;;  %v1483_v0 = vmax.f32 %v1245_v58, 0.0  ;;  %v981_v1 = vadd.f32 %v3468_v4, %v980_v61  ;;  %v1237_v2 = vadd.f32 %v3468_v4, %v1236_v62 }
 0x110   : > { %v3101_v6 = vpop.f32.mrf.mxu0  ;;  %v3165_v7 = vpop.f32.mrf.mxu1 }
 0x111   : > { %v2683_v8 = vpack.c.bf16 %v1419_v63, %v1418_v59  ;;  %v2843_v9 = vpack.c.bf16 %v1483_v0, %v1482_v60  ;;  %v1417_v10 = vmax.f32 %v981_v1, 0.0  ;;  %v1481_v11 = vmax.f32 %v1237_v2, 0.0 }
 0x112   : > { %v1002_v12 = vadd.f32 %v3101_v6, %v3468_v4  ;;  %v1258_v13 = vadd.f32 %v3165_v7, %v3468_v4  ;;  %v993_v14 = vpop.f32.mrf.mxu0  ;;  %v1249_v15 = vpop.f32.mrf.mxu1 }
 0x113   : > { %2947 = vst [vmem:[%s3483_s29 + $0x68] sm:$0xff] %v2683_v8   ;;  %2979 = vst [vmem:[%s3483_s29 + $0x168] sm:$0xff] %v2843_v9   ;;  %v2678_v16 = vpack.c.bf16 %v1417_v10, %v1416_v3  ;;  %v2838_v17 = vpack.c.bf16 %v1481_v11, %v1480_v5  ;;  %v994_v18 = vadd.f32 %v3468_v4, %v993_v14 }
 0x114   : > { %v1250_v19 = vadd.f32 %v3468_v4, %v1249_v15  ;;  %v3102_v20 = vpop.f32.mrf.mxu0  ;;  %v3166_v21 = vpop.f32.mrf.mxu1  ;;  %v1422_v24 = vmax.f32 %v1002_v12, 0.0  ;;  %v1486_v25 = vmax.f32 %v1258_v13, 0.0 }
 0x115   : > { %2946 = vst [vmem:[%s3483_s29 + $0x60] sm:$0xff] %v2678_v16   ;;  %2978 = vst [vmem:[%s3483_s29 + $0x160] sm:$0xff] %v2838_v17   ;;  %v1005_v22 = vadd.f32 %v3102_v20, %v3468_v4  ;;  %v1261_v23 = vadd.f32 %v3166_v21, %v3468_v4  ;;  %v1420_v32 = vmax.f32 %v994_v18, 0.0 }
 0x116   : > { %v996_v26 = vpop.f32.mrf.mxu0  ;;  %v1252_v27 = vpop.f32.mrf.mxu1  ;;  %v1484_v33 = vmax.f32 %v1250_v19, 0.0 }
 0x117   : > { %v1423_v28 = vmax.f32 %v1005_v22, 0.0  ;;  %v1487_v29 = vmax.f32 %v1261_v23, 0.0  ;;  %v997_v30 = vadd.f32 %v3468_v4, %v996_v26  ;;  %v1253_v31 = vadd.f32 %v3468_v4, %v1252_v27 }
 0x118   : > { %v3105_v34 = vpop.f32.mrf.mxu0  ;;  %v3169_v35 = vpop.f32.mrf.mxu1 }
 0x119   : > { %v2693_v36 = vpack.c.bf16 %v1423_v28, %v1422_v24  ;;  %v2853_v37 = vpack.c.bf16 %v1487_v29, %v1486_v25  ;;  %v1421_v38 = vmax.f32 %v997_v30, 0.0  ;;  %v1485_v39 = vmax.f32 %v1253_v31, 0.0 }
 0x11a   : > { %v1018_v40 = vadd.f32 %v3105_v34, %v3468_v4  ;;  %v1274_v41 = vadd.f32 %v3169_v35, %v3468_v4  ;;  %v1009_v42 = vpop.f32.mrf.mxu0  ;;  %v1265_v43 = vpop.f32.mrf.mxu1 }
 0x11b   : > { %2949 = vst [vmem:[%s3483_s29 + $0x78] sm:$0xff] %v2693_v36   ;;  %2981 = vst [vmem:[%s3483_s29 + $0x178] sm:$0xff] %v2853_v37   ;;  %v2688_v44 = vpack.c.bf16 %v1421_v38, %v1420_v32  ;;  %v2848_v45 = vpack.c.bf16 %v1485_v39, %v1484_v33  ;;  %v1010_v46 = vadd.f32 %v3468_v4, %v1009_v42 }
 0x11c   : > { %v1266_v47 = vadd.f32 %v3468_v4, %v1265_v43  ;;  %v3106_v48 = vpop.f32.mrf.mxu0  ;;  %v3170_v49 = vpop.f32.mrf.mxu1  ;;  %v1426_v52 = vmax.f32 %v1018_v40, 0.0  ;;  %v1490_v53 = vmax.f32 %v1274_v41, 0.0 }
 0x11d   : > { %2948 = vst [vmem:[%s3483_s29 + $0x70] sm:$0xff] %v2688_v44   ;;  %2980 = vst [vmem:[%s3483_s29 + $0x170] sm:$0xff] %v2848_v45   ;;  %v1021_v50 = vadd.f32 %v3106_v48, %v3468_v4  ;;  %v1277_v51 = vadd.f32 %v3170_v49, %v3468_v4  ;;  %v1424_v60 = vmax.f32 %v1010_v46, 0.0 }
 0x11e   : > { %v1012_v54 = vpop.f32.mrf.mxu0  ;;  %v1268_v55 = vpop.f32.mrf.mxu1  ;;  %v1488_v61 = vmax.f32 %v1266_v47, 0.0 }
 0x11f   : > { %v1427_v56 = vmax.f32 %v1021_v50, 0.0  ;;  %v1491_v57 = vmax.f32 %v1277_v51, 0.0  ;;  %v1013_v58 = vadd.f32 %v3468_v4, %v1012_v54  ;;  %v1269_v59 = vadd.f32 %v3468_v4, %v1268_v55 }
 0x120   : > { %v3109_v62 = vpop.f32.mrf.mxu0  ;;  %v3173_v63 = vpop.f32.mrf.mxu1 }
 0x121   : > { %v2703_v0 = vpack.c.bf16 %v1427_v56, %v1426_v52  ;;  %v2863_v1 = vpack.c.bf16 %v1491_v57, %v1490_v53  ;;  %v1425_v2 = vmax.f32 %v1013_v58, 0.0  ;;  %v1489_v3 = vmax.f32 %v1269_v59, 0.0 }
 0x122   : > { %v1034_v5 = vadd.f32 %v3109_v62, %v3468_v4  ;;  %v1290_v6 = vadd.f32 %v3173_v63, %v3468_v4  ;;  %v1025_v7 = vpop.f32.mrf.mxu0  ;;  %v1281_v8 = vpop.f32.mrf.mxu1 }
 0x123   : > { %2951 = vst [vmem:[%s3483_s29 + $0x88] sm:$0xff] %v2703_v0   ;;  %2983 = vst [vmem:[%s3483_s29 + $0x188] sm:$0xff] %v2863_v1   ;;  %v2698_v9 = vpack.c.bf16 %v1425_v2, %v1424_v60  ;;  %v2858_v10 = vpack.c.bf16 %v1489_v3, %v1488_v61  ;;  %v1026_v11 = vadd.f32 %v3468_v4, %v1025_v7 }
 0x124   : > { %v1282_v12 = vadd.f32 %v3468_v4, %v1281_v8  ;;  %v3110_v13 = vpop.f32.mrf.mxu0  ;;  %v3174_v14 = vpop.f32.mrf.mxu1  ;;  %v1430_v17 = vmax.f32 %v1034_v5, 0.0  ;;  %v1494_v18 = vmax.f32 %v1290_v6, 0.0 }
 0x125   : > { %2950 = vst [vmem:[%s3483_s29 + $0x80] sm:$0xff] %v2698_v9   ;;  %2982 = vst [vmem:[%s3483_s29 + $0x180] sm:$0xff] %v2858_v10   ;;  %v1037_v15 = vadd.f32 %v3110_v13, %v3468_v4  ;;  %v1293_v16 = vadd.f32 %v3174_v14, %v3468_v4  ;;  %v1428_v25 = vmax.f32 %v1026_v11, 0.0 }
 0x126   : > { %v1028_v19 = vpop.f32.mrf.mxu0  ;;  %v1284_v20 = vpop.f32.mrf.mxu1  ;;  %v1492_v26 = vmax.f32 %v1282_v12, 0.0 }
 0x127   : > { %v1431_v21 = vmax.f32 %v1037_v15, 0.0  ;;  %v1495_v22 = vmax.f32 %v1293_v16, 0.0  ;;  %v1029_v23 = vadd.f32 %v3468_v4, %v1028_v19  ;;  %v1285_v24 = vadd.f32 %v3468_v4, %v1284_v20 }
 0x128   : > { %v3113_v27 = vpop.f32.mrf.mxu0  ;;  %v3177_v28 = vpop.f32.mrf.mxu1 }
 0x129   : > { %v2713_v29 = vpack.c.bf16 %v1431_v21, %v1430_v17  ;;  %v2873_v30 = vpack.c.bf16 %v1495_v22, %v1494_v18  ;;  %v1429_v31 = vmax.f32 %v1029_v23, 0.0  ;;  %v1493_v32 = vmax.f32 %v1285_v24, 0.0 }
 0x12a   : > { %v1050_v33 = vadd.f32 %v3113_v27, %v3468_v4  ;;  %v1306_v34 = vadd.f32 %v3177_v28, %v3468_v4  ;;  %v1041_v35 = vpop.f32.mrf.mxu0  ;;  %v1297_v36 = vpop.f32.mrf.mxu1 }
 0x12b   : > { %2953 = vst [vmem:[%s3483_s29 + $0x98] sm:$0xff] %v2713_v29   ;;  %2985 = vst [vmem:[%s3483_s29 + $0x198] sm:$0xff] %v2873_v30   ;;  %v2708_v37 = vpack.c.bf16 %v1429_v31, %v1428_v25  ;;  %v2868_v38 = vpack.c.bf16 %v1493_v32, %v1492_v26  ;;  %v1042_v39 = vadd.f32 %v3468_v4, %v1041_v35 }
 0x12c   : > { %v1298_v40 = vadd.f32 %v3468_v4, %v1297_v36  ;;  %v3114_v41 = vpop.f32.mrf.mxu0  ;;  %v3178_v42 = vpop.f32.mrf.mxu1  ;;  %v1434_v45 = vmax.f32 %v1050_v33, 0.0  ;;  %v1498_v46 = vmax.f32 %v1306_v34, 0.0 }
 0x12d   : > { %2952 = vst [vmem:[%s3483_s29 + $0x90] sm:$0xff] %v2708_v37   ;;  %2984 = vst [vmem:[%s3483_s29 + $0x190] sm:$0xff] %v2868_v38   ;;  %v1053_v43 = vadd.f32 %v3114_v41, %v3468_v4  ;;  %v1309_v44 = vadd.f32 %v3178_v42, %v3468_v4  ;;  %v1432_v53 = vmax.f32 %v1042_v39, 0.0 }
 0x12e   : > { %v1044_v47 = vpop.f32.mrf.mxu0  ;;  %v1300_v48 = vpop.f32.mrf.mxu1  ;;  %v1496_v54 = vmax.f32 %v1298_v40, 0.0 }
 0x12f   : > { %v1435_v49 = vmax.f32 %v1053_v43, 0.0  ;;  %v1499_v50 = vmax.f32 %v1309_v44, 0.0  ;;  %v1045_v51 = vadd.f32 %v3468_v4, %v1044_v47  ;;  %v1301_v52 = vadd.f32 %v3468_v4, %v1300_v48 }
 0x130   : > { %v3117_v55 = vpop.f32.mrf.mxu0  ;;  %v3181_v56 = vpop.f32.mrf.mxu1 }
 0x131   : > { %v2723_v57 = vpack.c.bf16 %v1435_v49, %v1434_v45  ;;  %v2883_v58 = vpack.c.bf16 %v1499_v50, %v1498_v46  ;;  %v1433_v59 = vmax.f32 %v1045_v51, 0.0  ;;  %v1497_v60 = vmax.f32 %v1301_v52, 0.0 }
 0x132   : > { %v1066_v61 = vadd.f32 %v3117_v55, %v3468_v4  ;;  %v1322_v62 = vadd.f32 %v3181_v56, %v3468_v4  ;;  %v1057_v63 = vpop.f32.mrf.mxu0  ;;  %v1313_v0 = vpop.f32.mrf.mxu1 }
 0x133   : > { %2955 = vst [vmem:[%s3483_s29 + $0xa8] sm:$0xff] %v2723_v57   ;;  %2987 = vst [vmem:[%s3483_s29 + $0x1a8] sm:$0xff] %v2883_v58   ;;  %v2718_v1 = vpack.c.bf16 %v1433_v59, %v1432_v53  ;;  %v2878_v2 = vpack.c.bf16 %v1497_v60, %v1496_v54  ;;  %v1058_v3 = vadd.f32 %v3468_v4, %v1057_v63 }
 0x134   : > { %v1314_v5 = vadd.f32 %v3468_v4, %v1313_v0  ;;  %v3118_v6 = vpop.f32.mrf.mxu0  ;;  %v3182_v7 = vpop.f32.mrf.mxu1  ;;  %v1438_v10 = vmax.f32 %v1066_v61, 0.0  ;;  %v1502_v11 = vmax.f32 %v1322_v62, 0.0 }
 0x135   : > { %2954 = vst [vmem:[%s3483_s29 + $0xa0] sm:$0xff] %v2718_v1   ;;  %2986 = vst [vmem:[%s3483_s29 + $0x1a0] sm:$0xff] %v2878_v2   ;;  %v1069_v8 = vadd.f32 %v3118_v6, %v3468_v4  ;;  %v1325_v9 = vadd.f32 %v3182_v7, %v3468_v4  ;;  %v1436_v18 = vmax.f32 %v1058_v3, 0.0 }
 0x136   : > { %v1060_v12 = vpop.f32.mrf.mxu0  ;;  %v1316_v13 = vpop.f32.mrf.mxu1  ;;  %v1500_v19 = vmax.f32 %v1314_v5, 0.0 }
 0x137   : > { %v1439_v14 = vmax.f32 %v1069_v8, 0.0  ;;  %v1503_v15 = vmax.f32 %v1325_v9, 0.0  ;;  %v1061_v16 = vadd.f32 %v3468_v4, %v1060_v12  ;;  %v1317_v17 = vadd.f32 %v3468_v4, %v1316_v13 }
 0x138   : > { %v3121_v20 = vpop.f32.mrf.mxu0  ;;  %v3185_v21 = vpop.f32.mrf.mxu1 }
 0x139   : > { %v2733_v22 = vpack.c.bf16 %v1439_v14, %v1438_v10  ;;  %v2893_v23 = vpack.c.bf16 %v1503_v15, %v1502_v11  ;;  %v1437_v24 = vmax.f32 %v1061_v16, 0.0  ;;  %v1501_v25 = vmax.f32 %v1317_v17, 0.0 }
 0x13a   : > { %v1082_v26 = vadd.f32 %v3121_v20, %v3468_v4  ;;  %v1338_v27 = vadd.f32 %v3185_v21, %v3468_v4  ;;  %v1073_v28 = vpop.f32.mrf.mxu0  ;;  %v1329_v29 = vpop.f32.mrf.mxu1 }
 0x13b   : > { %2957 = vst [vmem:[%s3483_s29 + $0xb8] sm:$0xff] %v2733_v22   ;;  %2989 = vst [vmem:[%s3483_s29 + $0x1b8] sm:$0xff] %v2893_v23   ;;  %v2728_v30 = vpack.c.bf16 %v1437_v24, %v1436_v18  ;;  %v2888_v31 = vpack.c.bf16 %v1501_v25, %v1500_v19  ;;  %v1074_v32 = vadd.f32 %v3468_v4, %v1073_v28 }
 0x13c   : > { %v1330_v33 = vadd.f32 %v3468_v4, %v1329_v29  ;;  %v3122_v34 = vpop.f32.mrf.mxu0  ;;  %v3186_v35 = vpop.f32.mrf.mxu1  ;;  %v1442_v38 = vmax.f32 %v1082_v26, 0.0  ;;  %v1506_v39 = vmax.f32 %v1338_v27, 0.0 }
 0x13d   : > { %2956 = vst [vmem:[%s3483_s29 + $0xb0] sm:$0xff] %v2728_v30   ;;  %2988 = vst [vmem:[%s3483_s29 + $0x1b0] sm:$0xff] %v2888_v31   ;;  %v1085_v36 = vadd.f32 %v3122_v34, %v3468_v4  ;;  %v1341_v37 = vadd.f32 %v3186_v35, %v3468_v4  ;;  %v1440_v46 = vmax.f32 %v1074_v32, 0.0 }
 0x13e   : > { %v1076_v40 = vpop.f32.mrf.mxu0  ;;  %v1332_v41 = vpop.f32.mrf.mxu1  ;;  %v1504_v47 = vmax.f32 %v1330_v33, 0.0 }
 0x13f   : > { %v1443_v42 = vmax.f32 %v1085_v36, 0.0  ;;  %v1507_v43 = vmax.f32 %v1341_v37, 0.0  ;;  %v1077_v44 = vadd.f32 %v3468_v4, %v1076_v40  ;;  %v1333_v45 = vadd.f32 %v3468_v4, %v1332_v41 }
 0x140   : > { %v3125_v48 = vpop.f32.mrf.mxu0  ;;  %v3189_v49 = vpop.f32.mrf.mxu1 }
 0x141   : > { %v2743_v50 = vpack.c.bf16 %v1443_v42, %v1442_v38  ;;  %v2903_v51 = vpack.c.bf16 %v1507_v43, %v1506_v39  ;;  %v1441_v52 = vmax.f32 %v1077_v44, 0.0  ;;  %v1505_v53 = vmax.f32 %v1333_v45, 0.0 }
 0x142   : > { %v1098_v54 = vadd.f32 %v3125_v48, %v3468_v4  ;;  %v1354_v55 = vadd.f32 %v3189_v49, %v3468_v4  ;;  %v1089_v56 = vpop.f32.mrf.mxu0  ;;  %v1345_v57 = vpop.f32.mrf.mxu1 }
 0x143   : > { %2959 = vst [vmem:[%s3483_s29 + $0xc8] sm:$0xff] %v2743_v50   ;;  %2991 = vst [vmem:[%s3483_s29 + $0x1c8] sm:$0xff] %v2903_v51   ;;  %v2738_v58 = vpack.c.bf16 %v1441_v52, %v1440_v46  ;;  %v2898_v59 = vpack.c.bf16 %v1505_v53, %v1504_v47  ;;  %v1090_v60 = vadd.f32 %v3468_v4, %v1089_v56 }
 0x144   : > { %v1346_v61 = vadd.f32 %v3468_v4, %v1345_v57  ;;  %v3126_v62 = vpop.f32.mrf.mxu0  ;;  %v3190_v63 = vpop.f32.mrf.mxu1  ;;  %v1446_v2 = vmax.f32 %v1098_v54, 0.0  ;;  %v1510_v3 = vmax.f32 %v1354_v55, 0.0 }
 0x145   : > { %2958 = vst [vmem:[%s3483_s29 + $0xc0] sm:$0xff] %v2738_v58   ;;  %2990 = vst [vmem:[%s3483_s29 + $0x1c0] sm:$0xff] %v2898_v59   ;;  %v1101_v0 = vadd.f32 %v3126_v62, %v3468_v4  ;;  %v1357_v1 = vadd.f32 %v3190_v63, %v3468_v4  ;;  %v1444_v11 = vmax.f32 %v1090_v60, 0.0 }
 0x146   : > { %v1092_v5 = vpop.f32.mrf.mxu0  ;;  %v1348_v6 = vpop.f32.mrf.mxu1  ;;  %v1508_v12 = vmax.f32 %v1346_v61, 0.0 }
 0x147   : > { %v1447_v7 = vmax.f32 %v1101_v0, 0.0  ;;  %v1511_v8 = vmax.f32 %v1357_v1, 0.0  ;;  %v1093_v9 = vadd.f32 %v3468_v4, %v1092_v5  ;;  %v1349_v10 = vadd.f32 %v3468_v4, %v1348_v6 }
 0x148   : > { %v3129_v13 = vpop.f32.mrf.mxu0  ;;  %v3193_v14 = vpop.f32.mrf.mxu1 }
 0x149   : > { %v2753_v15 = vpack.c.bf16 %v1447_v7, %v1446_v2  ;;  %v2913_v16 = vpack.c.bf16 %v1511_v8, %v1510_v3  ;;  %v1445_v17 = vmax.f32 %v1093_v9, 0.0  ;;  %v1509_v18 = vmax.f32 %v1349_v10, 0.0 }
 0x14a   : > { %v1114_v19 = vadd.f32 %v3129_v13, %v3468_v4  ;;  %v1370_v20 = vadd.f32 %v3193_v14, %v3468_v4  ;;  %v1105_v21 = vpop.f32.mrf.mxu0  ;;  %v1361_v22 = vpop.f32.mrf.mxu1 }
 0x14b   : > { %2961 = vst [vmem:[%s3483_s29 + $0xd8] sm:$0xff] %v2753_v15   ;;  %2993 = vst [vmem:[%s3483_s29 + $0x1d8] sm:$0xff] %v2913_v16   ;;  %v2748_v23 = vpack.c.bf16 %v1445_v17, %v1444_v11  ;;  %v2908_v24 = vpack.c.bf16 %v1509_v18, %v1508_v12  ;;  %v1106_v25 = vadd.f32 %v3468_v4, %v1105_v21 }
 0x14c   : > { %v1362_v26 = vadd.f32 %v3468_v4, %v1361_v22  ;;  %v3130_v27 = vpop.f32.mrf.mxu0  ;;  %v3194_v28 = vpop.f32.mrf.mxu1  ;;  %v1450_v31 = vmax.f32 %v1114_v19, 0.0  ;;  %v1514_v32 = vmax.f32 %v1370_v20, 0.0 }
 0x14d   : > { %2960 = vst [vmem:[%s3483_s29 + $0xd0] sm:$0xff] %v2748_v23   ;;  %2992 = vst [vmem:[%s3483_s29 + $0x1d0] sm:$0xff] %v2908_v24   ;;  %v1117_v29 = vadd.f32 %v3130_v27, %v3468_v4  ;;  %v1373_v30 = vadd.f32 %v3194_v28, %v3468_v4  ;;  %v1448_v39 = vmax.f32 %v1106_v25, 0.0 }
 0x14e   : > { %v1108_v33 = vpop.f32.mrf.mxu0  ;;  %v1364_v34 = vpop.f32.mrf.mxu1  ;;  %v1512_v40 = vmax.f32 %v1362_v26, 0.0 }
 0x14f   : > { %v1451_v35 = vmax.f32 %v1117_v29, 0.0  ;;  %v1515_v36 = vmax.f32 %v1373_v30, 0.0  ;;  %v1109_v37 = vadd.f32 %v3468_v4, %v1108_v33  ;;  %v1365_v38 = vadd.f32 %v3468_v4, %v1364_v34 }
 0x150   : > { %v3133_v41 = vpop.f32.mrf.mxu0  ;;  %v3197_v42 = vpop.f32.mrf.mxu1 }
 0x151   : > { %v2763_v43 = vpack.c.bf16 %v1451_v35, %v1450_v31  ;;  %v2923_v44 = vpack.c.bf16 %v1515_v36, %v1514_v32  ;;  %v1449_v45 = vmax.f32 %v1109_v37, 0.0  ;;  %v1513_v46 = vmax.f32 %v1365_v38, 0.0 }
 0x152   : > { %v1130_v47 = vadd.f32 %v3133_v41, %v3468_v4  ;;  %v1386_v48 = vadd.f32 %v3197_v42, %v3468_v4  ;;  %v1121_v49 = vpop.f32.mrf.mxu0  ;;  %v1377_v50 = vpop.f32.mrf.mxu1 }
 0x153   : > { %2963 = vst [vmem:[%s3483_s29 + $0xe8] sm:$0xff] %v2763_v43   ;;  %2995 = vst [vmem:[%s3483_s29 + $0x1e8] sm:$0xff] %v2923_v44   ;;  %v2758_v51 = vpack.c.bf16 %v1449_v45, %v1448_v39  ;;  %v2918_v52 = vpack.c.bf16 %v1513_v46, %v1512_v40  ;;  %v1122_v53 = vadd.f32 %v3468_v4, %v1121_v49 }
 0x154   : > { %v1378_v54 = vadd.f32 %v3468_v4, %v1377_v50  ;;  %v3134_v55 = vpop.f32.mrf.mxu0  ;;  %v3198_v56 = vpop.f32.mrf.mxu1  ;;  %v1454_v59 = vmax.f32 %v1130_v47, 0.0  ;;  %v1518_v60 = vmax.f32 %v1386_v48, 0.0 }
 0x155   : > { %2962 = vst [vmem:[%s3483_s29 + $0xe0] sm:$0xff] %v2758_v51   ;;  %2994 = vst [vmem:[%s3483_s29 + $0x1e0] sm:$0xff] %v2918_v52   ;;  %v1133_v57 = vadd.f32 %v3134_v55, %v3468_v4  ;;  %v1389_v58 = vadd.f32 %v3198_v56, %v3468_v4  ;;  %v1452_v3 = vmax.f32 %v1122_v53, 0.0 }
 0x156   : > { %v1124_v61 = vpop.f32.mrf.mxu0  ;;  %v1380_v62 = vpop.f32.mrf.mxu1  ;;  %v1516_v5 = vmax.f32 %v1378_v54, 0.0 }
 0x157   : > { %v1455_v63 = vmax.f32 %v1133_v57, 0.0  ;;  %v1519_v0 = vmax.f32 %v1389_v58, 0.0  ;;  %v1125_v1 = vadd.f32 %v3468_v4, %v1124_v61  ;;  %v1381_v2 = vadd.f32 %v3468_v4, %v1380_v62 }
 0x159   : > { %v2773_v6 = vpack.c.bf16 %v1455_v63, %v1454_v59  ;;  %v2933_v7 = vpack.c.bf16 %v1519_v0, %v1518_v60  ;;  %v1453_v8 = vmax.f32 %v1125_v1, 0.0  ;;  %v1517_v9 = vmax.f32 %v1381_v2, 0.0 }
 0x15b   : > { %2965 = vst [vmem:[%s3483_s29 + $0xf8] sm:$0xff] %v2773_v6   ;;  %2997 = vst [vmem:[%s3483_s29 + $0x1f8] sm:$0xff] %v2933_v7   ;;  %v2768_v10 = vpack.c.bf16 %v1453_v8, %v1452_v3  ;;  %v2928_v11 = vpack.c.bf16 %v1517_v9, %v1516_v5 }
 0x15d   : > { %2964 = vst [vmem:[%s3483_s29 + $0xf0] sm:$0xff] %v2768_v10   ;;  %2996 = vst [vmem:[%s3483_s29 + $0x1f0] sm:$0xff] %v2928_v11  }
 0x15e PF: > { %s13_s12 = sadd.s32 1, %s3288_s12  }
 0x15f   : > { %p10_p4 = scmp.ge.s32.totalorder %s13_s12, 10  }
 0x161   :  { %12 = sbr.rel (!%p10_p4) target bundleno = 1 (0x1), region = 62 }

// kernel: _lambda_.39
= control target key start
LH: loop header
LB: loop body
LE: loop exit
PB: predicated region body
PF: predicated region fallthrough
CT: control target
= control target key end

     0   :  { %s3310_s12 = smov 0   ;;  %s3672_s0 = inlined_call_operand.vmem [shape: bf16[2048,36], index: 0, kind: input, shape index: {}]   ;;  %s3673_s1 = inlined_call_operand.vmem [shape: bf16[36,128], index: 1, kind: input, shape index: {}]   ;;  %s3674_s2 = inlined_call_operand.vmem [shape: f32[1,128], index: 2, kind: input, shape index: {}]   ;;  %s3675_s3 = inlined_call_operand.vmem [shape: bf16[2048,128], index: 3, kind: output, shape index: {}]  }
   0x1 LB: > { %s2216_s13 = sadd.s32 4294967295, %s3288_s12   ;;  %p2220_p0 = scmp.ge.s32.totalorder %s3288_s12, 1  ;;  %s3288_s12 = sphi %s3310_s12, %s13_s12  }
   0x2   : > { %p138_p1 = scmp.lt.s32.totalorder %s3288_s12, 3 }
   0x4   : > { %p139_p2 = pnand %p2220_p0, %p138_p1 }
   0x5   : > { %s2221_s18 = sshll.u32 (!%p139_p2), %s2216_s13, 7 }
   0x6   : > { %142 = sbr.rel (%p139_p2) target bundleno = 350 (0x15e), region = 32  ;;  %p163_p3 = scmp.lt.s32.totalorder (!%p139_p2), %s2221_s18, 255 }
   0xb   : > { %v3215_v0 = vld [vmem:[%s3673_s1 + $0x10] ss:$0 sps:$4 sm:$0x33]   ;;  %vm843_vm0 = vcmask 1041408   ;;  %v3216_v1 = vld [vmem:[%s3673_s1 + $0x8] sm:$0xff]   ;;  %v3217_v3 = vld [vmem:[%s3673_s1] sm:$0xff]  }
   0xc   : > { %3205 = vmatprep.subr.msk.bf16.mxu0 %vm843_vm0, %v3215_v0  ;;  %3206 = vmatprep.subr.msk.bf16.mxu1 %vm843_vm0, %v3215_v0  ;;  %v845_v2 = vsel %vm843_vm0, %v3215_v0, 0  ;;  %s3677_s18 = smov (!%p163_p3, %s2221_s18), 255  ;;  %vm650_vm1 = vcmask 293888  }
   0xd   : > { %3066 = vmatpush3.bf16.msra.mxu0 %v845_v2  ;;  %3202 = vmatpush3.bf16.msra.mxu1 %v845_v2  ;;  %s2222_s21 = sshll.u32 %s3677_s18, 2 }
   0xe   : > { %3067 = vmatprep.subr.bf16.mxu0 %v3216_v1  ;;  %3200 = vmatprep.subr.bf16.mxu1 %v3216_v1  ;;  %s3335_s24 = scalar_lea.vmem %s3672_s0, %s2222_s21  ;;  %s3483_s29 = scalar_lea.vmem %s3675_s3, %s2222_s21 }
   0xf   : > { %v3218_v4 = vld [vmem:[%s3335_s24] sm:$0xff]   ;;  %v3220_v6 = vld [vmem:[%s3335_s24 + $0x8] sm:$0xff]   ;;  %v3222_v8 = vld [vmem:[%s3335_s24 + $0x10] sm:$0xff]  }
  0x10   : > { %v3219_v5 = vld [vmem:[%s3335_s24 + $0x100] sm:$0xff]   ;;  %3071 = vmatprep.mubr.msk.bf16.mxu0 %vm650_vm1, %v3218_v4  ;;  %v3221_v7 = vld [vmem:[%s3335_s24 + $0x108] sm:$0xff]   ;;  %v3223_v9 = vld [vmem:[%s3335_s24 + $0x110] sm:$0xff]  }
  0x11   : > { %3068 = vmatpush3.bf16.msra.mxu0 %v3216_v1  ;;  %3203 = vmatpush3.bf16.msra.mxu1 %v3216_v1  ;;  %v3224_v10 = vld [vmem:[%s3335_s24 + $0x18] sm:$0xff]   ;;  %v3226_v12 = vld [vmem:[%s3335_s24 + $0x20] sm:$0xff]   ;;  %v3228_v14 = vld [vmem:[%s3335_s24 + $0x28] sm:$0xff]  }
  0x12   : > { %3069 = vmatprep.subr.bf16.mxu0 %v3217_v3  ;;  %3201 = vmatprep.subr.bf16.mxu1 %v3217_v3  ;;  %v3225_v11 = vld [vmem:[%s3335_s24 + $0x118] sm:$0xff]   ;;  %v3227_v13 = vld [vmem:[%s3335_s24 + $0x120] sm:$0xff]   ;;  %v3229_v15 = vld [vmem:[%s3335_s24 + $0x128] sm:$0xff]  }
  0x13   : > { %3135 = vmatprep.mubr.msk.bf16.mxu1 %vm650_vm1, %v3219_v5  ;;  %v3230_v16 = vld [vmem:[%s3335_s24 + $0x30] sm:$0xff]   ;;  %v3232_v18 = vld [vmem:[%s3335_s24 + $0x38] sm:$0xff]   ;;  %v3234_v20 = vld [vmem:[%s3335_s24 + $0x40] sm:$0xff]  }
  0x14   : > { %v3231_v17 = vld [vmem:[%s3335_s24 + $0x130] sm:$0xff]   ;;  %v3233_v19 = vld [vmem:[%s3335_s24 + $0x138] sm:$0xff]   ;;  %v3235_v21 = vld [vmem:[%s3335_s24 + $0x140] sm:$0xff]  }
  0x15   : > { %3070 = vmatpush3.bf16.msra.mxu0 %v3217_v3  ;;  %3204 = vmatpush3.bf16.msra.mxu1 %v3217_v3  ;;  %v3236_v22 = vld [vmem:[%s3335_s24 + $0x48] sm:$0xff]   ;;  %v3238_v24 = vld [vmem:[%s3335_s24 + $0x50] sm:$0xff]   ;;  %v3240_v26 = vld [vmem:[%s3335_s24 + $0x58] sm:$0xff]  }
  0x16   : > { %v3237_v23 = vld [vmem:[%s3335_s24 + $0x148] sm:$0xff]   ;;  %v3239_v25 = vld [vmem:[%s3335_s24 + $0x150] sm:$0xff]   ;;  %v3241_v27 = vld [vmem:[%s3335_s24 + $0x158] sm:$0xff]  }
  0x17   : > { %v3242_v28 = vld [vmem:[%s3335_s24 + $0x60] sm:$0xff]   ;;  %v3244_v30 = vld [vmem:[%s3335_s24 + $0x68] sm:$0xff]   ;;  %v3246_v32 = vld [vmem:[%s3335_s24 + $0x70] sm:$0xff]  }
  0x18   : > { %3072 = vmatmul.mubr.msk.bf16.vlgmr.msra.gmra.mxu0 %vm650_vm1, %v3220_v6  ;;  %3136 = vmatmul.mubr.msk.bf16.vlgmr.msra.gmra.mxu1 %vm650_vm1, %v3221_v7  ;;  %v3243_v29 = vld [vmem:[%s3335_s24 + $0x160] sm:$0xff]   ;;  %v3245_v31 = vld [vmem:[%s3335_s24 + $0x168] sm:$0xff]   ;;  %v3247_v33 = vld [vmem:[%s3335_s24 + $0x170] sm:$0xff]  }
  0x19   : > { %3075 = vmatprep.mubr.msk.bf16.mxu0 %vm650_vm1, %v3222_v8  ;;  %3139 = vmatprep.mubr.msk.bf16.mxu1 %vm650_vm1, %v3223_v9  ;;  %v3248_v34 = vld [vmem:[%s3335_s24 + $0x78] sm:$0xff]   ;;  %v3250_v36 = vld [vmem:[%s3335_s24 + $0x80] sm:$0xff]   ;;  %v3252_v38 = vld [vmem:[%s3335_s24 + $0x88] sm:$0xff]  }
  0x1a   : > { %v3249_v35 = vld [vmem:[%s3335_s24 + $0x178] sm:$0xff]   ;;  %v3251_v37 = vld [vmem:[%s3335_s24 + $0x180] sm:$0xff]   ;;  %v3253_v39 = vld [vmem:[%s3335_s24 + $0x188] sm:$0xff]  }
  0x1b   : > { %v3254_v40 = vld [vmem:[%s3335_s24 + $0x90] sm:$0xff]   ;;  %v3256_v42 = vld [vmem:[%s3335_s24 + $0x98] sm:$0xff]   ;;  %v3258_v44 = vld [vmem:[%s3335_s24 + $0xa0] sm:$0xff]  }
  0x1c   : > { %v3255_v41 = vld [vmem:[%s3335_s24 + $0x190] sm:$0xff]   ;;  %v3257_v43 = vld [vmem:[%s3335_s24 + $0x198] sm:$0xff]   ;;  %v3259_v45 = vld [vmem:[%s3335_s24 + $0x1a0] sm:$0xff]  }
  0x1d   : > { %v3260_v46 = vld [vmem:[%s3335_s24 + $0xa8] sm:$0xff]   ;;  %v3262_v48 = vld [vmem:[%s3335_s24 + $0xb0] sm:$0xff]   ;;  %v3264_v50 = vld [vmem:[%s3335_s24 + $0xb8] sm:$0xff]  }
  0x1e   : > { %v3261_v47 = vld [vmem:[%s3335_s24 + $0x1a8] sm:$0xff]   ;;  %v3263_v49 = vld [vmem:[%s3335_s24 + $0x1b0] sm:$0xff]   ;;  %v3265_v51 = vld [vmem:[%s3335_s24 + $0x1b8] sm:$0xff]  }
  0x1f   : > { %v3266_v52 = vld [vmem:[%s3335_s24 + $0xc0] sm:$0xff]   ;;  %v3268_v54 = vld [vmem:[%s3335_s24 + $0xc8] sm:$0xff]   ;;  %v3270_v56 = vld [vmem:[%s3335_s24 + $0xd0] sm:$0xff]  }
  0x20   : > { %3076 = vmatmul.mubr.msk.bf16.gmra.mxu0 %vm650_vm1, %v3224_v10  ;;  %3140 = vmatmul.mubr.msk.bf16.gmra.mxu1 %vm650_vm1, %v3225_v11  ;;  %v3267_v53 = vld [vmem:[%s3335_s24 + $0x1c0] sm:$0xff]   ;;  %v3269_v55 = vld [vmem:[%s3335_s24 + $0x1c8] sm:$0xff]   ;;  %v3271_v57 = vld [vmem:[%s3335_s24 + $0x1d0] sm:$0xff]  }
  0x21   : > { %3079 = vmatprep.mubr.msk.bf16.mxu0 %vm650_vm1, %v3226_v12  ;;  %3143 = vmatprep.mubr.msk.bf16.mxu1 %vm650_vm1, %v3227_v13  ;;  %v3272_v58 = vld [vmem:[%s3335_s24 + $0xd8] sm:$0xff]   ;;  %v3274_v60 = vld [vmem:[%s3335_s24 + $0xe0] sm:$0xff]   ;;  %v3276_v62 = vld [vmem:[%s3335_s24 + $0xe8] sm:$0xff]  }
  0x22   : > { %v3273_v59 = vld [vmem:[%s3335_s24 + $0x1d8] sm:$0xff]   ;;  %v3275_v61 = vld [vmem:[%s3335_s24 + $0x1e0] sm:$0xff]   ;;  %v3277_v63 = vld [vmem:[%s3335_s24 + $0x1e8] sm:$0xff]  }
  0x23   : > { %v3278_v0 = vld [vmem:[%s3335_s24 + $0xf0] sm:$0xff]   ;;  %v3280_v2 = vld [vmem:[%s3335_s24 + $0xf8] sm:$0xff]   ;;  %v3468_v4 = vld [vmem:[%s3674_s2] ss:$0 sm:$0xff] }
  0x24   : > { %v3279_v1 = vld [vmem:[%s3335_s24 + $0x1f0] sm:$0xff]   ;;  %v3281_v3 = vld [vmem:[%s3335_s24 + $0x1f8] sm:$0xff]  }
  0x28   : > { %3080 = vmatmul.mubr.msk.bf16.gmra.mxu0 %vm650_vm1, %v3228_v14  ;;  %3144 = vmatmul.mubr.msk.bf16.gmra.mxu1 %vm650_vm1, %v3229_v15 }
  0x29   : > { %3083 = vmatprep.mubr.msk.bf16.mxu0 %vm650_vm1, %v3230_v16  ;;  %3147 = vmatprep.mubr.msk.bf16.mxu1 %vm650_vm1, %v3231_v17 }
  0x30   : > { %3084 = vmatmul.mubr.msk.bf16.gmra.mxu0 %vm650_vm1, %v3232_v18  ;;  %3148 = vmatmul.mubr.msk.bf16.gmra.mxu1 %vm650_vm1, %v3233_v19 }
  0x31   : > { %3087 = vmatprep.mubr.msk.bf16.mxu0 %vm650_vm1, %v3234_v20  ;;  %3151 = vmatprep.mubr.msk.bf16.mxu1 %vm650_vm1, %v3235_v21 }
  0x38   : > { %3088 = vmatmul.mubr.msk.bf16.gmra.mxu0 %vm650_vm1, %v3236_v22  ;;  %3152 = vmatmul.mubr.msk.bf16.gmra.mxu1 %vm650_vm1, %v3237_v23 }
  0x39   : > { %3091 = vmatprep.mubr.msk.bf16.mxu0 %vm650_vm1, %v3238_v24  ;;  %3155 = vmatprep.mubr.msk.bf16.mxu1 %vm650_vm1, %v3239_v25 }
  0x40   : > { %3092 = vmatmul.mubr.msk.bf16.gmra.mxu0 %vm650_vm1, %v3240_v26  ;;  %3156 = vmatmul.mubr.msk.bf16.gmra.mxu1 %vm650_vm1, %v3241_v27 }
  0x41   : > { %3095 = vmatprep.mubr.msk.bf16.mxu0 %vm650_vm1, %v3242_v28  ;;  %3159 = vmatprep.mubr.msk.bf16.mxu1 %vm650_vm1, %v3243_v29 }
  0x48   : > { %3096 = vmatmul.mubr.msk.bf16.gmra.mxu0 %vm650_vm1, %v3244_v30  ;;  %3160 = vmatmul.mubr.msk.bf16.gmra.mxu1 %vm650_vm1, %v3245_v31 }
  0x49   : > { %3099 = vmatprep.mubr.msk.bf16.mxu0 %vm650_vm1, %v3246_v32  ;;  %3163 = vmatprep.mubr.msk.bf16.mxu1 %vm650_vm1, %v3247_v33 }
  0x50   : > { %3100 = vmatmul.mubr.msk.bf16.gmra.mxu0 %vm650_vm1, %v3248_v34  ;;  %3164 = vmatmul.mubr.msk.bf16.gmra.mxu1 %vm650_vm1, %v3249_v35 }
  0x51   : > { %3103 = vmatprep.mubr.msk.bf16.mxu0 %vm650_vm1, %v3250_v36  ;;  %3167 = vmatprep.mubr.msk.bf16.mxu1 %vm650_vm1, %v3251_v37 }
  0x58   : > { %3104 = vmatmul.mubr.msk.bf16.gmra.mxu0 %vm650_vm1, %v3252_v38  ;;  %3168 = vmatmul.mubr.msk.bf16.gmra.mxu1 %vm650_vm1, %v3253_v39 }
  0x59   : > { %3107 = vmatprep.mubr.msk.bf16.mxu0 %vm650_vm1, %v3254_v40  ;;  %3171 = vmatprep.mubr.msk.bf16.mxu1 %vm650_vm1, %v3255_v41 }
  0x60   : > { %3108 = vmatmul.mubr.msk.bf16.gmra.mxu0 %vm650_vm1, %v3256_v42  ;;  %3172 = vmatmul.mubr.msk.bf16.gmra.mxu1 %vm650_vm1, %v3257_v43 }
  0x61   : > { %3111 = vmatprep.mubr.msk.bf16.mxu0 %vm650_vm1, %v3258_v44  ;;  %3175 = vmatprep.mubr.msk.bf16.mxu1 %vm650_vm1, %v3259_v45 }
  0x68   : > { %3112 = vmatmul.mubr.msk.bf16.gmra.mxu0 %vm650_vm1, %v3260_v46  ;;  %3176 = vmatmul.mubr.msk.bf16.gmra.mxu1 %vm650_vm1, %v3261_v47 }
  0x69   : > { %3115 = vmatprep.mubr.msk.bf16.mxu0 %vm650_vm1, %v3262_v48  ;;  %3179 = vmatprep.mubr.msk.bf16.mxu1 %vm650_vm1, %v3263_v49 }
  0x70   : > { %3116 = vmatmul.mubr.msk.bf16.gmra.mxu0 %vm650_vm1, %v3264_v50  ;;  %3180 = vmatmul.mubr.msk.bf16.gmra.mxu1 %vm650_vm1, %v3265_v51 }
  0x71   : > { %3119 = vmatprep.mubr.msk.bf16.mxu0 %vm650_vm1, %v3266_v52  ;;  %3183 = vmatprep.mubr.msk.bf16.mxu1 %vm650_vm1, %v3267_v53 }
  0x78   : > { %3120 = vmatmul.mubr.msk.bf16.gmra.mxu0 %vm650_vm1, %v3268_v54  ;;  %3184 = vmatmul.mubr.msk.bf16.gmra.mxu1 %vm650_vm1, %v3269_v55 }
  0x79   : > { %3123 = vmatprep.mubr.msk.bf16.mxu0 %vm650_vm1, %v3270_v56  ;;  %3187 = vmatprep.mubr.msk.bf16.mxu1 %vm650_vm1, %v3271_v57 }
  0x80   : > { %3124 = vmatmul.mubr.msk.bf16.gmra.mxu0 %vm650_vm1, %v3272_v58  ;;  %3188 = vmatmul.mubr.msk.bf16.gmra.mxu1 %vm650_vm1, %v3273_v59 }
  0x81   : > { %3127 = vmatprep.mubr.msk.bf16.mxu0 %vm650_vm1, %v3274_v60  ;;  %3191 = vmatprep.mubr.msk.bf16.mxu1 %vm650_vm1, %v3275_v61 }
  0x88   : > { %3128 = vmatmul.mubr.msk.bf16.gmra.mxu0 %vm650_vm1, %v3276_v62  ;;  %3192 = vmatmul.mubr.msk.bf16.gmra.mxu1 %vm650_vm1, %v3277_v63 }
  0x89   : > { %3131 = vmatprep.mubr.msk.bf16.mxu0 %vm650_vm1, %v3278_v0  ;;  %3195 = vmatprep.mubr.msk.bf16.mxu1 %vm650_vm1, %v3279_v1 }
  0x90   : > { %3132 = vmatmul.mubr.msk.bf16.gmra.mxu0 %vm650_vm1, %v3280_v2  ;;  %3196 = vmatmul.mubr.msk.bf16.gmra.mxu1 %vm650_vm1, %v3281_v3 }
  0xd8   : > { %v3073_v5 = vpop.f32.mrf.mxu0  ;;  %v3137_v6 = vpop.f32.mrf.mxu1 }
  0xd9   : > { %v890_v7 = vadd.f32 %v3073_v5, %v3468_v4  ;;  %v1146_v8 = vadd.f32 %v3137_v6, %v3468_v4 }
  0xda   : > { %v881_v9 = vpop.f32.mrf.mxu0  ;;  %v1137_v10 = vpop.f32.mrf.mxu1 }
  0xdb   : > { %v882_v11 = vadd.f32 %v3468_v4, %v881_v9  ;;  %v1138_v12 = vadd.f32 %v3468_v4, %v1137_v10  ;;  %v1394_v17 = vmax.f32 %v890_v7, 0.0  ;;  %v1458_v18 = vmax.f32 %v1146_v8, 0.0 }
  0xdc   : > { %v3074_v13 = vpop.f32.mrf.mxu0  ;;  %v3138_v14 = vpop.f32.mrf.mxu1 }
  0xdd   : > { %v893_v15 = vadd.f32 %v3074_v13, %v3468_v4  ;;  %v1149_v16 = vadd.f32 %v3138_v14, %v3468_v4  ;;  %v1392_v25 = vmax.f32 %v882_v11, 0.0  ;;  %v1456_v26 = vmax.f32 %v1138_v12, 0.0 }
  0xde   : > { %v884_v19 = vpop.f32.mrf.mxu0  ;;  %v1140_v20 = vpop.f32.mrf.mxu1 }
  0xdf   : > { %v1395_v21 = vmax.f32 %v893_v15, 0.0  ;;  %v1459_v22 = vmax.f32 %v1149_v16, 0.0  ;;  %v885_v23 = vadd.f32 %v3468_v4, %v884_v19  ;;  %v1141_v24 = vadd.f32 %v3468_v4, %v1140_v20 }
  0xe0   : > { %v3077_v27 = vpop.f32.mrf.mxu0  ;;  %v3141_v28 = vpop.f32.mrf.mxu1 }
  0xe1   : > { %v2623_v29 = vpack.c.bf16 %v1395_v21, %v1394_v17  ;;  %v2783_v30 = vpack.c.bf16 %v1459_v22, %v1458_v18  ;;  %v1393_v31 = vmax.f32 %v885_v23, 0.0  ;;  %v1457_v32 = vmax.f32 %v1141_v24, 0.0 }
  0xe2   : > { %v906_v33 = vadd.f32 %v3077_v27, %v3468_v4  ;;  %v1162_v34 = vadd.f32 %v3141_v28, %v3468_v4  ;;  %v897_v35 = vpop.f32.mrf.mxu0  ;;  %v1153_v36 = vpop.f32.mrf.mxu1 }
  0xe3   : > { %2935 = vst [vmem:[%s3483_s29 + $0x8] sm:$0xff] %v2623_v29   ;;  %2967 = vst [vmem:[%s3483_s29 + $0x108] sm:$0xff] %v2783_v30   ;;  %v2618_v37 = vpack.c.bf16 %v1393_v31, %v1392_v25  ;;  %v2778_v38 = vpack.c.bf16 %v1457_v32, %v1456_v26  ;;  %v898_v39 = vadd.f32 %v3468_v4, %v897_v35 }
  0xe4   : > { %v1154_v40 = vadd.f32 %v3468_v4, %v1153_v36  ;;  %v3078_v41 = vpop.f32.mrf.mxu0  ;;  %v3142_v42 = vpop.f32.mrf.mxu1  ;;  %v1398_v45 = vmax.f32 %v906_v33, 0.0  ;;  %v1462_v46 = vmax.f32 %v1162_v34, 0.0 }
  0xe5   : > { %2619 = vst [vmem:[%s3483_s29] sm:$0xff] %v2618_v37   ;;  %2966 = vst [vmem:[%s3483_s29 + $0x100] sm:$0xff] %v2778_v38   ;;  %v909_v43 = vadd.f32 %v3078_v41, %v3468_v4  ;;  %v1165_v44 = vadd.f32 %v3142_v42, %v3468_v4  ;;  %v1396_v53 = vmax.f32 %v898_v39, 0.0 }
  0xe6   : > { %v900_v47 = vpop.f32.mrf.mxu0  ;;  %v1156_v48 = vpop.f32.mrf.mxu1  ;;  %v1460_v54 = vmax.f32 %v1154_v40, 0.0 }
  0xe7   : > { %v1399_v49 = vmax.f32 %v909_v43, 0.0  ;;  %v1463_v50 = vmax.f32 %v1165_v44, 0.0  ;;  %v901_v51 = vadd.f32 %v3468_v4, %v900_v47  ;;  %v1157_v52 = vadd.f32 %v3468_v4, %v1156_v48 }
  0xe8   : > { %v3081_v55 = vpop.f32.mrf.mxu0  ;;  %v3145_v56 = vpop.f32.mrf.mxu1 }
  0xe9   : > { %v2633_v57 = vpack.c.bf16 %v1399_v49, %v1398_v45  ;;  %v2793_v58 = vpack.c.bf16 %v1463_v50, %v1462_v46  ;;  %v1397_v59 = vmax.f32 %v901_v51, 0.0  ;;  %v1461_v60 = vmax.f32 %v1157_v52, 0.0 }
  0xea   : > { %v922_v61 = vadd.f32 %v3081_v55, %v3468_v4  ;;  %v1178_v62 = vadd.f32 %v3145_v56, %v3468_v4  ;;  %v913_v63 = vpop.f32.mrf.mxu0  ;;  %v1169_v0 = vpop.f32.mrf.mxu1 }
  0xeb   : > { %2937 = vst [vmem:[%s3483_s29 + $0x18] sm:$0xff] %v2633_v57   ;;  %2969 = vst [vmem:[%s3483_s29 + $0x118] sm:$0xff] %v2793_v58   ;;  %v2628_v1 = vpack.c.bf16 %v1397_v59, %v1396_v53  ;;  %v2788_v2 = vpack.c.bf16 %v1461_v60, %v1460_v54  ;;  %v914_v3 = vadd.f32 %v3468_v4, %v913_v63 }
  0xec   : > { %v1170_v5 = vadd.f32 %v3468_v4, %v1169_v0  ;;  %v3082_v6 = vpop.f32.mrf.mxu0  ;;  %v3146_v7 = vpop.f32.mrf.mxu1  ;;  %v1402_v10 = vmax.f32 %v922_v61, 0.0  ;;  %v1466_v11 = vmax.f32 %v1178_v62, 0.0 }
  0xed   : > { %2936 = vst [vmem:[%s3483_s29 + $0x10] sm:$0xff] %v2628_v1   ;;  %2968 = vst [vmem:[%s3483_s29 + $0x110] sm:$0xff] %v2788_v2   ;;  %v925_v8 = vadd.f32 %v3082_v6, %v3468_v4  ;;  %v1181_v9 = vadd.f32 %v3146_v7, %v3468_v4  ;;  %v1400_v18 = vmax.f32 %v914_v3, 0.0 }
  0xee   : > { %v916_v12 = vpop.f32.mrf.mxu0  ;;  %v1172_v13 = vpop.f32.mrf.mxu1  ;;  %v1464_v19 = vmax.f32 %v1170_v5, 0.0 }
  0xef   : > { %v1403_v14 = vmax.f32 %v925_v8, 0.0  ;;  %v1467_v15 = vmax.f32 %v1181_v9, 0.0  ;;  %v917_v16 = vadd.f32 %v3468_v4, %v916_v12  ;;  %v1173_v17 = vadd.f32 %v3468_v4, %v1172_v13 }
  0xf0   : > { %v3085_v20 = vpop.f32.mrf.mxu0  ;;  %v3149_v21 = vpop.f32.mrf.mxu1 }
  0xf1   : > { %v2643_v22 = vpack.c.bf16 %v1403_v14, %v1402_v10  ;;  %v2803_v23 = vpack.c.bf16 %v1467_v15, %v1466_v11  ;;  %v1401_v24 = vmax.f32 %v917_v16, 0.0  ;;  %v1465_v25 = vmax.f32 %v1173_v17, 0.0 }
  0xf2   : > { %v938_v26 = vadd.f32 %v3085_v20, %v3468_v4  ;;  %v1194_v27 = vadd.f32 %v3149_v21, %v3468_v4  ;;  %v929_v28 = vpop.f32.mrf.mxu0  ;;  %v1185_v29 = vpop.f32.mrf.mxu1 }
  0xf3   : > { %2939 = vst [vmem:[%s3483_s29 + $0x28] sm:$0xff] %v2643_v22   ;;  %2971 = vst [vmem:[%s3483_s29 + $0x128] sm:$0xff] %v2803_v23   ;;  %v2638_v30 = vpack.c.bf16 %v1401_v24, %v1400_v18  ;;  %v2798_v31 = vpack.c.bf16 %v1465_v25, %v1464_v19  ;;  %v930_v32 = vadd.f32 %v3468_v4, %v929_v28 }
  0xf4   : > { %v1186_v33 = vadd.f32 %v3468_v4, %v1185_v29  ;;  %v3086_v34 = vpop.f32.mrf.mxu0  ;;  %v3150_v35 = vpop.f32.mrf.mxu1  ;;  %v1406_v38 = vmax.f32 %v938_v26, 0.0  ;;  %v1470_v39 = vmax.f32 %v1194_v27, 0.0 }
  0xf5   : > { %2938 = vst [vmem:[%s3483_s29 + $0x20] sm:$0xff] %v2638_v30   ;;  %2970 = vst [vmem:[%s3483_s29 + $0x120] sm:$0xff] %v2798_v31   ;;  %v941_v36 = vadd.f32 %v3086_v34, %v3468_v4  ;;  %v1197_v37 = vadd.f32 %v3150_v35, %v3468_v4  ;;  %v1404_v46 = vmax.f32 %v930_v32, 0.0 }
  0xf6   : > { %v932_v40 = vpop.f32.mrf.mxu0  ;;  %v1188_v41 = vpop.f32.mrf.mxu1  ;;  %v1468_v47 = vmax.f32 %v1186_v33, 0.0 }
  0xf7   : > { %v1407_v42 = vmax.f32 %v941_v36, 0.0  ;;  %v1471_v43 = vmax.f32 %v1197_v37, 0.0  ;;  %v933_v44 = vadd.f32 %v3468_v4, %v932_v40  ;;  %v1189_v45 = vadd.f32 %v3468_v4, %v1188_v41 }
  0xf8   : > { %v3089_v48 = vpop.f32.mrf.mxu0  ;;  %v3153_v49 = vpop.f32.mrf.mxu1 }
  0xf9   : > { %v2653_v50 = vpack.c.bf16 %v1407_v42, %v1406_v38  ;;  %v2813_v51 = vpack.c.bf16 %v1471_v43, %v1470_v39  ;;  %v1405_v52 = vmax.f32 %v933_v44, 0.0  ;;  %v1469_v53 = vmax.f32 %v1189_v45, 0.0 }
  0xfa   : > { %v954_v54 = vadd.f32 %v3089_v48, %v3468_v4  ;;  %v1210_v55 = vadd.f32 %v3153_v49, %v3468_v4  ;;  %v945_v56 = vpop.f32.mrf.mxu0  ;;  %v1201_v57 = vpop.f32.mrf.mxu1 }
  0xfb   : > { %2941 = vst [vmem:[%s3483_s29 + $0x38] sm:$0xff] %v2653_v50   ;;  %2973 = vst [vmem:[%s3483_s29 + $0x138] sm:$0xff] %v2813_v51   ;;  %v2648_v58 = vpack.c.bf16 %v1405_v52, %v1404_v46  ;;  %v2808_v59 = vpack.c.bf16 %v1469_v53, %v1468_v47  ;;  %v946_v60 = vadd.f32 %v3468_v4, %v945_v56 }
  0xfc   : > { %v1202_v61 = vadd.f32 %v3468_v4, %v1201_v57  ;;  %v3090_v62 = vpop.f32.mrf.mxu0  ;;  %v3154_v63 = vpop.f32.mrf.mxu1  ;;  %v1410_v2 = vmax.f32 %v954_v54, 0.0  ;;  %v1474_v3 = vmax.f32 %v1210_v55, 0.0 }
  0xfd   : > { %2940 = vst [vmem:[%s3483_s29 + $0x30] sm:$0xff] %v2648_v58   ;;  %2972 = vst [vmem:[%s3483_s29 + $0x130] sm:$0xff] %v2808_v59   ;;  %v957_v0 = vadd.f32 %v3090_v62, %v3468_v4  ;;  %v1213_v1 = vadd.f32 %v3154_v63, %v3468_v4  ;;  %v1408_v11 = vmax.f32 %v946_v60, 0.0 }
  0xfe   : > { %v948_v5 = vpop.f32.mrf.mxu0  ;;  %v1204_v6 = vpop.f32.mrf.mxu1  ;;  %v1472_v12 = vmax.f32 %v1202_v61, 0.0 }
  0xff   : > { %v1411_v7 = vmax.f32 %v957_v0, 0.0  ;;  %v1475_v8 = vmax.f32 %v1213_v1, 0.0  ;;  %v949_v9 = vadd.f32 %v3468_v4, %v948_v5  ;;  %v1205_v10 = vadd.f32 %v3468_v4, %v1204_v6 }
 0x100   : > { %v3093_v13 = vpop.f32.mrf.mxu0  ;;  %v3157_v14 = vpop.f32.mrf.mxu1 }
 0x101   : > { %v2663_v15 = vpack.c.bf16 %v1411_v7, %v1410_v2  ;;  %v2823_v16 = vpack.c.bf16 %v1475_v8, %v1474_v3  ;;  %v1409_v17 = vmax.f32 %v949_v9, 0.0  ;;  %v1473_v18 = vmax.f32 %v1205_v10, 0.0 }
 0x102   : > { %v970_v19 = vadd.f32 %v3093_v13, %v3468_v4  ;;  %v1226_v20 = vadd.f32 %v3157_v14, %v3468_v4  ;;  %v961_v21 = vpop.f32.mrf.mxu0  ;;  %v1217_v22 = vpop.f32.mrf.mxu1 }
 0x103   : > { %2943 = vst [vmem:[%s3483_s29 + $0x48] sm:$0xff] %v2663_v15   ;;  %2975 = vst [vmem:[%s3483_s29 + $0x148] sm:$0xff] %v2823_v16   ;;  %v2658_v23 = vpack.c.bf16 %v1409_v17, %v1408_v11  ;;  %v2818_v24 = vpack.c.bf16 %v1473_v18, %v1472_v12  ;;  %v962_v25 = vadd.f32 %v3468_v4, %v961_v21 }
 0x104   : > { %v1218_v26 = vadd.f32 %v3468_v4, %v1217_v22  ;;  %v3094_v27 = vpop.f32.mrf.mxu0  ;;  %v3158_v28 = vpop.f32.mrf.mxu1  ;;  %v1414_v31 = vmax.f32 %v970_v19, 0.0  ;;  %v1478_v32 = vmax.f32 %v1226_v20, 0.0 }
 0x105   : > { %2942 = vst [vmem:[%s3483_s29 + $0x40] sm:$0xff] %v2658_v23   ;;  %2974 = vst [vmem:[%s3483_s29 + $0x140] sm:$0xff] %v2818_v24   ;;  %v973_v29 = vadd.f32 %v3094_v27, %v3468_v4  ;;  %v1229_v30 = vadd.f32 %v3158_v28, %v3468_v4  ;;  %v1412_v39 = vmax.f32 %v962_v25, 0.0 }
 0x106   : > { %v964_v33 = vpop.f32.mrf.mxu0  ;;  %v1220_v34 = vpop.f32.mrf.mxu1  ;;  %v1476_v40 = vmax.f32 %v1218_v26, 0.0 }
 0x107   : > { %v1415_v35 = vmax.f32 %v973_v29, 0.0  ;;  %v1479_v36 = vmax.f32 %v1229_v30, 0.0  ;;  %v965_v37 = vadd.f32 %v3468_v4, %v964_v33  ;;  %v1221_v38 = vadd.f32 %v3468_v4, %v1220_v34 }
 0x108   : > { %v3097_v41 = vpop.f32.mrf.mxu0  ;;  %v3161_v42 = vpop.f32.mrf.mxu1 }
 0x109   : > { %v2673_v43 = vpack.c.bf16 %v1415_v35, %v1414_v31  ;;  %v2833_v44 = vpack.c.bf16 %v1479_v36, %v1478_v32  ;;  %v1413_v45 = vmax.f32 %v965_v37, 0.0  ;;  %v1477_v46 = vmax.f32 %v1221_v38, 0.0 }
 0x10a   : > { %v986_v47 = vadd.f32 %v3097_v41, %v3468_v4  ;;  %v1242_v48 = vadd.f32 %v3161_v42, %v3468_v4  ;;  %v977_v49 = vpop.f32.mrf.mxu0  ;;  %v1233_v50 = vpop.f32.mrf.mxu1 }
 0x10b   : > { %2945 = vst [vmem:[%s3483_s29 + $0x58] sm:$0xff] %v2673_v43   ;;  %2977 = vst [vmem:[%s3483_s29 + $0x158] sm:$0xff] %v2833_v44   ;;  %v2668_v51 = vpack.c.bf16 %v1413_v45, %v1412_v39  ;;  %v2828_v52 = vpack.c.bf16 %v1477_v46, %v1476_v40  ;;  %v978_v53 = vadd.f32 %v3468_v4, %v977_v49 }
 0x10c   : > { %v1234_v54 = vadd.f32 %v3468_v4, %v1233_v50  ;;  %v3098_v55 = vpop.f32.mrf.mxu0  ;;  %v3162_v56 = vpop.f32.mrf.mxu1  ;;  %v1418_v59 = vmax.f32 %v986_v47, 0.0  ;;  %v1482_v60 = vmax.f32 %v1242_v48, 0.0 }
 0x10d   : > { %2944 = vst [vmem:[%s3483_s29 + $0x50] sm:$0xff] %v2668_v51   ;;  %2976 = vst [vmem:[%s3483_s29 + $0x150] sm:$0xff] %v2828_v52   ;;  %v989_v57 = vadd.f32 %v3098_v55, %v3468_v4  ;;  %v1245_v58 = vadd.f32 %v3162_v56, %v3468_v4  ;;  %v1416_v3 = vmax.f32 %v978_v53, 0.0 }
 0x10e   : > { %v980_v61 = vpop.f32.mrf.mxu0  ;;  %v1236_v62 = vpop.f32.mrf.mxu1  ;;  %v1480_v5 = vmax.f32 %v1234_v54, 0.0 }
 0x10f   : > { %v1419_v63 = vmax.f32 %v989_v57, 0.0  ;;  %v1483_v0 = vmax.f32 %v1245_v58, 0.0  ;;  %v981_v1 = vadd.f32 %v3468_v4, %v980_v61  ;;  %v1237_v2 = vadd.f32 %v3468_v4, %v1236_v62 }
 0x110   : > { %v3101_v6 = vpop.f32.mrf.mxu0  ;;  %v3165_v7 = vpop.f32.mrf.mxu1 }
 0x111   : > { %v2683_v8 = vpack.c.bf16 %v1419_v63, %v1418_v59  ;;  %v2843_v9 = vpack.c.bf16 %v1483_v0, %v1482_v60  ;;  %v1417_v10 = vmax.f32 %v981_v1, 0.0  ;;  %v1481_v11 = vmax.f32 %v1237_v2, 0.0 }
 0x112   : > { %v1002_v12 = vadd.f32 %v3101_v6, %v3468_v4  ;;  %v1258_v13 = vadd.f32 %v3165_v7, %v3468_v4  ;;  %v993_v14 = vpop.f32.mrf.mxu0  ;;  %v1249_v15 = vpop.f32.mrf.mxu1 }
 0x113   : > { %2947 = vst [vmem:[%s3483_s29 + $0x68] sm:$0xff] %v2683_v8   ;;  %2979 = vst [vmem:[%s3483_s29 + $0x168] sm:$0xff] %v2843_v9   ;;  %v2678_v16 = vpack.c.bf16 %v1417_v10, %v1416_v3  ;;  %v2838_v17 = vpack.c.bf16 %v1481_v11, %v1480_v5  ;;  %v994_v18 = vadd.f32 %v3468_v4, %v993_v14 }
 0x114   : > { %v1250_v19 = vadd.f32 %v3468_v4, %v1249_v15  ;;  %v3102_v20 = vpop.f32.mrf.mxu0  ;;  %v3166_v21 = vpop.f32.mrf.mxu1  ;;  %v1422_v24 = vmax.f32 %v1002_v12, 0.0  ;;  %v1486_v25 = vmax.f32 %v1258_v13, 0.0 }
 0x115   : > { %2946 = vst [vmem:[%s3483_s29 + $0x60] sm:$0xff] %v2678_v16   ;;  %2978 = vst [vmem:[%s3483_s29 + $0x160] sm:$0xff] %v2838_v17   ;;  %v1005_v22 = vadd.f32 %v3102_v20, %v3468_v4  ;;  %v1261_v23 = vadd.f32 %v3166_v21, %v3468_v4  ;;  %v1420_v32 = vmax.f32 %v994_v18, 0.0 }
 0x116   : > { %v996_v26 = vpop.f32.mrf.mxu0  ;;  %v1252_v27 = vpop.f32.mrf.mxu1  ;;  %v1484_v33 = vmax.f32 %v1250_v19, 0.0 }
 0x117   : > { %v1423_v28 = vmax.f32 %v1005_v22, 0.0  ;;  %v1487_v29 = vmax.f32 %v1261_v23, 0.0  ;;  %v997_v30 = vadd.f32 %v3468_v4, %v996_v26  ;;  %v1253_v31 = vadd.f32 %v3468_v4, %v1252_v27 }
 0x118   : > { %v3105_v34 = vpop.f32.mrf.mxu0  ;;  %v3169_v35 = vpop.f32.mrf.mxu1 }
 0x119   : > { %v2693_v36 = vpack.c.bf16 %v1423_v28, %v1422_v24  ;;  %v2853_v37 = vpack.c.bf16 %v1487_v29, %v1486_v25  ;;  %v1421_v38 = vmax.f32 %v997_v30, 0.0  ;;  %v1485_v39 = vmax.f32 %v1253_v31, 0.0 }
 0x11a   : > { %v1018_v40 = vadd.f32 %v3105_v34, %v3468_v4  ;;  %v1274_v41 = vadd.f32 %v3169_v35, %v3468_v4  ;;  %v1009_v42 = vpop.f32.mrf.mxu0  ;;  %v1265_v43 = vpop.f32.mrf.mxu1 }
 0x11b   : > { %2949 = vst [vmem:[%s3483_s29 + $0x78] sm:$0xff] %v2693_v36   ;;  %2981 = vst [vmem:[%s3483_s29 + $0x178] sm:$0xff] %v2853_v37   ;;  %v2688_v44 = vpack.c.bf16 %v1421_v38, %v1420_v32  ;;  %v2848_v45 = vpack.c.bf16 %v1485_v39, %v1484_v33  ;;  %v1010_v46 = vadd.f32 %v3468_v4, %v1009_v42 }
 0x11c   : > { %v1266_v47 = vadd.f32 %v3468_v4, %v1265_v43  ;;  %v3106_v48 = vpop.f32.mrf.mxu0  ;;  %v3170_v49 = vpop.f32.mrf.mxu1  ;;  %v1426_v52 = vmax.f32 %v1018_v40, 0.0  ;;  %v1490_v53 = vmax.f32 %v1274_v41, 0.0 }
 0x11d   : > { %2948 = vst [vmem:[%s3483_s29 + $0x70] sm:$0xff] %v2688_v44   ;;  %2980 = vst [vmem:[%s3483_s29 + $0x170] sm:$0xff] %v2848_v45   ;;  %v1021_v50 = vadd.f32 %v3106_v48, %v3468_v4  ;;  %v1277_v51 = vadd.f32 %v3170_v49, %v3468_v4  ;;  %v1424_v60 = vmax.f32 %v1010_v46, 0.0 }
 0x11e   : > { %v1012_v54 = vpop.f32.mrf.mxu0  ;;  %v1268_v55 = vpop.f32.mrf.mxu1  ;;  %v1488_v61 = vmax.f32 %v1266_v47, 0.0 }
 0x11f   : > { %v1427_v56 = vmax.f32 %v1021_v50, 0.0  ;;  %v1491_v57 = vmax.f32 %v1277_v51, 0.0  ;;  %v1013_v58 = vadd.f32 %v3468_v4, %v1012_v54  ;;  %v1269_v59 = vadd.f32 %v3468_v4, %v1268_v55 }
 0x120   : > { %v3109_v62 = vpop.f32.mrf.mxu0  ;;  %v3173_v63 = vpop.f32.mrf.mxu1 }
 0x121   : > { %v2703_v0 = vpack.c.bf16 %v1427_v56, %v1426_v52  ;;  %v2863_v1 = vpack.c.bf16 %v1491_v57, %v1490_v53  ;;  %v1425_v2 = vmax.f32 %v1013_v58, 0.0  ;;  %v1489_v3 = vmax.f32 %v1269_v59, 0.0 }
 0x122   : > { %v1034_v5 = vadd.f32 %v3109_v62, %v3468_v4  ;;  %v1290_v6 = vadd.f32 %v3173_v63, %v3468_v4  ;;  %v1025_v7 = vpop.f32.mrf.mxu0  ;;  %v1281_v8 = vpop.f32.mrf.mxu1 }
 0x123   : > { %2951 = vst [vmem:[%s3483_s29 + $0x88] sm:$0xff] %v2703_v0   ;;  %2983 = vst [vmem:[%s3483_s29 + $0x188] sm:$0xff] %v2863_v1   ;;  %v2698_v9 = vpack.c.bf16 %v1425_v2, %v1424_v60  ;;  %v2858_v10 = vpack.c.bf16 %v1489_v3, %v1488_v61  ;;  %v1026_v11 = vadd.f32 %v3468_v4, %v1025_v7 }
 0x124   : > { %v1282_v12 = vadd.f32 %v3468_v4, %v1281_v8  ;;  %v3110_v13 = vpop.f32.mrf.mxu0  ;;  %v3174_v14 = vpop.f32.mrf.mxu1  ;;  %v1430_v17 = vmax.f32 %v1034_v5, 0.0  ;;  %v1494_v18 = vmax.f32 %v1290_v6, 0.0 }
 0x125   : > { %2950 = vst [vmem:[%s3483_s29 + $0x80] sm:$0xff] %v2698_v9   ;;  %2982 = vst [vmem:[%s3483_s29 + $0x180] sm:$0xff] %v2858_v10   ;;  %v1037_v15 = vadd.f32 %v3110_v13, %v3468_v4  ;;  %v1293_v16 = vadd.f32 %v3174_v14, %v3468_v4  ;;  %v1428_v25 = vmax.f32 %v1026_v11, 0.0 }
 0x126   : > { %v1028_v19 = vpop.f32.mrf.mxu0  ;;  %v1284_v20 = vpop.f32.mrf.mxu1  ;;  %v1492_v26 = vmax.f32 %v1282_v12, 0.0 }
 0x127   : > { %v1431_v21 = vmax.f32 %v1037_v15, 0.0  ;;  %v1495_v22 = vmax.f32 %v1293_v16, 0.0  ;;  %v1029_v23 = vadd.f32 %v3468_v4, %v1028_v19  ;;  %v1285_v24 = vadd.f32 %v3468_v4, %v1284_v20 }
 0x128   : > { %v3113_v27 = vpop.f32.mrf.mxu0  ;;  %v3177_v28 = vpop.f32.mrf.mxu1 }
 0x129   : > { %v2713_v29 = vpack.c.bf16 %v1431_v21, %v1430_v17  ;;  %v2873_v30 = vpack.c.bf16 %v1495_v22, %v1494_v18  ;;  %v1429_v31 = vmax.f32 %v1029_v23, 0.0  ;;  %v1493_v32 = vmax.f32 %v1285_v24, 0.0 }
 0x12a   : > { %v1050_v33 = vadd.f32 %v3113_v27, %v3468_v4  ;;  %v1306_v34 = vadd.f32 %v3177_v28, %v3468_v4  ;;  %v1041_v35 = vpop.f32.mrf.mxu0  ;;  %v1297_v36 = vpop.f32.mrf.mxu1 }
 0x12b   : > { %2953 = vst [vmem:[%s3483_s29 + $0x98] sm:$0xff] %v2713_v29   ;;  %2985 = vst [vmem:[%s3483_s29 + $0x198] sm:$0xff] %v2873_v30   ;;  %v2708_v37 = vpack.c.bf16 %v1429_v31, %v1428_v25  ;;  %v2868_v38 = vpack.c.bf16 %v1493_v32, %v1492_v26  ;;  %v1042_v39 = vadd.f32 %v3468_v4, %v1041_v35 }
 0x12c   : > { %v1298_v40 = vadd.f32 %v3468_v4, %v1297_v36  ;;  %v3114_v41 = vpop.f32.mrf.mxu0  ;;  %v3178_v42 = vpop.f32.mrf.mxu1  ;;  %v1434_v45 = vmax.f32 %v1050_v33, 0.0  ;;  %v1498_v46 = vmax.f32 %v1306_v34, 0.0 }
 0x12d   : > { %2952 = vst [vmem:[%s3483_s29 + $0x90] sm:$0xff] %v2708_v37   ;;  %2984 = vst [vmem:[%s3483_s29 + $0x190] sm:$0xff] %v2868_v38   ;;  %v1053_v43 = vadd.f32 %v3114_v41, %v3468_v4  ;;  %v1309_v44 = vadd.f32 %v3178_v42, %v3468_v4  ;;  %v1432_v53 = vmax.f32 %v1042_v39, 0.0 }
 0x12e   : > { %v1044_v47 = vpop.f32.mrf.mxu0  ;;  %v1300_v48 = vpop.f32.mrf.mxu1  ;;  %v1496_v54 = vmax.f32 %v1298_v40, 0.0 }
 0x12f   : > { %v1435_v49 = vmax.f32 %v1053_v43, 0.0  ;;  %v1499_v50 = vmax.f32 %v1309_v44, 0.0  ;;  %v1045_v51 = vadd.f32 %v3468_v4, %v1044_v47  ;;  %v1301_v52 = vadd.f32 %v3468_v4, %v1300_v48 }
 0x130   : > { %v3117_v55 = vpop.f32.mrf.mxu0  ;;  %v3181_v56 = vpop.f32.mrf.mxu1 }
 0x131   : > { %v2723_v57 = vpack.c.bf16 %v1435_v49, %v1434_v45  ;;  %v2883_v58 = vpack.c.bf16 %v1499_v50, %v1498_v46  ;;  %v1433_v59 = vmax.f32 %v1045_v51, 0.0  ;;  %v1497_v60 = vmax.f32 %v1301_v52, 0.0 }
 0x132   : > { %v1066_v61 = vadd.f32 %v3117_v55, %v3468_v4  ;;  %v1322_v62 = vadd.f32 %v3181_v56, %v3468_v4  ;;  %v1057_v63 = vpop.f32.mrf.mxu0  ;;  %v1313_v0 = vpop.f32.mrf.mxu1 }
 0x133   : > { %2955 = vst [vmem:[%s3483_s29 + $0xa8] sm:$0xff] %v2723_v57   ;;  %2987 = vst [vmem:[%s3483_s29 + $0x1a8] sm:$0xff] %v2883_v58   ;;  %v2718_v1 = vpack.c.bf16 %v1433_v59, %v1432_v53  ;;  %v2878_v2 = vpack.c.bf16 %v1497_v60, %v1496_v54  ;;  %v1058_v3 = vadd.f32 %v3468_v4, %v1057_v63 }
 0x134   : > { %v1314_v5 = vadd.f32 %v3468_v4, %v1313_v0  ;;  %v3118_v6 = vpop.f32.mrf.mxu0  ;;  %v3182_v7 = vpop.f32.mrf.mxu1  ;;  %v1438_v10 = vmax.f32 %v1066_v61, 0.0  ;;  %v1502_v11 = vmax.f32 %v1322_v62, 0.0 }
 0x135   : > { %2954 = vst [vmem:[%s3483_s29 + $0xa0] sm:$0xff] %v2718_v1   ;;  %2986 = vst [vmem:[%s3483_s29 + $0x1a0] sm:$0xff] %v2878_v2   ;;  %v1069_v8 = vadd.f32 %v3118_v6, %v3468_v4  ;;  %v1325_v9 = vadd.f32 %v3182_v7, %v3468_v4  ;;  %v1436_v18 = vmax.f32 %v1058_v3, 0.0 }
 0x136   : > { %v1060_v12 = vpop.f32.mrf.mxu0  ;;  %v1316_v13 = vpop.f32.mrf.mxu1  ;;  %v1500_v19 = vmax.f32 %v1314_v5, 0.0 }
 0x137   : > { %v1439_v14 = vmax.f32 %v1069_v8, 0.0  ;;  %v1503_v15 = vmax.f32 %v1325_v9, 0.0  ;;  %v1061_v16 = vadd.f32 %v3468_v4, %v1060_v12  ;;  %v1317_v17 = vadd.f32 %v3468_v4, %v1316_v13 }
 0x138   : > { %v3121_v20 = vpop.f32.mrf.mxu0  ;;  %v3185_v21 = vpop.f32.mrf.mxu1 }
 0x139   : > { %v2733_v22 = vpack.c.bf16 %v1439_v14, %v1438_v10  ;;  %v2893_v23 = vpack.c.bf16 %v1503_v15, %v1502_v11  ;;  %v1437_v24 = vmax.f32 %v1061_v16, 0.0  ;;  %v1501_v25 = vmax.f32 %v1317_v17, 0.0 }
 0x13a   : > { %v1082_v26 = vadd.f32 %v3121_v20, %v3468_v4  ;;  %v1338_v27 = vadd.f32 %v3185_v21, %v3468_v4  ;;  %v1073_v28 = vpop.f32.mrf.mxu0  ;;  %v1329_v29 = vpop.f32.mrf.mxu1 }
 0x13b   : > { %2957 = vst [vmem:[%s3483_s29 + $0xb8] sm:$0xff] %v2733_v22   ;;  %2989 = vst [vmem:[%s3483_s29 + $0x1b8] sm:$0xff] %v2893_v23   ;;  %v2728_v30 = vpack.c.bf16 %v1437_v24, %v1436_v18  ;;  %v2888_v31 = vpack.c.bf16 %v1501_v25, %v1500_v19  ;;  %v1074_v32 = vadd.f32 %v3468_v4, %v1073_v28 }
 0x13c   : > { %v1330_v33 = vadd.f32 %v3468_v4, %v1329_v29  ;;  %v3122_v34 = vpop.f32.mrf.mxu0  ;;  %v3186_v35 = vpop.f32.mrf.mxu1  ;;  %v1442_v38 = vmax.f32 %v1082_v26, 0.0  ;;  %v1506_v39 = vmax.f32 %v1338_v27, 0.0 }
 0x13d   : > { %2956 = vst [vmem:[%s3483_s29 + $0xb0] sm:$0xff] %v2728_v30   ;;  %2988 = vst [vmem:[%s3483_s29 + $0x1b0] sm:$0xff] %v2888_v31   ;;  %v1085_v36 = vadd.f32 %v3122_v34, %v3468_v4  ;;  %v1341_v37 = vadd.f32 %v3186_v35, %v3468_v4  ;;  %v1440_v46 = vmax.f32 %v1074_v32, 0.0 }
 0x13e   : > { %v1076_v40 = vpop.f32.mrf.mxu0  ;;  %v1332_v41 = vpop.f32.mrf.mxu1  ;;  %v1504_v47 = vmax.f32 %v1330_v33, 0.0 }
 0x13f   : > { %v1443_v42 = vmax.f32 %v1085_v36, 0.0  ;;  %v1507_v43 = vmax.f32 %v1341_v37, 0.0  ;;  %v1077_v44 = vadd.f32 %v3468_v4, %v1076_v40  ;;  %v1333_v45 = vadd.f32 %v3468_v4, %v1332_v41 }
 0x140   : > { %v3125_v48 = vpop.f32.mrf.mxu0  ;;  %v3189_v49 = vpop.f32.mrf.mxu1 }
 0x141   : > { %v2743_v50 = vpack.c.bf16 %v1443_v42, %v1442_v38  ;;  %v2903_v51 = vpack.c.bf16 %v1507_v43, %v1506_v39  ;;  %v1441_v52 = vmax.f32 %v1077_v44, 0.0  ;;  %v1505_v53 = vmax.f32 %v1333_v45, 0.0 }
 0x142   : > { %v1098_v54 = vadd.f32 %v3125_v48, %v3468_v4  ;;  %v1354_v55 = vadd.f32 %v3189_v49, %v3468_v4  ;;  %v1089_v56 = vpop.f32.mrf.mxu0  ;;  %v1345_v57 = vpop.f32.mrf.mxu1 }
 0x143   : > { %2959 = vst [vmem:[%s3483_s29 + $0xc8] sm:$0xff] %v2743_v50   ;;  %2991 = vst [vmem:[%s3483_s29 + $0x1c8] sm:$0xff] %v2903_v51   ;;  %v2738_v58 = vpack.c.bf16 %v1441_v52, %v1440_v46  ;;  %v2898_v59 = vpack.c.bf16 %v1505_v53, %v1504_v47  ;;  %v1090_v60 = vadd.f32 %v3468_v4, %v1089_v56 }
 0x144   : > { %v1346_v61 = vadd.f32 %v3468_v4, %v1345_v57  ;;  %v3126_v62 = vpop.f32.mrf.mxu0  ;;  %v3190_v63 = vpop.f32.mrf.mxu1  ;;  %v1446_v2 = vmax.f32 %v1098_v54, 0.0  ;;  %v1510_v3 = vmax.f32 %v1354_v55, 0.0 }
 0x145   : > { %2958 = vst [vmem:[%s3483_s29 + $0xc0] sm:$0xff] %v2738_v58   ;;  %2990 = vst [vmem:[%s3483_s29 + $0x1c0] sm:$0xff] %v2898_v59   ;;  %v1101_v0 = vadd.f32 %v3126_v62, %v3468_v4  ;;  %v1357_v1 = vadd.f32 %v3190_v63, %v3468_v4  ;;  %v1444_v11 = vmax.f32 %v1090_v60, 0.0 }
 0x146   : > { %v1092_v5 = vpop.f32.mrf.mxu0  ;;  %v1348_v6 = vpop.f32.mrf.mxu1  ;;  %v1508_v12 = vmax.f32 %v1346_v61, 0.0 }
 0x147   : > { %v1447_v7 = vmax.f32 %v1101_v0, 0.0  ;;  %v1511_v8 = vmax.f32 %v1357_v1, 0.0  ;;  %v1093_v9 = vadd.f32 %v3468_v4, %v1092_v5  ;;  %v1349_v10 = vadd.f32 %v3468_v4, %v1348_v6 }
 0x148   : > { %v3129_v13 = vpop.f32.mrf.mxu0  ;;  %v3193_v14 = vpop.f32.mrf.mxu1 }
 0x149   : > { %v2753_v15 = vpack.c.bf16 %v1447_v7, %v1446_v2  ;;  %v2913_v16 = vpack.c.bf16 %v1511_v8, %v1510_v3  ;;  %v1445_v17 = vmax.f32 %v1093_v9, 0.0  ;;  %v1509_v18 = vmax.f32 %v1349_v10, 0.0 }
 0x14a   : > { %v1114_v19 = vadd.f32 %v3129_v13, %v3468_v4  ;;  %v1370_v20 = vadd.f32 %v3193_v14, %v3468_v4  ;;  %v1105_v21 = vpop.f32.mrf.mxu0  ;;  %v1361_v22 = vpop.f32.mrf.mxu1 }
 0x14b   : > { %2961 = vst [vmem:[%s3483_s29 + $0xd8] sm:$0xff] %v2753_v15   ;;  %2993 = vst [vmem:[%s3483_s29 + $0x1d8] sm:$0xff] %v2913_v16   ;;  %v2748_v23 = vpack.c.bf16 %v1445_v17, %v1444_v11  ;;  %v2908_v24 = vpack.c.bf16 %v1509_v18, %v1508_v12  ;;  %v1106_v25 = vadd.f32 %v3468_v4, %v1105_v21 }
 0x14c   : > { %v1362_v26 = vadd.f32 %v3468_v4, %v1361_v22  ;;  %v3130_v27 = vpop.f32.mrf.mxu0  ;;  %v3194_v28 = vpop.f32.mrf.mxu1  ;;  %v1450_v31 = vmax.f32 %v1114_v19, 0.0  ;;  %v1514_v32 = vmax.f32 %v1370_v20, 0.0 }
 0x14d   : > { %2960 = vst [vmem:[%s3483_s29 + $0xd0] sm:$0xff] %v2748_v23   ;;  %2992 = vst [vmem:[%s3483_s29 + $0x1d0] sm:$0xff] %v2908_v24   ;;  %v1117_v29 = vadd.f32 %v3130_v27, %v3468_v4  ;;  %v1373_v30 = vadd.f32 %v3194_v28, %v3468_v4  ;;  %v1448_v39 = vmax.f32 %v1106_v25, 0.0 }
 0x14e   : > { %v1108_v33 = vpop.f32.mrf.mxu0  ;;  %v1364_v34 = vpop.f32.mrf.mxu1  ;;  %v1512_v40 = vmax.f32 %v1362_v26, 0.0 }
 0x14f   : > { %v1451_v35 = vmax.f32 %v1117_v29, 0.0  ;;  %v1515_v36 = vmax.f32 %v1373_v30, 0.0  ;;  %v1109_v37 = vadd.f32 %v3468_v4, %v1108_v33  ;;  %v1365_v38 = vadd.f32 %v3468_v4, %v1364_v34 }
 0x150   : > { %v3133_v41 = vpop.f32.mrf.mxu0  ;;  %v3197_v42 = vpop.f32.mrf.mxu1 }
 0x151   : > { %v2763_v43 = vpack.c.bf16 %v1451_v35, %v1450_v31  ;;  %v2923_v44 = vpack.c.bf16 %v1515_v36, %v1514_v32  ;;  %v1449_v45 = vmax.f32 %v1109_v37, 0.0  ;;  %v1513_v46 = vmax.f32 %v1365_v38, 0.0 }
 0x152   : > { %v1130_v47 = vadd.f32 %v3133_v41, %v3468_v4  ;;  %v1386_v48 = vadd.f32 %v3197_v42, %v3468_v4  ;;  %v1121_v49 = vpop.f32.mrf.mxu0  ;;  %v1377_v50 = vpop.f32.mrf.mxu1 }
 0x153   : > { %2963 = vst [vmem:[%s3483_s29 + $0xe8] sm:$0xff] %v2763_v43   ;;  %2995 = vst [vmem:[%s3483_s29 + $0x1e8] sm:$0xff] %v2923_v44   ;;  %v2758_v51 = vpack.c.bf16 %v1449_v45, %v1448_v39  ;;  %v2918_v52 = vpack.c.bf16 %v1513_v46, %v1512_v40  ;;  %v1122_v53 = vadd.f32 %v3468_v4, %v1121_v49 }
 0x154   : > { %v1378_v54 = vadd.f32 %v3468_v4, %v1377_v50  ;;  %v3134_v55 = vpop.f32.mrf.mxu0  ;;  %v3198_v56 = vpop.f32.mrf.mxu1  ;;  %v1454_v59 = vmax.f32 %v1130_v47, 0.0  ;;  %v1518_v60 = vmax.f32 %v1386_v48, 0.0 }
 0x155   : > { %2962 = vst [vmem:[%s3483_s29 + $0xe0] sm:$0xff] %v2758_v51   ;;  %2994 = vst [vmem:[%s3483_s29 + $0x1e0] sm:$0xff] %v2918_v52   ;;  %v1133_v57 = vadd.f32 %v3134_v55, %v3468_v4  ;;  %v1389_v58 = vadd.f32 %v3198_v56, %v3468_v4  ;;  %v1452_v3 = vmax.f32 %v1122_v53, 0.0 }
 0x156   : > { %v1124_v61 = vpop.f32.mrf.mxu0  ;;  %v1380_v62 = vpop.f32.mrf.mxu1  ;;  %v1516_v5 = vmax.f32 %v1378_v54, 0.0 }
 0x157   : > { %v1455_v63 = vmax.f32 %v1133_v57, 0.0  ;;  %v1519_v0 = vmax.f32 %v1389_v58, 0.0  ;;  %v1125_v1 = vadd.f32 %v3468_v4, %v1124_v61  ;;  %v1381_v2 = vadd.f32 %v3468_v4, %v1380_v62 }
 0x159   : > { %v2773_v6 = vpack.c.bf16 %v1455_v63, %v1454_v59  ;;  %v2933_v7 = vpack.c.bf16 %v1519_v0, %v1518_v60  ;;  %v1453_v8 = vmax.f32 %v1125_v1, 0.0  ;;  %v1517_v9 = vmax.f32 %v1381_v2, 0.0 }
 0x15b   : > { %2965 = vst [vmem:[%s3483_s29 + $0xf8] sm:$0xff] %v2773_v6   ;;  %2997 = vst [vmem:[%s3483_s29 + $0x1f8] sm:$0xff] %v2933_v7   ;;  %v2768_v10 = vpack.c.bf16 %v1453_v8, %v1452_v3  ;;  %v2928_v11 = vpack.c.bf16 %v1517_v9, %v1516_v5 }
 0x15d   : > { %2964 = vst [vmem:[%s3483_s29 + $0xf0] sm:$0xff] %v2768_v10   ;;  %2996 = vst [vmem:[%s3483_s29 + $0x1f0] sm:$0xff] %v2928_v11  }
 0x15e PF: > { %s13_s12 = sadd.s32 1, %s3288_s12  }
 0x15f   : > { %p10_p4 = scmp.ge.s32.totalorder %s13_s12, 4  }
 0x161   :  { %12 = sbr.rel (!%p10_p4) target bundleno = 1 (0x1), region = 62 }

// kernel: _lambda_.40
= control target key start
LH: loop header
LB: loop body
LE: loop exit
PB: predicated region body
PF: predicated region fallthrough
CT: control target
= control target key end

     0   :  { %vm344_vm0 = vcmask 1043456   ;;  %vm247_vm1 = vcmask 64512   ;;  %s1796_s1 = inlined_call_operand.vmem [shape: bf16[8,128], index: 1, kind: input, shape index: {}]   ;;  %s1797_s0 = inlined_call_operand.vmem [shape: bf16[512,8], index: 0, kind: input, shape index: {}]   ;;  %s1798_s2 = inlined_call_operand.vmem [shape: f32[1,128], index: 2, kind: input, shape index: {}]   ;;  %s1799_s3 = inlined_call_operand.vmem [shape: bf16[512,128], index: 3, kind: output, shape index: {}]  }
   0x1   :  { %v79_v0 = vld [vmem:[%s1796_s1] sm:$0xf]  ;;  %v1450_v4 = vld [vmem:[%s1797_s0 + $0x8] sm:$0xff]   ;;  %v1452_v6 = vld [vmem:[%s1797_s0 + $0x10] sm:$0xff]  }
   0x2   :  { %1446 = vmatprep.subr.msk.bf16.mxu0 %vm344_vm0, %v79_v0  ;;  %1447 = vmatprep.subr.msk.bf16.mxu1 %vm344_vm0, %v79_v0  ;;  %v346_v1 = vsel %vm344_vm0, %v79_v0, 0  ;;  %v1448_v2 = vld [vmem:[%s1797_s0] sm:$0xff]   ;;  %v1451_v5 = vld [vmem:[%s1797_s0 + $0x88] sm:$0xff]   ;;  %v1453_v7 = vld [vmem:[%s1797_s0 + $0x90] sm:$0xff]  }
   0x3   :  { %1379 = vmatpush3.bf16.msra.mxu0 %v346_v1  ;;  %1445 = vmatpush3.bf16.msra.mxu1 %v346_v1  ;;  %v1449_v3 = vld [vmem:[%s1797_s0 + $0x80] sm:$0xff]   ;;  %v1454_v8 = vld [vmem:[%s1797_s0 + $0x18] sm:$0xff]   ;;  %v1458_v12 = vld [vmem:[%s1797_s0 + $0x28] sm:$0xff]  }
   0x4   :  { %1380 = vmatprep.mubr.msk.bf16.mxu0 %vm247_vm1, %v1448_v2  ;;  %1412 = vmatprep.mubr.msk.bf16.mxu1 %vm247_vm1, %v1449_v3  ;;  %v1455_v9 = vld [vmem:[%s1797_s0 + $0x98] sm:$0xff]   ;;  %v1456_v10 = vld [vmem:[%s1797_s0 + $0x20] sm:$0xff]   ;;  %v1459_v13 = vld [vmem:[%s1797_s0 + $0xa8] sm:$0xff]  }
   0x5   :  { %v1457_v11 = vld [vmem:[%s1797_s0 + $0xa0] sm:$0xff]   ;;  %v1460_v14 = vld [vmem:[%s1797_s0 + $0x30] sm:$0xff]   ;;  %v1462_v16 = vld [vmem:[%s1797_s0 + $0x38] sm:$0xff]  }
   0x6   :  { %1381 = vmatmul.mubr.msk.bf16.vlgmr.msra.gmra.mxu0 %vm247_vm1, %v1450_v4  ;;  %1413 = vmatmul.mubr.msk.bf16.vlgmr.msra.gmra.mxu1 %vm247_vm1, %v1451_v5  ;;  %v1461_v15 = vld [vmem:[%s1797_s0 + $0xb0] sm:$0xff]   ;;  %v1463_v17 = vld [vmem:[%s1797_s0 + $0xb8] sm:$0xff]   ;;  %v1464_v18 = vld [vmem:[%s1797_s0 + $0x40] sm:$0xff]  }
   0x7   :  { %1384 = vmatprep.mubr.msk.bf16.mxu0 %vm247_vm1, %v1452_v6  ;;  %1416 = vmatprep.mubr.msk.bf16.mxu1 %vm247_vm1, %v1453_v7  ;;  %v1465_v19 = vld [vmem:[%s1797_s0 + $0xc0] sm:$0xff]   ;;  %v1466_v20 = vld [vmem:[%s1797_s0 + $0x48] sm:$0xff]   ;;  %v1468_v22 = vld [vmem:[%s1797_s0 + $0x50] sm:$0xff]  }
   0x8   :  { %v1467_v21 = vld [vmem:[%s1797_s0 + $0xc8] sm:$0xff]   ;;  %v1469_v23 = vld [vmem:[%s1797_s0 + $0xd0] sm:$0xff]   ;;  %v1470_v24 = vld [vmem:[%s1797_s0 + $0x58] sm:$0xff]  }
   0x9   :  { %v1471_v25 = vld [vmem:[%s1797_s0 + $0xd8] sm:$0xff]   ;;  %v1472_v26 = vld [vmem:[%s1797_s0 + $0x60] sm:$0xff]   ;;  %v1474_v28 = vld [vmem:[%s1797_s0 + $0x68] sm:$0xff]  }
   0xa   :  { %v1473_v27 = vld [vmem:[%s1797_s0 + $0xe0] sm:$0xff]   ;;  %v1475_v29 = vld [vmem:[%s1797_s0 + $0xe8] sm:$0xff]   ;;  %v1476_v30 = vld [vmem:[%s1797_s0 + $0x70] sm:$0xff]  }
   0xb   :  { %v1477_v31 = vld [vmem:[%s1797_s0 + $0xf0] sm:$0xff]   ;;  %v1478_v32 = vld [vmem:[%s1797_s0 + $0x78] sm:$0xff]   ;;  %v1634_v36 = vld [vmem:[%s1798_s2] ss:$0 sm:$0xff] }
   0xc   :  { %v1479_v33 = vld [vmem:[%s1797_s0 + $0xf8] sm:$0xff]  }
   0xe   :  { %1385 = vmatmul.mubr.msk.bf16.gmra.mxu0 %vm247_vm1, %v1454_v8  ;;  %1417 = vmatmul.mubr.msk.bf16.gmra.mxu1 %vm247_vm1, %v1455_v9 }
   0xf   :  { %1388 = vmatprep.mubr.msk.bf16.mxu0 %vm247_vm1, %v1456_v10  ;;  %1420 = vmatprep.mubr.msk.bf16.mxu1 %vm247_vm1, %v1457_v11 }
  0x16   :  { %1389 = vmatmul.mubr.msk.bf16.gmra.mxu0 %vm247_vm1, %v1458_v12  ;;  %1421 = vmatmul.mubr.msk.bf16.gmra.mxu1 %vm247_vm1, %v1459_v13 }
  0x17   :  { %1392 = vmatprep.mubr.msk.bf16.mxu0 %vm247_vm1, %v1460_v14  ;;  %1424 = vmatprep.mubr.msk.bf16.mxu1 %vm247_vm1, %v1461_v15 }
  0x1e   :  { %1393 = vmatmul.mubr.msk.bf16.gmra.mxu0 %vm247_vm1, %v1462_v16  ;;  %1425 = vmatmul.mubr.msk.bf16.gmra.mxu1 %vm247_vm1, %v1463_v17 }
  0x1f   :  { %1396 = vmatprep.mubr.msk.bf16.mxu0 %vm247_vm1, %v1464_v18  ;;  %1428 = vmatprep.mubr.msk.bf16.mxu1 %vm247_vm1, %v1465_v19 }
  0x26   :  { %1397 = vmatmul.mubr.msk.bf16.gmra.mxu0 %vm247_vm1, %v1466_v20  ;;  %1429 = vmatmul.mubr.msk.bf16.gmra.mxu1 %vm247_vm1, %v1467_v21 }
  0x27   :  { %1400 = vmatprep.mubr.msk.bf16.mxu0 %vm247_vm1, %v1468_v22  ;;  %1432 = vmatprep.mubr.msk.bf16.mxu1 %vm247_vm1, %v1469_v23 }
  0x2e   :  { %1401 = vmatmul.mubr.msk.bf16.gmra.mxu0 %vm247_vm1, %v1470_v24  ;;  %1433 = vmatmul.mubr.msk.bf16.gmra.mxu1 %vm247_vm1, %v1471_v25 }
  0x2f   :  { %1404 = vmatprep.mubr.msk.bf16.mxu0 %vm247_vm1, %v1472_v26  ;;  %1436 = vmatprep.mubr.msk.bf16.mxu1 %vm247_vm1, %v1473_v27 }
  0x36   :  { %1405 = vmatmul.mubr.msk.bf16.gmra.mxu0 %vm247_vm1, %v1474_v28  ;;  %1437 = vmatmul.mubr.msk.bf16.gmra.mxu1 %vm247_vm1, %v1475_v29 }
  0x37   :  { %1408 = vmatprep.mubr.msk.bf16.mxu0 %vm247_vm1, %v1476_v30  ;;  %1440 = vmatprep.mubr.msk.bf16.mxu1 %vm247_vm1, %v1477_v31 }
  0x3e   :  { %1409 = vmatmul.mubr.msk.bf16.gmra.mxu0 %vm247_vm1, %v1478_v32  ;;  %1441 = vmatmul.mubr.msk.bf16.gmra.mxu1 %vm247_vm1, %v1479_v33 }
  0xc6   :  { %v1382_v34 = vpop.f32.mrf.mxu0  ;;  %v1414_v35 = vpop.f32.mrf.mxu1 }
  0xc7   :  { %v391_v40 = vadd.f32 %v1382_v34, %v1634_v36  ;;  %v519_v43 = vadd.f32 %v1414_v35, %v1634_v36 }
  0xc8   :  { %v382_v37 = vpop.f32.mrf.mxu0  ;;  %v510_v38 = vpop.f32.mrf.mxu1 }
  0xc9   :  { %v383_v46 = vadd.f32 %v1634_v36, %v382_v37  ;;  %v511_v50 = vadd.f32 %v1634_v36, %v510_v38 }
  0xca   :  { %v1383_v39 = vpop.f32.mrf.mxu0  ;;  %v1415_v42 = vpop.f32.mrf.mxu1 }
  0xcb   :  { %v394_v41 = vadd.f32 %v1383_v39, %v1634_v36  ;;  %v522_v44 = vadd.f32 %v1415_v42, %v1634_v36 }
  0xcc   :  { %v385_v45 = vpop.f32.mrf.mxu0  ;;  %v513_v49 = vpop.f32.mrf.mxu1 }
  0xcd   :  { %v1162_v47 = vpack.c.bf16 %v394_v41, %v391_v40  ;;  %v386_v48 = vadd.f32 %v1634_v36, %v385_v45  ;;  %v1242_v51 = vpack.c.bf16 %v522_v44, %v519_v43  ;;  %v514_v52 = vadd.f32 %v1634_v36, %v513_v49 }
  0xce   :  { %v1386_v53 = vpop.f32.mrf.mxu0  ;;  %v1418_v55 = vpop.f32.mrf.mxu1 }
  0xcf   :  { %1314 = vst [vmem:[%s1799_s3 + $0x8] sm:$0xff] %v1162_v47   ;;  %v1157_v54 = vpack.c.bf16 %v386_v48, %v383_v46  ;;  %1330 = vst [vmem:[%s1799_s3 + $0x88] sm:$0xff] %v1242_v51   ;;  %v1237_v56 = vpack.c.bf16 %v514_v52, %v511_v50  ;;  %v407_v60 = vadd.f32 %v1386_v53, %v1634_v36 }
  0xd0   :  { %v398_v57 = vpop.f32.mrf.mxu0  ;;  %v526_v58 = vpop.f32.mrf.mxu1  ;;  %v535_v63 = vadd.f32 %v1418_v55, %v1634_v36 }
  0xd1   :  { %1158 = vst [vmem:[%s1799_s3] sm:$0xff] %v1157_v54   ;;  %1329 = vst [vmem:[%s1799_s3 + $0x80] sm:$0xff] %v1237_v56   ;;  %v399_v2 = vadd.f32 %v1634_v36, %v398_v57  ;;  %v527_v6 = vadd.f32 %v1634_v36, %v526_v58 }
  0xd2   :  { %v1387_v59 = vpop.f32.mrf.mxu0  ;;  %v1419_v62 = vpop.f32.mrf.mxu1 }
  0xd3   :  { %v410_v61 = vadd.f32 %v1387_v59, %v1634_v36  ;;  %v538_v0 = vadd.f32 %v1419_v62, %v1634_v36 }
  0xd4   :  { %v401_v1 = vpop.f32.mrf.mxu0  ;;  %v529_v5 = vpop.f32.mrf.mxu1 }
  0xd5   :  { %v1172_v3 = vpack.c.bf16 %v410_v61, %v407_v60  ;;  %v402_v4 = vadd.f32 %v1634_v36, %v401_v1  ;;  %v1252_v7 = vpack.c.bf16 %v538_v0, %v535_v63  ;;  %v530_v8 = vadd.f32 %v1634_v36, %v529_v5 }
  0xd6   :  { %v1390_v9 = vpop.f32.mrf.mxu0  ;;  %v1422_v11 = vpop.f32.mrf.mxu1 }
  0xd7   :  { %1316 = vst [vmem:[%s1799_s3 + $0x18] sm:$0xff] %v1172_v3   ;;  %v1167_v10 = vpack.c.bf16 %v402_v4, %v399_v2  ;;  %1332 = vst [vmem:[%s1799_s3 + $0x98] sm:$0xff] %v1252_v7   ;;  %v1247_v12 = vpack.c.bf16 %v530_v8, %v527_v6  ;;  %v423_v16 = vadd.f32 %v1390_v9, %v1634_v36 }
  0xd8   :  { %v414_v13 = vpop.f32.mrf.mxu0  ;;  %v542_v14 = vpop.f32.mrf.mxu1  ;;  %v551_v19 = vadd.f32 %v1422_v11, %v1634_v36 }
  0xd9   :  { %1315 = vst [vmem:[%s1799_s3 + $0x10] sm:$0xff] %v1167_v10   ;;  %1331 = vst [vmem:[%s1799_s3 + $0x90] sm:$0xff] %v1247_v12   ;;  %v415_v22 = vadd.f32 %v1634_v36, %v414_v13  ;;  %v543_v26 = vadd.f32 %v1634_v36, %v542_v14 }
  0xda   :  { %v1391_v15 = vpop.f32.mrf.mxu0  ;;  %v1423_v18 = vpop.f32.mrf.mxu1 }
  0xdb   :  { %v426_v17 = vadd.f32 %v1391_v15, %v1634_v36  ;;  %v554_v20 = vadd.f32 %v1423_v18, %v1634_v36 }
  0xdc   :  { %v417_v21 = vpop.f32.mrf.mxu0  ;;  %v545_v25 = vpop.f32.mrf.mxu1 }
  0xdd   :  { %v1182_v23 = vpack.c.bf16 %v426_v17, %v423_v16  ;;  %v418_v24 = vadd.f32 %v1634_v36, %v417_v21  ;;  %v1262_v27 = vpack.c.bf16 %v554_v20, %v551_v19  ;;  %v546_v28 = vadd.f32 %v1634_v36, %v545_v25 }
  0xde   :  { %v1394_v29 = vpop.f32.mrf.mxu0  ;;  %v1426_v31 = vpop.f32.mrf.mxu1 }
  0xdf   :  { %1318 = vst [vmem:[%s1799_s3 + $0x28] sm:$0xff] %v1182_v23   ;;  %v1177_v30 = vpack.c.bf16 %v418_v24, %v415_v22  ;;  %1334 = vst [vmem:[%s1799_s3 + $0xa8] sm:$0xff] %v1262_v27   ;;  %v1257_v32 = vpack.c.bf16 %v546_v28, %v543_v26  ;;  %v439_v37 = vadd.f32 %v1394_v29, %v1634_v36 }
  0xe0   :  { %v430_v33 = vpop.f32.mrf.mxu0  ;;  %v558_v34 = vpop.f32.mrf.mxu1  ;;  %v567_v40 = vadd.f32 %v1426_v31, %v1634_v36 }
  0xe1   :  { %1317 = vst [vmem:[%s1799_s3 + $0x20] sm:$0xff] %v1177_v30   ;;  %1333 = vst [vmem:[%s1799_s3 + $0xa0] sm:$0xff] %v1257_v32   ;;  %v431_v43 = vadd.f32 %v1634_v36, %v430_v33  ;;  %v559_v47 = vadd.f32 %v1634_v36, %v558_v34 }
  0xe2   :  { %v1395_v35 = vpop.f32.mrf.mxu0  ;;  %v1427_v39 = vpop.f32.mrf.mxu1 }
  0xe3   :  { %v442_v38 = vadd.f32 %v1395_v35, %v1634_v36  ;;  %v570_v41 = vadd.f32 %v1427_v39, %v1634_v36 }
  0xe4   :  { %v433_v42 = vpop.f32.mrf.mxu0  ;;  %v561_v46 = vpop.f32.mrf.mxu1 }
  0xe5   :  { %v1192_v44 = vpack.c.bf16 %v442_v38, %v439_v37  ;;  %v434_v45 = vadd.f32 %v1634_v36, %v433_v42  ;;  %v1272_v48 = vpack.c.bf16 %v570_v41, %v567_v40  ;;  %v562_v49 = vadd.f32 %v1634_v36, %v561_v46 }
  0xe6   :  { %v1398_v50 = vpop.f32.mrf.mxu0  ;;  %v1430_v52 = vpop.f32.mrf.mxu1 }
  0xe7   :  { %1320 = vst [vmem:[%s1799_s3 + $0x38] sm:$0xff] %v1192_v44   ;;  %v1187_v51 = vpack.c.bf16 %v434_v45, %v431_v43  ;;  %1336 = vst [vmem:[%s1799_s3 + $0xb8] sm:$0xff] %v1272_v48   ;;  %v1267_v53 = vpack.c.bf16 %v562_v49, %v559_v47  ;;  %v455_v57 = vadd.f32 %v1398_v50, %v1634_v36 }
  0xe8   :  { %v446_v54 = vpop.f32.mrf.mxu0  ;;  %v574_v55 = vpop.f32.mrf.mxu1  ;;  %v583_v60 = vadd.f32 %v1430_v52, %v1634_v36 }
  0xe9   :  { %1319 = vst [vmem:[%s1799_s3 + $0x30] sm:$0xff] %v1187_v51   ;;  %1335 = vst [vmem:[%s1799_s3 + $0xb0] sm:$0xff] %v1267_v53   ;;  %v447_v63 = vadd.f32 %v1634_v36, %v446_v54  ;;  %v575_v3 = vadd.f32 %v1634_v36, %v574_v55 }
  0xea   :  { %v1399_v56 = vpop.f32.mrf.mxu0  ;;  %v1431_v59 = vpop.f32.mrf.mxu1 }
  0xeb   :  { %v458_v58 = vadd.f32 %v1399_v56, %v1634_v36  ;;  %v586_v61 = vadd.f32 %v1431_v59, %v1634_v36 }
  0xec   :  { %v449_v62 = vpop.f32.mrf.mxu0  ;;  %v577_v2 = vpop.f32.mrf.mxu1 }
  0xed   :  { %v1202_v0 = vpack.c.bf16 %v458_v58, %v455_v57  ;;  %v450_v1 = vadd.f32 %v1634_v36, %v449_v62  ;;  %v1282_v4 = vpack.c.bf16 %v586_v61, %v583_v60  ;;  %v578_v5 = vadd.f32 %v1634_v36, %v577_v2 }
  0xee   :  { %v1402_v6 = vpop.f32.mrf.mxu0  ;;  %v1434_v8 = vpop.f32.mrf.mxu1 }
  0xef   :  { %1322 = vst [vmem:[%s1799_s3 + $0x48] sm:$0xff] %v1202_v0   ;;  %v1197_v7 = vpack.c.bf16 %v450_v1, %v447_v63  ;;  %1338 = vst [vmem:[%s1799_s3 + $0xc8] sm:$0xff] %v1282_v4   ;;  %v1277_v9 = vpack.c.bf16 %v578_v5, %v575_v3  ;;  %v471_v13 = vadd.f32 %v1402_v6, %v1634_v36 }
  0xf0   :  { %v462_v10 = vpop.f32.mrf.mxu0  ;;  %v590_v11 = vpop.f32.mrf.mxu1  ;;  %v599_v16 = vadd.f32 %v1434_v8, %v1634_v36 }
  0xf1   :  { %1321 = vst [vmem:[%s1799_s3 + $0x40] sm:$0xff] %v1197_v7   ;;  %1337 = vst [vmem:[%s1799_s3 + $0xc0] sm:$0xff] %v1277_v9   ;;  %v463_v19 = vadd.f32 %v1634_v36, %v462_v10  ;;  %v591_v23 = vadd.f32 %v1634_v36, %v590_v11 }
  0xf2   :  { %v1403_v12 = vpop.f32.mrf.mxu0  ;;  %v1435_v15 = vpop.f32.mrf.mxu1 }
  0xf3   :  { %v474_v14 = vadd.f32 %v1403_v12, %v1634_v36  ;;  %v602_v17 = vadd.f32 %v1435_v15, %v1634_v36 }
  0xf4   :  { %v465_v18 = vpop.f32.mrf.mxu0  ;;  %v593_v22 = vpop.f32.mrf.mxu1 }
  0xf5   :  { %v1212_v20 = vpack.c.bf16 %v474_v14, %v471_v13  ;;  %v466_v21 = vadd.f32 %v1634_v36, %v465_v18  ;;  %v1292_v24 = vpack.c.bf16 %v602_v17, %v599_v16  ;;  %v594_v25 = vadd.f32 %v1634_v36, %v593_v22 }
  0xf6   :  { %v1406_v26 = vpop.f32.mrf.mxu0  ;;  %v1438_v28 = vpop.f32.mrf.mxu1 }
  0xf7   :  { %1324 = vst [vmem:[%s1799_s3 + $0x58] sm:$0xff] %v1212_v20   ;;  %v1207_v27 = vpack.c.bf16 %v466_v21, %v463_v19  ;;  %1340 = vst [vmem:[%s1799_s3 + $0xd8] sm:$0xff] %v1292_v24   ;;  %v1287_v29 = vpack.c.bf16 %v594_v25, %v591_v23  ;;  %v487_v33 = vadd.f32 %v1406_v26, %v1634_v36 }
  0xf8   :  { %v478_v30 = vpop.f32.mrf.mxu0  ;;  %v606_v31 = vpop.f32.mrf.mxu1  ;;  %v615_v37 = vadd.f32 %v1438_v28, %v1634_v36 }
  0xf9   :  { %1323 = vst [vmem:[%s1799_s3 + $0x50] sm:$0xff] %v1207_v27   ;;  %1339 = vst [vmem:[%s1799_s3 + $0xd0] sm:$0xff] %v1287_v29   ;;  %v479_v40 = vadd.f32 %v1634_v36, %v478_v30  ;;  %v607_v44 = vadd.f32 %v1634_v36, %v606_v31 }
  0xfa   :  { %v1407_v32 = vpop.f32.mrf.mxu0  ;;  %v1439_v35 = vpop.f32.mrf.mxu1 }
  0xfb   :  { %v490_v34 = vadd.f32 %v1407_v32, %v1634_v36  ;;  %v618_v38 = vadd.f32 %v1439_v35, %v1634_v36 }
  0xfc   :  { %v481_v39 = vpop.f32.mrf.mxu0  ;;  %v609_v43 = vpop.f32.mrf.mxu1 }
  0xfd   :  { %v1222_v41 = vpack.c.bf16 %v490_v34, %v487_v33  ;;  %v482_v42 = vadd.f32 %v1634_v36, %v481_v39  ;;  %v1302_v45 = vpack.c.bf16 %v618_v38, %v615_v37  ;;  %v610_v46 = vadd.f32 %v1634_v36, %v609_v43 }
  0xfe   :  { %v1410_v47 = vpop.f32.mrf.mxu0  ;;  %v1442_v49 = vpop.f32.mrf.mxu1 }
  0xff   :  { %1326 = vst [vmem:[%s1799_s3 + $0x68] sm:$0xff] %v1222_v41   ;;  %v1217_v48 = vpack.c.bf16 %v482_v42, %v479_v40  ;;  %1342 = vst [vmem:[%s1799_s3 + $0xe8] sm:$0xff] %v1302_v45   ;;  %v1297_v50 = vpack.c.bf16 %v610_v46, %v607_v44  ;;  %v503_v54 = vadd.f32 %v1410_v47, %v1634_v36 }
 0x100   :  { %v494_v51 = vpop.f32.mrf.mxu0  ;;  %v622_v52 = vpop.f32.mrf.mxu1  ;;  %v631_v57 = vadd.f32 %v1442_v49, %v1634_v36 }
 0x101   :  { %1325 = vst [vmem:[%s1799_s3 + $0x60] sm:$0xff] %v1217_v48   ;;  %1341 = vst [vmem:[%s1799_s3 + $0xe0] sm:$0xff] %v1297_v50   ;;  %v495_v60 = vadd.f32 %v1634_v36, %v494_v51  ;;  %v623_v0 = vadd.f32 %v1634_v36, %v622_v52 }
 0x102   :  { %v1411_v53 = vpop.f32.mrf.mxu0  ;;  %v1443_v56 = vpop.f32.mrf.mxu1 }
 0x103   :  { %v506_v55 = vadd.f32 %v1411_v53, %v1634_v36  ;;  %v634_v58 = vadd.f32 %v1443_v56, %v1634_v36 }
 0x104   :  { %v497_v59 = vpop.f32.mrf.mxu0  ;;  %v625_v63 = vpop.f32.mrf.mxu1 }
 0x105   :  { %v1232_v61 = vpack.c.bf16 %v506_v55, %v503_v54  ;;  %v498_v62 = vadd.f32 %v1634_v36, %v497_v59  ;;  %v1312_v1 = vpack.c.bf16 %v634_v58, %v631_v57  ;;  %v626_v2 = vadd.f32 %v1634_v36, %v625_v63 }
 0x107   :  { %1328 = vst [vmem:[%s1799_s3 + $0x78] sm:$0xff] %v1232_v61   ;;  %v1227_v3 = vpack.c.bf16 %v498_v62, %v495_v60  ;;  %1344 = vst [vmem:[%s1799_s3 + $0xf8] sm:$0xff] %v1312_v1   ;;  %v1307_v4 = vpack.c.bf16 %v626_v2, %v623_v0 }
 0x109   :  { %1327 = vst [vmem:[%s1799_s3 + $0x70] sm:$0xff] %v1227_v3   ;;  %1343 = vst [vmem:[%s1799_s3 + $0xf0] sm:$0xff] %v1307_v4  }

// kernel: _lambda_.41
= control target key start
LH: loop header
LB: loop body
LE: loop exit
PB: predicated region body
PF: predicated region fallthrough
CT: control target
= control target key end

     0   :  { %vm379_vm0 = vcmask 1043456   ;;  %vm282_vm1 = vcmask 588800   ;;  %s1937_s1 = inlined_call_operand.vmem [shape: bf16[72,128], index: 1, kind: input, shape index: {}]   ;;  %s1938_s0 = inlined_call_operand.vmem [shape: bf16[512,72], index: 0, kind: input, shape index: {}]   ;;  %s1939_s2 = inlined_call_operand.vmem [shape: f32[1,128], index: 2, kind: input, shape index: {}]   ;;  %s1940_s3 = inlined_call_operand.vmem [shape: bf16[512,128], index: 3, kind: output, shape index: {}]  }
   0x1   :  { %v1572_v0 = vld [vmem:[%s1937_s1 + $0x20] ss:$0 sps:$4 sm:$0xff]   ;;  %v1573_v1 = vld [vmem:[%s1937_s1 + $0x18] sm:$0xff]   ;;  %v1574_v3 = vld [vmem:[%s1937_s1 + $0x10] sm:$0xff]  }
   0x2   :  { %1570 = vmatprep.subr.msk.bf16.mxu0 %vm379_vm0, %v1572_v0  ;;  %1571 = vmatprep.subr.msk.bf16.mxu1 %vm379_vm0, %v1572_v0  ;;  %v381_v2 = vsel %vm379_vm0, %v1572_v0, 0  ;;  %v1577_v4 = vld [vmem:[%s1938_s0] sm:$0xff]   ;;  %v1575_v6 = vld [vmem:[%s1937_s1 + $0x8] sm:$0xff]   ;;  %v1581_v10 = vld [vmem:[%s1938_s0 + $0x10] sm:$0xff]  }
   0x3   :  { %1487 = vmatpush3.bf16.msra.mxu0 %v381_v2  ;;  %1565 = vmatpush3.bf16.msra.mxu1 %v381_v2  ;;  %v1578_v5 = vld [vmem:[%s1938_s0 + $0x80] sm:$0xff]   ;;  %v1579_v8 = vld [vmem:[%s1938_s0 + $0x8] sm:$0xff]   ;;  %v1582_v11 = vld [vmem:[%s1938_s0 + $0x90] sm:$0xff]  }
   0x4   :  { %1488 = vmatprep.subr.bf16.mxu0 %v1573_v1  ;;  %1561 = vmatprep.subr.bf16.mxu1 %v1573_v1  ;;  %v1576_v7 = vld [vmem:[%s1937_s1] sm:$0xff]   ;;  %v1580_v9 = vld [vmem:[%s1938_s0 + $0x88] sm:$0xff]   ;;  %v1583_v12 = vld [vmem:[%s1938_s0 + $0x18] sm:$0xff]  }
   0x5   :  { %1496 = vmatprep.mubr.msk.bf16.mxu0 %vm282_vm1, %v1577_v4  ;;  %1528 = vmatprep.mubr.msk.bf16.mxu1 %vm282_vm1, %v1578_v5  ;;  %v1584_v13 = vld [vmem:[%s1938_s0 + $0x98] sm:$0xff]   ;;  %v1585_v14 = vld [vmem:[%s1938_s0 + $0x20] sm:$0xff]   ;;  %v1587_v16 = vld [vmem:[%s1938_s0 + $0x28] sm:$0xff]  }
   0x6   :  { %v1586_v15 = vld [vmem:[%s1938_s0 + $0xa0] sm:$0xff]   ;;  %v1588_v17 = vld [vmem:[%s1938_s0 + $0xa8] sm:$0xff]   ;;  %v1589_v18 = vld [vmem:[%s1938_s0 + $0x30] sm:$0xff]  }
   0x7   :  { %1489 = vmatpush3.bf16.msra.mxu0 %v1573_v1  ;;  %1566 = vmatpush3.bf16.msra.mxu1 %v1573_v1  ;;  %v1590_v19 = vld [vmem:[%s1938_s0 + $0xb0] sm:$0xff]   ;;  %v1591_v20 = vld [vmem:[%s1938_s0 + $0x38] sm:$0xff]   ;;  %v1593_v22 = vld [vmem:[%s1938_s0 + $0x40] sm:$0xff]  }
   0x8   :  { %1490 = vmatprep.subr.bf16.mxu0 %v1574_v3  ;;  %1562 = vmatprep.subr.bf16.mxu1 %v1574_v3  ;;  %v1592_v21 = vld [vmem:[%s1938_s0 + $0xb8] sm:$0xff]   ;;  %v1594_v23 = vld [vmem:[%s1938_s0 + $0xc0] sm:$0xff]   ;;  %v1595_v24 = vld [vmem:[%s1938_s0 + $0x48] sm:$0xff]  }
   0x9   :  { %v1596_v25 = vld [vmem:[%s1938_s0 + $0xc8] sm:$0xff]   ;;  %v1597_v26 = vld [vmem:[%s1938_s0 + $0x50] sm:$0xff]   ;;  %v1599_v28 = vld [vmem:[%s1938_s0 + $0x58] sm:$0xff]  }
   0xa   :  { %v1598_v27 = vld [vmem:[%s1938_s0 + $0xd0] sm:$0xff]   ;;  %v1600_v29 = vld [vmem:[%s1938_s0 + $0xd8] sm:$0xff]   ;;  %v1601_v30 = vld [vmem:[%s1938_s0 + $0x60] sm:$0xff]  }
   0xb   :  { %1491 = vmatpush3.bf16.msra.mxu0 %v1574_v3  ;;  %1567 = vmatpush3.bf16.msra.mxu1 %v1574_v3  ;;  %v1602_v31 = vld [vmem:[%s1938_s0 + $0xe0] sm:$0xff]   ;;  %v1603_v32 = vld [vmem:[%s1938_s0 + $0x68] sm:$0xff]   ;;  %v1605_v34 = vld [vmem:[%s1938_s0 + $0x70] sm:$0xff]  }
   0xc   :  { %1492 = vmatprep.subr.bf16.mxu0 %v1575_v6  ;;  %1563 = vmatprep.subr.bf16.mxu1 %v1575_v6  ;;  %v1604_v33 = vld [vmem:[%s1938_s0 + $0xe8] sm:$0xff]   ;;  %v1606_v35 = vld [vmem:[%s1938_s0 + $0xf0] sm:$0xff]   ;;  %v1607_v36 = vld [vmem:[%s1938_s0 + $0x78] sm:$0xff]  }
   0xd   :  { %v1608_v37 = vld [vmem:[%s1938_s0 + $0xf8] sm:$0xff]   ;;  %v1775_v38 = vld [vmem:[%s1939_s2] ss:$0 sm:$0xff] }
   0xf   :  { %1493 = vmatpush3.bf16.msra.mxu0 %v1575_v6  ;;  %1568 = vmatpush3.bf16.msra.mxu1 %v1575_v6 }
  0x10   :  { %1494 = vmatprep.subr.bf16.mxu0 %v1576_v7  ;;  %1564 = vmatprep.subr.bf16.mxu1 %v1576_v7 }
  0x13   :  { %1495 = vmatpush3.bf16.msra.mxu0 %v1576_v7  ;;  %1569 = vmatpush3.bf16.msra.mxu1 %v1576_v7 }
  0x16   :  { %1497 = vmatmul.mubr.msk.bf16.vlgmr.msra.gmra.mxu0 %vm282_vm1, %v1579_v8  ;;  %1529 = vmatmul.mubr.msk.bf16.vlgmr.msra.gmra.mxu1 %vm282_vm1, %v1580_v9 }
  0x17   :  { %1500 = vmatprep.mubr.msk.bf16.mxu0 %vm282_vm1, %v1581_v10  ;;  %1532 = vmatprep.mubr.msk.bf16.mxu1 %vm282_vm1, %v1582_v11 }
  0x1e   :  { %1501 = vmatmul.mubr.msk.bf16.gmra.mxu0 %vm282_vm1, %v1583_v12  ;;  %1533 = vmatmul.mubr.msk.bf16.gmra.mxu1 %vm282_vm1, %v1584_v13 }
  0x1f   :  { %1504 = vmatprep.mubr.msk.bf16.mxu0 %vm282_vm1, %v1585_v14  ;;  %1536 = vmatprep.mubr.msk.bf16.mxu1 %vm282_vm1, %v1586_v15 }
  0x26   :  { %1505 = vmatmul.mubr.msk.bf16.gmra.mxu0 %vm282_vm1, %v1587_v16  ;;  %1537 = vmatmul.mubr.msk.bf16.gmra.mxu1 %vm282_vm1, %v1588_v17 }
  0x27   :  { %1508 = vmatprep.mubr.msk.bf16.mxu0 %vm282_vm1, %v1589_v18  ;;  %1540 = vmatprep.mubr.msk.bf16.mxu1 %vm282_vm1, %v1590_v19 }
  0x2e   :  { %1509 = vmatmul.mubr.msk.bf16.gmra.mxu0 %vm282_vm1, %v1591_v20  ;;  %1541 = vmatmul.mubr.msk.bf16.gmra.mxu1 %vm282_vm1, %v1592_v21 }
  0x2f   :  { %1512 = vmatprep.mubr.msk.bf16.mxu0 %vm282_vm1, %v1593_v22  ;;  %1544 = vmatprep.mubr.msk.bf16.mxu1 %vm282_vm1, %v1594_v23 }
  0x36   :  { %1513 = vmatmul.mubr.msk.bf16.gmra.mxu0 %vm282_vm1, %v1595_v24  ;;  %1545 = vmatmul.mubr.msk.bf16.gmra.mxu1 %vm282_vm1, %v1596_v25 }
  0x37   :  { %1516 = vmatprep.mubr.msk.bf16.mxu0 %vm282_vm1, %v1597_v26  ;;  %1548 = vmatprep.mubr.msk.bf16.mxu1 %vm282_vm1, %v1598_v27 }
  0x3e   :  { %1517 = vmatmul.mubr.msk.bf16.gmra.mxu0 %vm282_vm1, %v1599_v28  ;;  %1549 = vmatmul.mubr.msk.bf16.gmra.mxu1 %vm282_vm1, %v1600_v29 }
  0x3f   :  { %1520 = vmatprep.mubr.msk.bf16.mxu0 %vm282_vm1, %v1601_v30  ;;  %1552 = vmatprep.mubr.msk.bf16.mxu1 %vm282_vm1, %v1602_v31 }
  0x46   :  { %1521 = vmatmul.mubr.msk.bf16.gmra.mxu0 %vm282_vm1, %v1603_v32  ;;  %1553 = vmatmul.mubr.msk.bf16.gmra.mxu1 %vm282_vm1, %v1604_v33 }
  0x47   :  { %1524 = vmatprep.mubr.msk.bf16.mxu0 %vm282_vm1, %v1605_v34  ;;  %1556 = vmatprep.mubr.msk.bf16.mxu1 %vm282_vm1, %v1606_v35 }
  0x4e   :  { %1525 = vmatmul.mubr.msk.bf16.gmra.mxu0 %vm282_vm1, %v1607_v36  ;;  %1557 = vmatmul.mubr.msk.bf16.gmra.mxu1 %vm282_vm1, %v1608_v37 }
  0xd6   :  { %v1498_v39 = vpop.f32.mrf.mxu0  ;;  %v1530_v40 = vpop.f32.mrf.mxu1 }
  0xd7   :  { %v426_v41 = vadd.f32 %v1498_v39, %v1775_v38  ;;  %v554_v42 = vadd.f32 %v1530_v40, %v1775_v38 }
  0xd8   :  { %v417_v43 = vpop.f32.mrf.mxu0  ;;  %v545_v44 = vpop.f32.mrf.mxu1 }
  0xd9   :  { %v418_v45 = vadd.f32 %v1775_v38, %v417_v43  ;;  %v546_v46 = vadd.f32 %v1775_v38, %v545_v44  ;;  %v674_v51 = vmax.f32 %v426_v41, 0.0  ;;  %v706_v52 = vmax.f32 %v554_v42, 0.0 }
  0xda   :  { %v1499_v47 = vpop.f32.mrf.mxu0  ;;  %v1531_v48 = vpop.f32.mrf.mxu1 }
  0xdb   :  { %v429_v49 = vadd.f32 %v1499_v47, %v1775_v38  ;;  %v557_v50 = vadd.f32 %v1531_v48, %v1775_v38  ;;  %v672_v59 = vmax.f32 %v418_v45, 0.0  ;;  %v704_v60 = vmax.f32 %v546_v46, 0.0 }
  0xdc   :  { %v420_v53 = vpop.f32.mrf.mxu0  ;;  %v548_v54 = vpop.f32.mrf.mxu1 }
  0xdd   :  { %v675_v55 = vmax.f32 %v429_v49, 0.0  ;;  %v707_v56 = vmax.f32 %v557_v50, 0.0  ;;  %v421_v57 = vadd.f32 %v1775_v38, %v420_v53  ;;  %v549_v58 = vadd.f32 %v1775_v38, %v548_v54 }
  0xde   :  { %v1502_v61 = vpop.f32.mrf.mxu0  ;;  %v1534_v62 = vpop.f32.mrf.mxu1 }
  0xdf   :  { %v1266_v63 = vpack.c.bf16 %v675_v55, %v674_v51  ;;  %v1346_v0 = vpack.c.bf16 %v707_v56, %v706_v52  ;;  %v673_v1 = vmax.f32 %v421_v57, 0.0  ;;  %v705_v2 = vmax.f32 %v549_v58, 0.0 }
  0xe0   :  { %v442_v3 = vadd.f32 %v1502_v61, %v1775_v38  ;;  %v570_v4 = vadd.f32 %v1534_v62, %v1775_v38  ;;  %v433_v5 = vpop.f32.mrf.mxu0  ;;  %v561_v6 = vpop.f32.mrf.mxu1 }
  0xe1   :  { %1418 = vst [vmem:[%s1940_s3 + $0x8] sm:$0xff] %v1266_v63   ;;  %1434 = vst [vmem:[%s1940_s3 + $0x88] sm:$0xff] %v1346_v0   ;;  %v1261_v7 = vpack.c.bf16 %v673_v1, %v672_v59  ;;  %v1341_v8 = vpack.c.bf16 %v705_v2, %v704_v60  ;;  %v434_v9 = vadd.f32 %v1775_v38, %v433_v5 }
  0xe2   :  { %v562_v10 = vadd.f32 %v1775_v38, %v561_v6  ;;  %v1503_v11 = vpop.f32.mrf.mxu0  ;;  %v1535_v12 = vpop.f32.mrf.mxu1  ;;  %v678_v15 = vmax.f32 %v442_v3, 0.0  ;;  %v710_v16 = vmax.f32 %v570_v4, 0.0 }
  0xe3   :  { %1262 = vst [vmem:[%s1940_s3] sm:$0xff] %v1261_v7   ;;  %1433 = vst [vmem:[%s1940_s3 + $0x80] sm:$0xff] %v1341_v8   ;;  %v445_v13 = vadd.f32 %v1503_v11, %v1775_v38  ;;  %v573_v14 = vadd.f32 %v1535_v12, %v1775_v38  ;;  %v676_v23 = vmax.f32 %v434_v9, 0.0 }
  0xe4   :  { %v436_v17 = vpop.f32.mrf.mxu0  ;;  %v564_v18 = vpop.f32.mrf.mxu1  ;;  %v708_v24 = vmax.f32 %v562_v10, 0.0 }
  0xe5   :  { %v679_v19 = vmax.f32 %v445_v13, 0.0  ;;  %v711_v20 = vmax.f32 %v573_v14, 0.0  ;;  %v437_v21 = vadd.f32 %v1775_v38, %v436_v17  ;;  %v565_v22 = vadd.f32 %v1775_v38, %v564_v18 }
  0xe6   :  { %v1506_v25 = vpop.f32.mrf.mxu0  ;;  %v1538_v26 = vpop.f32.mrf.mxu1 }
  0xe7   :  { %v1276_v27 = vpack.c.bf16 %v679_v19, %v678_v15  ;;  %v1356_v28 = vpack.c.bf16 %v711_v20, %v710_v16  ;;  %v677_v29 = vmax.f32 %v437_v21, 0.0  ;;  %v709_v30 = vmax.f32 %v565_v22, 0.0 }
  0xe8   :  { %v458_v31 = vadd.f32 %v1506_v25, %v1775_v38  ;;  %v586_v32 = vadd.f32 %v1538_v26, %v1775_v38  ;;  %v449_v33 = vpop.f32.mrf.mxu0  ;;  %v577_v34 = vpop.f32.mrf.mxu1 }
  0xe9   :  { %1420 = vst [vmem:[%s1940_s3 + $0x18] sm:$0xff] %v1276_v27   ;;  %1436 = vst [vmem:[%s1940_s3 + $0x98] sm:$0xff] %v1356_v28   ;;  %v1271_v35 = vpack.c.bf16 %v677_v29, %v676_v23  ;;  %v1351_v36 = vpack.c.bf16 %v709_v30, %v708_v24  ;;  %v450_v37 = vadd.f32 %v1775_v38, %v449_v33 }
  0xea   :  { %v578_v39 = vadd.f32 %v1775_v38, %v577_v34  ;;  %v1507_v40 = vpop.f32.mrf.mxu0  ;;  %v1539_v41 = vpop.f32.mrf.mxu1  ;;  %v682_v44 = vmax.f32 %v458_v31, 0.0  ;;  %v714_v45 = vmax.f32 %v586_v32, 0.0 }
  0xeb   :  { %1419 = vst [vmem:[%s1940_s3 + $0x10] sm:$0xff] %v1271_v35   ;;  %1435 = vst [vmem:[%s1940_s3 + $0x90] sm:$0xff] %v1351_v36   ;;  %v461_v42 = vadd.f32 %v1507_v40, %v1775_v38  ;;  %v589_v43 = vadd.f32 %v1539_v41, %v1775_v38  ;;  %v680_v52 = vmax.f32 %v450_v37, 0.0 }
  0xec   :  { %v452_v46 = vpop.f32.mrf.mxu0  ;;  %v580_v47 = vpop.f32.mrf.mxu1  ;;  %v712_v53 = vmax.f32 %v578_v39, 0.0 }
  0xed   :  { %v683_v48 = vmax.f32 %v461_v42, 0.0  ;;  %v715_v49 = vmax.f32 %v589_v43, 0.0  ;;  %v453_v50 = vadd.f32 %v1775_v38, %v452_v46  ;;  %v581_v51 = vadd.f32 %v1775_v38, %v580_v47 }
  0xee   :  { %v1510_v54 = vpop.f32.mrf.mxu0  ;;  %v1542_v55 = vpop.f32.mrf.mxu1 }
  0xef   :  { %v1286_v56 = vpack.c.bf16 %v683_v48, %v682_v44  ;;  %v1366_v57 = vpack.c.bf16 %v715_v49, %v714_v45  ;;  %v681_v58 = vmax.f32 %v453_v50, 0.0  ;;  %v713_v59 = vmax.f32 %v581_v51, 0.0 }
  0xf0   :  { %v474_v60 = vadd.f32 %v1510_v54, %v1775_v38  ;;  %v602_v61 = vadd.f32 %v1542_v55, %v1775_v38  ;;  %v465_v62 = vpop.f32.mrf.mxu0  ;;  %v593_v63 = vpop.f32.mrf.mxu1 }
  0xf1   :  { %1422 = vst [vmem:[%s1940_s3 + $0x28] sm:$0xff] %v1286_v56   ;;  %1438 = vst [vmem:[%s1940_s3 + $0xa8] sm:$0xff] %v1366_v57   ;;  %v1281_v0 = vpack.c.bf16 %v681_v58, %v680_v52  ;;  %v1361_v1 = vpack.c.bf16 %v713_v59, %v712_v53  ;;  %v466_v2 = vadd.f32 %v1775_v38, %v465_v62 }
  0xf2   :  { %v594_v3 = vadd.f32 %v1775_v38, %v593_v63  ;;  %v1511_v4 = vpop.f32.mrf.mxu0  ;;  %v1543_v5 = vpop.f32.mrf.mxu1  ;;  %v686_v8 = vmax.f32 %v474_v60, 0.0  ;;  %v718_v9 = vmax.f32 %v602_v61, 0.0 }
  0xf3   :  { %1421 = vst [vmem:[%s1940_s3 + $0x20] sm:$0xff] %v1281_v0   ;;  %1437 = vst [vmem:[%s1940_s3 + $0xa0] sm:$0xff] %v1361_v1   ;;  %v477_v6 = vadd.f32 %v1511_v4, %v1775_v38  ;;  %v605_v7 = vadd.f32 %v1543_v5, %v1775_v38  ;;  %v684_v16 = vmax.f32 %v466_v2, 0.0 }
  0xf4   :  { %v468_v10 = vpop.f32.mrf.mxu0  ;;  %v596_v11 = vpop.f32.mrf.mxu1  ;;  %v716_v17 = vmax.f32 %v594_v3, 0.0 }
  0xf5   :  { %v687_v12 = vmax.f32 %v477_v6, 0.0  ;;  %v719_v13 = vmax.f32 %v605_v7, 0.0  ;;  %v469_v14 = vadd.f32 %v1775_v38, %v468_v10  ;;  %v597_v15 = vadd.f32 %v1775_v38, %v596_v11 }
  0xf6   :  { %v1514_v18 = vpop.f32.mrf.mxu0  ;;  %v1546_v19 = vpop.f32.mrf.mxu1 }
  0xf7   :  { %v1296_v20 = vpack.c.bf16 %v687_v12, %v686_v8  ;;  %v1376_v21 = vpack.c.bf16 %v719_v13, %v718_v9  ;;  %v685_v22 = vmax.f32 %v469_v14, 0.0  ;;  %v717_v23 = vmax.f32 %v597_v15, 0.0 }
  0xf8   :  { %v490_v24 = vadd.f32 %v1514_v18, %v1775_v38  ;;  %v618_v25 = vadd.f32 %v1546_v19, %v1775_v38  ;;  %v481_v26 = vpop.f32.mrf.mxu0  ;;  %v609_v27 = vpop.f32.mrf.mxu1 }
  0xf9   :  { %1424 = vst [vmem:[%s1940_s3 + $0x38] sm:$0xff] %v1296_v20   ;;  %1440 = vst [vmem:[%s1940_s3 + $0xb8] sm:$0xff] %v1376_v21   ;;  %v1291_v28 = vpack.c.bf16 %v685_v22, %v684_v16  ;;  %v1371_v29 = vpack.c.bf16 %v717_v23, %v716_v17  ;;  %v482_v30 = vadd.f32 %v1775_v38, %v481_v26 }
  0xfa   :  { %v610_v31 = vadd.f32 %v1775_v38, %v609_v27  ;;  %v1515_v32 = vpop.f32.mrf.mxu0  ;;  %v1547_v33 = vpop.f32.mrf.mxu1  ;;  %v690_v36 = vmax.f32 %v490_v24, 0.0  ;;  %v722_v37 = vmax.f32 %v618_v25, 0.0 }
  0xfb   :  { %1423 = vst [vmem:[%s1940_s3 + $0x30] sm:$0xff] %v1291_v28   ;;  %1439 = vst [vmem:[%s1940_s3 + $0xb0] sm:$0xff] %v1371_v29   ;;  %v493_v34 = vadd.f32 %v1515_v32, %v1775_v38  ;;  %v621_v35 = vadd.f32 %v1547_v33, %v1775_v38  ;;  %v688_v45 = vmax.f32 %v482_v30, 0.0 }
  0xfc   :  { %v484_v39 = vpop.f32.mrf.mxu0  ;;  %v612_v40 = vpop.f32.mrf.mxu1  ;;  %v720_v46 = vmax.f32 %v610_v31, 0.0 }
  0xfd   :  { %v691_v41 = vmax.f32 %v493_v34, 0.0  ;;  %v723_v42 = vmax.f32 %v621_v35, 0.0  ;;  %v485_v43 = vadd.f32 %v1775_v38, %v484_v39  ;;  %v613_v44 = vadd.f32 %v1775_v38, %v612_v40 }
  0xfe   :  { %v1518_v47 = vpop.f32.mrf.mxu0  ;;  %v1550_v48 = vpop.f32.mrf.mxu1 }
  0xff   :  { %v1306_v49 = vpack.c.bf16 %v691_v41, %v690_v36  ;;  %v1386_v50 = vpack.c.bf16 %v723_v42, %v722_v37  ;;  %v689_v51 = vmax.f32 %v485_v43, 0.0  ;;  %v721_v52 = vmax.f32 %v613_v44, 0.0 }
 0x100   :  { %v506_v53 = vadd.f32 %v1518_v47, %v1775_v38  ;;  %v634_v54 = vadd.f32 %v1550_v48, %v1775_v38  ;;  %v497_v55 = vpop.f32.mrf.mxu0  ;;  %v625_v56 = vpop.f32.mrf.mxu1 }
 0x101   :  { %1426 = vst [vmem:[%s1940_s3 + $0x48] sm:$0xff] %v1306_v49   ;;  %1442 = vst [vmem:[%s1940_s3 + $0xc8] sm:$0xff] %v1386_v50   ;;  %v1301_v57 = vpack.c.bf16 %v689_v51, %v688_v45  ;;  %v1381_v58 = vpack.c.bf16 %v721_v52, %v720_v46  ;;  %v498_v59 = vadd.f32 %v1775_v38, %v497_v55 }
 0x102   :  { %v626_v60 = vadd.f32 %v1775_v38, %v625_v56  ;;  %v1519_v61 = vpop.f32.mrf.mxu0  ;;  %v1551_v62 = vpop.f32.mrf.mxu1  ;;  %v694_v1 = vmax.f32 %v506_v53, 0.0  ;;  %v726_v2 = vmax.f32 %v634_v54, 0.0 }
 0x103   :  { %1425 = vst [vmem:[%s1940_s3 + $0x40] sm:$0xff] %v1301_v57   ;;  %1441 = vst [vmem:[%s1940_s3 + $0xc0] sm:$0xff] %v1381_v58   ;;  %v509_v63 = vadd.f32 %v1519_v61, %v1775_v38  ;;  %v637_v0 = vadd.f32 %v1551_v62, %v1775_v38  ;;  %v692_v9 = vmax.f32 %v498_v59, 0.0 }
 0x104   :  { %v500_v3 = vpop.f32.mrf.mxu0  ;;  %v628_v4 = vpop.f32.mrf.mxu1  ;;  %v724_v10 = vmax.f32 %v626_v60, 0.0 }
 0x105   :  { %v695_v5 = vmax.f32 %v509_v63, 0.0  ;;  %v727_v6 = vmax.f32 %v637_v0, 0.0  ;;  %v501_v7 = vadd.f32 %v1775_v38, %v500_v3  ;;  %v629_v8 = vadd.f32 %v1775_v38, %v628_v4 }
 0x106   :  { %v1522_v11 = vpop.f32.mrf.mxu0  ;;  %v1554_v12 = vpop.f32.mrf.mxu1 }
 0x107   :  { %v1316_v13 = vpack.c.bf16 %v695_v5, %v694_v1  ;;  %v1396_v14 = vpack.c.bf16 %v727_v6, %v726_v2  ;;  %v693_v15 = vmax.f32 %v501_v7, 0.0  ;;  %v725_v16 = vmax.f32 %v629_v8, 0.0 }
 0x108   :  { %v522_v17 = vadd.f32 %v1522_v11, %v1775_v38  ;;  %v650_v18 = vadd.f32 %v1554_v12, %v1775_v38  ;;  %v513_v19 = vpop.f32.mrf.mxu0  ;;  %v641_v20 = vpop.f32.mrf.mxu1 }
 0x109   :  { %1428 = vst [vmem:[%s1940_s3 + $0x58] sm:$0xff] %v1316_v13   ;;  %1444 = vst [vmem:[%s1940_s3 + $0xd8] sm:$0xff] %v1396_v14   ;;  %v1311_v21 = vpack.c.bf16 %v693_v15, %v692_v9  ;;  %v1391_v22 = vpack.c.bf16 %v725_v16, %v724_v10  ;;  %v514_v23 = vadd.f32 %v1775_v38, %v513_v19 }
 0x10a   :  { %v642_v24 = vadd.f32 %v1775_v38, %v641_v20  ;;  %v1523_v25 = vpop.f32.mrf.mxu0  ;;  %v1555_v26 = vpop.f32.mrf.mxu1  ;;  %v698_v29 = vmax.f32 %v522_v17, 0.0  ;;  %v730_v30 = vmax.f32 %v650_v18, 0.0 }
 0x10b   :  { %1427 = vst [vmem:[%s1940_s3 + $0x50] sm:$0xff] %v1311_v21   ;;  %1443 = vst [vmem:[%s1940_s3 + $0xd0] sm:$0xff] %v1391_v22   ;;  %v525_v27 = vadd.f32 %v1523_v25, %v1775_v38  ;;  %v653_v28 = vadd.f32 %v1555_v26, %v1775_v38  ;;  %v696_v37 = vmax.f32 %v514_v23, 0.0 }
 0x10c   :  { %v516_v31 = vpop.f32.mrf.mxu0  ;;  %v644_v32 = vpop.f32.mrf.mxu1  ;;  %v728_v39 = vmax.f32 %v642_v24, 0.0 }
 0x10d   :  { %v699_v33 = vmax.f32 %v525_v27, 0.0  ;;  %v731_v34 = vmax.f32 %v653_v28, 0.0  ;;  %v517_v35 = vadd.f32 %v1775_v38, %v516_v31  ;;  %v645_v36 = vadd.f32 %v1775_v38, %v644_v32 }
 0x10e   :  { %v1526_v40 = vpop.f32.mrf.mxu0  ;;  %v1558_v41 = vpop.f32.mrf.mxu1 }
 0x10f   :  { %v1326_v42 = vpack.c.bf16 %v699_v33, %v698_v29  ;;  %v1406_v43 = vpack.c.bf16 %v731_v34, %v730_v30  ;;  %v697_v44 = vmax.f32 %v517_v35, 0.0  ;;  %v729_v45 = vmax.f32 %v645_v36, 0.0 }
 0x110   :  { %v538_v46 = vadd.f32 %v1526_v40, %v1775_v38  ;;  %v666_v47 = vadd.f32 %v1558_v41, %v1775_v38  ;;  %v529_v48 = vpop.f32.mrf.mxu0  ;;  %v657_v49 = vpop.f32.mrf.mxu1 }
 0x111   :  { %1430 = vst [vmem:[%s1940_s3 + $0x68] sm:$0xff] %v1326_v42   ;;  %1446 = vst [vmem:[%s1940_s3 + $0xe8] sm:$0xff] %v1406_v43   ;;  %v1321_v50 = vpack.c.bf16 %v697_v44, %v696_v37  ;;  %v1401_v51 = vpack.c.bf16 %v729_v45, %v728_v39  ;;  %v530_v52 = vadd.f32 %v1775_v38, %v529_v48 }
 0x112   :  { %v658_v53 = vadd.f32 %v1775_v38, %v657_v49  ;;  %v1527_v54 = vpop.f32.mrf.mxu0  ;;  %v1559_v55 = vpop.f32.mrf.mxu1  ;;  %v702_v58 = vmax.f32 %v538_v46, 0.0  ;;  %v734_v59 = vmax.f32 %v666_v47, 0.0 }
 0x113   :  { %1429 = vst [vmem:[%s1940_s3 + $0x60] sm:$0xff] %v1321_v50   ;;  %1445 = vst [vmem:[%s1940_s3 + $0xe0] sm:$0xff] %v1401_v51   ;;  %v541_v56 = vadd.f32 %v1527_v54, %v1775_v38  ;;  %v669_v57 = vadd.f32 %v1559_v55, %v1775_v38  ;;  %v700_v2 = vmax.f32 %v530_v52, 0.0 }
 0x114   :  { %v532_v60 = vpop.f32.mrf.mxu0  ;;  %v660_v61 = vpop.f32.mrf.mxu1  ;;  %v732_v3 = vmax.f32 %v658_v53, 0.0 }
 0x115   :  { %v703_v62 = vmax.f32 %v541_v56, 0.0  ;;  %v735_v63 = vmax.f32 %v669_v57, 0.0  ;;  %v533_v0 = vadd.f32 %v1775_v38, %v532_v60  ;;  %v661_v1 = vadd.f32 %v1775_v38, %v660_v61 }
 0x117   :  { %v1336_v4 = vpack.c.bf16 %v703_v62, %v702_v58  ;;  %v1416_v5 = vpack.c.bf16 %v735_v63, %v734_v59  ;;  %v701_v6 = vmax.f32 %v533_v0, 0.0  ;;  %v733_v7 = vmax.f32 %v661_v1, 0.0 }
 0x119   :  { %1432 = vst [vmem:[%s1940_s3 + $0x78] sm:$0xff] %v1336_v4   ;;  %1448 = vst [vmem:[%s1940_s3 + $0xf8] sm:$0xff] %v1416_v5   ;;  %v1331_v8 = vpack.c.bf16 %v701_v6, %v700_v2  ;;  %v1411_v9 = vpack.c.bf16 %v733_v7, %v732_v3 }
 0x11b   :  { %1431 = vst [vmem:[%s1940_s3 + $0x70] sm:$0xff] %v1331_v8   ;;  %1447 = vst [vmem:[%s1940_s3 + $0xf0] sm:$0xff] %v1411_v9  }

// kernel: _lambda_.43
= control target key start
LH: loop header
LB: loop body
LE: loop exit
PB: predicated region body
PF: predicated region fallthrough
CT: control target
= control target key end

     0   :  { %v1769_v0 = vmov 0   ;;  %vm446_vm0 = vcmask 130048   ;;  %s2206_s1 = inlined_call_operand.vmem [shape: bf16[144,128], index: 1, kind: input, shape index: {}]   ;;  %s2207_s0 = inlined_call_operand.vmem [shape: bf16[512,144], index: 0, kind: input, shape index: {}]   ;;  %s2208_s2 = inlined_call_operand.vmem [shape: f32[1,128], index: 2, kind: input, shape index: {}]   ;;  %s2209_s3 = inlined_call_operand.vmem [shape: bf16[512,128], index: 3, kind: output, shape index: {}]  }
   0x1   :  { %543 = vmatprep.subr.bf16.mxu0 %v1769_v0  ;;  %1645 = vmatprep.subr.bf16.mxu1 %v1769_v0  ;;  %v1664_v1 = vld [vmem:[%s2206_s1 + $0x38] sm:$0xff]   ;;  %v1665_v2 = vld [vmem:[%s2206_s1 + $0x30] sm:$0xff]   ;;  %v1666_v3 = vld [vmem:[%s2206_s1 + $0x28] sm:$0xff]  }
   0x2   :  { %544 = vmatpush1.bf16.msra.mxu0 %v1664_v1  ;;  %1654 = vmatpush1.bf16.msra.mxu1 %v1664_v1  ;;  %v1667_v4 = vld [vmem:[%s2206_s1 + $0x20] sm:$0xff]   ;;  %v1668_v7 = vld [vmem:[%s2206_s1 + $0x18] sm:$0xff]   ;;  %v1669_v8 = vld [vmem:[%s2206_s1 + $0x10] sm:$0xff]  }
   0x3   :  { %545 = vmatprep.subr.bf16.mxu0 %v1769_v0  ;;  %1646 = vmatprep.subr.bf16.mxu1 %v1769_v0  ;;  %v1675_v5 = vld [vmem:[%s2207_s0 + $0x4] ss:$8 sps:$4 sm:$0xff]   ;;  %v1673_v12 = vld [vmem:[%s2207_s0] ss:$8 sps:$4 sm:$0xff]   ;;  %v1679_v14 = vld [vmem:[%s2207_s0 + $0x14] ss:$8 sps:$4 sm:$0xff]  }
   0x4   :  { %v1678_v6 = vld [vmem:[%s2207_s0 + $0x104] ss:$8 sps:$4 sm:$0xff]   ;;  %1294 = vmatprep.mubr.msk.bf16.mxu0 %vm446_vm0, %v1675_v5  ;;  %v1676_v13 = vld [vmem:[%s2207_s0 + $0x100] ss:$8 sps:$4 sm:$0xff]   ;;  %v1681_v15 = vld [vmem:[%s2207_s0 + $0x114] ss:$8 sps:$4 sm:$0xff]  }
   0x5   :  { %1310 = vmatprep.mubr.msk.bf16.mxu1 %vm446_vm0, %v1678_v6  ;;  %v1670_v9 = vld [vmem:[%s2206_s1 + $0x8] sm:$0xff]   ;;  %v1671_v10 = vld [vmem:[%s2206_s1] sm:$0xff]   ;;  %v1683_v16 = vld [vmem:[%s2207_s0 + $0x10] ss:$8 sps:$4 sm:$0xff]  }
   0x6   :  { %546 = vmatpush1.bf16.msra.mxu0 %v1665_v2  ;;  %1655 = vmatpush1.bf16.msra.mxu1 %v1665_v2  ;;  %v1672_v11 = vld [vmem:[%s2206_s1 + $0x40] sm:$0xff]   ;;  %v1684_v17 = vld [vmem:[%s2207_s0 + $0x110] ss:$8 sps:$4 sm:$0xff]   ;;  %v1691_v22 = vld [vmem:[%s2207_s0 + $0x34] ss:$8 sps:$4 sm:$0xff]  }
   0x7   :  { %547 = vmatprep.subr.bf16.mxu0 %v1769_v0  ;;  %1647 = vmatprep.subr.bf16.mxu1 %v1769_v0  ;;  %v1685_v18 = vld [vmem:[%s2207_s0 + $0x24] ss:$8 sps:$4 sm:$0xff]   ;;  %v1689_v20 = vld [vmem:[%s2207_s0 + $0x20] ss:$8 sps:$4 sm:$0xff]   ;;  %v1693_v23 = vld [vmem:[%s2207_s0 + $0x134] ss:$8 sps:$4 sm:$0xff]  }
   0x8   :  { %v1687_v19 = vld [vmem:[%s2207_s0 + $0x124] ss:$8 sps:$4 sm:$0xff]   ;;  %v1690_v21 = vld [vmem:[%s2207_s0 + $0x120] ss:$8 sps:$4 sm:$0xff]   ;;  %v1695_v24 = vld [vmem:[%s2207_s0 + $0x30] ss:$8 sps:$4 sm:$0xff]  }
   0x9   :  { %v1696_v25 = vld [vmem:[%s2207_s0 + $0x130] ss:$8 sps:$4 sm:$0xff]   ;;  %v1697_v26 = vld [vmem:[%s2207_s0 + $0x44] ss:$8 sps:$4 sm:$0xff]   ;;  %v1701_v28 = vld [vmem:[%s2207_s0 + $0x40] ss:$8 sps:$4 sm:$0xff]  }
   0xa   :  { %548 = vmatpush1.bf16.msra.mxu0 %v1666_v3  ;;  %1656 = vmatpush1.bf16.msra.mxu1 %v1666_v3  ;;  %v1699_v27 = vld [vmem:[%s2207_s0 + $0x144] ss:$8 sps:$4 sm:$0xff]   ;;  %v1702_v29 = vld [vmem:[%s2207_s0 + $0x140] ss:$8 sps:$4 sm:$0xff]   ;;  %v1703_v30 = vld [vmem:[%s2207_s0 + $0x54] ss:$8 sps:$4 sm:$0xff]  }
   0xb   :  { %549 = vmatprep.subr.bf16.mxu0 %v1769_v0  ;;  %1648 = vmatprep.subr.bf16.mxu1 %v1769_v0  ;;  %v1705_v31 = vld [vmem:[%s2207_s0 + $0x154] ss:$8 sps:$4 sm:$0xff]   ;;  %v1707_v32 = vld [vmem:[%s2207_s0 + $0x50] ss:$8 sps:$4 sm:$0xff]   ;;  %v1709_v34 = vld [vmem:[%s2207_s0 + $0x64] ss:$8 sps:$4 sm:$0xff]  }
   0xc   :  { %v1708_v33 = vld [vmem:[%s2207_s0 + $0x150] ss:$8 sps:$4 sm:$0xff]   ;;  %v1711_v35 = vld [vmem:[%s2207_s0 + $0x164] ss:$8 sps:$4 sm:$0xff]   ;;  %v1713_v36 = vld [vmem:[%s2207_s0 + $0x60] ss:$8 sps:$4 sm:$0xff]  }
   0xd   :  { %v1714_v37 = vld [vmem:[%s2207_s0 + $0x160] ss:$8 sps:$4 sm:$0xff]   ;;  %v1715_v38 = vld [vmem:[%s2207_s0 + $0x74] ss:$8 sps:$4 sm:$0xff]   ;;  %v1719_v40 = vld [vmem:[%s2207_s0 + $0x70] ss:$8 sps:$4 sm:$0xff]  }
   0xe   :  { %550 = vmatpush1.bf16.msra.mxu0 %v1667_v4  ;;  %1657 = vmatpush1.bf16.msra.mxu1 %v1667_v4  ;;  %v1717_v39 = vld [vmem:[%s2207_s0 + $0x174] ss:$8 sps:$4 sm:$0xff]   ;;  %v1720_v41 = vld [vmem:[%s2207_s0 + $0x170] ss:$8 sps:$4 sm:$0xff]   ;;  %v1721_v42 = vld [vmem:[%s2207_s0 + $0x84] ss:$8 sps:$4 sm:$0xff]  }
   0xf   :  { %551 = vmatprep.subr.bf16.mxu0 %v1769_v0  ;;  %1649 = vmatprep.subr.bf16.mxu1 %v1769_v0  ;;  %v1723_v43 = vld [vmem:[%s2207_s0 + $0x184] ss:$8 sps:$4 sm:$0xff]   ;;  %v1725_v44 = vld [vmem:[%s2207_s0 + $0x80] ss:$8 sps:$4 sm:$0xff]   ;;  %v1727_v46 = vld [vmem:[%s2207_s0 + $0x94] ss:$8 sps:$4 sm:$0xff]  }
  0x10   :  { %v1726_v45 = vld [vmem:[%s2207_s0 + $0x180] ss:$8 sps:$4 sm:$0xff]   ;;  %v1729_v47 = vld [vmem:[%s2207_s0 + $0x194] ss:$8 sps:$4 sm:$0xff]   ;;  %v1731_v48 = vld [vmem:[%s2207_s0 + $0x90] ss:$8 sps:$4 sm:$0xff]  }
  0x11   :  { %v1732_v49 = vld [vmem:[%s2207_s0 + $0x190] ss:$8 sps:$4 sm:$0xff]   ;;  %v1733_v50 = vld [vmem:[%s2207_s0 + $0xa4] ss:$8 sps:$4 sm:$0xff]   ;;  %v1737_v52 = vld [vmem:[%s2207_s0 + $0xa0] ss:$8 sps:$4 sm:$0xff]  }
  0x12   :  { %552 = vmatpush1.bf16.msra.mxu0 %v1668_v7  ;;  %1658 = vmatpush1.bf16.msra.mxu1 %v1668_v7  ;;  %v1735_v51 = vld [vmem:[%s2207_s0 + $0x1a4] ss:$8 sps:$4 sm:$0xff]   ;;  %v1738_v53 = vld [vmem:[%s2207_s0 + $0x1a0] ss:$8 sps:$4 sm:$0xff]   ;;  %v1739_v54 = vld [vmem:[%s2207_s0 + $0xb4] ss:$8 sps:$4 sm:$0xff]  }
  0x13   :  { %553 = vmatprep.subr.bf16.mxu0 %v1769_v0  ;;  %1650 = vmatprep.subr.bf16.mxu1 %v1769_v0  ;;  %v1741_v55 = vld [vmem:[%s2207_s0 + $0x1b4] ss:$8 sps:$4 sm:$0xff]   ;;  %v1743_v56 = vld [vmem:[%s2207_s0 + $0xb0] ss:$8 sps:$4 sm:$0xff]   ;;  %v1745_v58 = vld [vmem:[%s2207_s0 + $0xc4] ss:$8 sps:$4 sm:$0xff]  }
  0x14   :  { %v1744_v57 = vld [vmem:[%s2207_s0 + $0x1b0] ss:$8 sps:$4 sm:$0xff]   ;;  %v1747_v59 = vld [vmem:[%s2207_s0 + $0x1c4] ss:$8 sps:$4 sm:$0xff]   ;;  %v1749_v60 = vld [vmem:[%s2207_s0 + $0xc0] ss:$8 sps:$4 sm:$0xff]  }
  0x15   :  { %v1750_v61 = vld [vmem:[%s2207_s0 + $0x1c0] ss:$8 sps:$4 sm:$0xff]   ;;  %v1751_v62 = vld [vmem:[%s2207_s0 + $0xd4] ss:$8 sps:$4 sm:$0xff]   ;;  %v1756_v1 = vld [vmem:[%s2207_s0 + $0x1d0] ss:$8 sps:$4 sm:$0xff]  }
  0x16   :  { %554 = vmatpush1.bf16.msra.mxu0 %v1669_v8  ;;  %1659 = vmatpush1.bf16.msra.mxu1 %v1669_v8  ;;  %v1753_v63 = vld [vmem:[%s2207_s0 + $0x1d4] ss:$8 sps:$4 sm:$0xff]   ;;  %v1757_v2 = vld [vmem:[%s2207_s0 + $0xe4] ss:$8 sps:$4 sm:$0xff]   ;;  %v1761_v4 = vld [vmem:[%s2207_s0 + $0xe0] ss:$8 sps:$4 sm:$0xff]  }
  0x17   :  { %555 = vmatprep.subr.bf16.mxu0 %v1769_v0  ;;  %1651 = vmatprep.subr.bf16.mxu1 %v1769_v0  ;;  %v1759_v3 = vld [vmem:[%s2207_s0 + $0x1e4] ss:$8 sps:$4 sm:$0xff]   ;;  %v1762_v5 = vld [vmem:[%s2207_s0 + $0x1e0] ss:$8 sps:$4 sm:$0xff]   ;;  %v1763_v6 = vld [vmem:[%s2207_s0 + $0xf4] ss:$8 sps:$4 sm:$0xff]  }
  0x18   :  { %v1765_v7 = vld [vmem:[%s2207_s0 + $0x1f4] ss:$8 sps:$4 sm:$0xff]   ;;  %v1767_v8 = vld [vmem:[%s2207_s0 + $0xf0] ss:$8 sps:$4 sm:$0xff]  }
  0x1a   :  { %556 = vmatpush1.bf16.msra.mxu0 %v1670_v9  ;;  %1660 = vmatpush1.bf16.msra.mxu1 %v1670_v9  ;;  %v1768_v9 = vld [vmem:[%s2207_s0 + $0x1f0] ss:$8 sps:$4 sm:$0xff]  }
  0x1b   :  { %557 = vmatprep.subr.bf16.mxu0 %v1769_v0  ;;  %1652 = vmatprep.subr.bf16.mxu1 %v1769_v0 }
  0x1e   :  { %558 = vmatpush1.bf16.msra.mxu0 %v1671_v10  ;;  %1661 = vmatpush1.bf16.msra.mxu1 %v1671_v10  ;;  %v2044_v10 = vld [vmem:[%s2208_s2] ss:$0 sm:$0xff] }
  0x1f   :  { %573 = vmatprep.subr.bf16.mxu0 %v1769_v0  ;;  %1653 = vmatprep.subr.bf16.mxu1 %v1769_v0  ;;  %v1755_v0 = vld [vmem:[%s2207_s0 + $0xd0] ss:$8 sps:$4 sm:$0xff]  }
  0x22   :  { %574 = vmatpush2.bf16.msra.mxu0 %v1672_v11  ;;  %1662 = vmatpush2.bf16.msra.mxu1 %v1672_v11 }
  0x25   :  { %576 = vmatmul.mubr.bf16.vlgmr.msra.gmra.mxu0 %v1673_v12  ;;  %704 = vmatmul.mubr.bf16.vlgmr.msra.gmra.mxu1 %v1676_v13 }
  0x26   :  { %1295 = vmatprep.mubr.msk.bf16.mxu0 %vm446_vm0, %v1679_v14  ;;  %1311 = vmatprep.mubr.msk.bf16.mxu1 %vm446_vm0, %v1681_v15 }
  0x2d   :  { %584 = vmatmul.mubr.bf16.gmra.mxu0 %v1683_v16  ;;  %712 = vmatmul.mubr.bf16.gmra.mxu1 %v1684_v17 }
  0x2e   :  { %1296 = vmatprep.mubr.msk.bf16.mxu0 %vm446_vm0, %v1685_v18  ;;  %1312 = vmatprep.mubr.msk.bf16.mxu1 %vm446_vm0, %v1687_v19 }
  0x35   :  { %592 = vmatmul.mubr.bf16.gmra.mxu0 %v1689_v20  ;;  %720 = vmatmul.mubr.bf16.gmra.mxu1 %v1690_v21 }
  0x36   :  { %1297 = vmatprep.mubr.msk.bf16.mxu0 %vm446_vm0, %v1691_v22  ;;  %1313 = vmatprep.mubr.msk.bf16.mxu1 %vm446_vm0, %v1693_v23 }
  0x3d   :  { %600 = vmatmul.mubr.bf16.gmra.mxu0 %v1695_v24  ;;  %728 = vmatmul.mubr.bf16.gmra.mxu1 %v1696_v25 }
  0x3e   :  { %1298 = vmatprep.mubr.msk.bf16.mxu0 %vm446_vm0, %v1697_v26  ;;  %1314 = vmatprep.mubr.msk.bf16.mxu1 %vm446_vm0, %v1699_v27 }
  0x45   :  { %608 = vmatmul.mubr.bf16.gmra.mxu0 %v1701_v28  ;;  %736 = vmatmul.mubr.bf16.gmra.mxu1 %v1702_v29 }
  0x46   :  { %1299 = vmatprep.mubr.msk.bf16.mxu0 %vm446_vm0, %v1703_v30  ;;  %1315 = vmatprep.mubr.msk.bf16.mxu1 %vm446_vm0, %v1705_v31 }
  0x4d   :  { %616 = vmatmul.mubr.bf16.gmra.mxu0 %v1707_v32  ;;  %744 = vmatmul.mubr.bf16.gmra.mxu1 %v1708_v33 }
  0x4e   :  { %1300 = vmatprep.mubr.msk.bf16.mxu0 %vm446_vm0, %v1709_v34  ;;  %1316 = vmatprep.mubr.msk.bf16.mxu1 %vm446_vm0, %v1711_v35 }
  0x55   :  { %624 = vmatmul.mubr.bf16.gmra.mxu0 %v1713_v36  ;;  %752 = vmatmul.mubr.bf16.gmra.mxu1 %v1714_v37 }
  0x56   :  { %1301 = vmatprep.mubr.msk.bf16.mxu0 %vm446_vm0, %v1715_v38  ;;  %1317 = vmatprep.mubr.msk.bf16.mxu1 %vm446_vm0, %v1717_v39 }
  0x5d   :  { %632 = vmatmul.mubr.bf16.gmra.mxu0 %v1719_v40  ;;  %760 = vmatmul.mubr.bf16.gmra.mxu1 %v1720_v41 }
  0x5e   :  { %1302 = vmatprep.mubr.msk.bf16.mxu0 %vm446_vm0, %v1721_v42  ;;  %1318 = vmatprep.mubr.msk.bf16.mxu1 %vm446_vm0, %v1723_v43 }
  0x65   :  { %640 = vmatmul.mubr.bf16.gmra.mxu0 %v1725_v44  ;;  %768 = vmatmul.mubr.bf16.gmra.mxu1 %v1726_v45 }
  0x66   :  { %1303 = vmatprep.mubr.msk.bf16.mxu0 %vm446_vm0, %v1727_v46  ;;  %1319 = vmatprep.mubr.msk.bf16.mxu1 %vm446_vm0, %v1729_v47 }
  0x6d   :  { %648 = vmatmul.mubr.bf16.gmra.mxu0 %v1731_v48  ;;  %776 = vmatmul.mubr.bf16.gmra.mxu1 %v1732_v49 }
  0x6e   :  { %1304 = vmatprep.mubr.msk.bf16.mxu0 %vm446_vm0, %v1733_v50  ;;  %1320 = vmatprep.mubr.msk.bf16.mxu1 %vm446_vm0, %v1735_v51 }
  0x75   :  { %656 = vmatmul.mubr.bf16.gmra.mxu0 %v1737_v52  ;;  %784 = vmatmul.mubr.bf16.gmra.mxu1 %v1738_v53 }
  0x76   :  { %1305 = vmatprep.mubr.msk.bf16.mxu0 %vm446_vm0, %v1739_v54  ;;  %1321 = vmatprep.mubr.msk.bf16.mxu1 %vm446_vm0, %v1741_v55 }
  0x7d   :  { %664 = vmatmul.mubr.bf16.gmra.mxu0 %v1743_v56  ;;  %792 = vmatmul.mubr.bf16.gmra.mxu1 %v1744_v57 }
  0x7e   :  { %1306 = vmatprep.mubr.msk.bf16.mxu0 %vm446_vm0, %v1745_v58  ;;  %1322 = vmatprep.mubr.msk.bf16.mxu1 %vm446_vm0, %v1747_v59 }
  0x85   :  { %672 = vmatmul.mubr.bf16.gmra.mxu0 %v1749_v60  ;;  %800 = vmatmul.mubr.bf16.gmra.mxu1 %v1750_v61 }
  0x86   :  { %1307 = vmatprep.mubr.msk.bf16.mxu0 %vm446_vm0, %v1751_v62  ;;  %1323 = vmatprep.mubr.msk.bf16.mxu1 %vm446_vm0, %v1753_v63 }
  0x8d   :  { %680 = vmatmul.mubr.bf16.gmra.mxu0 %v1755_v0  ;;  %808 = vmatmul.mubr.bf16.gmra.mxu1 %v1756_v1 }
  0x8e   :  { %1308 = vmatprep.mubr.msk.bf16.mxu0 %vm446_vm0, %v1757_v2  ;;  %1324 = vmatprep.mubr.msk.bf16.mxu1 %vm446_vm0, %v1759_v3 }
  0x95   :  { %688 = vmatmul.mubr.bf16.gmra.mxu0 %v1761_v4  ;;  %816 = vmatmul.mubr.bf16.gmra.mxu1 %v1762_v5 }
  0x96   :  { %1309 = vmatprep.mubr.msk.bf16.mxu0 %vm446_vm0, %v1763_v6  ;;  %1325 = vmatprep.mubr.msk.bf16.mxu1 %vm446_vm0, %v1765_v7 }
  0x9d   :  { %696 = vmatmul.mubr.bf16.gmra.mxu0 %v1767_v8  ;;  %824 = vmatmul.mubr.bf16.gmra.mxu1 %v1768_v9 }
  0xe5   :  { %v577_v11 = vpop.f32.mrf.mxu0  ;;  %v705_v12 = vpop.f32.mrf.mxu1 }
  0xe6   :  { %v578_v15 = vadd.f32 %v2044_v10, %v577_v11  ;;  %v706_v16 = vadd.f32 %v2044_v10, %v705_v12 }
  0xe7   :  { %v579_v13 = vpop.f32.mrf.mxu0  ;;  %v707_v14 = vpop.f32.mrf.mxu1 }
  0xe8   :  { %v832_v23 = vmax.f32 %v578_v15, 0.0  ;;  %v864_v24 = vmax.f32 %v706_v16, 0.0 }
  0xe9   :  { %v580_v17 = vpop.f32.mrf.mxu0  ;;  %v708_v18 = vpop.f32.mrf.mxu1 }
  0xea   :  { %v581_v19 = vadd.f32 %v2044_v10, %v580_v17  ;;  %v709_v20 = vadd.f32 %v2044_v10, %v708_v18 }
  0xeb   :  { %v582_v21 = vpop.f32.mrf.mxu0  ;;  %v710_v22 = vpop.f32.mrf.mxu1 }
  0xec   :  { %v833_v25 = vmax.f32 %v581_v19, 0.0  ;;  %v865_v26 = vmax.f32 %v709_v20, 0.0 }
  0xed   :  { %v585_v27 = vpop.f32.mrf.mxu0  ;;  %v713_v28 = vpop.f32.mrf.mxu1 }
  0xee   :  { %v1457_v29 = vpack.c.bf16 %v833_v25, %v832_v23  ;;  %v1537_v30 = vpack.c.bf16 %v865_v26, %v864_v24  ;;  %v586_v33 = vadd.f32 %v2044_v10, %v585_v27  ;;  %v714_v34 = vadd.f32 %v2044_v10, %v713_v28 }
  0xef   :  { %v587_v31 = vpop.f32.mrf.mxu0  ;;  %v715_v32 = vpop.f32.mrf.mxu1 }
  0xf0   :  { %1458 = vst [vmem:[%s2209_s3] sm:$0xff] %v1457_v29   ;;  %1629 = vst [vmem:[%s2209_s3 + $0x80] sm:$0xff] %v1537_v30   ;;  %v834_v41 = vmax.f32 %v586_v33, 0.0  ;;  %v866_v42 = vmax.f32 %v714_v34, 0.0 }
  0xf1   :  { %v588_v35 = vpop.f32.mrf.mxu0  ;;  %v716_v36 = vpop.f32.mrf.mxu1 }
  0xf2   :  { %v589_v37 = vadd.f32 %v2044_v10, %v588_v35  ;;  %v717_v38 = vadd.f32 %v2044_v10, %v716_v36 }
  0xf3   :  { %v590_v39 = vpop.f32.mrf.mxu0  ;;  %v718_v40 = vpop.f32.mrf.mxu1 }
  0xf4   :  { %v835_v43 = vmax.f32 %v589_v37, 0.0  ;;  %v867_v44 = vmax.f32 %v717_v38, 0.0 }
  0xf5   :  { %v593_v45 = vpop.f32.mrf.mxu0  ;;  %v721_v46 = vpop.f32.mrf.mxu1 }
  0xf6   :  { %v1462_v47 = vpack.c.bf16 %v835_v43, %v834_v41  ;;  %v1542_v48 = vpack.c.bf16 %v867_v44, %v866_v42  ;;  %v594_v51 = vadd.f32 %v2044_v10, %v593_v45  ;;  %v722_v52 = vadd.f32 %v2044_v10, %v721_v46 }
  0xf7   :  { %v595_v49 = vpop.f32.mrf.mxu0  ;;  %v723_v50 = vpop.f32.mrf.mxu1 }
  0xf8   :  { %1614 = vst [vmem:[%s2209_s3 + $0x8] sm:$0xff] %v1462_v47   ;;  %1630 = vst [vmem:[%s2209_s3 + $0x88] sm:$0xff] %v1542_v48   ;;  %v836_v59 = vmax.f32 %v594_v51, 0.0  ;;  %v868_v60 = vmax.f32 %v722_v52, 0.0 }
  0xf9   :  { %v596_v53 = vpop.f32.mrf.mxu0  ;;  %v724_v54 = vpop.f32.mrf.mxu1 }
  0xfa   :  { %v597_v55 = vadd.f32 %v2044_v10, %v596_v53  ;;  %v725_v56 = vadd.f32 %v2044_v10, %v724_v54 }
  0xfb   :  { %v598_v57 = vpop.f32.mrf.mxu0  ;;  %v726_v58 = vpop.f32.mrf.mxu1 }
  0xfc   :  { %v837_v61 = vmax.f32 %v597_v55, 0.0  ;;  %v869_v62 = vmax.f32 %v725_v56, 0.0 }
  0xfd   :  { %v601_v63 = vpop.f32.mrf.mxu0  ;;  %v729_v0 = vpop.f32.mrf.mxu1 }
  0xfe   :  { %v1467_v1 = vpack.c.bf16 %v837_v61, %v836_v59  ;;  %v1547_v2 = vpack.c.bf16 %v869_v62, %v868_v60  ;;  %v602_v5 = vadd.f32 %v2044_v10, %v601_v63  ;;  %v730_v6 = vadd.f32 %v2044_v10, %v729_v0 }
  0xff   :  { %v603_v3 = vpop.f32.mrf.mxu0  ;;  %v731_v4 = vpop.f32.mrf.mxu1 }
 0x100   :  { %1615 = vst [vmem:[%s2209_s3 + $0x10] sm:$0xff] %v1467_v1   ;;  %1631 = vst [vmem:[%s2209_s3 + $0x90] sm:$0xff] %v1547_v2   ;;  %v838_v14 = vmax.f32 %v602_v5, 0.0  ;;  %v870_v15 = vmax.f32 %v730_v6, 0.0 }
 0x101   :  { %v604_v7 = vpop.f32.mrf.mxu0  ;;  %v732_v8 = vpop.f32.mrf.mxu1 }
 0x102   :  { %v605_v9 = vadd.f32 %v2044_v10, %v604_v7  ;;  %v733_v11 = vadd.f32 %v2044_v10, %v732_v8 }
 0x103   :  { %v606_v12 = vpop.f32.mrf.mxu0  ;;  %v734_v13 = vpop.f32.mrf.mxu1 }
 0x104   :  { %v839_v16 = vmax.f32 %v605_v9, 0.0  ;;  %v871_v17 = vmax.f32 %v733_v11, 0.0 }
 0x105   :  { %v609_v18 = vpop.f32.mrf.mxu0  ;;  %v737_v19 = vpop.f32.mrf.mxu1 }
 0x106   :  { %v1472_v20 = vpack.c.bf16 %v839_v16, %v838_v14  ;;  %v1552_v21 = vpack.c.bf16 %v871_v17, %v870_v15  ;;  %v610_v24 = vadd.f32 %v2044_v10, %v609_v18  ;;  %v738_v25 = vadd.f32 %v2044_v10, %v737_v19 }
 0x107   :  { %v611_v22 = vpop.f32.mrf.mxu0  ;;  %v739_v23 = vpop.f32.mrf.mxu1 }
 0x108   :  { %1616 = vst [vmem:[%s2209_s3 + $0x18] sm:$0xff] %v1472_v20   ;;  %1632 = vst [vmem:[%s2209_s3 + $0x98] sm:$0xff] %v1552_v21   ;;  %v840_v32 = vmax.f32 %v610_v24, 0.0  ;;  %v872_v33 = vmax.f32 %v738_v25, 0.0 }
 0x109   :  { %v612_v26 = vpop.f32.mrf.mxu0  ;;  %v740_v27 = vpop.f32.mrf.mxu1 }
 0x10a   :  { %v613_v28 = vadd.f32 %v2044_v10, %v612_v26  ;;  %v741_v29 = vadd.f32 %v2044_v10, %v740_v27 }
 0x10b   :  { %v614_v30 = vpop.f32.mrf.mxu0  ;;  %v742_v31 = vpop.f32.mrf.mxu1 }
 0x10c   :  { %v841_v34 = vmax.f32 %v613_v28, 0.0  ;;  %v873_v35 = vmax.f32 %v741_v29, 0.0 }
 0x10d   :  { %v617_v36 = vpop.f32.mrf.mxu0  ;;  %v745_v37 = vpop.f32.mrf.mxu1 }
 0x10e   :  { %v1477_v38 = vpack.c.bf16 %v841_v34, %v840_v32  ;;  %v1557_v39 = vpack.c.bf16 %v873_v35, %v872_v33  ;;  %v618_v42 = vadd.f32 %v2044_v10, %v617_v36  ;;  %v746_v43 = vadd.f32 %v2044_v10, %v745_v37 }
 0x10f   :  { %v619_v40 = vpop.f32.mrf.mxu0  ;;  %v747_v41 = vpop.f32.mrf.mxu1 }
 0x110   :  { %1617 = vst [vmem:[%s2209_s3 + $0x20] sm:$0xff] %v1477_v38   ;;  %1633 = vst [vmem:[%s2209_s3 + $0xa0] sm:$0xff] %v1557_v39   ;;  %v842_v50 = vmax.f32 %v618_v42, 0.0  ;;  %v874_v51 = vmax.f32 %v746_v43, 0.0 }
 0x111   :  { %v620_v44 = vpop.f32.mrf.mxu0  ;;  %v748_v45 = vpop.f32.mrf.mxu1 }
 0x112   :  { %v621_v46 = vadd.f32 %v2044_v10, %v620_v44  ;;  %v749_v47 = vadd.f32 %v2044_v10, %v748_v45 }
 0x113   :  { %v622_v48 = vpop.f32.mrf.mxu0  ;;  %v750_v49 = vpop.f32.mrf.mxu1 }
 0x114   :  { %v843_v52 = vmax.f32 %v621_v46, 0.0  ;;  %v875_v53 = vmax.f32 %v749_v47, 0.0 }
 0x115   :  { %v625_v54 = vpop.f32.mrf.mxu0  ;;  %v753_v55 = vpop.f32.mrf.mxu1 }
 0x116   :  { %v1482_v56 = vpack.c.bf16 %v843_v52, %v842_v50  ;;  %v1562_v57 = vpack.c.bf16 %v875_v53, %v874_v51  ;;  %v626_v60 = vadd.f32 %v2044_v10, %v625_v54  ;;  %v754_v61 = vadd.f32 %v2044_v10, %v753_v55 }
 0x117   :  { %v627_v58 = vpop.f32.mrf.mxu0  ;;  %v755_v59 = vpop.f32.mrf.mxu1 }
 0x118   :  { %1618 = vst [vmem:[%s2209_s3 + $0x28] sm:$0xff] %v1482_v56   ;;  %1634 = vst [vmem:[%s2209_s3 + $0xa8] sm:$0xff] %v1562_v57   ;;  %v844_v4 = vmax.f32 %v626_v60, 0.0  ;;  %v876_v5 = vmax.f32 %v754_v61, 0.0 }
 0x119   :  { %v628_v62 = vpop.f32.mrf.mxu0  ;;  %v756_v63 = vpop.f32.mrf.mxu1 }
 0x11a   :  { %v629_v0 = vadd.f32 %v2044_v10, %v628_v62  ;;  %v757_v1 = vadd.f32 %v2044_v10, %v756_v63 }
 0x11b   :  { %v630_v2 = vpop.f32.mrf.mxu0  ;;  %v758_v3 = vpop.f32.mrf.mxu1 }
 0x11c   :  { %v845_v6 = vmax.f32 %v629_v0, 0.0  ;;  %v877_v7 = vmax.f32 %v757_v1, 0.0 }
 0x11d   :  { %v633_v8 = vpop.f32.mrf.mxu0  ;;  %v761_v9 = vpop.f32.mrf.mxu1 }
 0x11e   :  { %v1487_v11 = vpack.c.bf16 %v845_v6, %v844_v4  ;;  %v1567_v12 = vpack.c.bf16 %v877_v7, %v876_v5  ;;  %v634_v15 = vadd.f32 %v2044_v10, %v633_v8  ;;  %v762_v16 = vadd.f32 %v2044_v10, %v761_v9 }
 0x11f   :  { %v635_v13 = vpop.f32.mrf.mxu0  ;;  %v763_v14 = vpop.f32.mrf.mxu1 }
 0x120   :  { %1619 = vst [vmem:[%s2209_s3 + $0x30] sm:$0xff] %v1487_v11   ;;  %1635 = vst [vmem:[%s2209_s3 + $0xb0] sm:$0xff] %v1567_v12   ;;  %v846_v23 = vmax.f32 %v634_v15, 0.0  ;;  %v878_v24 = vmax.f32 %v762_v16, 0.0 }
 0x121   :  { %v636_v17 = vpop.f32.mrf.mxu0  ;;  %v764_v18 = vpop.f32.mrf.mxu1 }
 0x122   :  { %v637_v19 = vadd.f32 %v2044_v10, %v636_v17  ;;  %v765_v20 = vadd.f32 %v2044_v10, %v764_v18 }
 0x123   :  { %v638_v21 = vpop.f32.mrf.mxu0  ;;  %v766_v22 = vpop.f32.mrf.mxu1 }
 0x124   :  { %v847_v25 = vmax.f32 %v637_v19, 0.0  ;;  %v879_v26 = vmax.f32 %v765_v20, 0.0 }
 0x125   :  { %v641_v27 = vpop.f32.mrf.mxu0  ;;  %v769_v28 = vpop.f32.mrf.mxu1 }
 0x126   :  { %v1492_v29 = vpack.c.bf16 %v847_v25, %v846_v23  ;;  %v1572_v30 = vpack.c.bf16 %v879_v26, %v878_v24  ;;  %v642_v33 = vadd.f32 %v2044_v10, %v641_v27  ;;  %v770_v34 = vadd.f32 %v2044_v10, %v769_v28 }
 0x127   :  { %v643_v31 = vpop.f32.mrf.mxu0  ;;  %v771_v32 = vpop.f32.mrf.mxu1 }
 0x128   :  { %1620 = vst [vmem:[%s2209_s3 + $0x38] sm:$0xff] %v1492_v29   ;;  %1636 = vst [vmem:[%s2209_s3 + $0xb8] sm:$0xff] %v1572_v30   ;;  %v848_v41 = vmax.f32 %v642_v33, 0.0  ;;  %v880_v42 = vmax.f32 %v770_v34, 0.0 }
 0x129   :  { %v644_v35 = vpop.f32.mrf.mxu0  ;;  %v772_v36 = vpop.f32.mrf.mxu1 }
 0x12a   :  { %v645_v37 = vadd.f32 %v2044_v10, %v644_v35  ;;  %v773_v38 = vadd.f32 %v2044_v10, %v772_v36 }
 0x12b   :  { %v646_v39 = vpop.f32.mrf.mxu0  ;;  %v774_v40 = vpop.f32.mrf.mxu1 }
 0x12c   :  { %v849_v43 = vmax.f32 %v645_v37, 0.0  ;;  %v881_v44 = vmax.f32 %v773_v38, 0.0 }
 0x12d   :  { %v649_v45 = vpop.f32.mrf.mxu0  ;;  %v777_v46 = vpop.f32.mrf.mxu1 }
 0x12e   :  { %v1497_v47 = vpack.c.bf16 %v849_v43, %v848_v41  ;;  %v1577_v48 = vpack.c.bf16 %v881_v44, %v880_v42  ;;  %v650_v51 = vadd.f32 %v2044_v10, %v649_v45  ;;  %v778_v52 = vadd.f32 %v2044_v10, %v777_v46 }
 0x12f   :  { %v651_v49 = vpop.f32.mrf.mxu0  ;;  %v779_v50 = vpop.f32.mrf.mxu1 }
 0x130   :  { %1621 = vst [vmem:[%s2209_s3 + $0x40] sm:$0xff] %v1497_v47   ;;  %1637 = vst [vmem:[%s2209_s3 + $0xc0] sm:$0xff] %v1577_v48   ;;  %v850_v59 = vmax.f32 %v650_v51, 0.0  ;;  %v882_v60 = vmax.f32 %v778_v52, 0.0 }
 0x131   :  { %v652_v53 = vpop.f32.mrf.mxu0  ;;  %v780_v54 = vpop.f32.mrf.mxu1 }
 0x132   :  { %v653_v55 = vadd.f32 %v2044_v10, %v652_v53  ;;  %v781_v56 = vadd.f32 %v2044_v10, %v780_v54 }
 0x133   :  { %v654_v57 = vpop.f32.mrf.mxu0  ;;  %v782_v58 = vpop.f32.mrf.mxu1 }
 0x134   :  { %v851_v61 = vmax.f32 %v653_v55, 0.0  ;;  %v883_v62 = vmax.f32 %v781_v56, 0.0 }
 0x135   :  { %v657_v63 = vpop.f32.mrf.mxu0  ;;  %v785_v0 = vpop.f32.mrf.mxu1 }
 0x136   :  { %v1502_v1 = vpack.c.bf16 %v851_v61, %v850_v59  ;;  %v1582_v2 = vpack.c.bf16 %v883_v62, %v882_v60  ;;  %v658_v5 = vadd.f32 %v2044_v10, %v657_v63  ;;  %v786_v6 = vadd.f32 %v2044_v10, %v785_v0 }
 0x137   :  { %v659_v3 = vpop.f32.mrf.mxu0  ;;  %v787_v4 = vpop.f32.mrf.mxu1 }
 0x138   :  { %1622 = vst [vmem:[%s2209_s3 + $0x48] sm:$0xff] %v1502_v1   ;;  %1638 = vst [vmem:[%s2209_s3 + $0xc8] sm:$0xff] %v1582_v2   ;;  %v852_v14 = vmax.f32 %v658_v5, 0.0  ;;  %v884_v15 = vmax.f32 %v786_v6, 0.0 }
 0x139   :  { %v660_v7 = vpop.f32.mrf.mxu0  ;;  %v788_v8 = vpop.f32.mrf.mxu1 }
 0x13a   :  { %v661_v9 = vadd.f32 %v2044_v10, %v660_v7  ;;  %v789_v11 = vadd.f32 %v2044_v10, %v788_v8 }
 0x13b   :  { %v662_v12 = vpop.f32.mrf.mxu0  ;;  %v790_v13 = vpop.f32.mrf.mxu1 }
 0x13c   :  { %v853_v16 = vmax.f32 %v661_v9, 0.0  ;;  %v885_v17 = vmax.f32 %v789_v11, 0.0 }
 0x13d   :  { %v665_v18 = vpop.f32.mrf.mxu0  ;;  %v793_v19 = vpop.f32.mrf.mxu1 }
 0x13e   :  { %v1507_v20 = vpack.c.bf16 %v853_v16, %v852_v14  ;;  %v1587_v21 = vpack.c.bf16 %v885_v17, %v884_v15  ;;  %v666_v24 = vadd.f32 %v2044_v10, %v665_v18  ;;  %v794_v25 = vadd.f32 %v2044_v10, %v793_v19 }
 0x13f   :  { %v667_v22 = vpop.f32.mrf.mxu0  ;;  %v795_v23 = vpop.f32.mrf.mxu1 }
 0x140   :  { %1623 = vst [vmem:[%s2209_s3 + $0x50] sm:$0xff] %v1507_v20   ;;  %1639 = vst [vmem:[%s2209_s3 + $0xd0] sm:$0xff] %v1587_v21   ;;  %v854_v32 = vmax.f32 %v666_v24, 0.0  ;;  %v886_v33 = vmax.f32 %v794_v25, 0.0 }
 0x141   :  { %v668_v26 = vpop.f32.mrf.mxu0  ;;  %v796_v27 = vpop.f32.mrf.mxu1 }
 0x142   :  { %v669_v28 = vadd.f32 %v2044_v10, %v668_v26  ;;  %v797_v29 = vadd.f32 %v2044_v10, %v796_v27 }
 0x143   :  { %v670_v30 = vpop.f32.mrf.mxu0  ;;  %v798_v31 = vpop.f32.mrf.mxu1 }
 0x144   :  { %v855_v34 = vmax.f32 %v669_v28, 0.0  ;;  %v887_v35 = vmax.f32 %v797_v29, 0.0 }
 0x145   :  { %v673_v36 = vpop.f32.mrf.mxu0  ;;  %v801_v37 = vpop.f32.mrf.mxu1 }
 0x146   :  { %v1512_v38 = vpack.c.bf16 %v855_v34, %v854_v32  ;;  %v1592_v39 = vpack.c.bf16 %v887_v35, %v886_v33  ;;  %v674_v42 = vadd.f32 %v2044_v10, %v673_v36  ;;  %v802_v43 = vadd.f32 %v2044_v10, %v801_v37 }
 0x147   :  { %v675_v40 = vpop.f32.mrf.mxu0  ;;  %v803_v41 = vpop.f32.mrf.mxu1 }
 0x148   :  { %1624 = vst [vmem:[%s2209_s3 + $0x58] sm:$0xff] %v1512_v38   ;;  %1640 = vst [vmem:[%s2209_s3 + $0xd8] sm:$0xff] %v1592_v39   ;;  %v856_v50 = vmax.f32 %v674_v42, 0.0  ;;  %v888_v51 = vmax.f32 %v802_v43, 0.0 }
 0x149   :  { %v676_v44 = vpop.f32.mrf.mxu0  ;;  %v804_v45 = vpop.f32.mrf.mxu1 }
 0x14a   :  { %v677_v46 = vadd.f32 %v2044_v10, %v676_v44  ;;  %v805_v47 = vadd.f32 %v2044_v10, %v804_v45 }
 0x14b   :  { %v678_v48 = vpop.f32.mrf.mxu0  ;;  %v806_v49 = vpop.f32.mrf.mxu1 }
 0x14c   :  { %v857_v52 = vmax.f32 %v677_v46, 0.0  ;;  %v889_v53 = vmax.f32 %v805_v47, 0.0 }
 0x14d   :  { %v681_v54 = vpop.f32.mrf.mxu0  ;;  %v809_v55 = vpop.f32.mrf.mxu1 }
 0x14e   :  { %v1517_v56 = vpack.c.bf16 %v857_v52, %v856_v50  ;;  %v1597_v57 = vpack.c.bf16 %v889_v53, %v888_v51  ;;  %v682_v60 = vadd.f32 %v2044_v10, %v681_v54  ;;  %v810_v61 = vadd.f32 %v2044_v10, %v809_v55 }
 0x14f   :  { %v683_v58 = vpop.f32.mrf.mxu0  ;;  %v811_v59 = vpop.f32.mrf.mxu1 }
 0x150   :  { %1625 = vst [vmem:[%s2209_s3 + $0x60] sm:$0xff] %v1517_v56   ;;  %1641 = vst [vmem:[%s2209_s3 + $0xe0] sm:$0xff] %v1597_v57   ;;  %v858_v4 = vmax.f32 %v682_v60, 0.0  ;;  %v890_v5 = vmax.f32 %v810_v61, 0.0 }
 0x151   :  { %v684_v62 = vpop.f32.mrf.mxu0  ;;  %v812_v63 = vpop.f32.mrf.mxu1 }
 0x152   :  { %v685_v0 = vadd.f32 %v2044_v10, %v684_v62  ;;  %v813_v1 = vadd.f32 %v2044_v10, %v812_v63 }
 0x153   :  { %v686_v2 = vpop.f32.mrf.mxu0  ;;  %v814_v3 = vpop.f32.mrf.mxu1 }
 0x154   :  { %v859_v6 = vmax.f32 %v685_v0, 0.0  ;;  %v891_v7 = vmax.f32 %v813_v1, 0.0 }
 0x155   :  { %v689_v8 = vpop.f32.mrf.mxu0  ;;  %v817_v9 = vpop.f32.mrf.mxu1 }
 0x156   :  { %v1522_v11 = vpack.c.bf16 %v859_v6, %v858_v4  ;;  %v1602_v12 = vpack.c.bf16 %v891_v7, %v890_v5  ;;  %v690_v15 = vadd.f32 %v2044_v10, %v689_v8  ;;  %v818_v16 = vadd.f32 %v2044_v10, %v817_v9 }
 0x157   :  { %v691_v13 = vpop.f32.mrf.mxu0  ;;  %v819_v14 = vpop.f32.mrf.mxu1 }
 0x158   :  { %1626 = vst [vmem:[%s2209_s3 + $0x68] sm:$0xff] %v1522_v11   ;;  %1642 = vst [vmem:[%s2209_s3 + $0xe8] sm:$0xff] %v1602_v12   ;;  %v860_v23 = vmax.f32 %v690_v15, 0.0  ;;  %v892_v24 = vmax.f32 %v818_v16, 0.0 }
 0x159   :  { %v692_v17 = vpop.f32.mrf.mxu0  ;;  %v820_v18 = vpop.f32.mrf.mxu1 }
 0x15a   :  { %v693_v19 = vadd.f32 %v2044_v10, %v692_v17  ;;  %v821_v20 = vadd.f32 %v2044_v10, %v820_v18 }
 0x15b   :  { %v694_v21 = vpop.f32.mrf.mxu0  ;;  %v822_v22 = vpop.f32.mrf.mxu1 }
 0x15c   :  { %v861_v25 = vmax.f32 %v693_v19, 0.0  ;;  %v893_v26 = vmax.f32 %v821_v20, 0.0 }
 0x15d   :  { %v697_v27 = vpop.f32.mrf.mxu0  ;;  %v825_v28 = vpop.f32.mrf.mxu1 }
 0x15e   :  { %v1527_v29 = vpack.c.bf16 %v861_v25, %v860_v23  ;;  %v1607_v30 = vpack.c.bf16 %v893_v26, %v892_v24  ;;  %v698_v33 = vadd.f32 %v2044_v10, %v697_v27  ;;  %v826_v34 = vadd.f32 %v2044_v10, %v825_v28 }
 0x15f   :  { %v699_v31 = vpop.f32.mrf.mxu0  ;;  %v827_v32 = vpop.f32.mrf.mxu1 }
 0x160   :  { %1627 = vst [vmem:[%s2209_s3 + $0x70] sm:$0xff] %v1527_v29   ;;  %1643 = vst [vmem:[%s2209_s3 + $0xf0] sm:$0xff] %v1607_v30   ;;  %v862_v41 = vmax.f32 %v698_v33, 0.0  ;;  %v894_v42 = vmax.f32 %v826_v34, 0.0 }
 0x161   :  { %v700_v35 = vpop.f32.mrf.mxu0  ;;  %v828_v36 = vpop.f32.mrf.mxu1 }
 0x162   :  { %v701_v37 = vadd.f32 %v2044_v10, %v700_v35  ;;  %v829_v38 = vadd.f32 %v2044_v10, %v828_v36 }
 0x163   :  { %v702_v39 = vpop.f32.mrf.mxu0  ;;  %v830_v40 = vpop.f32.mrf.mxu1 }
 0x164   :  { %v863_v43 = vmax.f32 %v701_v37, 0.0  ;;  %v895_v44 = vmax.f32 %v829_v38, 0.0 }
 0x166   :  { %v1532_v45 = vpack.c.bf16 %v863_v43, %v862_v41  ;;  %v1612_v46 = vpack.c.bf16 %v895_v44, %v894_v42 }
 0x168   :  { %1628 = vst [vmem:[%s2209_s3 + $0x78] sm:$0xff] %v1532_v45   ;;  %1644 = vst [vmem:[%s2209_s3 + $0xf8] sm:$0xff] %v1612_v46  }

// kernel: _lambda_.42
= control target key start
LH: loop header
LB: loop body
LE: loop exit
PB: predicated region body
PF: predicated region fallthrough
CT: control target
= control target key end

     0   :  { %v2123_v0 = vmov 0   ;;  %vm449_vm0 = vcmask 130048   ;;  %s2661_s1 = inlined_call_operand.vmem [shape: bf16[144,128], index: 1, kind: input, shape index: {}]   ;;  %s2662_s0 = inlined_call_operand.vmem [shape: bf16[512,144], index: 0, kind: input, shape index: {}]   ;;  %s2663_s3 = inlined_call_operand.vmem [shape: bf16[512,128], index: 3, kind: input, shape index: {}]   ;;  %s2664_s2 = inlined_call_operand.vmem [shape: f32[1,128], index: 2, kind: input, shape index: {}]   ;;  %s2665_s4 = inlined_call_operand.vmem [shape: bf16[512,128], index: 4, kind: output, shape index: {}]  }
   0x1   :  { %546 = vmatprep.subr.bf16.mxu0 %v2123_v0  ;;  %1999 = vmatprep.subr.bf16.mxu1 %v2123_v0  ;;  %v2018_v1 = vld [vmem:[%s2661_s1 + $0x38] sm:$0xff]   ;;  %v2019_v2 = vld [vmem:[%s2661_s1 + $0x30] sm:$0xff]   ;;  %v2020_v3 = vld [vmem:[%s2661_s1 + $0x28] sm:$0xff]  }
   0x2   :  { %547 = vmatpush1.bf16.msra.mxu0 %v2018_v1  ;;  %2008 = vmatpush1.bf16.msra.mxu1 %v2018_v1  ;;  %v2021_v4 = vld [vmem:[%s2661_s1 + $0x20] sm:$0xff]   ;;  %v2022_v7 = vld [vmem:[%s2661_s1 + $0x18] sm:$0xff]   ;;  %v2023_v8 = vld [vmem:[%s2661_s1 + $0x10] sm:$0xff]  }
   0x3   :  { %548 = vmatprep.subr.bf16.mxu0 %v2123_v0  ;;  %2000 = vmatprep.subr.bf16.mxu1 %v2123_v0  ;;  %v2029_v5 = vld [vmem:[%s2662_s0 + $0x4] ss:$8 sps:$4 sm:$0xff]   ;;  %v2027_v12 = vld [vmem:[%s2662_s0] ss:$8 sps:$4 sm:$0xff]   ;;  %v2033_v14 = vld [vmem:[%s2662_s0 + $0x14] ss:$8 sps:$4 sm:$0xff]  }
   0x4   :  { %v2032_v6 = vld [vmem:[%s2662_s0 + $0x104] ss:$8 sps:$4 sm:$0xff]   ;;  %1489 = vmatprep.mubr.msk.bf16.mxu0 %vm449_vm0, %v2029_v5  ;;  %v2030_v13 = vld [vmem:[%s2662_s0 + $0x100] ss:$8 sps:$4 sm:$0xff]   ;;  %v2035_v15 = vld [vmem:[%s2662_s0 + $0x114] ss:$8 sps:$4 sm:$0xff]  }
   0x5   :  { %1505 = vmatprep.mubr.msk.bf16.mxu1 %vm449_vm0, %v2032_v6  ;;  %v2024_v9 = vld [vmem:[%s2661_s1 + $0x8] sm:$0xff]   ;;  %v2025_v10 = vld [vmem:[%s2661_s1] sm:$0xff]   ;;  %v2037_v16 = vld [vmem:[%s2662_s0 + $0x10] ss:$8 sps:$4 sm:$0xff]  }
   0x6   :  { %549 = vmatpush1.bf16.msra.mxu0 %v2019_v2  ;;  %2009 = vmatpush1.bf16.msra.mxu1 %v2019_v2  ;;  %v2026_v11 = vld [vmem:[%s2661_s1 + $0x40] sm:$0xff]   ;;  %v2038_v17 = vld [vmem:[%s2662_s0 + $0x110] ss:$8 sps:$4 sm:$0xff]   ;;  %v2045_v22 = vld [vmem:[%s2662_s0 + $0x34] ss:$8 sps:$4 sm:$0xff]  }
   0x7   :  { %550 = vmatprep.subr.bf16.mxu0 %v2123_v0  ;;  %2001 = vmatprep.subr.bf16.mxu1 %v2123_v0  ;;  %v2039_v18 = vld [vmem:[%s2662_s0 + $0x24] ss:$8 sps:$4 sm:$0xff]   ;;  %v2043_v20 = vld [vmem:[%s2662_s0 + $0x20] ss:$8 sps:$4 sm:$0xff]   ;;  %v2047_v23 = vld [vmem:[%s2662_s0 + $0x134] ss:$8 sps:$4 sm:$0xff]  }
   0x8   :  { %v2041_v19 = vld [vmem:[%s2662_s0 + $0x124] ss:$8 sps:$4 sm:$0xff]   ;;  %v2044_v21 = vld [vmem:[%s2662_s0 + $0x120] ss:$8 sps:$4 sm:$0xff]   ;;  %v2049_v24 = vld [vmem:[%s2662_s0 + $0x30] ss:$8 sps:$4 sm:$0xff]  }
   0x9   :  { %v2050_v25 = vld [vmem:[%s2662_s0 + $0x130] ss:$8 sps:$4 sm:$0xff]   ;;  %v2051_v26 = vld [vmem:[%s2662_s0 + $0x44] ss:$8 sps:$4 sm:$0xff]   ;;  %v2055_v28 = vld [vmem:[%s2662_s0 + $0x40] ss:$8 sps:$4 sm:$0xff]  }
   0xa   :  { %551 = vmatpush1.bf16.msra.mxu0 %v2020_v3  ;;  %2010 = vmatpush1.bf16.msra.mxu1 %v2020_v3  ;;  %v2053_v27 = vld [vmem:[%s2662_s0 + $0x144] ss:$8 sps:$4 sm:$0xff]   ;;  %v2056_v29 = vld [vmem:[%s2662_s0 + $0x140] ss:$8 sps:$4 sm:$0xff]   ;;  %v2057_v30 = vld [vmem:[%s2662_s0 + $0x54] ss:$8 sps:$4 sm:$0xff]  }
   0xb   :  { %552 = vmatprep.subr.bf16.mxu0 %v2123_v0  ;;  %2002 = vmatprep.subr.bf16.mxu1 %v2123_v0  ;;  %v2059_v31 = vld [vmem:[%s2662_s0 + $0x154] ss:$8 sps:$4 sm:$0xff]   ;;  %v2061_v32 = vld [vmem:[%s2662_s0 + $0x50] ss:$8 sps:$4 sm:$0xff]   ;;  %v2063_v34 = vld [vmem:[%s2662_s0 + $0x64] ss:$8 sps:$4 sm:$0xff]  }
   0xc   :  { %v2062_v33 = vld [vmem:[%s2662_s0 + $0x150] ss:$8 sps:$4 sm:$0xff]   ;;  %v2065_v35 = vld [vmem:[%s2662_s0 + $0x164] ss:$8 sps:$4 sm:$0xff]   ;;  %v2067_v36 = vld [vmem:[%s2662_s0 + $0x60] ss:$8 sps:$4 sm:$0xff]  }
   0xd   :  { %v2068_v37 = vld [vmem:[%s2662_s0 + $0x160] ss:$8 sps:$4 sm:$0xff]   ;;  %v2069_v38 = vld [vmem:[%s2662_s0 + $0x74] ss:$8 sps:$4 sm:$0xff]   ;;  %v2073_v40 = vld [vmem:[%s2662_s0 + $0x70] ss:$8 sps:$4 sm:$0xff]  }
   0xe   :  { %553 = vmatpush1.bf16.msra.mxu0 %v2021_v4  ;;  %2011 = vmatpush1.bf16.msra.mxu1 %v2021_v4  ;;  %v2071_v39 = vld [vmem:[%s2662_s0 + $0x174] ss:$8 sps:$4 sm:$0xff]   ;;  %v2074_v41 = vld [vmem:[%s2662_s0 + $0x170] ss:$8 sps:$4 sm:$0xff]   ;;  %v2075_v42 = vld [vmem:[%s2662_s0 + $0x84] ss:$8 sps:$4 sm:$0xff]  }
   0xf   :  { %554 = vmatprep.subr.bf16.mxu0 %v2123_v0  ;;  %2003 = vmatprep.subr.bf16.mxu1 %v2123_v0  ;;  %v2077_v43 = vld [vmem:[%s2662_s0 + $0x184] ss:$8 sps:$4 sm:$0xff]   ;;  %v2079_v44 = vld [vmem:[%s2662_s0 + $0x80] ss:$8 sps:$4 sm:$0xff]   ;;  %v2081_v46 = vld [vmem:[%s2662_s0 + $0x94] ss:$8 sps:$4 sm:$0xff]  }
  0x10   :  { %v2080_v45 = vld [vmem:[%s2662_s0 + $0x180] ss:$8 sps:$4 sm:$0xff]   ;;  %v2083_v47 = vld [vmem:[%s2662_s0 + $0x194] ss:$8 sps:$4 sm:$0xff]   ;;  %v2085_v48 = vld [vmem:[%s2662_s0 + $0x90] ss:$8 sps:$4 sm:$0xff]  }
  0x11   :  { %v2086_v49 = vld [vmem:[%s2662_s0 + $0x190] ss:$8 sps:$4 sm:$0xff]   ;;  %v2087_v50 = vld [vmem:[%s2662_s0 + $0xa4] ss:$8 sps:$4 sm:$0xff]   ;;  %v2091_v52 = vld [vmem:[%s2662_s0 + $0xa0] ss:$8 sps:$4 sm:$0xff]  }
  0x12   :  { %555 = vmatpush1.bf16.msra.mxu0 %v2022_v7  ;;  %2012 = vmatpush1.bf16.msra.mxu1 %v2022_v7  ;;  %v2089_v51 = vld [vmem:[%s2662_s0 + $0x1a4] ss:$8 sps:$4 sm:$0xff]   ;;  %v2092_v53 = vld [vmem:[%s2662_s0 + $0x1a0] ss:$8 sps:$4 sm:$0xff]   ;;  %v2093_v54 = vld [vmem:[%s2662_s0 + $0xb4] ss:$8 sps:$4 sm:$0xff]  }
  0x13   :  { %556 = vmatprep.subr.bf16.mxu0 %v2123_v0  ;;  %2004 = vmatprep.subr.bf16.mxu1 %v2123_v0  ;;  %v2095_v55 = vld [vmem:[%s2662_s0 + $0x1b4] ss:$8 sps:$4 sm:$0xff]   ;;  %v2097_v56 = vld [vmem:[%s2662_s0 + $0xb0] ss:$8 sps:$4 sm:$0xff]   ;;  %v2099_v58 = vld [vmem:[%s2662_s0 + $0xc4] ss:$8 sps:$4 sm:$0xff]  }
  0x14   :  { %v2098_v57 = vld [vmem:[%s2662_s0 + $0x1b0] ss:$8 sps:$4 sm:$0xff]   ;;  %v2101_v59 = vld [vmem:[%s2662_s0 + $0x1c4] ss:$8 sps:$4 sm:$0xff]   ;;  %v2103_v60 = vld [vmem:[%s2662_s0 + $0xc0] ss:$8 sps:$4 sm:$0xff]  }
  0x15   :  { %v2104_v61 = vld [vmem:[%s2662_s0 + $0x1c0] ss:$8 sps:$4 sm:$0xff]   ;;  %v2105_v62 = vld [vmem:[%s2662_s0 + $0xd4] ss:$8 sps:$4 sm:$0xff]   ;;  %v2110_v1 = vld [vmem:[%s2662_s0 + $0x1d0] ss:$8 sps:$4 sm:$0xff]  }
  0x16   :  { %557 = vmatpush1.bf16.msra.mxu0 %v2023_v8  ;;  %2013 = vmatpush1.bf16.msra.mxu1 %v2023_v8  ;;  %v2107_v63 = vld [vmem:[%s2662_s0 + $0x1d4] ss:$8 sps:$4 sm:$0xff]   ;;  %v2111_v2 = vld [vmem:[%s2662_s0 + $0xe4] ss:$8 sps:$4 sm:$0xff]   ;;  %v2115_v4 = vld [vmem:[%s2662_s0 + $0xe0] ss:$8 sps:$4 sm:$0xff]  }
  0x17   :  { %558 = vmatprep.subr.bf16.mxu0 %v2123_v0  ;;  %2005 = vmatprep.subr.bf16.mxu1 %v2123_v0  ;;  %v2113_v3 = vld [vmem:[%s2662_s0 + $0x1e4] ss:$8 sps:$4 sm:$0xff]   ;;  %v2116_v5 = vld [vmem:[%s2662_s0 + $0x1e0] ss:$8 sps:$4 sm:$0xff]   ;;  %v2117_v6 = vld [vmem:[%s2662_s0 + $0xf4] ss:$8 sps:$4 sm:$0xff]  }
  0x18   :  { %v2119_v7 = vld [vmem:[%s2662_s0 + $0x1f4] ss:$8 sps:$4 sm:$0xff]   ;;  %v2121_v8 = vld [vmem:[%s2662_s0 + $0xf0] ss:$8 sps:$4 sm:$0xff]  }
  0x1a   :  { %559 = vmatpush1.bf16.msra.mxu0 %v2024_v9  ;;  %2014 = vmatpush1.bf16.msra.mxu1 %v2024_v9  ;;  %v2122_v9 = vld [vmem:[%s2662_s0 + $0x1f0] ss:$8 sps:$4 sm:$0xff]  }
  0x1b   :  { %560 = vmatprep.subr.bf16.mxu0 %v2123_v0  ;;  %2006 = vmatprep.subr.bf16.mxu1 %v2123_v0 }
  0x1e   :  { %561 = vmatpush1.bf16.msra.mxu0 %v2025_v10  ;;  %2015 = vmatpush1.bf16.msra.mxu1 %v2025_v10  ;;  %v1650_v10 = vld [vmem:[%s2663_s3] sm:$0xff]  }
  0x1f   :  { %576 = vmatprep.subr.bf16.mxu0 %v2123_v0  ;;  %2007 = vmatprep.subr.bf16.mxu1 %v2123_v0  ;;  %v2109_v0 = vld [vmem:[%s2662_s0 + $0xd0] ss:$8 sps:$4 sm:$0xff]  }
  0x22   :  { %577 = vmatpush2.bf16.msra.mxu0 %v2026_v11  ;;  %2016 = vmatpush2.bf16.msra.mxu1 %v2026_v11  ;;  %v1952_v11 = vld [vmem:[%s2663_s3 + $0x80] sm:$0xff]  }
  0x25   :  { %579 = vmatmul.mubr.bf16.vlgmr.msra.gmra.mxu0 %v2027_v12  ;;  %707 = vmatmul.mubr.bf16.vlgmr.msra.gmra.mxu1 %v2030_v13  ;;  %v2409_v12 = vld [vmem:[%s2664_s2] ss:$0 sm:$0xff] }
  0x26   :  { %1490 = vmatprep.mubr.msk.bf16.mxu0 %vm449_vm0, %v2033_v14  ;;  %1506 = vmatprep.mubr.msk.bf16.mxu1 %vm449_vm0, %v2035_v15  ;;  %v1651_v14 = vunpack.c.l.bf16 %v1650_v10 }
  0x2d   :  { %587 = vmatmul.mubr.bf16.gmra.mxu0 %v2037_v16  ;;  %715 = vmatmul.mubr.bf16.gmra.mxu1 %v2038_v17  ;;  %v1715_v16 = vunpack.c.l.bf16 %v1952_v11 }
  0x2e   :  { %1491 = vmatprep.mubr.msk.bf16.mxu0 %vm449_vm0, %v2039_v18  ;;  %1507 = vmatprep.mubr.msk.bf16.mxu1 %vm449_vm0, %v2041_v19 }
  0x35   :  { %595 = vmatmul.mubr.bf16.gmra.mxu0 %v2043_v20  ;;  %723 = vmatmul.mubr.bf16.gmra.mxu1 %v2044_v21  ;;  %v1652_v21 = vunpack.c.h.bf16 %v1650_v10 }
  0x36   :  { %1492 = vmatprep.mubr.msk.bf16.mxu0 %vm449_vm0, %v2045_v22  ;;  %1508 = vmatprep.mubr.msk.bf16.mxu1 %vm449_vm0, %v2047_v23  ;;  %v1716_v22 = vunpack.c.h.bf16 %v1952_v11 }
  0x3d   :  { %603 = vmatmul.mubr.bf16.gmra.mxu0 %v2049_v24  ;;  %731 = vmatmul.mubr.bf16.gmra.mxu1 %v2050_v25 }
  0x3e   :  { %1493 = vmatprep.mubr.msk.bf16.mxu0 %vm449_vm0, %v2051_v26  ;;  %1509 = vmatprep.mubr.msk.bf16.mxu1 %vm449_vm0, %v2053_v27 }
  0x45   :  { %611 = vmatmul.mubr.bf16.gmra.mxu0 %v2055_v28  ;;  %739 = vmatmul.mubr.bf16.gmra.mxu1 %v2056_v29  ;;  %v1937_v29 = vld [vmem:[%s2663_s3 + $0x8] sm:$0xff]  }
  0x46   :  { %1494 = vmatprep.mubr.msk.bf16.mxu0 %vm449_vm0, %v2057_v30  ;;  %1510 = vmatprep.mubr.msk.bf16.mxu1 %vm449_vm0, %v2059_v31  ;;  %v1953_v30 = vld [vmem:[%s2663_s3 + $0x88] sm:$0xff]  }
  0x4d   :  { %619 = vmatmul.mubr.bf16.gmra.mxu0 %v2061_v32  ;;  %747 = vmatmul.mubr.bf16.gmra.mxu1 %v2062_v33 }
  0x4e   :  { %1495 = vmatprep.mubr.msk.bf16.mxu0 %vm449_vm0, %v2063_v34  ;;  %1511 = vmatprep.mubr.msk.bf16.mxu1 %vm449_vm0, %v2065_v35 }
  0x55   :  { %627 = vmatmul.mubr.bf16.gmra.mxu0 %v2067_v36  ;;  %755 = vmatmul.mubr.bf16.gmra.mxu1 %v2068_v37 }
  0x56   :  { %1496 = vmatprep.mubr.msk.bf16.mxu0 %vm449_vm0, %v2069_v38  ;;  %1512 = vmatprep.mubr.msk.bf16.mxu1 %vm449_vm0, %v2071_v39  ;;  %v1655_v38 = vunpack.c.l.bf16 %v1937_v29 }
  0x5d   :  { %635 = vmatmul.mubr.bf16.gmra.mxu0 %v2073_v40  ;;  %763 = vmatmul.mubr.bf16.gmra.mxu1 %v2074_v41  ;;  %v1719_v40 = vunpack.c.l.bf16 %v1953_v30 }
  0x5e   :  { %1497 = vmatprep.mubr.msk.bf16.mxu0 %vm449_vm0, %v2075_v42  ;;  %1513 = vmatprep.mubr.msk.bf16.mxu1 %vm449_vm0, %v2077_v43 }
  0x65   :  { %643 = vmatmul.mubr.bf16.gmra.mxu0 %v2079_v44  ;;  %771 = vmatmul.mubr.bf16.gmra.mxu1 %v2080_v45 }
  0x66   :  { %1498 = vmatprep.mubr.msk.bf16.mxu0 %vm449_vm0, %v2081_v46  ;;  %1514 = vmatprep.mubr.msk.bf16.mxu1 %vm449_vm0, %v2083_v47 }
  0x6d   :  { %651 = vmatmul.mubr.bf16.gmra.mxu0 %v2085_v48  ;;  %779 = vmatmul.mubr.bf16.gmra.mxu1 %v2086_v49  ;;  %v1656_v49 = vunpack.c.h.bf16 %v1937_v29 }
  0x6e   :  { %1499 = vmatprep.mubr.msk.bf16.mxu0 %vm449_vm0, %v2087_v50  ;;  %1515 = vmatprep.mubr.msk.bf16.mxu1 %vm449_vm0, %v2089_v51  ;;  %v1720_v50 = vunpack.c.h.bf16 %v1953_v30 }
  0x75   :  { %659 = vmatmul.mubr.bf16.gmra.mxu0 %v2091_v52  ;;  %787 = vmatmul.mubr.bf16.gmra.mxu1 %v2092_v53 }
  0x76   :  { %1500 = vmatprep.mubr.msk.bf16.mxu0 %vm449_vm0, %v2093_v54  ;;  %1516 = vmatprep.mubr.msk.bf16.mxu1 %vm449_vm0, %v2095_v55 }
  0x7d   :  { %667 = vmatmul.mubr.bf16.gmra.mxu0 %v2097_v56  ;;  %795 = vmatmul.mubr.bf16.gmra.mxu1 %v2098_v57  ;;  %v1938_v57 = vld [vmem:[%s2663_s3 + $0x10] sm:$0xff]  }
  0x7e   :  { %1501 = vmatprep.mubr.msk.bf16.mxu0 %vm449_vm0, %v2099_v58  ;;  %1517 = vmatprep.mubr.msk.bf16.mxu1 %vm449_vm0, %v2101_v59  ;;  %v1954_v58 = vld [vmem:[%s2663_s3 + $0x90] sm:$0xff]  }
  0x85   :  { %675 = vmatmul.mubr.bf16.gmra.mxu0 %v2103_v60  ;;  %803 = vmatmul.mubr.bf16.gmra.mxu1 %v2104_v61 }
  0x86   :  { %1502 = vmatprep.mubr.msk.bf16.mxu0 %vm449_vm0, %v2105_v62  ;;  %1518 = vmatprep.mubr.msk.bf16.mxu1 %vm449_vm0, %v2107_v63 }
  0x8d   :  { %683 = vmatmul.mubr.bf16.gmra.mxu0 %v2109_v0  ;;  %811 = vmatmul.mubr.bf16.gmra.mxu1 %v2110_v1 }
  0x8e   :  { %1503 = vmatprep.mubr.msk.bf16.mxu0 %vm449_vm0, %v2111_v2  ;;  %1519 = vmatprep.mubr.msk.bf16.mxu1 %vm449_vm0, %v2113_v3  ;;  %v1659_v2 = vunpack.c.l.bf16 %v1938_v57 }
  0x95   :  { %691 = vmatmul.mubr.bf16.gmra.mxu0 %v2115_v4  ;;  %819 = vmatmul.mubr.bf16.gmra.mxu1 %v2116_v5  ;;  %v1723_v4 = vunpack.c.l.bf16 %v1954_v58 }
  0x96   :  { %1504 = vmatprep.mubr.msk.bf16.mxu0 %vm449_vm0, %v2117_v6  ;;  %1520 = vmatprep.mubr.msk.bf16.mxu1 %vm449_vm0, %v2119_v7 }
  0x9d   :  { %699 = vmatmul.mubr.bf16.gmra.mxu0 %v2121_v8  ;;  %827 = vmatmul.mubr.bf16.gmra.mxu1 %v2122_v9 }
  0xe5   :  { %v580_v13 = vpop.f32.mrf.mxu0  ;;  %v708_v15 = vpop.f32.mrf.mxu1 }
  0xe6   :  { %v581_v17 = vadd.f32 %v2409_v12, %v580_v13  ;;  %v709_v18 = vadd.f32 %v2409_v12, %v708_v15  ;;  %v1724_v15 = vunpack.c.h.bf16 %v1954_v58 }
  0xe7   :  { %v582_v19 = vpop.f32.mrf.mxu0  ;;  %v710_v20 = vpop.f32.mrf.mxu1 }
  0xe8   :  { %v963_v23 = vadd.f32 %v1651_v14, %v581_v17  ;;  %v995_v24 = vadd.f32 %v1715_v16, %v709_v18  ;;  %v1660_v14 = vunpack.c.h.bf16 %v1938_v57 }
  0xe9   :  { %v583_v25 = vpop.f32.mrf.mxu0  ;;  %v711_v26 = vpop.f32.mrf.mxu1 }
  0xea   :  { %v584_v27 = vadd.f32 %v2409_v12, %v583_v25  ;;  %v712_v28 = vadd.f32 %v2409_v12, %v711_v26  ;;  %v1027_v35 = vmax.f32 %v963_v23, 0.0  ;;  %v1059_v36 = vmax.f32 %v995_v24, 0.0  ;;  %v1955_v23 = vld [vmem:[%s2663_s3 + $0x98] sm:$0xff]  }
  0xeb   :  { %v585_v31 = vpop.f32.mrf.mxu0  ;;  %v713_v32 = vpop.f32.mrf.mxu1 }
  0xec   :  { %v964_v33 = vadd.f32 %v1652_v21, %v584_v27  ;;  %v996_v34 = vadd.f32 %v1716_v22, %v712_v28  ;;  %v1939_v22 = vld [vmem:[%s2663_s3 + $0x18] sm:$0xff]  }
  0xed   :  { %v588_v37 = vpop.f32.mrf.mxu0  ;;  %v716_v39 = vpop.f32.mrf.mxu1  ;;  %v1663_v31 = vunpack.c.l.bf16 %v1939_v22 }
  0xee   :  { %v1028_v41 = vmax.f32 %v964_v33, 0.0  ;;  %v1060_v42 = vmax.f32 %v996_v34, 0.0  ;;  %v589_v43 = vadd.f32 %v2409_v12, %v588_v37  ;;  %v717_v44 = vadd.f32 %v2409_v12, %v716_v39 }
  0xef   :  { %v590_v45 = vpop.f32.mrf.mxu0  ;;  %v718_v46 = vpop.f32.mrf.mxu1  ;;  %v1727_v33 = vunpack.c.l.bf16 %v1955_v23 }
  0xf0   :  { %v1780_v47 = vpack.c.bf16 %v1028_v41, %v1027_v35  ;;  %v1860_v48 = vpack.c.bf16 %v1060_v42, %v1059_v36  ;;  %v965_v51 = vadd.f32 %v1655_v38, %v589_v43  ;;  %v997_v52 = vadd.f32 %v1719_v40, %v717_v44 }
  0xf1   :  { %v591_v53 = vpop.f32.mrf.mxu0  ;;  %v719_v54 = vpop.f32.mrf.mxu1  ;;  %v1664_v42 = vunpack.c.h.bf16 %v1939_v22  ;;  %v1728_v43 = vunpack.c.h.bf16 %v1955_v23 }
  0xf2   :  { %1781 = vst [vmem:[%s2665_s4] sm:$0xff] %v1780_v47   ;;  %1983 = vst [vmem:[%s2665_s4 + $0x80] sm:$0xff] %v1860_v48   ;;  %v592_v55 = vadd.f32 %v2409_v12, %v591_v53  ;;  %v720_v56 = vadd.f32 %v2409_v12, %v719_v54  ;;  %v1029_v63 = vmax.f32 %v965_v51, 0.0  ;;  %v1061_v0 = vmax.f32 %v997_v52, 0.0  ;;  %v1956_v51 = vld [vmem:[%s2663_s3 + $0xa0] sm:$0xff]  }
  0xf3   :  { %v593_v59 = vpop.f32.mrf.mxu0  ;;  %v721_v60 = vpop.f32.mrf.mxu1 }
  0xf4   :  { %v966_v61 = vadd.f32 %v1656_v49, %v592_v55  ;;  %v998_v62 = vadd.f32 %v1720_v50, %v720_v56  ;;  %v1940_v50 = vld [vmem:[%s2663_s3 + $0x20] sm:$0xff]  }
  0xf5   :  { %v596_v1 = vpop.f32.mrf.mxu0  ;;  %v724_v3 = vpop.f32.mrf.mxu1  ;;  %v1667_v59 = vunpack.c.l.bf16 %v1940_v50 }
  0xf6   :  { %v1030_v5 = vmax.f32 %v966_v61, 0.0  ;;  %v1062_v6 = vmax.f32 %v998_v62, 0.0  ;;  %v597_v7 = vadd.f32 %v2409_v12, %v596_v1  ;;  %v725_v8 = vadd.f32 %v2409_v12, %v724_v3 }
  0xf7   :  { %v598_v9 = vpop.f32.mrf.mxu0  ;;  %v726_v10 = vpop.f32.mrf.mxu1  ;;  %v1731_v61 = vunpack.c.l.bf16 %v1956_v51 }
  0xf8   :  { %v1785_v11 = vpack.c.bf16 %v1030_v5, %v1029_v63  ;;  %v1865_v13 = vpack.c.bf16 %v1062_v6, %v1061_v0  ;;  %v967_v16 = vadd.f32 %v1659_v2, %v597_v7  ;;  %v999_v17 = vadd.f32 %v1723_v4, %v725_v8 }
  0xf9   :  { %v599_v18 = vpop.f32.mrf.mxu0  ;;  %v727_v19 = vpop.f32.mrf.mxu1  ;;  %v1668_v6 = vunpack.c.h.bf16 %v1940_v50  ;;  %v1732_v7 = vunpack.c.h.bf16 %v1956_v51 }
  0xfa   :  { %1968 = vst [vmem:[%s2665_s4 + $0x8] sm:$0xff] %v1785_v11   ;;  %1984 = vst [vmem:[%s2665_s4 + $0x88] sm:$0xff] %v1865_v13   ;;  %v600_v20 = vadd.f32 %v2409_v12, %v599_v18  ;;  %v728_v21 = vadd.f32 %v2409_v12, %v727_v19  ;;  %v1031_v28 = vmax.f32 %v967_v16, 0.0  ;;  %v1063_v29 = vmax.f32 %v999_v17, 0.0  ;;  %v1957_v16 = vld [vmem:[%s2663_s3 + $0xa8] sm:$0xff]  }
  0xfb   :  { %v601_v24 = vpop.f32.mrf.mxu0  ;;  %v729_v25 = vpop.f32.mrf.mxu1 }
  0xfc   :  { %v968_v26 = vadd.f32 %v1660_v14, %v600_v20  ;;  %v1000_v27 = vadd.f32 %v1724_v15, %v728_v21  ;;  %v1941_v15 = vld [vmem:[%s2663_s3 + $0x28] sm:$0xff]  }
  0xfd   :  { %v604_v30 = vpop.f32.mrf.mxu0  ;;  %v732_v32 = vpop.f32.mrf.mxu1  ;;  %v1671_v24 = vunpack.c.l.bf16 %v1941_v15 }
  0xfe   :  { %v1032_v34 = vmax.f32 %v968_v26, 0.0  ;;  %v1064_v35 = vmax.f32 %v1000_v27, 0.0  ;;  %v605_v36 = vadd.f32 %v2409_v12, %v604_v30  ;;  %v733_v37 = vadd.f32 %v2409_v12, %v732_v32 }
  0xff   :  { %v606_v38 = vpop.f32.mrf.mxu0  ;;  %v734_v39 = vpop.f32.mrf.mxu1  ;;  %v1735_v26 = vunpack.c.l.bf16 %v1957_v16 }
 0x100   :  { %v1790_v40 = vpack.c.bf16 %v1032_v34, %v1031_v28  ;;  %v1870_v41 = vpack.c.bf16 %v1064_v35, %v1063_v29  ;;  %v969_v44 = vadd.f32 %v1663_v31, %v605_v36  ;;  %v1001_v45 = vadd.f32 %v1727_v33, %v733_v37 }
 0x101   :  { %v607_v46 = vpop.f32.mrf.mxu0  ;;  %v735_v47 = vpop.f32.mrf.mxu1  ;;  %v1672_v35 = vunpack.c.h.bf16 %v1941_v15  ;;  %v1736_v36 = vunpack.c.h.bf16 %v1957_v16 }
 0x102   :  { %1969 = vst [vmem:[%s2665_s4 + $0x10] sm:$0xff] %v1790_v40   ;;  %1985 = vst [vmem:[%s2665_s4 + $0x90] sm:$0xff] %v1870_v41   ;;  %v608_v48 = vadd.f32 %v2409_v12, %v607_v46  ;;  %v736_v49 = vadd.f32 %v2409_v12, %v735_v47  ;;  %v1033_v56 = vmax.f32 %v969_v44, 0.0  ;;  %v1065_v57 = vmax.f32 %v1001_v45, 0.0  ;;  %v1958_v44 = vld [vmem:[%s2663_s3 + $0xb0] sm:$0xff]  }
 0x103   :  { %v609_v52 = vpop.f32.mrf.mxu0  ;;  %v737_v53 = vpop.f32.mrf.mxu1 }
 0x104   :  { %v970_v54 = vadd.f32 %v1664_v42, %v608_v48  ;;  %v1002_v55 = vadd.f32 %v1728_v43, %v736_v49  ;;  %v1942_v43 = vld [vmem:[%s2663_s3 + $0x30] sm:$0xff]  }
 0x105   :  { %v612_v58 = vpop.f32.mrf.mxu0  ;;  %v740_v60 = vpop.f32.mrf.mxu1  ;;  %v1675_v52 = vunpack.c.l.bf16 %v1942_v43 }
 0x106   :  { %v1034_v62 = vmax.f32 %v970_v54, 0.0  ;;  %v1066_v63 = vmax.f32 %v1002_v55, 0.0  ;;  %v613_v0 = vadd.f32 %v2409_v12, %v612_v58  ;;  %v741_v1 = vadd.f32 %v2409_v12, %v740_v60 }
 0x107   :  { %v614_v2 = vpop.f32.mrf.mxu0  ;;  %v742_v3 = vpop.f32.mrf.mxu1  ;;  %v1739_v54 = vunpack.c.l.bf16 %v1958_v44 }
 0x108   :  { %v1795_v4 = vpack.c.bf16 %v1034_v62, %v1033_v56  ;;  %v1875_v5 = vpack.c.bf16 %v1066_v63, %v1065_v57  ;;  %v971_v8 = vadd.f32 %v1667_v59, %v613_v0  ;;  %v1003_v9 = vadd.f32 %v1731_v61, %v741_v1 }
 0x109   :  { %v615_v10 = vpop.f32.mrf.mxu0  ;;  %v743_v11 = vpop.f32.mrf.mxu1  ;;  %v1676_v63 = vunpack.c.h.bf16 %v1942_v43  ;;  %v1740_v0 = vunpack.c.h.bf16 %v1958_v44 }
 0x10a   :  { %1970 = vst [vmem:[%s2665_s4 + $0x18] sm:$0xff] %v1795_v4   ;;  %1986 = vst [vmem:[%s2665_s4 + $0x98] sm:$0xff] %v1875_v5   ;;  %v616_v13 = vadd.f32 %v2409_v12, %v615_v10  ;;  %v744_v14 = vadd.f32 %v2409_v12, %v743_v11  ;;  %v1035_v21 = vmax.f32 %v971_v8, 0.0  ;;  %v1067_v22 = vmax.f32 %v1003_v9, 0.0  ;;  %v1959_v8 = vld [vmem:[%s2663_s3 + $0xb8] sm:$0xff]  }
 0x10b   :  { %v617_v17 = vpop.f32.mrf.mxu0  ;;  %v745_v18 = vpop.f32.mrf.mxu1 }
 0x10c   :  { %v972_v19 = vadd.f32 %v1668_v6, %v616_v13  ;;  %v1004_v20 = vadd.f32 %v1732_v7, %v744_v14  ;;  %v1943_v7 = vld [vmem:[%s2663_s3 + $0x38] sm:$0xff]  }
 0x10d   :  { %v620_v23 = vpop.f32.mrf.mxu0  ;;  %v748_v25 = vpop.f32.mrf.mxu1  ;;  %v1679_v17 = vunpack.c.l.bf16 %v1943_v7 }
 0x10e   :  { %v1036_v27 = vmax.f32 %v972_v19, 0.0  ;;  %v1068_v28 = vmax.f32 %v1004_v20, 0.0  ;;  %v621_v29 = vadd.f32 %v2409_v12, %v620_v23  ;;  %v749_v30 = vadd.f32 %v2409_v12, %v748_v25 }
 0x10f   :  { %v622_v31 = vpop.f32.mrf.mxu0  ;;  %v750_v32 = vpop.f32.mrf.mxu1  ;;  %v1743_v19 = vunpack.c.l.bf16 %v1959_v8 }
 0x110   :  { %v1800_v33 = vpack.c.bf16 %v1036_v27, %v1035_v21  ;;  %v1880_v34 = vpack.c.bf16 %v1068_v28, %v1067_v22  ;;  %v973_v37 = vadd.f32 %v1671_v24, %v621_v29  ;;  %v1005_v38 = vadd.f32 %v1735_v26, %v749_v30 }
 0x111   :  { %v623_v39 = vpop.f32.mrf.mxu0  ;;  %v751_v40 = vpop.f32.mrf.mxu1  ;;  %v1680_v28 = vunpack.c.h.bf16 %v1943_v7  ;;  %v1744_v29 = vunpack.c.h.bf16 %v1959_v8 }
 0x112   :  { %1971 = vst [vmem:[%s2665_s4 + $0x20] sm:$0xff] %v1800_v33   ;;  %1987 = vst [vmem:[%s2665_s4 + $0xa0] sm:$0xff] %v1880_v34   ;;  %v624_v41 = vadd.f32 %v2409_v12, %v623_v39  ;;  %v752_v42 = vadd.f32 %v2409_v12, %v751_v40  ;;  %v1037_v49 = vmax.f32 %v973_v37, 0.0  ;;  %v1069_v50 = vmax.f32 %v1005_v38, 0.0  ;;  %v1960_v37 = vld [vmem:[%s2663_s3 + $0xc0] sm:$0xff]  }
 0x113   :  { %v625_v45 = vpop.f32.mrf.mxu0  ;;  %v753_v46 = vpop.f32.mrf.mxu1 }
 0x114   :  { %v974_v47 = vadd.f32 %v1672_v35, %v624_v41  ;;  %v1006_v48 = vadd.f32 %v1736_v36, %v752_v42  ;;  %v1944_v36 = vld [vmem:[%s2663_s3 + $0x40] sm:$0xff]  }
 0x115   :  { %v628_v51 = vpop.f32.mrf.mxu0  ;;  %v756_v53 = vpop.f32.mrf.mxu1  ;;  %v1683_v45 = vunpack.c.l.bf16 %v1944_v36 }
 0x116   :  { %v1038_v55 = vmax.f32 %v974_v47, 0.0  ;;  %v1070_v56 = vmax.f32 %v1006_v48, 0.0  ;;  %v629_v57 = vadd.f32 %v2409_v12, %v628_v51  ;;  %v757_v58 = vadd.f32 %v2409_v12, %v756_v53 }
 0x117   :  { %v630_v59 = vpop.f32.mrf.mxu0  ;;  %v758_v60 = vpop.f32.mrf.mxu1  ;;  %v1747_v47 = vunpack.c.l.bf16 %v1960_v37 }
 0x118   :  { %v1805_v61 = vpack.c.bf16 %v1038_v55, %v1037_v49  ;;  %v1885_v62 = vpack.c.bf16 %v1070_v56, %v1069_v50  ;;  %v975_v1 = vadd.f32 %v1675_v52, %v629_v57  ;;  %v1007_v2 = vadd.f32 %v1739_v54, %v757_v58 }
 0x119   :  { %v631_v3 = vpop.f32.mrf.mxu0  ;;  %v759_v4 = vpop.f32.mrf.mxu1  ;;  %v1684_v56 = vunpack.c.h.bf16 %v1944_v36  ;;  %v1748_v57 = vunpack.c.h.bf16 %v1960_v37 }
 0x11a   :  { %1972 = vst [vmem:[%s2665_s4 + $0x28] sm:$0xff] %v1805_v61   ;;  %1988 = vst [vmem:[%s2665_s4 + $0xa8] sm:$0xff] %v1885_v62   ;;  %v632_v5 = vadd.f32 %v2409_v12, %v631_v3  ;;  %v760_v6 = vadd.f32 %v2409_v12, %v759_v4  ;;  %v1039_v14 = vmax.f32 %v975_v1, 0.0  ;;  %v1071_v15 = vmax.f32 %v1007_v2, 0.0  ;;  %v1961_v1 = vld [vmem:[%s2663_s3 + $0xc8] sm:$0xff]  }
 0x11b   :  { %v633_v9 = vpop.f32.mrf.mxu0  ;;  %v761_v10 = vpop.f32.mrf.mxu1 }
 0x11c   :  { %v976_v11 = vadd.f32 %v1676_v63, %v632_v5  ;;  %v1008_v13 = vadd.f32 %v1740_v0, %v760_v6  ;;  %v1945_v0 = vld [vmem:[%s2663_s3 + $0x48] sm:$0xff]  }
 0x11d   :  { %v636_v16 = vpop.f32.mrf.mxu0  ;;  %v764_v18 = vpop.f32.mrf.mxu1  ;;  %v1687_v9 = vunpack.c.l.bf16 %v1945_v0 }
 0x11e   :  { %v1040_v20 = vmax.f32 %v976_v11, 0.0  ;;  %v1072_v21 = vmax.f32 %v1008_v13, 0.0  ;;  %v637_v22 = vadd.f32 %v2409_v12, %v636_v16  ;;  %v765_v23 = vadd.f32 %v2409_v12, %v764_v18 }
 0x11f   :  { %v638_v24 = vpop.f32.mrf.mxu0  ;;  %v766_v25 = vpop.f32.mrf.mxu1  ;;  %v1751_v11 = vunpack.c.l.bf16 %v1961_v1 }
 0x120   :  { %v1810_v26 = vpack.c.bf16 %v1040_v20, %v1039_v14  ;;  %v1890_v27 = vpack.c.bf16 %v1072_v21, %v1071_v15  ;;  %v977_v30 = vadd.f32 %v1679_v17, %v637_v22  ;;  %v1009_v31 = vadd.f32 %v1743_v19, %v765_v23 }
 0x121   :  { %v639_v32 = vpop.f32.mrf.mxu0  ;;  %v767_v33 = vpop.f32.mrf.mxu1  ;;  %v1688_v21 = vunpack.c.h.bf16 %v1945_v0  ;;  %v1752_v22 = vunpack.c.h.bf16 %v1961_v1 }
 0x122   :  { %1973 = vst [vmem:[%s2665_s4 + $0x30] sm:$0xff] %v1810_v26   ;;  %1989 = vst [vmem:[%s2665_s4 + $0xb0] sm:$0xff] %v1890_v27   ;;  %v640_v34 = vadd.f32 %v2409_v12, %v639_v32  ;;  %v768_v35 = vadd.f32 %v2409_v12, %v767_v33  ;;  %v1041_v42 = vmax.f32 %v977_v30, 0.0  ;;  %v1073_v43 = vmax.f32 %v1009_v31, 0.0  ;;  %v1962_v30 = vld [vmem:[%s2663_s3 + $0xd0] sm:$0xff]  }
 0x123   :  { %v641_v38 = vpop.f32.mrf.mxu0  ;;  %v769_v39 = vpop.f32.mrf.mxu1 }
 0x124   :  { %v978_v40 = vadd.f32 %v1680_v28, %v640_v34  ;;  %v1010_v41 = vadd.f32 %v1744_v29, %v768_v35  ;;  %v1946_v29 = vld [vmem:[%s2663_s3 + $0x50] sm:$0xff]  }
 0x125   :  { %v644_v44 = vpop.f32.mrf.mxu0  ;;  %v772_v46 = vpop.f32.mrf.mxu1  ;;  %v1691_v38 = vunpack.c.l.bf16 %v1946_v29 }
 0x126   :  { %v1042_v48 = vmax.f32 %v978_v40, 0.0  ;;  %v1074_v49 = vmax.f32 %v1010_v41, 0.0  ;;  %v645_v50 = vadd.f32 %v2409_v12, %v644_v44  ;;  %v773_v51 = vadd.f32 %v2409_v12, %v772_v46 }
 0x127   :  { %v646_v52 = vpop.f32.mrf.mxu0  ;;  %v774_v53 = vpop.f32.mrf.mxu1  ;;  %v1755_v40 = vunpack.c.l.bf16 %v1962_v30 }
 0x128   :  { %v1815_v54 = vpack.c.bf16 %v1042_v48, %v1041_v42  ;;  %v1895_v55 = vpack.c.bf16 %v1074_v49, %v1073_v43  ;;  %v979_v58 = vadd.f32 %v1683_v45, %v645_v50  ;;  %v1011_v59 = vadd.f32 %v1747_v47, %v773_v51 }
 0x129   :  { %v647_v60 = vpop.f32.mrf.mxu0  ;;  %v775_v61 = vpop.f32.mrf.mxu1  ;;  %v1692_v49 = vunpack.c.h.bf16 %v1946_v29  ;;  %v1756_v50 = vunpack.c.h.bf16 %v1962_v30 }
 0x12a   :  { %1974 = vst [vmem:[%s2665_s4 + $0x38] sm:$0xff] %v1815_v54   ;;  %1990 = vst [vmem:[%s2665_s4 + $0xb8] sm:$0xff] %v1895_v55   ;;  %v648_v62 = vadd.f32 %v2409_v12, %v647_v60  ;;  %v776_v63 = vadd.f32 %v2409_v12, %v775_v61  ;;  %v1043_v6 = vmax.f32 %v979_v58, 0.0  ;;  %v1075_v7 = vmax.f32 %v1011_v59, 0.0  ;;  %v1963_v58 = vld [vmem:[%s2663_s3 + $0xd8] sm:$0xff]  }
 0x12b   :  { %v649_v2 = vpop.f32.mrf.mxu0  ;;  %v777_v3 = vpop.f32.mrf.mxu1 }
 0x12c   :  { %v980_v4 = vadd.f32 %v1684_v56, %v648_v62  ;;  %v1012_v5 = vadd.f32 %v1748_v57, %v776_v63  ;;  %v1947_v57 = vld [vmem:[%s2663_s3 + $0x58] sm:$0xff]  }
 0x12d   :  { %v652_v8 = vpop.f32.mrf.mxu0  ;;  %v780_v10 = vpop.f32.mrf.mxu1  ;;  %v1695_v2 = vunpack.c.l.bf16 %v1947_v57 }
 0x12e   :  { %v1044_v13 = vmax.f32 %v980_v4, 0.0  ;;  %v1076_v14 = vmax.f32 %v1012_v5, 0.0  ;;  %v653_v15 = vadd.f32 %v2409_v12, %v652_v8  ;;  %v781_v16 = vadd.f32 %v2409_v12, %v780_v10 }
 0x12f   :  { %v654_v17 = vpop.f32.mrf.mxu0  ;;  %v782_v18 = vpop.f32.mrf.mxu1  ;;  %v1759_v4 = vunpack.c.l.bf16 %v1963_v58 }
 0x130   :  { %v1820_v19 = vpack.c.bf16 %v1044_v13, %v1043_v6  ;;  %v1900_v20 = vpack.c.bf16 %v1076_v14, %v1075_v7  ;;  %v981_v23 = vadd.f32 %v1687_v9, %v653_v15  ;;  %v1013_v24 = vadd.f32 %v1751_v11, %v781_v16 }
 0x131   :  { %v655_v25 = vpop.f32.mrf.mxu0  ;;  %v783_v26 = vpop.f32.mrf.mxu1  ;;  %v1696_v14 = vunpack.c.h.bf16 %v1947_v57  ;;  %v1760_v15 = vunpack.c.h.bf16 %v1963_v58 }
 0x132   :  { %1975 = vst [vmem:[%s2665_s4 + $0x40] sm:$0xff] %v1820_v19   ;;  %1991 = vst [vmem:[%s2665_s4 + $0xc0] sm:$0xff] %v1900_v20   ;;  %v656_v27 = vadd.f32 %v2409_v12, %v655_v25  ;;  %v784_v28 = vadd.f32 %v2409_v12, %v783_v26  ;;  %v1045_v35 = vmax.f32 %v981_v23, 0.0  ;;  %v1077_v36 = vmax.f32 %v1013_v24, 0.0  ;;  %v1964_v23 = vld [vmem:[%s2663_s3 + $0xe0] sm:$0xff]  }
 0x133   :  { %v657_v31 = vpop.f32.mrf.mxu0  ;;  %v785_v32 = vpop.f32.mrf.mxu1 }
 0x134   :  { %v982_v33 = vadd.f32 %v1688_v21, %v656_v27  ;;  %v1014_v34 = vadd.f32 %v1752_v22, %v784_v28  ;;  %v1948_v22 = vld [vmem:[%s2663_s3 + $0x60] sm:$0xff]  }
 0x135   :  { %v660_v37 = vpop.f32.mrf.mxu0  ;;  %v788_v39 = vpop.f32.mrf.mxu1  ;;  %v1699_v31 = vunpack.c.l.bf16 %v1948_v22 }
 0x136   :  { %v1046_v41 = vmax.f32 %v982_v33, 0.0  ;;  %v1078_v42 = vmax.f32 %v1014_v34, 0.0  ;;  %v661_v43 = vadd.f32 %v2409_v12, %v660_v37  ;;  %v789_v44 = vadd.f32 %v2409_v12, %v788_v39 }
 0x137   :  { %v662_v45 = vpop.f32.mrf.mxu0  ;;  %v790_v46 = vpop.f32.mrf.mxu1  ;;  %v1763_v33 = vunpack.c.l.bf16 %v1964_v23 }
 0x138   :  { %v1825_v47 = vpack.c.bf16 %v1046_v41, %v1045_v35  ;;  %v1905_v48 = vpack.c.bf16 %v1078_v42, %v1077_v36  ;;  %v983_v51 = vadd.f32 %v1691_v38, %v661_v43  ;;  %v1015_v52 = vadd.f32 %v1755_v40, %v789_v44 }
 0x139   :  { %v663_v53 = vpop.f32.mrf.mxu0  ;;  %v791_v54 = vpop.f32.mrf.mxu1  ;;  %v1700_v42 = vunpack.c.h.bf16 %v1948_v22  ;;  %v1764_v43 = vunpack.c.h.bf16 %v1964_v23 }
 0x13a   :  { %1976 = vst [vmem:[%s2665_s4 + $0x48] sm:$0xff] %v1825_v47   ;;  %1992 = vst [vmem:[%s2665_s4 + $0xc8] sm:$0xff] %v1905_v48   ;;  %v664_v55 = vadd.f32 %v2409_v12, %v663_v53  ;;  %v792_v56 = vadd.f32 %v2409_v12, %v791_v54  ;;  %v1047_v63 = vmax.f32 %v983_v51, 0.0  ;;  %v1079_v0 = vmax.f32 %v1015_v52, 0.0  ;;  %v1965_v51 = vld [vmem:[%s2663_s3 + $0xe8] sm:$0xff]  }
 0x13b   :  { %v665_v59 = vpop.f32.mrf.mxu0  ;;  %v793_v60 = vpop.f32.mrf.mxu1 }
 0x13c   :  { %v984_v61 = vadd.f32 %v1692_v49, %v664_v55  ;;  %v1016_v62 = vadd.f32 %v1756_v50, %v792_v56  ;;  %v1949_v50 = vld [vmem:[%s2663_s3 + $0x68] sm:$0xff]  }
 0x13d   :  { %v668_v1 = vpop.f32.mrf.mxu0  ;;  %v796_v3 = vpop.f32.mrf.mxu1  ;;  %v1703_v59 = vunpack.c.l.bf16 %v1949_v50 }
 0x13e   :  { %v1048_v5 = vmax.f32 %v984_v61, 0.0  ;;  %v1080_v6 = vmax.f32 %v1016_v62, 0.0  ;;  %v669_v7 = vadd.f32 %v2409_v12, %v668_v1  ;;  %v797_v8 = vadd.f32 %v2409_v12, %v796_v3 }
 0x13f   :  { %v670_v9 = vpop.f32.mrf.mxu0  ;;  %v798_v10 = vpop.f32.mrf.mxu1  ;;  %v1767_v61 = vunpack.c.l.bf16 %v1965_v51 }
 0x140   :  { %v1830_v11 = vpack.c.bf16 %v1048_v5, %v1047_v63  ;;  %v1910_v13 = vpack.c.bf16 %v1080_v6, %v1079_v0  ;;  %v985_v16 = vadd.f32 %v1695_v2, %v669_v7  ;;  %v1017_v17 = vadd.f32 %v1759_v4, %v797_v8 }
 0x141   :  { %v671_v18 = vpop.f32.mrf.mxu0  ;;  %v799_v19 = vpop.f32.mrf.mxu1  ;;  %v1704_v6 = vunpack.c.h.bf16 %v1949_v50  ;;  %v1768_v7 = vunpack.c.h.bf16 %v1965_v51 }
 0x142   :  { %1977 = vst [vmem:[%s2665_s4 + $0x50] sm:$0xff] %v1830_v11   ;;  %1993 = vst [vmem:[%s2665_s4 + $0xd0] sm:$0xff] %v1910_v13   ;;  %v672_v20 = vadd.f32 %v2409_v12, %v671_v18  ;;  %v800_v21 = vadd.f32 %v2409_v12, %v799_v19  ;;  %v1049_v28 = vmax.f32 %v985_v16, 0.0  ;;  %v1081_v29 = vmax.f32 %v1017_v17, 0.0  ;;  %v1966_v16 = vld [vmem:[%s2663_s3 + $0xf0] sm:$0xff]  }
 0x143   :  { %v673_v24 = vpop.f32.mrf.mxu0  ;;  %v801_v25 = vpop.f32.mrf.mxu1 }
 0x144   :  { %v986_v26 = vadd.f32 %v1696_v14, %v672_v20  ;;  %v1018_v27 = vadd.f32 %v1760_v15, %v800_v21  ;;  %v1950_v15 = vld [vmem:[%s2663_s3 + $0x70] sm:$0xff]  }
 0x145   :  { %v676_v30 = vpop.f32.mrf.mxu0  ;;  %v804_v32 = vpop.f32.mrf.mxu1  ;;  %v1707_v24 = vunpack.c.l.bf16 %v1950_v15 }
 0x146   :  { %v1050_v34 = vmax.f32 %v986_v26, 0.0  ;;  %v1082_v35 = vmax.f32 %v1018_v27, 0.0  ;;  %v677_v36 = vadd.f32 %v2409_v12, %v676_v30  ;;  %v805_v37 = vadd.f32 %v2409_v12, %v804_v32 }
 0x147   :  { %v678_v38 = vpop.f32.mrf.mxu0  ;;  %v806_v39 = vpop.f32.mrf.mxu1  ;;  %v1771_v26 = vunpack.c.l.bf16 %v1966_v16 }
 0x148   :  { %v1835_v40 = vpack.c.bf16 %v1050_v34, %v1049_v28  ;;  %v1915_v41 = vpack.c.bf16 %v1082_v35, %v1081_v29  ;;  %v987_v44 = vadd.f32 %v1699_v31, %v677_v36  ;;  %v1019_v45 = vadd.f32 %v1763_v33, %v805_v37 }
 0x149   :  { %v679_v46 = vpop.f32.mrf.mxu0  ;;  %v807_v47 = vpop.f32.mrf.mxu1  ;;  %v1708_v35 = vunpack.c.h.bf16 %v1950_v15  ;;  %v1772_v36 = vunpack.c.h.bf16 %v1966_v16 }
 0x14a   :  { %1978 = vst [vmem:[%s2665_s4 + $0x58] sm:$0xff] %v1835_v40   ;;  %1994 = vst [vmem:[%s2665_s4 + $0xd8] sm:$0xff] %v1915_v41   ;;  %v680_v48 = vadd.f32 %v2409_v12, %v679_v46  ;;  %v808_v49 = vadd.f32 %v2409_v12, %v807_v47  ;;  %v1051_v56 = vmax.f32 %v987_v44, 0.0  ;;  %v1083_v57 = vmax.f32 %v1019_v45, 0.0  ;;  %v1967_v44 = vld [vmem:[%s2663_s3 + $0xf8] sm:$0xff]  }
 0x14b   :  { %v681_v52 = vpop.f32.mrf.mxu0  ;;  %v809_v53 = vpop.f32.mrf.mxu1 }
 0x14c   :  { %v988_v54 = vadd.f32 %v1700_v42, %v680_v48  ;;  %v1020_v55 = vadd.f32 %v1764_v43, %v808_v49  ;;  %v1951_v43 = vld [vmem:[%s2663_s3 + $0x78] sm:$0xff]  }
 0x14d   :  { %v684_v58 = vpop.f32.mrf.mxu0  ;;  %v812_v60 = vpop.f32.mrf.mxu1  ;;  %v1711_v52 = vunpack.c.l.bf16 %v1951_v43 }
 0x14e   :  { %v1052_v62 = vmax.f32 %v988_v54, 0.0  ;;  %v1084_v63 = vmax.f32 %v1020_v55, 0.0  ;;  %v685_v0 = vadd.f32 %v2409_v12, %v684_v58  ;;  %v813_v1 = vadd.f32 %v2409_v12, %v812_v60 }
 0x14f   :  { %v686_v2 = vpop.f32.mrf.mxu0  ;;  %v814_v3 = vpop.f32.mrf.mxu1  ;;  %v1775_v54 = vunpack.c.l.bf16 %v1967_v44 }
 0x150   :  { %v1840_v4 = vpack.c.bf16 %v1052_v62, %v1051_v56  ;;  %v1920_v5 = vpack.c.bf16 %v1084_v63, %v1083_v57  ;;  %v989_v8 = vadd.f32 %v1703_v59, %v685_v0  ;;  %v1021_v9 = vadd.f32 %v1767_v61, %v813_v1 }
 0x151   :  { %v687_v10 = vpop.f32.mrf.mxu0  ;;  %v815_v11 = vpop.f32.mrf.mxu1  ;;  %v1712_v63 = vunpack.c.h.bf16 %v1951_v43  ;;  %v1776_v0 = vunpack.c.h.bf16 %v1967_v44 }
 0x152   :  { %1979 = vst [vmem:[%s2665_s4 + $0x60] sm:$0xff] %v1840_v4   ;;  %1995 = vst [vmem:[%s2665_s4 + $0xe0] sm:$0xff] %v1920_v5   ;;  %v688_v13 = vadd.f32 %v2409_v12, %v687_v10  ;;  %v816_v14 = vadd.f32 %v2409_v12, %v815_v11  ;;  %v1053_v21 = vmax.f32 %v989_v8, 0.0  ;;  %v1085_v22 = vmax.f32 %v1021_v9, 0.0 }
 0x153   :  { %v689_v17 = vpop.f32.mrf.mxu0  ;;  %v817_v18 = vpop.f32.mrf.mxu1 }
 0x154   :  { %v990_v19 = vadd.f32 %v1704_v6, %v688_v13  ;;  %v1022_v20 = vadd.f32 %v1768_v7, %v816_v14 }
 0x155   :  { %v692_v23 = vpop.f32.mrf.mxu0  ;;  %v820_v25 = vpop.f32.mrf.mxu1 }
 0x156   :  { %v1054_v27 = vmax.f32 %v990_v19, 0.0  ;;  %v1086_v28 = vmax.f32 %v1022_v20, 0.0  ;;  %v693_v29 = vadd.f32 %v2409_v12, %v692_v23  ;;  %v821_v30 = vadd.f32 %v2409_v12, %v820_v25 }
 0x157   :  { %v694_v31 = vpop.f32.mrf.mxu0  ;;  %v822_v32 = vpop.f32.mrf.mxu1 }
 0x158   :  { %v1845_v33 = vpack.c.bf16 %v1054_v27, %v1053_v21  ;;  %v1925_v34 = vpack.c.bf16 %v1086_v28, %v1085_v22  ;;  %v991_v37 = vadd.f32 %v1707_v24, %v693_v29  ;;  %v1023_v38 = vadd.f32 %v1771_v26, %v821_v30 }
 0x159   :  { %v695_v39 = vpop.f32.mrf.mxu0  ;;  %v823_v40 = vpop.f32.mrf.mxu1 }
 0x15a   :  { %1980 = vst [vmem:[%s2665_s4 + $0x68] sm:$0xff] %v1845_v33   ;;  %1996 = vst [vmem:[%s2665_s4 + $0xe8] sm:$0xff] %v1925_v34   ;;  %v696_v41 = vadd.f32 %v2409_v12, %v695_v39  ;;  %v824_v42 = vadd.f32 %v2409_v12, %v823_v40  ;;  %v1055_v49 = vmax.f32 %v991_v37, 0.0  ;;  %v1087_v50 = vmax.f32 %v1023_v38, 0.0 }
 0x15b   :  { %v697_v45 = vpop.f32.mrf.mxu0  ;;  %v825_v46 = vpop.f32.mrf.mxu1 }
 0x15c   :  { %v992_v47 = vadd.f32 %v1708_v35, %v696_v41  ;;  %v1024_v48 = vadd.f32 %v1772_v36, %v824_v42 }
 0x15d   :  { %v700_v51 = vpop.f32.mrf.mxu0  ;;  %v828_v53 = vpop.f32.mrf.mxu1 }
 0x15e   :  { %v1056_v55 = vmax.f32 %v992_v47, 0.0  ;;  %v1088_v56 = vmax.f32 %v1024_v48, 0.0  ;;  %v701_v57 = vadd.f32 %v2409_v12, %v700_v51  ;;  %v829_v58 = vadd.f32 %v2409_v12, %v828_v53 }
 0x15f   :  { %v702_v59 = vpop.f32.mrf.mxu0  ;;  %v830_v60 = vpop.f32.mrf.mxu1 }
 0x160   :  { %v1850_v61 = vpack.c.bf16 %v1056_v55, %v1055_v49  ;;  %v1930_v62 = vpack.c.bf16 %v1088_v56, %v1087_v50  ;;  %v993_v3 = vadd.f32 %v1711_v52, %v701_v57  ;;  %v1025_v4 = vadd.f32 %v1775_v54, %v829_v58 }
 0x161   :  { %v703_v1 = vpop.f32.mrf.mxu0  ;;  %v831_v2 = vpop.f32.mrf.mxu1 }
 0x162   :  { %1981 = vst [vmem:[%s2665_s4 + $0x70] sm:$0xff] %v1850_v61   ;;  %1997 = vst [vmem:[%s2665_s4 + $0xf0] sm:$0xff] %v1930_v62   ;;  %v704_v5 = vadd.f32 %v2409_v12, %v703_v1  ;;  %v832_v6 = vadd.f32 %v2409_v12, %v831_v2  ;;  %v1057_v11 = vmax.f32 %v993_v3, 0.0  ;;  %v1089_v13 = vmax.f32 %v1025_v4, 0.0 }
 0x163   :  { %v705_v7 = vpop.f32.mrf.mxu0  ;;  %v833_v8 = vpop.f32.mrf.mxu1 }
 0x164   :  { %v994_v9 = vadd.f32 %v1712_v63, %v704_v5  ;;  %v1026_v10 = vadd.f32 %v1776_v0, %v832_v6 }
 0x166   :  { %v1058_v14 = vmax.f32 %v994_v9, 0.0  ;;  %v1090_v15 = vmax.f32 %v1026_v10, 0.0 }
 0x168   :  { %v1855_v16 = vpack.c.bf16 %v1058_v14, %v1057_v11  ;;  %v1935_v17 = vpack.c.bf16 %v1090_v15, %v1089_v13 }
 0x16a   :  { %1982 = vst [vmem:[%s2665_s4 + $0x78] sm:$0xff] %v1855_v16   ;;  %1998 = vst [vmem:[%s2665_s4 + $0xf8] sm:$0xff] %v1935_v17  }

// kernel: _lambda_.45
= control target key start
LH: loop header
LB: loop body
LE: loop exit
PB: predicated region body
PF: predicated region fallthrough
CT: control target
= control target key end

     0   :  { %vm262_vm0 = vcmask 261120   ;;  %s1881_s1 = inlined_call_operand.vmem [shape: bf16[32,128], index: 1, kind: input, shape index: {}]   ;;  %s1882_s0 = inlined_call_operand.vmem [shape: bf16[512,32], index: 0, kind: input, shape index: {}]   ;;  %s1883_s2 = inlined_call_operand.vmem [shape: f32[1,128], index: 2, kind: input, shape index: {}]   ;;  %s1884_s3 = inlined_call_operand.vmem [shape: bf16[512,128], index: 3, kind: output, shape index: {}]  }
   0x1   :  { %v1528_v0 = vld [vmem:[%s1881_s1 + $0x8] sm:$0xff]   ;;  %v1529_v1 = vld [vmem:[%s1881_s1] sm:$0xff]   ;;  %v1534_v6 = vld [vmem:[%s1882_s0 + $0x10] sm:$0xff]  }
   0x2   :  { %1456 = vmatprep.subr.bf16.mxu0 %v1528_v0  ;;  %1524 = vmatprep.subr.bf16.mxu1 %v1528_v0  ;;  %v1530_v2 = vld [vmem:[%s1882_s0] sm:$0xff]   ;;  %v1532_v4 = vld [vmem:[%s1882_s0 + $0x8] sm:$0xff]   ;;  %v1535_v7 = vld [vmem:[%s1882_s0 + $0x90] sm:$0xff]  }
   0x3   :  { %1457 = vmatpush3.bf16.msra.mxu0 %v1528_v0  ;;  %1526 = vmatpush3.bf16.msra.mxu1 %v1528_v0  ;;  %v1531_v3 = vld [vmem:[%s1882_s0 + $0x80] sm:$0xff]   ;;  %v1533_v5 = vld [vmem:[%s1882_s0 + $0x88] sm:$0xff]   ;;  %v1536_v8 = vld [vmem:[%s1882_s0 + $0x18] sm:$0xff]  }
   0x4   :  { %1458 = vmatprep.subr.bf16.mxu0 %v1529_v1  ;;  %1525 = vmatprep.subr.bf16.mxu1 %v1529_v1  ;;  %v1537_v9 = vld [vmem:[%s1882_s0 + $0x98] sm:$0xff]   ;;  %v1538_v10 = vld [vmem:[%s1882_s0 + $0x20] sm:$0xff]   ;;  %v1540_v12 = vld [vmem:[%s1882_s0 + $0x28] sm:$0xff]  }
   0x5   :  { %1460 = vmatprep.mubr.msk.bf16.mxu0 %vm262_vm0, %v1530_v2  ;;  %1492 = vmatprep.mubr.msk.bf16.mxu1 %vm262_vm0, %v1531_v3  ;;  %v1539_v11 = vld [vmem:[%s1882_s0 + $0xa0] sm:$0xff]   ;;  %v1541_v13 = vld [vmem:[%s1882_s0 + $0xa8] sm:$0xff]   ;;  %v1542_v14 = vld [vmem:[%s1882_s0 + $0x30] sm:$0xff]  }
   0x6   :  { %v1543_v15 = vld [vmem:[%s1882_s0 + $0xb0] sm:$0xff]   ;;  %v1544_v16 = vld [vmem:[%s1882_s0 + $0x38] sm:$0xff]   ;;  %v1546_v18 = vld [vmem:[%s1882_s0 + $0x40] sm:$0xff]  }
   0x7   :  { %1459 = vmatpush3.bf16.msra.mxu0 %v1529_v1  ;;  %1527 = vmatpush3.bf16.msra.mxu1 %v1529_v1  ;;  %v1545_v17 = vld [vmem:[%s1882_s0 + $0xb8] sm:$0xff]   ;;  %v1547_v19 = vld [vmem:[%s1882_s0 + $0xc0] sm:$0xff]   ;;  %v1548_v20 = vld [vmem:[%s1882_s0 + $0x48] sm:$0xff]  }
   0x8   :  { %v1549_v21 = vld [vmem:[%s1882_s0 + $0xc8] sm:$0xff]   ;;  %v1550_v22 = vld [vmem:[%s1882_s0 + $0x50] sm:$0xff]   ;;  %v1552_v24 = vld [vmem:[%s1882_s0 + $0x58] sm:$0xff]  }
   0x9   :  { %v1551_v23 = vld [vmem:[%s1882_s0 + $0xd0] sm:$0xff]   ;;  %v1553_v25 = vld [vmem:[%s1882_s0 + $0xd8] sm:$0xff]   ;;  %v1554_v26 = vld [vmem:[%s1882_s0 + $0x60] sm:$0xff]  }
   0xa   :  { %1461 = vmatmul.mubr.msk.bf16.vlgmr.msra.gmra.mxu0 %vm262_vm0, %v1532_v4  ;;  %1493 = vmatmul.mubr.msk.bf16.vlgmr.msra.gmra.mxu1 %vm262_vm0, %v1533_v5  ;;  %v1555_v27 = vld [vmem:[%s1882_s0 + $0xe0] sm:$0xff]   ;;  %v1556_v28 = vld [vmem:[%s1882_s0 + $0x68] sm:$0xff]   ;;  %v1558_v30 = vld [vmem:[%s1882_s0 + $0x70] sm:$0xff]  }
   0xb   :  { %1464 = vmatprep.mubr.msk.bf16.mxu0 %vm262_vm0, %v1534_v6  ;;  %1496 = vmatprep.mubr.msk.bf16.mxu1 %vm262_vm0, %v1535_v7  ;;  %v1557_v29 = vld [vmem:[%s1882_s0 + $0xe8] sm:$0xff]   ;;  %v1559_v31 = vld [vmem:[%s1882_s0 + $0xf0] sm:$0xff]   ;;  %v1560_v32 = vld [vmem:[%s1882_s0 + $0x78] sm:$0xff]  }
   0xc   :  { %v1561_v33 = vld [vmem:[%s1882_s0 + $0xf8] sm:$0xff]   ;;  %v1719_v34 = vld [vmem:[%s1883_s2] ss:$0 sm:$0xff] }
  0x12   :  { %1465 = vmatmul.mubr.msk.bf16.gmra.mxu0 %vm262_vm0, %v1536_v8  ;;  %1497 = vmatmul.mubr.msk.bf16.gmra.mxu1 %vm262_vm0, %v1537_v9 }
  0x13   :  { %1468 = vmatprep.mubr.msk.bf16.mxu0 %vm262_vm0, %v1538_v10  ;;  %1500 = vmatprep.mubr.msk.bf16.mxu1 %vm262_vm0, %v1539_v11 }
  0x1a   :  { %1469 = vmatmul.mubr.msk.bf16.gmra.mxu0 %vm262_vm0, %v1540_v12  ;;  %1501 = vmatmul.mubr.msk.bf16.gmra.mxu1 %vm262_vm0, %v1541_v13 }
  0x1b   :  { %1472 = vmatprep.mubr.msk.bf16.mxu0 %vm262_vm0, %v1542_v14  ;;  %1504 = vmatprep.mubr.msk.bf16.mxu1 %vm262_vm0, %v1543_v15 }
  0x22   :  { %1473 = vmatmul.mubr.msk.bf16.gmra.mxu0 %vm262_vm0, %v1544_v16  ;;  %1505 = vmatmul.mubr.msk.bf16.gmra.mxu1 %vm262_vm0, %v1545_v17 }
  0x23   :  { %1476 = vmatprep.mubr.msk.bf16.mxu0 %vm262_vm0, %v1546_v18  ;;  %1508 = vmatprep.mubr.msk.bf16.mxu1 %vm262_vm0, %v1547_v19 }
  0x2a   :  { %1477 = vmatmul.mubr.msk.bf16.gmra.mxu0 %vm262_vm0, %v1548_v20  ;;  %1509 = vmatmul.mubr.msk.bf16.gmra.mxu1 %vm262_vm0, %v1549_v21 }
  0x2b   :  { %1480 = vmatprep.mubr.msk.bf16.mxu0 %vm262_vm0, %v1550_v22  ;;  %1512 = vmatprep.mubr.msk.bf16.mxu1 %vm262_vm0, %v1551_v23 }
  0x32   :  { %1481 = vmatmul.mubr.msk.bf16.gmra.mxu0 %vm262_vm0, %v1552_v24  ;;  %1513 = vmatmul.mubr.msk.bf16.gmra.mxu1 %vm262_vm0, %v1553_v25 }
  0x33   :  { %1484 = vmatprep.mubr.msk.bf16.mxu0 %vm262_vm0, %v1554_v26  ;;  %1516 = vmatprep.mubr.msk.bf16.mxu1 %vm262_vm0, %v1555_v27 }
  0x3a   :  { %1485 = vmatmul.mubr.msk.bf16.gmra.mxu0 %vm262_vm0, %v1556_v28  ;;  %1517 = vmatmul.mubr.msk.bf16.gmra.mxu1 %vm262_vm0, %v1557_v29 }
  0x3b   :  { %1488 = vmatprep.mubr.msk.bf16.mxu0 %vm262_vm0, %v1558_v30  ;;  %1520 = vmatprep.mubr.msk.bf16.mxu1 %vm262_vm0, %v1559_v31 }
  0x42   :  { %1489 = vmatmul.mubr.msk.bf16.gmra.mxu0 %vm262_vm0, %v1560_v32  ;;  %1521 = vmatmul.mubr.msk.bf16.gmra.mxu1 %vm262_vm0, %v1561_v33 }
  0xca   :  { %v1462_v35 = vpop.f32.mrf.mxu0  ;;  %v1494_v36 = vpop.f32.mrf.mxu1 }
  0xcb   :  { %v402_v37 = vadd.f32 %v1462_v35, %v1719_v34  ;;  %v530_v38 = vadd.f32 %v1494_v36, %v1719_v34 }
  0xcc   :  { %v393_v39 = vpop.f32.mrf.mxu0  ;;  %v521_v40 = vpop.f32.mrf.mxu1 }
  0xcd   :  { %v394_v41 = vadd.f32 %v1719_v34, %v393_v39  ;;  %v522_v42 = vadd.f32 %v1719_v34, %v521_v40  ;;  %v650_v47 = vmax.f32 %v402_v37, 0.0  ;;  %v682_v48 = vmax.f32 %v530_v38, 0.0 }
  0xce   :  { %v1463_v43 = vpop.f32.mrf.mxu0  ;;  %v1495_v44 = vpop.f32.mrf.mxu1 }
  0xcf   :  { %v405_v45 = vadd.f32 %v1463_v43, %v1719_v34  ;;  %v533_v46 = vadd.f32 %v1495_v44, %v1719_v34  ;;  %v648_v55 = vmax.f32 %v394_v41, 0.0  ;;  %v680_v56 = vmax.f32 %v522_v42, 0.0 }
  0xd0   :  { %v396_v49 = vpop.f32.mrf.mxu0  ;;  %v524_v50 = vpop.f32.mrf.mxu1 }
  0xd1   :  { %v651_v51 = vmax.f32 %v405_v45, 0.0  ;;  %v683_v52 = vmax.f32 %v533_v46, 0.0  ;;  %v397_v53 = vadd.f32 %v1719_v34, %v396_v49  ;;  %v525_v54 = vadd.f32 %v1719_v34, %v524_v50 }
  0xd2   :  { %v1466_v57 = vpop.f32.mrf.mxu0  ;;  %v1498_v58 = vpop.f32.mrf.mxu1 }
  0xd3   :  { %v1239_v59 = vpack.c.bf16 %v651_v51, %v650_v47  ;;  %v1319_v60 = vpack.c.bf16 %v683_v52, %v682_v48  ;;  %v649_v61 = vmax.f32 %v397_v53, 0.0  ;;  %v681_v62 = vmax.f32 %v525_v54, 0.0 }
  0xd4   :  { %v418_v63 = vadd.f32 %v1466_v57, %v1719_v34  ;;  %v546_v0 = vadd.f32 %v1498_v58, %v1719_v34  ;;  %v409_v1 = vpop.f32.mrf.mxu0  ;;  %v537_v2 = vpop.f32.mrf.mxu1 }
  0xd5   :  { %1391 = vst [vmem:[%s1884_s3 + $0x8] sm:$0xff] %v1239_v59   ;;  %1407 = vst [vmem:[%s1884_s3 + $0x88] sm:$0xff] %v1319_v60   ;;  %v1234_v3 = vpack.c.bf16 %v649_v61, %v648_v55  ;;  %v1314_v4 = vpack.c.bf16 %v681_v62, %v680_v56  ;;  %v410_v5 = vadd.f32 %v1719_v34, %v409_v1 }
  0xd6   :  { %v538_v6 = vadd.f32 %v1719_v34, %v537_v2  ;;  %v1467_v7 = vpop.f32.mrf.mxu0  ;;  %v1499_v8 = vpop.f32.mrf.mxu1  ;;  %v654_v11 = vmax.f32 %v418_v63, 0.0  ;;  %v686_v12 = vmax.f32 %v546_v0, 0.0 }
  0xd7   :  { %1235 = vst [vmem:[%s1884_s3] sm:$0xff] %v1234_v3   ;;  %1406 = vst [vmem:[%s1884_s3 + $0x80] sm:$0xff] %v1314_v4   ;;  %v421_v9 = vadd.f32 %v1467_v7, %v1719_v34  ;;  %v549_v10 = vadd.f32 %v1499_v8, %v1719_v34  ;;  %v652_v19 = vmax.f32 %v410_v5, 0.0 }
  0xd8   :  { %v412_v13 = vpop.f32.mrf.mxu0  ;;  %v540_v14 = vpop.f32.mrf.mxu1  ;;  %v684_v20 = vmax.f32 %v538_v6, 0.0 }
  0xd9   :  { %v655_v15 = vmax.f32 %v421_v9, 0.0  ;;  %v687_v16 = vmax.f32 %v549_v10, 0.0  ;;  %v413_v17 = vadd.f32 %v1719_v34, %v412_v13  ;;  %v541_v18 = vadd.f32 %v1719_v34, %v540_v14 }
  0xda   :  { %v1470_v21 = vpop.f32.mrf.mxu0  ;;  %v1502_v22 = vpop.f32.mrf.mxu1 }
  0xdb   :  { %v1249_v23 = vpack.c.bf16 %v655_v15, %v654_v11  ;;  %v1329_v24 = vpack.c.bf16 %v687_v16, %v686_v12  ;;  %v653_v25 = vmax.f32 %v413_v17, 0.0  ;;  %v685_v26 = vmax.f32 %v541_v18, 0.0 }
  0xdc   :  { %v434_v27 = vadd.f32 %v1470_v21, %v1719_v34  ;;  %v562_v28 = vadd.f32 %v1502_v22, %v1719_v34  ;;  %v425_v29 = vpop.f32.mrf.mxu0  ;;  %v553_v30 = vpop.f32.mrf.mxu1 }
  0xdd   :  { %1393 = vst [vmem:[%s1884_s3 + $0x18] sm:$0xff] %v1249_v23   ;;  %1409 = vst [vmem:[%s1884_s3 + $0x98] sm:$0xff] %v1329_v24   ;;  %v1244_v31 = vpack.c.bf16 %v653_v25, %v652_v19  ;;  %v1324_v32 = vpack.c.bf16 %v685_v26, %v684_v20  ;;  %v426_v33 = vadd.f32 %v1719_v34, %v425_v29 }
  0xde   :  { %v554_v35 = vadd.f32 %v1719_v34, %v553_v30  ;;  %v1471_v36 = vpop.f32.mrf.mxu0  ;;  %v1503_v37 = vpop.f32.mrf.mxu1  ;;  %v658_v40 = vmax.f32 %v434_v27, 0.0  ;;  %v690_v41 = vmax.f32 %v562_v28, 0.0 }
  0xdf   :  { %1392 = vst [vmem:[%s1884_s3 + $0x10] sm:$0xff] %v1244_v31   ;;  %1408 = vst [vmem:[%s1884_s3 + $0x90] sm:$0xff] %v1324_v32   ;;  %v437_v38 = vadd.f32 %v1471_v36, %v1719_v34  ;;  %v565_v39 = vadd.f32 %v1503_v37, %v1719_v34  ;;  %v656_v48 = vmax.f32 %v426_v33, 0.0 }
  0xe0   :  { %v428_v42 = vpop.f32.mrf.mxu0  ;;  %v556_v43 = vpop.f32.mrf.mxu1  ;;  %v688_v49 = vmax.f32 %v554_v35, 0.0 }
  0xe1   :  { %v659_v44 = vmax.f32 %v437_v38, 0.0  ;;  %v691_v45 = vmax.f32 %v565_v39, 0.0  ;;  %v429_v46 = vadd.f32 %v1719_v34, %v428_v42  ;;  %v557_v47 = vadd.f32 %v1719_v34, %v556_v43 }
  0xe2   :  { %v1474_v50 = vpop.f32.mrf.mxu0  ;;  %v1506_v51 = vpop.f32.mrf.mxu1 }
  0xe3   :  { %v1259_v52 = vpack.c.bf16 %v659_v44, %v658_v40  ;;  %v1339_v53 = vpack.c.bf16 %v691_v45, %v690_v41  ;;  %v657_v54 = vmax.f32 %v429_v46, 0.0  ;;  %v689_v55 = vmax.f32 %v557_v47, 0.0 }
  0xe4   :  { %v450_v56 = vadd.f32 %v1474_v50, %v1719_v34  ;;  %v578_v57 = vadd.f32 %v1506_v51, %v1719_v34  ;;  %v441_v58 = vpop.f32.mrf.mxu0  ;;  %v569_v59 = vpop.f32.mrf.mxu1 }
  0xe5   :  { %1395 = vst [vmem:[%s1884_s3 + $0x28] sm:$0xff] %v1259_v52   ;;  %1411 = vst [vmem:[%s1884_s3 + $0xa8] sm:$0xff] %v1339_v53   ;;  %v1254_v60 = vpack.c.bf16 %v657_v54, %v656_v48  ;;  %v1334_v61 = vpack.c.bf16 %v689_v55, %v688_v49  ;;  %v442_v62 = vadd.f32 %v1719_v34, %v441_v58 }
  0xe6   :  { %v570_v63 = vadd.f32 %v1719_v34, %v569_v59  ;;  %v1475_v0 = vpop.f32.mrf.mxu0  ;;  %v1507_v1 = vpop.f32.mrf.mxu1  ;;  %v662_v4 = vmax.f32 %v450_v56, 0.0  ;;  %v694_v5 = vmax.f32 %v578_v57, 0.0 }
  0xe7   :  { %1394 = vst [vmem:[%s1884_s3 + $0x20] sm:$0xff] %v1254_v60   ;;  %1410 = vst [vmem:[%s1884_s3 + $0xa0] sm:$0xff] %v1334_v61   ;;  %v453_v2 = vadd.f32 %v1475_v0, %v1719_v34  ;;  %v581_v3 = vadd.f32 %v1507_v1, %v1719_v34  ;;  %v660_v12 = vmax.f32 %v442_v62, 0.0 }
  0xe8   :  { %v444_v6 = vpop.f32.mrf.mxu0  ;;  %v572_v7 = vpop.f32.mrf.mxu1  ;;  %v692_v13 = vmax.f32 %v570_v63, 0.0 }
  0xe9   :  { %v663_v8 = vmax.f32 %v453_v2, 0.0  ;;  %v695_v9 = vmax.f32 %v581_v3, 0.0  ;;  %v445_v10 = vadd.f32 %v1719_v34, %v444_v6  ;;  %v573_v11 = vadd.f32 %v1719_v34, %v572_v7 }
  0xea   :  { %v1478_v14 = vpop.f32.mrf.mxu0  ;;  %v1510_v15 = vpop.f32.mrf.mxu1 }
  0xeb   :  { %v1269_v16 = vpack.c.bf16 %v663_v8, %v662_v4  ;;  %v1349_v17 = vpack.c.bf16 %v695_v9, %v694_v5  ;;  %v661_v18 = vmax.f32 %v445_v10, 0.0  ;;  %v693_v19 = vmax.f32 %v573_v11, 0.0 }
  0xec   :  { %v466_v20 = vadd.f32 %v1478_v14, %v1719_v34  ;;  %v594_v21 = vadd.f32 %v1510_v15, %v1719_v34  ;;  %v457_v22 = vpop.f32.mrf.mxu0  ;;  %v585_v23 = vpop.f32.mrf.mxu1 }
  0xed   :  { %1397 = vst [vmem:[%s1884_s3 + $0x38] sm:$0xff] %v1269_v16   ;;  %1413 = vst [vmem:[%s1884_s3 + $0xb8] sm:$0xff] %v1349_v17   ;;  %v1264_v24 = vpack.c.bf16 %v661_v18, %v660_v12  ;;  %v1344_v25 = vpack.c.bf16 %v693_v19, %v692_v13  ;;  %v458_v26 = vadd.f32 %v1719_v34, %v457_v22 }
  0xee   :  { %v586_v27 = vadd.f32 %v1719_v34, %v585_v23  ;;  %v1479_v28 = vpop.f32.mrf.mxu0  ;;  %v1511_v29 = vpop.f32.mrf.mxu1  ;;  %v666_v32 = vmax.f32 %v466_v20, 0.0  ;;  %v698_v33 = vmax.f32 %v594_v21, 0.0 }
  0xef   :  { %1396 = vst [vmem:[%s1884_s3 + $0x30] sm:$0xff] %v1264_v24   ;;  %1412 = vst [vmem:[%s1884_s3 + $0xb0] sm:$0xff] %v1344_v25   ;;  %v469_v30 = vadd.f32 %v1479_v28, %v1719_v34  ;;  %v597_v31 = vadd.f32 %v1511_v29, %v1719_v34  ;;  %v664_v41 = vmax.f32 %v458_v26, 0.0 }
  0xf0   :  { %v460_v35 = vpop.f32.mrf.mxu0  ;;  %v588_v36 = vpop.f32.mrf.mxu1  ;;  %v696_v42 = vmax.f32 %v586_v27, 0.0 }
  0xf1   :  { %v667_v37 = vmax.f32 %v469_v30, 0.0  ;;  %v699_v38 = vmax.f32 %v597_v31, 0.0  ;;  %v461_v39 = vadd.f32 %v1719_v34, %v460_v35  ;;  %v589_v40 = vadd.f32 %v1719_v34, %v588_v36 }
  0xf2   :  { %v1482_v43 = vpop.f32.mrf.mxu0  ;;  %v1514_v44 = vpop.f32.mrf.mxu1 }
  0xf3   :  { %v1279_v45 = vpack.c.bf16 %v667_v37, %v666_v32  ;;  %v1359_v46 = vpack.c.bf16 %v699_v38, %v698_v33  ;;  %v665_v47 = vmax.f32 %v461_v39, 0.0  ;;  %v697_v48 = vmax.f32 %v589_v40, 0.0 }
  0xf4   :  { %v482_v49 = vadd.f32 %v1482_v43, %v1719_v34  ;;  %v610_v50 = vadd.f32 %v1514_v44, %v1719_v34  ;;  %v473_v51 = vpop.f32.mrf.mxu0  ;;  %v601_v52 = vpop.f32.mrf.mxu1 }
  0xf5   :  { %1399 = vst [vmem:[%s1884_s3 + $0x48] sm:$0xff] %v1279_v45   ;;  %1415 = vst [vmem:[%s1884_s3 + $0xc8] sm:$0xff] %v1359_v46   ;;  %v1274_v53 = vpack.c.bf16 %v665_v47, %v664_v41  ;;  %v1354_v54 = vpack.c.bf16 %v697_v48, %v696_v42  ;;  %v474_v55 = vadd.f32 %v1719_v34, %v473_v51 }
  0xf6   :  { %v602_v56 = vadd.f32 %v1719_v34, %v601_v52  ;;  %v1483_v57 = vpop.f32.mrf.mxu0  ;;  %v1515_v58 = vpop.f32.mrf.mxu1  ;;  %v670_v61 = vmax.f32 %v482_v49, 0.0  ;;  %v702_v62 = vmax.f32 %v610_v50, 0.0 }
  0xf7   :  { %1398 = vst [vmem:[%s1884_s3 + $0x40] sm:$0xff] %v1274_v53   ;;  %1414 = vst [vmem:[%s1884_s3 + $0xc0] sm:$0xff] %v1354_v54   ;;  %v485_v59 = vadd.f32 %v1483_v57, %v1719_v34  ;;  %v613_v60 = vadd.f32 %v1515_v58, %v1719_v34  ;;  %v668_v5 = vmax.f32 %v474_v55, 0.0 }
  0xf8   :  { %v476_v63 = vpop.f32.mrf.mxu0  ;;  %v604_v0 = vpop.f32.mrf.mxu1  ;;  %v700_v6 = vmax.f32 %v602_v56, 0.0 }
  0xf9   :  { %v671_v1 = vmax.f32 %v485_v59, 0.0  ;;  %v703_v2 = vmax.f32 %v613_v60, 0.0  ;;  %v477_v3 = vadd.f32 %v1719_v34, %v476_v63  ;;  %v605_v4 = vadd.f32 %v1719_v34, %v604_v0 }
  0xfa   :  { %v1486_v7 = vpop.f32.mrf.mxu0  ;;  %v1518_v8 = vpop.f32.mrf.mxu1 }
  0xfb   :  { %v1289_v9 = vpack.c.bf16 %v671_v1, %v670_v61  ;;  %v1369_v10 = vpack.c.bf16 %v703_v2, %v702_v62  ;;  %v669_v11 = vmax.f32 %v477_v3, 0.0  ;;  %v701_v12 = vmax.f32 %v605_v4, 0.0 }
  0xfc   :  { %v498_v13 = vadd.f32 %v1486_v7, %v1719_v34  ;;  %v626_v14 = vadd.f32 %v1518_v8, %v1719_v34  ;;  %v489_v15 = vpop.f32.mrf.mxu0  ;;  %v617_v16 = vpop.f32.mrf.mxu1 }
  0xfd   :  { %1401 = vst [vmem:[%s1884_s3 + $0x58] sm:$0xff] %v1289_v9   ;;  %1417 = vst [vmem:[%s1884_s3 + $0xd8] sm:$0xff] %v1369_v10   ;;  %v1284_v17 = vpack.c.bf16 %v669_v11, %v668_v5  ;;  %v1364_v18 = vpack.c.bf16 %v701_v12, %v700_v6  ;;  %v490_v19 = vadd.f32 %v1719_v34, %v489_v15 }
  0xfe   :  { %v618_v20 = vadd.f32 %v1719_v34, %v617_v16  ;;  %v1487_v21 = vpop.f32.mrf.mxu0  ;;  %v1519_v22 = vpop.f32.mrf.mxu1  ;;  %v674_v25 = vmax.f32 %v498_v13, 0.0  ;;  %v706_v26 = vmax.f32 %v626_v14, 0.0 }
  0xff   :  { %1400 = vst [vmem:[%s1884_s3 + $0x50] sm:$0xff] %v1284_v17   ;;  %1416 = vst [vmem:[%s1884_s3 + $0xd0] sm:$0xff] %v1364_v18   ;;  %v501_v23 = vadd.f32 %v1487_v21, %v1719_v34  ;;  %v629_v24 = vadd.f32 %v1519_v22, %v1719_v34  ;;  %v672_v33 = vmax.f32 %v490_v19, 0.0 }
 0x100   :  { %v492_v27 = vpop.f32.mrf.mxu0  ;;  %v620_v28 = vpop.f32.mrf.mxu1  ;;  %v704_v35 = vmax.f32 %v618_v20, 0.0 }
 0x101   :  { %v675_v29 = vmax.f32 %v501_v23, 0.0  ;;  %v707_v30 = vmax.f32 %v629_v24, 0.0  ;;  %v493_v31 = vadd.f32 %v1719_v34, %v492_v27  ;;  %v621_v32 = vadd.f32 %v1719_v34, %v620_v28 }
 0x102   :  { %v1490_v36 = vpop.f32.mrf.mxu0  ;;  %v1522_v37 = vpop.f32.mrf.mxu1 }
 0x103   :  { %v1299_v38 = vpack.c.bf16 %v675_v29, %v674_v25  ;;  %v1379_v39 = vpack.c.bf16 %v707_v30, %v706_v26  ;;  %v673_v40 = vmax.f32 %v493_v31, 0.0  ;;  %v705_v41 = vmax.f32 %v621_v32, 0.0 }
 0x104   :  { %v514_v42 = vadd.f32 %v1490_v36, %v1719_v34  ;;  %v642_v43 = vadd.f32 %v1522_v37, %v1719_v34  ;;  %v505_v44 = vpop.f32.mrf.mxu0  ;;  %v633_v45 = vpop.f32.mrf.mxu1 }
 0x105   :  { %1403 = vst [vmem:[%s1884_s3 + $0x68] sm:$0xff] %v1299_v38   ;;  %1419 = vst [vmem:[%s1884_s3 + $0xe8] sm:$0xff] %v1379_v39   ;;  %v1294_v46 = vpack.c.bf16 %v673_v40, %v672_v33  ;;  %v1374_v47 = vpack.c.bf16 %v705_v41, %v704_v35  ;;  %v506_v48 = vadd.f32 %v1719_v34, %v505_v44 }
 0x106   :  { %v634_v49 = vadd.f32 %v1719_v34, %v633_v45  ;;  %v1491_v50 = vpop.f32.mrf.mxu0  ;;  %v1523_v51 = vpop.f32.mrf.mxu1  ;;  %v678_v54 = vmax.f32 %v514_v42, 0.0  ;;  %v710_v55 = vmax.f32 %v642_v43, 0.0 }
 0x107   :  { %1402 = vst [vmem:[%s1884_s3 + $0x60] sm:$0xff] %v1294_v46   ;;  %1418 = vst [vmem:[%s1884_s3 + $0xe0] sm:$0xff] %v1374_v47   ;;  %v517_v52 = vadd.f32 %v1491_v50, %v1719_v34  ;;  %v645_v53 = vadd.f32 %v1523_v51, %v1719_v34  ;;  %v676_v62 = vmax.f32 %v506_v48, 0.0 }
 0x108   :  { %v508_v56 = vpop.f32.mrf.mxu0  ;;  %v636_v57 = vpop.f32.mrf.mxu1  ;;  %v708_v63 = vmax.f32 %v634_v49, 0.0 }
 0x109   :  { %v679_v58 = vmax.f32 %v517_v52, 0.0  ;;  %v711_v59 = vmax.f32 %v645_v53, 0.0  ;;  %v509_v60 = vadd.f32 %v1719_v34, %v508_v56  ;;  %v637_v61 = vadd.f32 %v1719_v34, %v636_v57 }
 0x10b   :  { %v1309_v0 = vpack.c.bf16 %v679_v58, %v678_v54  ;;  %v1389_v1 = vpack.c.bf16 %v711_v59, %v710_v55  ;;  %v677_v2 = vmax.f32 %v509_v60, 0.0  ;;  %v709_v3 = vmax.f32 %v637_v61, 0.0 }
 0x10d   :  { %1405 = vst [vmem:[%s1884_s3 + $0x78] sm:$0xff] %v1309_v0   ;;  %1421 = vst [vmem:[%s1884_s3 + $0xf8] sm:$0xff] %v1389_v1   ;;  %v1304_v4 = vpack.c.bf16 %v677_v2, %v676_v62  ;;  %v1384_v5 = vpack.c.bf16 %v709_v3, %v708_v63 }
 0x10f   :  { %1404 = vst [vmem:[%s1884_s3 + $0x70] sm:$0xff] %v1304_v4   ;;  %1420 = vst [vmem:[%s1884_s3 + $0xf0] sm:$0xff] %v1384_v5  }

// kernel: _lambda_.46
= control target key start
LH: loop header
LB: loop body
LE: loop exit
PB: predicated region body
PF: predicated region fallthrough
CT: control target
= control target key end

     0   :  { %vm86_vm0 = vcmask 130048   ;;  %s509_s1 = inlined_call_operand.vmem [shape: bf16[16,128], index: 1, kind: input, shape index: {}]   ;;  %s510_s0 = inlined_call_operand.vmem [shape: bf16[128,16], index: 0, kind: input, shape index: {}]   ;;  %s511_s2 = inlined_call_operand.vmem [shape: f32[1,128], index: 2, kind: input, shape index: {}]   ;;  %s512_s3 = inlined_call_operand.vmem [shape: bf16[128,128], index: 3, kind: output, shape index: {}]  }
   0x1   :  { %v418_v0 = vld [vmem:[%s509_s1] sm:$0xff]   ;;  %v421_v3 = vld [vmem:[%s510_s0 + $0x8] sm:$0xff]   ;;  %v423_v5 = vld [vmem:[%s510_s0 + $0x10] sm:$0xff]  }
   0x2   :  { %v419_v1 = vld [vmem:[%s510_s0] sm:$0xff]   ;;  %398 = vmatprep.subr.bf16.mxu0 %v418_v0  ;;  %416 = vmatprep.subr.bf16.mxu1 %v418_v0  ;;  %v422_v4 = vld [vmem:[%s510_s0 + $0x28] sm:$0xff]   ;;  %v424_v6 = vld [vmem:[%s510_s0 + $0x30] sm:$0xff]  }
   0x3   :  { %v420_v2 = vld [vmem:[%s510_s0 + $0x20] sm:$0xff]   ;;  %399 = vmatpush3.bf16.msra.mxu0 %v418_v0  ;;  %417 = vmatpush3.bf16.msra.mxu1 %v418_v0  ;;  %v425_v7 = vld [vmem:[%s510_s0 + $0x18] sm:$0xff]  }
   0x4   :  { %400 = vmatprep.mubr.msk.bf16.mxu0 %vm86_vm0, %v419_v1  ;;  %408 = vmatprep.mubr.msk.bf16.mxu1 %vm86_vm0, %v420_v2  ;;  %v426_v8 = vld [vmem:[%s510_s0 + $0x38] sm:$0xff]   ;;  %v292_v11 = vld [vmem:[%s511_s2] ss:$0 sm:$0xff] }
   0x6   :  { %401 = vmatmul.mubr.msk.bf16.vlgmr.msra.gmra.mxu0 %vm86_vm0, %v421_v3  ;;  %409 = vmatmul.mubr.msk.bf16.vlgmr.msra.gmra.mxu1 %vm86_vm0, %v422_v4 }
   0x7   :  { %404 = vmatprep.mubr.msk.bf16.mxu0 %vm86_vm0, %v423_v5  ;;  %412 = vmatprep.mubr.msk.bf16.mxu1 %vm86_vm0, %v424_v6 }
   0xe   :  { %405 = vmatmul.mubr.msk.bf16.gmra.mxu0 %vm86_vm0, %v425_v7  ;;  %413 = vmatmul.mubr.msk.bf16.gmra.mxu1 %vm86_vm0, %v426_v8 }
  0xc6   :  { %v402_v9 = vpop.f32.mrf.mxu0  ;;  %v410_v10 = vpop.f32.mrf.mxu1 }
  0xc7   :  { %v154_v16 = vadd.f32 %v402_v9, %v292_v11  ;;  %v186_v17 = vadd.f32 %v410_v10, %v292_v11 }
  0xc8   :  { %v145_v12 = vpop.f32.mrf.mxu0  ;;  %v177_v13 = vpop.f32.mrf.mxu1 }
  0xc9   :  { %v146_v20 = vadd.f32 %v292_v11, %v145_v12  ;;  %v178_v21 = vadd.f32 %v292_v11, %v177_v13 }
  0xca   :  { %v403_v14 = vpop.f32.mrf.mxu0  ;;  %v411_v15 = vpop.f32.mrf.mxu1 }
  0xcb   :  { %v157_v18 = vadd.f32 %v403_v14, %v292_v11  ;;  %v189_v19 = vadd.f32 %v411_v15, %v292_v11 }
  0xcc   :  { %v148_v22 = vpop.f32.mrf.mxu0  ;;  %v180_v23 = vpop.f32.mrf.mxu1 }
  0xcd   :  { %v350_v24 = vpack.c.bf16 %v157_v18, %v154_v16  ;;  %v370_v25 = vpack.c.bf16 %v189_v19, %v186_v17  ;;  %v149_v26 = vadd.f32 %v292_v11, %v148_v22  ;;  %v181_v27 = vadd.f32 %v292_v11, %v180_v23 }
  0xce   :  { %v406_v28 = vpop.f32.mrf.mxu0  ;;  %v414_v29 = vpop.f32.mrf.mxu1 }
  0xcf   :  { %382 = vst [vmem:[%s512_s3 + $0x8] sm:$0xff] %v350_v24   ;;  %386 = vst [vmem:[%s512_s3 + $0x28] sm:$0xff] %v370_v25   ;;  %v345_v30 = vpack.c.bf16 %v149_v26, %v146_v20  ;;  %v365_v31 = vpack.c.bf16 %v181_v27, %v178_v21  ;;  %v170_v36 = vadd.f32 %v406_v28, %v292_v11 }
  0xd0   :  { %v161_v32 = vpop.f32.mrf.mxu0  ;;  %v193_v33 = vpop.f32.mrf.mxu1  ;;  %v202_v37 = vadd.f32 %v414_v29, %v292_v11 }
  0xd1   :  { %346 = vst [vmem:[%s512_s3] sm:$0xff] %v345_v30   ;;  %385 = vst [vmem:[%s512_s3 + $0x20] sm:$0xff] %v365_v31   ;;  %v162_v40 = vadd.f32 %v292_v11, %v161_v32  ;;  %v194_v41 = vadd.f32 %v292_v11, %v193_v33 }
  0xd2   :  { %v407_v34 = vpop.f32.mrf.mxu0  ;;  %v415_v35 = vpop.f32.mrf.mxu1 }
  0xd3   :  { %v173_v38 = vadd.f32 %v407_v34, %v292_v11  ;;  %v205_v39 = vadd.f32 %v415_v35, %v292_v11 }
  0xd4   :  { %v164_v42 = vpop.f32.mrf.mxu0  ;;  %v196_v43 = vpop.f32.mrf.mxu1 }
  0xd5   :  { %v360_v44 = vpack.c.bf16 %v173_v38, %v170_v36  ;;  %v380_v45 = vpack.c.bf16 %v205_v39, %v202_v37  ;;  %v165_v46 = vadd.f32 %v292_v11, %v164_v42  ;;  %v197_v47 = vadd.f32 %v292_v11, %v196_v43 }
  0xd7   :  { %384 = vst [vmem:[%s512_s3 + $0x18] sm:$0xff] %v360_v44   ;;  %388 = vst [vmem:[%s512_s3 + $0x38] sm:$0xff] %v380_v45   ;;  %v355_v48 = vpack.c.bf16 %v165_v46, %v162_v40  ;;  %v375_v49 = vpack.c.bf16 %v197_v47, %v194_v41 }
  0xd9   :  { %383 = vst [vmem:[%s512_s3 + $0x10] sm:$0xff] %v355_v48   ;;  %387 = vst [vmem:[%s512_s3 + $0x30] sm:$0xff] %v375_v49  }

// kernel: _lambda_.47
= control target key start
LH: loop header
LB: loop body
LE: loop exit
PB: predicated region body
PF: predicated region fallthrough
CT: control target
= control target key end

     0   :  { %v569_v0 = vmov 0   ;;  %vm182_vm0 = vcmask 130048   ;;  %s718_s1 = inlined_call_operand.vmem [shape: bf16[144,128], index: 1, kind: input, shape index: {}]   ;;  %s719_s0 = inlined_call_operand.vmem [shape: bf16[128,144], index: 0, kind: input, shape index: {}]   ;;  %s720_s2 = inlined_call_operand.vmem [shape: f32[1,128], index: 2, kind: input, shape index: {}]   ;;  %s721_s3 = inlined_call_operand.vmem [shape: bf16[128,128], index: 3, kind: output, shape index: {}]  }
   0x1   :  { %207 = vmatprep.subr.bf16.mxu0 %v569_v0  ;;  %517 = vmatprep.subr.bf16.mxu1 %v569_v0  ;;  %v536_v1 = vld [vmem:[%s718_s1 + $0x38] sm:$0xff]   ;;  %v537_v2 = vld [vmem:[%s718_s1 + $0x30] sm:$0xff]   ;;  %v538_v3 = vld [vmem:[%s718_s1 + $0x28] sm:$0xff]  }
   0x2   :  { %208 = vmatpush1.bf16.msra.mxu0 %v536_v1  ;;  %526 = vmatpush1.bf16.msra.mxu1 %v536_v1  ;;  %v539_v4 = vld [vmem:[%s718_s1 + $0x20] sm:$0xff]   ;;  %v540_v7 = vld [vmem:[%s718_s1 + $0x18] sm:$0xff]   ;;  %v541_v8 = vld [vmem:[%s718_s1 + $0x10] sm:$0xff]  }
   0x3   :  { %209 = vmatprep.subr.bf16.mxu0 %v569_v0  ;;  %518 = vmatprep.subr.bf16.mxu1 %v569_v0  ;;  %v547_v5 = vld [vmem:[%s719_s0 + $0x4] ss:$8 sps:$4 sm:$0xff]   ;;  %v545_v12 = vld [vmem:[%s719_s0] ss:$8 sps:$4 sm:$0xff]   ;;  %v551_v14 = vld [vmem:[%s719_s0 + $0x14] ss:$8 sps:$4 sm:$0xff]  }
   0x4   :  { %v550_v6 = vld [vmem:[%s719_s0 + $0x44] ss:$8 sps:$4 sm:$0xff]   ;;  %430 = vmatprep.mubr.msk.bf16.mxu0 %vm182_vm0, %v547_v5  ;;  %v548_v13 = vld [vmem:[%s719_s0 + $0x40] ss:$8 sps:$4 sm:$0xff]   ;;  %v553_v15 = vld [vmem:[%s719_s0 + $0x54] ss:$8 sps:$4 sm:$0xff]  }
   0x5   :  { %434 = vmatprep.mubr.msk.bf16.mxu1 %vm182_vm0, %v550_v6  ;;  %v542_v9 = vld [vmem:[%s718_s1 + $0x8] sm:$0xff]   ;;  %v543_v10 = vld [vmem:[%s718_s1] sm:$0xff]   ;;  %v555_v16 = vld [vmem:[%s719_s0 + $0x10] ss:$8 sps:$4 sm:$0xff]  }
   0x6   :  { %210 = vmatpush1.bf16.msra.mxu0 %v537_v2  ;;  %527 = vmatpush1.bf16.msra.mxu1 %v537_v2  ;;  %v544_v11 = vld [vmem:[%s718_s1 + $0x40] sm:$0xff]   ;;  %v556_v17 = vld [vmem:[%s719_s0 + $0x50] ss:$8 sps:$4 sm:$0xff]   ;;  %v563_v22 = vld [vmem:[%s719_s0 + $0x34] ss:$8 sps:$4 sm:$0xff]  }
   0x7   :  { %211 = vmatprep.subr.bf16.mxu0 %v569_v0  ;;  %519 = vmatprep.subr.bf16.mxu1 %v569_v0  ;;  %v557_v18 = vld [vmem:[%s719_s0 + $0x24] ss:$8 sps:$4 sm:$0xff]   ;;  %v561_v20 = vld [vmem:[%s719_s0 + $0x20] ss:$8 sps:$4 sm:$0xff]   ;;  %v565_v23 = vld [vmem:[%s719_s0 + $0x74] ss:$8 sps:$4 sm:$0xff]  }
   0x8   :  { %v559_v19 = vld [vmem:[%s719_s0 + $0x64] ss:$8 sps:$4 sm:$0xff]   ;;  %v562_v21 = vld [vmem:[%s719_s0 + $0x60] ss:$8 sps:$4 sm:$0xff]   ;;  %v567_v24 = vld [vmem:[%s719_s0 + $0x30] ss:$8 sps:$4 sm:$0xff]  }
   0x9   :  { %v568_v25 = vld [vmem:[%s719_s0 + $0x70] ss:$8 sps:$4 sm:$0xff]   ;;  %v676_v26 = vld [vmem:[%s720_s2] ss:$0 sm:$0xff] }
   0xa   :  { %212 = vmatpush1.bf16.msra.mxu0 %v538_v3  ;;  %528 = vmatpush1.bf16.msra.mxu1 %v538_v3 }
   0xb   :  { %213 = vmatprep.subr.bf16.mxu0 %v569_v0  ;;  %520 = vmatprep.subr.bf16.mxu1 %v569_v0 }
   0xe   :  { %214 = vmatpush1.bf16.msra.mxu0 %v539_v4  ;;  %529 = vmatpush1.bf16.msra.mxu1 %v539_v4 }
   0xf   :  { %215 = vmatprep.subr.bf16.mxu0 %v569_v0  ;;  %521 = vmatprep.subr.bf16.mxu1 %v569_v0 }
  0x12   :  { %216 = vmatpush1.bf16.msra.mxu0 %v540_v7  ;;  %530 = vmatpush1.bf16.msra.mxu1 %v540_v7 }
  0x13   :  { %217 = vmatprep.subr.bf16.mxu0 %v569_v0  ;;  %522 = vmatprep.subr.bf16.mxu1 %v569_v0 }
  0x16   :  { %218 = vmatpush1.bf16.msra.mxu0 %v541_v8  ;;  %531 = vmatpush1.bf16.msra.mxu1 %v541_v8 }
  0x17   :  { %219 = vmatprep.subr.bf16.mxu0 %v569_v0  ;;  %523 = vmatprep.subr.bf16.mxu1 %v569_v0 }
  0x1a   :  { %220 = vmatpush1.bf16.msra.mxu0 %v542_v9  ;;  %532 = vmatpush1.bf16.msra.mxu1 %v542_v9 }
  0x1b   :  { %221 = vmatprep.subr.bf16.mxu0 %v569_v0  ;;  %524 = vmatprep.subr.bf16.mxu1 %v569_v0 }
  0x1e   :  { %222 = vmatpush1.bf16.msra.mxu0 %v543_v10  ;;  %533 = vmatpush1.bf16.msra.mxu1 %v543_v10 }
  0x1f   :  { %237 = vmatprep.subr.bf16.mxu0 %v569_v0  ;;  %525 = vmatprep.subr.bf16.mxu1 %v569_v0 }
  0x22   :  { %238 = vmatpush2.bf16.msra.mxu0 %v544_v11  ;;  %534 = vmatpush2.bf16.msra.mxu1 %v544_v11 }
  0x25   :  { %240 = vmatmul.mubr.bf16.vlgmr.msra.gmra.mxu0 %v545_v12  ;;  %272 = vmatmul.mubr.bf16.vlgmr.msra.gmra.mxu1 %v548_v13 }
  0x26   :  { %431 = vmatprep.mubr.msk.bf16.mxu0 %vm182_vm0, %v551_v14  ;;  %435 = vmatprep.mubr.msk.bf16.mxu1 %vm182_vm0, %v553_v15 }
  0x2d   :  { %248 = vmatmul.mubr.bf16.gmra.mxu0 %v555_v16  ;;  %280 = vmatmul.mubr.bf16.gmra.mxu1 %v556_v17 }
  0x2e   :  { %432 = vmatprep.mubr.msk.bf16.mxu0 %vm182_vm0, %v557_v18  ;;  %436 = vmatprep.mubr.msk.bf16.mxu1 %vm182_vm0, %v559_v19 }
  0x35   :  { %256 = vmatmul.mubr.bf16.gmra.mxu0 %v561_v20  ;;  %288 = vmatmul.mubr.bf16.gmra.mxu1 %v562_v21 }
  0x36   :  { %433 = vmatprep.mubr.msk.bf16.mxu0 %vm182_vm0, %v563_v22  ;;  %437 = vmatprep.mubr.msk.bf16.mxu1 %vm182_vm0, %v565_v23 }
  0x3d   :  { %264 = vmatmul.mubr.bf16.gmra.mxu0 %v567_v24  ;;  %296 = vmatmul.mubr.bf16.gmra.mxu1 %v568_v25 }
  0xe5   :  { %v241_v27 = vpop.f32.mrf.mxu0  ;;  %v273_v28 = vpop.f32.mrf.mxu1 }
  0xe6   :  { %v242_v31 = vadd.f32 %v676_v26, %v241_v27  ;;  %v274_v32 = vadd.f32 %v676_v26, %v273_v28 }
  0xe7   :  { %v243_v29 = vpop.f32.mrf.mxu0  ;;  %v275_v30 = vpop.f32.mrf.mxu1 }
  0xe8   :  { %v304_v39 = vmax.f32 %v242_v31, 0.0  ;;  %v312_v40 = vmax.f32 %v274_v32, 0.0 }
  0xe9   :  { %v244_v33 = vpop.f32.mrf.mxu0  ;;  %v276_v34 = vpop.f32.mrf.mxu1 }
  0xea   :  { %v245_v35 = vadd.f32 %v676_v26, %v244_v33  ;;  %v277_v36 = vadd.f32 %v676_v26, %v276_v34 }
  0xeb   :  { %v246_v37 = vpop.f32.mrf.mxu0  ;;  %v278_v38 = vpop.f32.mrf.mxu1 }
  0xec   :  { %v305_v41 = vmax.f32 %v245_v35, 0.0  ;;  %v313_v42 = vmax.f32 %v277_v36, 0.0 }
  0xed   :  { %v249_v43 = vpop.f32.mrf.mxu0  ;;  %v281_v44 = vpop.f32.mrf.mxu1 }
  0xee   :  { %v473_v45 = vpack.c.bf16 %v305_v41, %v304_v39  ;;  %v493_v46 = vpack.c.bf16 %v313_v42, %v312_v40  ;;  %v250_v49 = vadd.f32 %v676_v26, %v249_v43  ;;  %v282_v50 = vadd.f32 %v676_v26, %v281_v44 }
  0xef   :  { %v251_v47 = vpop.f32.mrf.mxu0  ;;  %v283_v48 = vpop.f32.mrf.mxu1 }
  0xf0   :  { %474 = vst [vmem:[%s721_s3] sm:$0xff] %v473_v45   ;;  %513 = vst [vmem:[%s721_s3 + $0x20] sm:$0xff] %v493_v46   ;;  %v306_v57 = vmax.f32 %v250_v49, 0.0  ;;  %v314_v58 = vmax.f32 %v282_v50, 0.0 }
  0xf1   :  { %v252_v51 = vpop.f32.mrf.mxu0  ;;  %v284_v52 = vpop.f32.mrf.mxu1 }
  0xf2   :  { %v253_v53 = vadd.f32 %v676_v26, %v252_v51  ;;  %v285_v54 = vadd.f32 %v676_v26, %v284_v52 }
  0xf3   :  { %v254_v55 = vpop.f32.mrf.mxu0  ;;  %v286_v56 = vpop.f32.mrf.mxu1 }
  0xf4   :  { %v307_v59 = vmax.f32 %v253_v53, 0.0  ;;  %v315_v60 = vmax.f32 %v285_v54, 0.0 }
  0xf5   :  { %v257_v61 = vpop.f32.mrf.mxu0  ;;  %v289_v62 = vpop.f32.mrf.mxu1 }
  0xf6   :  { %v478_v63 = vpack.c.bf16 %v307_v59, %v306_v57  ;;  %v498_v0 = vpack.c.bf16 %v315_v60, %v314_v58  ;;  %v258_v3 = vadd.f32 %v676_v26, %v257_v61  ;;  %v290_v4 = vadd.f32 %v676_v26, %v289_v62 }
  0xf7   :  { %v259_v1 = vpop.f32.mrf.mxu0  ;;  %v291_v2 = vpop.f32.mrf.mxu1 }
  0xf8   :  { %510 = vst [vmem:[%s721_s3 + $0x8] sm:$0xff] %v478_v63   ;;  %514 = vst [vmem:[%s721_s3 + $0x28] sm:$0xff] %v498_v0   ;;  %v308_v11 = vmax.f32 %v258_v3, 0.0  ;;  %v316_v12 = vmax.f32 %v290_v4, 0.0 }
  0xf9   :  { %v260_v5 = vpop.f32.mrf.mxu0  ;;  %v292_v6 = vpop.f32.mrf.mxu1 }
  0xfa   :  { %v261_v7 = vadd.f32 %v676_v26, %v260_v5  ;;  %v293_v8 = vadd.f32 %v676_v26, %v292_v6 }
  0xfb   :  { %v262_v9 = vpop.f32.mrf.mxu0  ;;  %v294_v10 = vpop.f32.mrf.mxu1 }
  0xfc   :  { %v309_v13 = vmax.f32 %v261_v7, 0.0  ;;  %v317_v14 = vmax.f32 %v293_v8, 0.0 }
  0xfd   :  { %v265_v15 = vpop.f32.mrf.mxu0  ;;  %v297_v16 = vpop.f32.mrf.mxu1 }
  0xfe   :  { %v483_v17 = vpack.c.bf16 %v309_v13, %v308_v11  ;;  %v503_v18 = vpack.c.bf16 %v317_v14, %v316_v12  ;;  %v266_v21 = vadd.f32 %v676_v26, %v265_v15  ;;  %v298_v22 = vadd.f32 %v676_v26, %v297_v16 }
  0xff   :  { %v267_v19 = vpop.f32.mrf.mxu0  ;;  %v299_v20 = vpop.f32.mrf.mxu1 }
 0x100   :  { %511 = vst [vmem:[%s721_s3 + $0x10] sm:$0xff] %v483_v17   ;;  %515 = vst [vmem:[%s721_s3 + $0x30] sm:$0xff] %v503_v18   ;;  %v310_v30 = vmax.f32 %v266_v21, 0.0  ;;  %v318_v31 = vmax.f32 %v298_v22, 0.0 }
 0x101   :  { %v268_v23 = vpop.f32.mrf.mxu0  ;;  %v300_v24 = vpop.f32.mrf.mxu1 }
 0x102   :  { %v269_v25 = vadd.f32 %v676_v26, %v268_v23  ;;  %v301_v27 = vadd.f32 %v676_v26, %v300_v24 }
 0x103   :  { %v270_v28 = vpop.f32.mrf.mxu0  ;;  %v302_v29 = vpop.f32.mrf.mxu1 }
 0x104   :  { %v311_v32 = vmax.f32 %v269_v25, 0.0  ;;  %v319_v33 = vmax.f32 %v301_v27, 0.0 }
 0x106   :  { %v488_v34 = vpack.c.bf16 %v311_v32, %v310_v30  ;;  %v508_v35 = vpack.c.bf16 %v319_v33, %v318_v31 }
 0x108   :  { %512 = vst [vmem:[%s721_s3 + $0x18] sm:$0xff] %v488_v34   ;;  %516 = vst [vmem:[%s721_s3 + $0x38] sm:$0xff] %v508_v35  }

// kernel: _lambda_.51
= control target key start
LH: loop header
LB: loop body
LE: loop exit
PB: predicated region body
PF: predicated region fallthrough
CT: control target
= control target key end

     0   :  { %vm110_vm0 = vcmask 523264   ;;  %s579_s1 = inlined_call_operand.vmem [shape: bf16[64,128], index: 1, kind: input, shape index: {}]   ;;  %s580_s0 = inlined_call_operand.vmem [shape: bf16[128,64], index: 0, kind: input, shape index: {}]   ;;  %s581_s2 = inlined_call_operand.vmem [shape: f32[1,128], index: 2, kind: input, shape index: {}]   ;;  %s582_s3 = inlined_call_operand.vmem [shape: bf16[128,128], index: 3, kind: output, shape index: {}]  }
   0x1   :  { %v476_v0 = vld [vmem:[%s579_s1 + $0x18] sm:$0xff]   ;;  %v477_v1 = vld [vmem:[%s579_s1 + $0x10] sm:$0xff]   ;;  %v478_v2 = vld [vmem:[%s579_s1 + $0x8] sm:$0xff]  }
   0x2   :  { %444 = vmatprep.subr.bf16.mxu0 %v476_v0  ;;  %468 = vmatprep.subr.bf16.mxu1 %v476_v0  ;;  %v480_v3 = vld [vmem:[%s580_s0] sm:$0xff]   ;;  %v482_v6 = vld [vmem:[%s580_s0 + $0x8] sm:$0xff]   ;;  %v484_v8 = vld [vmem:[%s580_s0 + $0x10] sm:$0xff]  }
   0x3   :  { %445 = vmatpush3.bf16.msra.mxu0 %v476_v0  ;;  %472 = vmatpush3.bf16.msra.mxu1 %v476_v0  ;;  %v481_v4 = vld [vmem:[%s580_s0 + $0x20] sm:$0xff]   ;;  %v483_v7 = vld [vmem:[%s580_s0 + $0x28] sm:$0xff]   ;;  %v485_v9 = vld [vmem:[%s580_s0 + $0x30] sm:$0xff]  }
   0x4   :  { %446 = vmatprep.subr.bf16.mxu0 %v477_v1  ;;  %469 = vmatprep.subr.bf16.mxu1 %v477_v1  ;;  %v479_v5 = vld [vmem:[%s579_s1] sm:$0xff]   ;;  %v486_v10 = vld [vmem:[%s580_s0 + $0x18] sm:$0xff]  }
   0x5   :  { %452 = vmatprep.mubr.msk.bf16.mxu0 %vm110_vm0, %v480_v3  ;;  %460 = vmatprep.mubr.msk.bf16.mxu1 %vm110_vm0, %v481_v4  ;;  %v487_v11 = vld [vmem:[%s580_s0 + $0x38] sm:$0xff]   ;;  %v332_v12 = vld [vmem:[%s581_s2] ss:$0 sm:$0xff] }
   0x7   :  { %447 = vmatpush3.bf16.msra.mxu0 %v477_v1  ;;  %473 = vmatpush3.bf16.msra.mxu1 %v477_v1 }
   0x8   :  { %448 = vmatprep.subr.bf16.mxu0 %v478_v2  ;;  %470 = vmatprep.subr.bf16.mxu1 %v478_v2 }
   0xb   :  { %449 = vmatpush3.bf16.msra.mxu0 %v478_v2  ;;  %474 = vmatpush3.bf16.msra.mxu1 %v478_v2 }
   0xc   :  { %450 = vmatprep.subr.bf16.mxu0 %v479_v5  ;;  %471 = vmatprep.subr.bf16.mxu1 %v479_v5 }
   0xf   :  { %451 = vmatpush3.bf16.msra.mxu0 %v479_v5  ;;  %475 = vmatpush3.bf16.msra.mxu1 %v479_v5 }
  0x12   :  { %453 = vmatmul.mubr.msk.bf16.vlgmr.msra.gmra.mxu0 %vm110_vm0, %v482_v6  ;;  %461 = vmatmul.mubr.msk.bf16.vlgmr.msra.gmra.mxu1 %vm110_vm0, %v483_v7 }
  0x13   :  { %456 = vmatprep.mubr.msk.bf16.mxu0 %vm110_vm0, %v484_v8  ;;  %464 = vmatprep.mubr.msk.bf16.mxu1 %vm110_vm0, %v485_v9 }
  0x1a   :  { %457 = vmatmul.mubr.msk.bf16.gmra.mxu0 %vm110_vm0, %v486_v10  ;;  %465 = vmatmul.mubr.msk.bf16.gmra.mxu1 %vm110_vm0, %v487_v11 }
  0xd2   :  { %v454_v13 = vpop.f32.mrf.mxu0  ;;  %v462_v14 = vpop.f32.mrf.mxu1 }
  0xd3   :  { %v178_v15 = vadd.f32 %v454_v13, %v332_v12  ;;  %v210_v16 = vadd.f32 %v462_v14, %v332_v12 }
  0xd4   :  { %v169_v17 = vpop.f32.mrf.mxu0  ;;  %v201_v18 = vpop.f32.mrf.mxu1 }
  0xd5   :  { %v170_v19 = vadd.f32 %v332_v12, %v169_v17  ;;  %v202_v20 = vadd.f32 %v332_v12, %v201_v18  ;;  %v234_v25 = vmax.f32 %v178_v15, 0.0  ;;  %v242_v26 = vmax.f32 %v210_v16, 0.0 }
  0xd6   :  { %v455_v21 = vpop.f32.mrf.mxu0  ;;  %v463_v22 = vpop.f32.mrf.mxu1 }
  0xd7   :  { %v181_v23 = vadd.f32 %v455_v21, %v332_v12  ;;  %v213_v24 = vadd.f32 %v463_v22, %v332_v12  ;;  %v232_v33 = vmax.f32 %v170_v19, 0.0  ;;  %v240_v34 = vmax.f32 %v202_v20, 0.0 }
  0xd8   :  { %v172_v27 = vpop.f32.mrf.mxu0  ;;  %v204_v28 = vpop.f32.mrf.mxu1 }
  0xd9   :  { %v235_v29 = vmax.f32 %v181_v23, 0.0  ;;  %v243_v30 = vmax.f32 %v213_v24, 0.0  ;;  %v173_v31 = vadd.f32 %v332_v12, %v172_v27  ;;  %v205_v32 = vadd.f32 %v332_v12, %v204_v28 }
  0xda   :  { %v458_v35 = vpop.f32.mrf.mxu0  ;;  %v466_v36 = vpop.f32.mrf.mxu1 }
  0xdb   :  { %v393_v37 = vpack.c.bf16 %v235_v29, %v234_v25  ;;  %v413_v38 = vpack.c.bf16 %v243_v30, %v242_v26  ;;  %v233_v39 = vmax.f32 %v173_v31, 0.0  ;;  %v241_v40 = vmax.f32 %v205_v32, 0.0 }
  0xdc   :  { %v194_v41 = vadd.f32 %v458_v35, %v332_v12  ;;  %v226_v42 = vadd.f32 %v466_v36, %v332_v12  ;;  %v185_v43 = vpop.f32.mrf.mxu0  ;;  %v217_v44 = vpop.f32.mrf.mxu1 }
  0xdd   :  { %425 = vst [vmem:[%s582_s3 + $0x8] sm:$0xff] %v393_v37   ;;  %429 = vst [vmem:[%s582_s3 + $0x28] sm:$0xff] %v413_v38   ;;  %v388_v45 = vpack.c.bf16 %v233_v39, %v232_v33  ;;  %v408_v46 = vpack.c.bf16 %v241_v40, %v240_v34  ;;  %v186_v47 = vadd.f32 %v332_v12, %v185_v43 }
  0xde   :  { %v218_v48 = vadd.f32 %v332_v12, %v217_v44  ;;  %v459_v49 = vpop.f32.mrf.mxu0  ;;  %v467_v50 = vpop.f32.mrf.mxu1  ;;  %v238_v53 = vmax.f32 %v194_v41, 0.0  ;;  %v246_v54 = vmax.f32 %v226_v42, 0.0 }
  0xdf   :  { %389 = vst [vmem:[%s582_s3] sm:$0xff] %v388_v45   ;;  %428 = vst [vmem:[%s582_s3 + $0x20] sm:$0xff] %v408_v46   ;;  %v197_v51 = vadd.f32 %v459_v49, %v332_v12  ;;  %v229_v52 = vadd.f32 %v467_v50, %v332_v12  ;;  %v236_v61 = vmax.f32 %v186_v47, 0.0 }
  0xe0   :  { %v188_v55 = vpop.f32.mrf.mxu0  ;;  %v220_v56 = vpop.f32.mrf.mxu1  ;;  %v244_v62 = vmax.f32 %v218_v48, 0.0 }
  0xe1   :  { %v239_v57 = vmax.f32 %v197_v51, 0.0  ;;  %v247_v58 = vmax.f32 %v229_v52, 0.0  ;;  %v189_v59 = vadd.f32 %v332_v12, %v188_v55  ;;  %v221_v60 = vadd.f32 %v332_v12, %v220_v56 }
  0xe3   :  { %v403_v63 = vpack.c.bf16 %v239_v57, %v238_v53  ;;  %v423_v0 = vpack.c.bf16 %v247_v58, %v246_v54  ;;  %v237_v1 = vmax.f32 %v189_v59, 0.0  ;;  %v245_v2 = vmax.f32 %v221_v60, 0.0 }
  0xe5   :  { %427 = vst [vmem:[%s582_s3 + $0x18] sm:$0xff] %v403_v63   ;;  %431 = vst [vmem:[%s582_s3 + $0x38] sm:$0xff] %v423_v0   ;;  %v398_v3 = vpack.c.bf16 %v237_v1, %v236_v61  ;;  %v418_v4 = vpack.c.bf16 %v245_v2, %v244_v62 }
  0xe7   :  { %426 = vst [vmem:[%s582_s3 + $0x10] sm:$0xff] %v398_v3   ;;  %430 = vst [vmem:[%s582_s3 + $0x30] sm:$0xff] %v418_v4  }

// kernel: _lambda_.49
= control target key start
LH: loop header
LB: loop body
LE: loop exit
PB: predicated region body
PF: predicated region fallthrough
CT: control target
= control target key end

     0   :  { %vm318_vm0 = vcmask 261120   ;;  %s1150_s1 = inlined_call_operand.vmem [shape: bf16[288,128], index: 1, kind: input, shape index: {}]   ;;  %s1151_s0 = inlined_call_operand.vmem [shape: bf16[128,288], index: 0, kind: input, shape index: {}]   ;;  %s1152_s2 = inlined_call_operand.vmem [shape: f32[1,128], index: 2, kind: input, shape index: {}]   ;;  %s1153_s3 = inlined_call_operand.vmem [shape: bf16[128,128], index: 3, kind: output, shape index: {}]  }
   0x1   :  { %v877_v0 = vld [vmem:[%s1150_s1 + $0x78] sm:$0xff]   ;;  %v879_v2 = vld [vmem:[%s1150_s1 + $0x70] sm:$0xff]   ;;  %v881_v4 = vld [vmem:[%s1150_s1 + $0x68] sm:$0xff]  }
   0x2   :  { %v878_v1 = vld [vmem:[%s1150_s1 + $0x38] sm:$0xff]   ;;  %767 = vmatprep.subr.bf16.mxu0 %v877_v0  ;;  %861 = vmatprep.subr.bf16.mxu1 %v877_v0  ;;  %v880_v3 = vld [vmem:[%s1150_s1 + $0x30] sm:$0xff]   ;;  %v882_v5 = vld [vmem:[%s1150_s1 + $0x28] sm:$0xff]  }
   0x3   :  { %768 = vmatpush3.bf16.msra.mxu0 %v878_v1  ;;  %869 = vmatpush3.bf16.msra.mxu1 %v878_v1  ;;  %v883_v6 = vld [vmem:[%s1150_s1 + $0x60] sm:$0xff]   ;;  %v885_v8 = vld [vmem:[%s1150_s1 + $0x58] sm:$0xff]   ;;  %v887_v10 = vld [vmem:[%s1150_s1 + $0x50] sm:$0xff]  }
   0x4   :  { %769 = vmatprep.subr.bf16.mxu0 %v879_v2  ;;  %862 = vmatprep.subr.bf16.mxu1 %v879_v2  ;;  %v884_v7 = vld [vmem:[%s1150_s1 + $0x20] sm:$0xff]   ;;  %v886_v9 = vld [vmem:[%s1150_s1 + $0x18] sm:$0xff]   ;;  %v888_v13 = vld [vmem:[%s1150_s1 + $0x10] sm:$0xff]  }
   0x5   :  { %v895_v11 = vld [vmem:[%s1151_s0 + $0x4] ss:$12 sps:$4 sm:$0xff]   ;;  %v898_v12 = vld [vmem:[%s1151_s0 + $0x94] ss:$12 sps:$4 sm:$0xff]   ;;  %v889_v14 = vld [vmem:[%s1150_s1 + $0x48] sm:$0xff]  }
   0x6   :  { %375 = vmatprep.mubr.bf16.mxu0 %v895_v11  ;;  %423 = vmatprep.mubr.bf16.mxu1 %v898_v12  ;;  %v890_v15 = vld [vmem:[%s1150_s1 + $0x8] sm:$0xff]   ;;  %v891_v16 = vld [vmem:[%s1150_s1 + $0x40] sm:$0xff]   ;;  %v896_v20 = vld [vmem:[%s1151_s0 + $0x90] ss:$12 sps:$4 sm:$0xff]  }
   0x7   :  { %770 = vmatpush3.bf16.msra.mxu0 %v880_v3  ;;  %870 = vmatpush3.bf16.msra.mxu1 %v880_v3  ;;  %v892_v17 = vld [vmem:[%s1150_s1] sm:$0xff]   ;;  %v899_v19 = vld [vmem:[%s1150_s1 + $0x88] sm:$0xff]   ;;  %v910_v28 = vld [vmem:[%s1151_s0 + $0x30] ss:$12 sps:$4 sm:$0xff]  }
   0x8   :  { %771 = vmatprep.subr.bf16.mxu0 %v881_v4  ;;  %863 = vmatprep.subr.bf16.mxu1 %v881_v4  ;;  %v893_v18 = vld [vmem:[%s1151_s0] ss:$12 sps:$4 sm:$0xff]   ;;  %v900_v21 = vld [vmem:[%s1151_s0 + $0x1c] ss:$12 sps:$4 sm:$0xff]   ;;  %v904_v24 = vld [vmem:[%s1151_s0 + $0x18] ss:$12 sps:$4 sm:$0xff]  }
   0x9   :  { %v902_v22 = vld [vmem:[%s1151_s0 + $0xac] ss:$12 sps:$4 sm:$0xff]   ;;  %v906_v23 = vld [vmem:[%s1150_s1 + $0x80] sm:$0xff]   ;;  %v905_v25 = vld [vmem:[%s1151_s0 + $0xa8] ss:$12 sps:$4 sm:$0xff]  }
   0xa   :  { %v907_v26 = vld [vmem:[%s1151_s0 + $0x34] ss:$12 sps:$4 sm:$0xff]   ;;  %v912_v30 = vld [vmem:[%s1151_s0 + $0x4c] ss:$12 sps:$4 sm:$0xff]   ;;  %v916_v33 = vld [vmem:[%s1151_s0 + $0x50] ss:$12 sps:$4 sm:$0xff]  }
   0xb   :  { %772 = vmatpush3.bf16.msra.mxu0 %v882_v5  ;;  %871 = vmatpush3.bf16.msra.mxu1 %v882_v5  ;;  %v909_v27 = vld [vmem:[%s1151_s0 + $0x8] ss:$12 sps:$4 sm:$0xff]   ;;  %v911_v29 = vld [vmem:[%s1151_s0 + $0x20] ss:$12 sps:$4 sm:$0xff]   ;;  %v914_v31 = vld [vmem:[%s1151_s0 + $0x38] ss:$12 sps:$4 sm:$0xff]  }
   0xc   :  { %773 = vmatprep.subr.bf16.mxu0 %v883_v6  ;;  %864 = vmatprep.subr.bf16.mxu1 %v883_v6  ;;  %v915_v32 = vld [vmem:[%s1151_s0 + $0x48] ss:$12 sps:$4 sm:$0xff]   ;;  %v917_v34 = vld [vmem:[%s1151_s0 + $0x64] ss:$12 sps:$4 sm:$0xff]   ;;  %v920_v36 = vld [vmem:[%s1151_s0 + $0x60] ss:$12 sps:$4 sm:$0xff]  }
   0xd   :  { %v919_v35 = vld [vmem:[%s1151_s0 + $0x68] ss:$12 sps:$4 sm:$0xff]   ;;  %v921_v37 = vld [vmem:[%s1151_s0 + $0x80] ss:$12 sps:$4 sm:$0xff]   ;;  %v924_v39 = vld [vmem:[%s1151_s0 + $0x98] ss:$12 sps:$4 sm:$0xff]  }
   0xe   :  { %v922_v38 = vld [vmem:[%s1151_s0 + $0x7c] ss:$12 sps:$4 sm:$0xff]   ;;  %v925_v40 = vld [vmem:[%s1151_s0 + $0x78] ss:$12 sps:$4 sm:$0xff]   ;;  %v1100_v62 = vld [vmem:[%s1152_s2] ss:$0 sm:$0xff] }
   0xf   :  { %774 = vmatpush3.bf16.msra.mxu0 %v884_v7  ;;  %872 = vmatpush3.bf16.msra.mxu1 %v884_v7  ;;  %v926_v41 = vld [vmem:[%s1151_s0 + $0xb0] ss:$12 sps:$4 sm:$0xff]  }
  0x10   :  { %775 = vmatprep.subr.bf16.mxu0 %v885_v8  ;;  %865 = vmatprep.subr.bf16.mxu1 %v885_v8 }
  0x13   :  { %776 = vmatpush3.bf16.msra.mxu0 %v886_v9  ;;  %873 = vmatpush3.bf16.msra.mxu1 %v886_v9 }
  0x14   :  { %777 = vmatprep.subr.bf16.mxu0 %v887_v10  ;;  %866 = vmatprep.subr.bf16.mxu1 %v887_v10 }
  0x17   :  { %778 = vmatpush3.bf16.msra.mxu0 %v888_v13  ;;  %874 = vmatpush3.bf16.msra.mxu1 %v888_v13 }
  0x18   :  { %779 = vmatprep.subr.bf16.mxu0 %v889_v14  ;;  %867 = vmatprep.subr.bf16.mxu1 %v889_v14 }
  0x1b   :  { %780 = vmatpush3.bf16.msra.mxu0 %v890_v15  ;;  %875 = vmatpush3.bf16.msra.mxu1 %v890_v15 }
  0x1c   :  { %781 = vmatprep.subr.bf16.mxu0 %v891_v16  ;;  %868 = vmatprep.subr.bf16.mxu1 %v891_v16 }
  0x1f   :  { %782 = vmatpush3.bf16.msra.mxu0 %v892_v17  ;;  %876 = vmatpush3.bf16.msra.mxu1 %v892_v17 }
  0x20   :  { %841 = vmatprep.subr.bf16.mxu1 %v899_v19 }
  0x22   :  { %376 = vmatmul.mubr.bf16.vlgmr.msra.gmra.mxu0 %v893_v18  ;;  %424 = vmatmul.mubr.bf16.vlgmr.msra.gmra.mxu1 %v896_v20 }
  0x23   :  { %842 = vmatpush3.bf16.msra.mxu1 %v899_v19  ;;  %383 = vmatprep.mubr.bf16.mxu0 %v900_v21 }
  0x24   :  { %431 = vmatprep.mubr.bf16.mxu1 %v902_v22  ;;  %843 = vmatprep.subr.bf16.mxu1 %v906_v23 }
  0x27   :  { %844 = vmatpush3.bf16.msra.mxu1 %v906_v23 }
  0x2a   :  { %384 = vmatmul.mubr.bf16.gmra.mxu0 %v904_v24  ;;  %432 = vmatmul.mubr.bf16.gmra.mxu1 %v905_v25 }
  0x2b   :  { %391 = vmatprep.mubr.bf16.mxu0 %v907_v26  ;;  %845 = vmatprep.mubr.msk.bf16.mxu1 %vm318_vm0, %v909_v27 }
  0x32   :  { %392 = vmatmul.mubr.bf16.gmra.mxu0 %v910_v28  ;;  %846 = vmatmul.mubr.msk.bf16.vlgmr.msra.gmra.mxu1 %vm318_vm0, %v911_v29 }
  0x33   :  { %399 = vmatprep.mubr.bf16.mxu0 %v912_v30  ;;  %849 = vmatprep.mubr.msk.bf16.mxu1 %vm318_vm0, %v914_v31 }
  0x3a   :  { %400 = vmatmul.mubr.bf16.gmra.mxu0 %v915_v32  ;;  %850 = vmatmul.mubr.msk.bf16.gmra.mxu1 %vm318_vm0, %v916_v33 }
  0x3b   :  { %407 = vmatprep.mubr.bf16.mxu0 %v917_v34  ;;  %853 = vmatprep.mubr.msk.bf16.mxu1 %vm318_vm0, %v919_v35 }
  0x42   :  { %408 = vmatmul.mubr.bf16.gmra.mxu0 %v920_v36  ;;  %854 = vmatmul.mubr.msk.bf16.gmra.mxu1 %vm318_vm0, %v921_v37 }
  0x43   :  { %415 = vmatprep.mubr.bf16.mxu0 %v922_v38  ;;  %857 = vmatprep.mubr.msk.bf16.mxu1 %vm318_vm0, %v924_v39 }
  0x4a   :  { %416 = vmatmul.mubr.bf16.gmra.mxu0 %v925_v40  ;;  %858 = vmatmul.mubr.msk.bf16.gmra.mxu1 %vm318_vm0, %v926_v41 }
  0xe2   :  { %v783_v42 = vpop.f32.mrf.mxu0  ;;  %v1081_v43 = vpop.f32.mrf.mxu1 }
  0xe4   :  { %v784_v44 = vpop.f32.mrf.mxu0  ;;  %v1083_v45 = vpop.f32.mrf.mxu1 }
  0xe5   :  { %v785_v59 = vadd.f32 %v784_v44, %v783_v42 }
  0xe6   :  { %v786_v46 = vpop.f32.mrf.mxu0  ;;  %v1085_v47 = vpop.f32.mrf.mxu1 }
  0xe7   :  { %v378_v5 = vadd.f32 %v785_v59, %v1100_v62 }
  0xe8   :  { %v787_v48 = vpop.f32.mrf.mxu0  ;;  %v1087_v49 = vpop.f32.mrf.mxu1 }
  0xe9   :  { %v788_v0 = vadd.f32 %v787_v48, %v786_v46 }
  0xea   :  { %v789_v50 = vpop.f32.mrf.mxu0  ;;  %v1089_v51 = vpop.f32.mrf.mxu1 }
  0xeb   :  { %v381_v11 = vadd.f32 %v788_v0, %v1100_v62 }
  0xec   :  { %v790_v52 = vpop.f32.mrf.mxu0  ;;  %v1091_v53 = vpop.f32.mrf.mxu1 }
  0xed   :  { %v791_v56 = vadd.f32 %v790_v52, %v789_v50  ;;  %v827_v59 = vadd.f32 %v1091_v53, %v1089_v51 }
  0xee   :  { %v792_v54 = vpop.f32.mrf.mxu0  ;;  %v1093_v55 = vpop.f32.mrf.mxu1 }
  0xef   :  { %v386_v1 = vadd.f32 %v791_v56, %v1100_v62 }
  0xf0   :  { %v793_v57 = vpop.f32.mrf.mxu0  ;;  %v1095_v58 = vpop.f32.mrf.mxu1 }
  0xf1   :  { %v794_v60 = vadd.f32 %v793_v57, %v792_v54 }
  0xf2   :  { %v795_v61 = vpop.f32.mrf.mxu0  ;;  %v847_v63 = vpop.f32.mrf.mxu1 }
  0xf3   :  { %v483_v4 = vadd.f32 %v847_v63, %v386_v1  ;;  %v389_v6 = vadd.f32 %v794_v60, %v1100_v62 }
  0xf4   :  { %v796_v2 = vpop.f32.mrf.mxu0  ;;  %v474_v3 = vpop.f32.mrf.mxu1 }
  0xf5   :  { %v475_v9 = vadd.f32 %v474_v3, %v378_v5  ;;  %v539_v14 = vmax.f32 %v483_v4, 0.0  ;;  %v797_v15 = vadd.f32 %v796_v2, %v795_v61  ;;  %v830_v2 = vadd.f32 %v1095_v58, %v1093_v55 }
  0xf6   :  { %v798_v7 = vpop.f32.mrf.mxu0  ;;  %v848_v8 = vpop.f32.mrf.mxu1  ;;  %v821_v5 = vadd.f32 %v1083_v45, %v1081_v43 }
  0xf7   :  { %v486_v10 = vadd.f32 %v848_v8, %v389_v6  ;;  %v537_v20 = vmax.f32 %v475_v9, 0.0  ;;  %v394_v28 = vadd.f32 %v797_v15, %v1100_v62  ;;  %v434_v8 = vadd.f32 %v827_v59, %v1100_v62 }
  0xf8   :  { %v799_v12 = vpop.f32.mrf.mxu0  ;;  %v477_v13 = vpop.f32.mrf.mxu1  ;;  %v824_v9 = vadd.f32 %v1087_v49, %v1085_v47  ;;  %v437_v43 = vadd.f32 %v830_v2, %v1100_v62  ;;  %v426_v45 = vadd.f32 %v821_v5, %v1100_v62 }
  0xf9   :  { %v540_v16 = vmax.f32 %v486_v10, 0.0  ;;  %v478_v17 = vadd.f32 %v477_v13, %v381_v11  ;;  %v800_v22 = vadd.f32 %v799_v12, %v798_v7 }
  0xfa   :  { %v801_v18 = vpop.f32.mrf.mxu0  ;;  %v851_v19 = vpop.f32.mrf.mxu1  ;;  %v429_v47 = vadd.f32 %v824_v9, %v1100_v62 }
  0xfb   :  { %v728_v21 = vpack.c.bf16 %v540_v16, %v539_v14  ;;  %v538_v23 = vmax.f32 %v478_v17, 0.0  ;;  %v397_v33 = vadd.f32 %v800_v22, %v1100_v62 }
  0xfc   :  { %v802_v24 = vpop.f32.mrf.mxu0  ;;  %v490_v25 = vpop.f32.mrf.mxu1 }
  0xfd   :  { %760 = vst [vmem:[%s1153_s3 + $0x8] sm:$0xff] %v728_v21   ;;  %v723_v26 = vpack.c.bf16 %v538_v23, %v537_v20  ;;  %v803_v27 = vadd.f32 %v802_v24, %v801_v18  ;;  %v491_v32 = vadd.f32 %v490_v25, %v394_v28 }
  0xfe   :  { %v804_v29 = vpop.f32.mrf.mxu0  ;;  %v852_v30 = vpop.f32.mrf.mxu1 }
  0xff   :  { %724 = vst [vmem:[%s1153_s3] sm:$0xff] %v723_v26   ;;  %v402_v31 = vadd.f32 %v803_v27, %v1100_v62  ;;  %v541_v41 = vmax.f32 %v491_v32, 0.0 }
 0x100   :  { %v805_v34 = vpop.f32.mrf.mxu0  ;;  %v493_v35 = vpop.f32.mrf.mxu1 }
 0x101   :  { %v806_v36 = vadd.f32 %v805_v34, %v804_v29  ;;  %v494_v37 = vadd.f32 %v493_v35, %v397_v33  ;;  %v499_v40 = vadd.f32 %v851_v19, %v402_v31 }
 0x102   :  { %v807_v38 = vpop.f32.mrf.mxu0  ;;  %v855_v39 = vpop.f32.mrf.mxu1 }
 0x103   :  { %v405_v42 = vadd.f32 %v806_v36, %v1100_v62  ;;  %v542_v44 = vmax.f32 %v494_v37, 0.0  ;;  %v543_v60 = vmax.f32 %v499_v40, 0.0 }
 0x104   :  { %v808_v46 = vpop.f32.mrf.mxu0  ;;  %v506_v48 = vpop.f32.mrf.mxu1 }
 0x105   :  { %v502_v50 = vadd.f32 %v852_v30, %v405_v42  ;;  %v733_v52 = vpack.c.bf16 %v542_v44, %v541_v41  ;;  %v809_v54 = vadd.f32 %v808_v46, %v807_v38 }
 0x106   :  { %v810_v56 = vpop.f32.mrf.mxu0  ;;  %v856_v57 = vpop.f32.mrf.mxu1 }
 0x107   :  { %v544_v61 = vmax.f32 %v502_v50, 0.0  ;;  %761 = vst [vmem:[%s1153_s3 + $0x10] sm:$0xff] %v733_v52   ;;  %v410_v63 = vadd.f32 %v809_v54, %v1100_v62 }
 0x108   :  { %v811_v0 = vpop.f32.mrf.mxu0  ;;  %v509_v1 = vpop.f32.mrf.mxu1 }
 0x109   :  { %v738_v3 = vpack.c.bf16 %v544_v61, %v543_v60  ;;  %v812_v4 = vadd.f32 %v811_v0, %v810_v56  ;;  %v507_v53 = vadd.f32 %v506_v48, %v410_v63 }
 0x10a   :  { %v813_v6 = vpop.f32.mrf.mxu0  ;;  %v859_v51 = vpop.f32.mrf.mxu1 }
 0x10b   :  { %762 = vst [vmem:[%s1153_s3 + $0x18] sm:$0xff] %v738_v3   ;;  %v413_v7 = vadd.f32 %v812_v4, %v1100_v62  ;;  %v531_v11 = vadd.f32 %v859_v51, %v434_v8  ;;  %v545_v15 = vmax.f32 %v507_v53, 0.0 }
 0x10c   :  { %v814_v55 = vpop.f32.mrf.mxu0  ;;  %v522_v58 = vpop.f32.mrf.mxu1 }
 0x10d   :  { %v510_v10 = vadd.f32 %v509_v1, %v413_v7  ;;  %v815_v12 = vadd.f32 %v814_v55, %v813_v6  ;;  %v523_v19 = vadd.f32 %v522_v58, %v426_v45  ;;  %v551_v22 = vmax.f32 %v531_v11, 0.0 }
 0x10e   :  { %v816_v13 = vpop.f32.mrf.mxu0  ;;  %v860_v14 = vpop.f32.mrf.mxu1 }
 0x10f   :  { %v546_v16 = vmax.f32 %v510_v10, 0.0  ;;  %v418_v17 = vadd.f32 %v815_v12, %v1100_v62  ;;  %v534_v18 = vadd.f32 %v860_v14, %v437_v43  ;;  %v549_v29 = vmax.f32 %v523_v19, 0.0 }
 0x110   :  { %v817_v20 = vpop.f32.mrf.mxu0  ;;  %v525_v49 = vpop.f32.mrf.mxu1 }
 0x111   :  { %v743_v21 = vpack.c.bf16 %v546_v16, %v545_v15  ;;  %v552_v23 = vmax.f32 %v534_v18, 0.0  ;;  %v818_v24 = vadd.f32 %v817_v20, %v816_v13  ;;  %v526_v25 = vadd.f32 %v525_v49, %v429_v47 }
 0x112   :  { %v515_v26 = vadd.f32 %v855_v39, %v418_v17 }
 0x113   :  { %763 = vst [vmem:[%s1153_s3 + $0x20] sm:$0xff] %v743_v21   ;;  %v758_v27 = vpack.c.bf16 %v552_v23, %v551_v22  ;;  %v421_v28 = vadd.f32 %v818_v24, %v1100_v62  ;;  %v550_v30 = vmax.f32 %v526_v25, 0.0 }
 0x114   :  { %v547_v33 = vmax.f32 %v515_v26, 0.0 }
 0x115   :  { %766 = vst [vmem:[%s1153_s3 + $0x38] sm:$0xff] %v758_v27   ;;  %v518_v31 = vadd.f32 %v856_v57, %v421_v28  ;;  %v753_v32 = vpack.c.bf16 %v550_v30, %v549_v29 }
 0x117   :  { %v548_v34 = vmax.f32 %v518_v31, 0.0  ;;  %765 = vst [vmem:[%s1153_s3 + $0x30] sm:$0xff] %v753_v32  }
 0x119   :  { %v748_v35 = vpack.c.bf16 %v548_v34, %v547_v33 }
 0x11b   :  { %764 = vst [vmem:[%s1153_s3 + $0x28] sm:$0xff] %v748_v35  }

// kernel: _lambda_.48
= control target key start
LH: loop header
LB: loop body
LE: loop exit
PB: predicated region body
PF: predicated region fallthrough
CT: control target
= control target key end

     0   :  { %vm321_vm0 = vcmask 261120   ;;  %s1275_s1 = inlined_call_operand.vmem [shape: bf16[288,128], index: 1, kind: input, shape index: {}]   ;;  %s1276_s0 = inlined_call_operand.vmem [shape: bf16[128,288], index: 0, kind: input, shape index: {}]   ;;  %s1277_s3 = inlined_call_operand.vmem [shape: bf16[128,128], index: 3, kind: input, shape index: {}]   ;;  %s1278_s2 = inlined_call_operand.vmem [shape: f32[1,128], index: 2, kind: input, shape index: {}]   ;;  %s1279_s4 = inlined_call_operand.vmem [shape: bf16[128,128], index: 4, kind: output, shape index: {}]  }
   0x1   :  { %v967_v0 = vld [vmem:[%s1275_s1 + $0x78] sm:$0xff]   ;;  %v969_v2 = vld [vmem:[%s1275_s1 + $0x70] sm:$0xff]   ;;  %v971_v4 = vld [vmem:[%s1275_s1 + $0x68] sm:$0xff]  }
   0x2   :  { %v968_v1 = vld [vmem:[%s1275_s1 + $0x38] sm:$0xff]   ;;  %857 = vmatprep.subr.bf16.mxu0 %v967_v0  ;;  %951 = vmatprep.subr.bf16.mxu1 %v967_v0  ;;  %v970_v3 = vld [vmem:[%s1275_s1 + $0x30] sm:$0xff]   ;;  %v972_v5 = vld [vmem:[%s1275_s1 + $0x28] sm:$0xff]  }
   0x3   :  { %858 = vmatpush3.bf16.msra.mxu0 %v968_v1  ;;  %959 = vmatpush3.bf16.msra.mxu1 %v968_v1  ;;  %v973_v6 = vld [vmem:[%s1275_s1 + $0x60] sm:$0xff]   ;;  %v975_v8 = vld [vmem:[%s1275_s1 + $0x58] sm:$0xff]   ;;  %v977_v10 = vld [vmem:[%s1275_s1 + $0x50] sm:$0xff]  }
   0x4   :  { %859 = vmatprep.subr.bf16.mxu0 %v969_v2  ;;  %952 = vmatprep.subr.bf16.mxu1 %v969_v2  ;;  %v974_v7 = vld [vmem:[%s1275_s1 + $0x20] sm:$0xff]   ;;  %v976_v9 = vld [vmem:[%s1275_s1 + $0x18] sm:$0xff]   ;;  %v978_v13 = vld [vmem:[%s1275_s1 + $0x10] sm:$0xff]  }
   0x5   :  { %v985_v11 = vld [vmem:[%s1276_s0 + $0x4] ss:$12 sps:$4 sm:$0xff]   ;;  %v988_v12 = vld [vmem:[%s1276_s0 + $0x94] ss:$12 sps:$4 sm:$0xff]   ;;  %v979_v14 = vld [vmem:[%s1275_s1 + $0x48] sm:$0xff]  }
   0x6   :  { %378 = vmatprep.mubr.bf16.mxu0 %v985_v11  ;;  %426 = vmatprep.mubr.bf16.mxu1 %v988_v12  ;;  %v980_v15 = vld [vmem:[%s1275_s1 + $0x8] sm:$0xff]   ;;  %v981_v16 = vld [vmem:[%s1275_s1 + $0x40] sm:$0xff]   ;;  %v986_v20 = vld [vmem:[%s1276_s0 + $0x90] ss:$12 sps:$4 sm:$0xff]  }
   0x7   :  { %860 = vmatpush3.bf16.msra.mxu0 %v970_v3  ;;  %960 = vmatpush3.bf16.msra.mxu1 %v970_v3  ;;  %v982_v17 = vld [vmem:[%s1275_s1] sm:$0xff]   ;;  %v989_v19 = vld [vmem:[%s1275_s1 + $0x88] sm:$0xff]   ;;  %v1000_v28 = vld [vmem:[%s1276_s0 + $0x30] ss:$12 sps:$4 sm:$0xff]  }
   0x8   :  { %861 = vmatprep.subr.bf16.mxu0 %v971_v4  ;;  %953 = vmatprep.subr.bf16.mxu1 %v971_v4  ;;  %v983_v18 = vld [vmem:[%s1276_s0] ss:$12 sps:$4 sm:$0xff]   ;;  %v990_v21 = vld [vmem:[%s1276_s0 + $0x1c] ss:$12 sps:$4 sm:$0xff]   ;;  %v994_v24 = vld [vmem:[%s1276_s0 + $0x18] ss:$12 sps:$4 sm:$0xff]  }
   0x9   :  { %v992_v22 = vld [vmem:[%s1276_s0 + $0xac] ss:$12 sps:$4 sm:$0xff]   ;;  %v996_v23 = vld [vmem:[%s1275_s1 + $0x80] sm:$0xff]   ;;  %v995_v25 = vld [vmem:[%s1276_s0 + $0xa8] ss:$12 sps:$4 sm:$0xff]  }
   0xa   :  { %v997_v26 = vld [vmem:[%s1276_s0 + $0x34] ss:$12 sps:$4 sm:$0xff]   ;;  %v1002_v30 = vld [vmem:[%s1276_s0 + $0x4c] ss:$12 sps:$4 sm:$0xff]   ;;  %v1006_v33 = vld [vmem:[%s1276_s0 + $0x50] ss:$12 sps:$4 sm:$0xff]  }
   0xb   :  { %862 = vmatpush3.bf16.msra.mxu0 %v972_v5  ;;  %961 = vmatpush3.bf16.msra.mxu1 %v972_v5  ;;  %v999_v27 = vld [vmem:[%s1276_s0 + $0x8] ss:$12 sps:$4 sm:$0xff]   ;;  %v1001_v29 = vld [vmem:[%s1276_s0 + $0x20] ss:$12 sps:$4 sm:$0xff]   ;;  %v1004_v31 = vld [vmem:[%s1276_s0 + $0x38] ss:$12 sps:$4 sm:$0xff]  }
   0xc   :  { %863 = vmatprep.subr.bf16.mxu0 %v973_v6  ;;  %954 = vmatprep.subr.bf16.mxu1 %v973_v6  ;;  %v1005_v32 = vld [vmem:[%s1276_s0 + $0x48] ss:$12 sps:$4 sm:$0xff]   ;;  %v1007_v34 = vld [vmem:[%s1276_s0 + $0x64] ss:$12 sps:$4 sm:$0xff]   ;;  %v1010_v36 = vld [vmem:[%s1276_s0 + $0x60] ss:$12 sps:$4 sm:$0xff]  }
   0xd   :  { %v1009_v35 = vld [vmem:[%s1276_s0 + $0x68] ss:$12 sps:$4 sm:$0xff]   ;;  %v1011_v37 = vld [vmem:[%s1276_s0 + $0x80] ss:$12 sps:$4 sm:$0xff]   ;;  %v1014_v39 = vld [vmem:[%s1276_s0 + $0x98] ss:$12 sps:$4 sm:$0xff]  }
   0xe   :  { %v1012_v38 = vld [vmem:[%s1276_s0 + $0x7c] ss:$12 sps:$4 sm:$0xff]   ;;  %v1015_v40 = vld [vmem:[%s1276_s0 + $0x78] ss:$12 sps:$4 sm:$0xff]   ;;  %v1198_v61 = vld [vmem:[%s1278_s2] ss:$0 sm:$0xff] }
   0xf   :  { %864 = vmatpush3.bf16.msra.mxu0 %v974_v7  ;;  %962 = vmatpush3.bf16.msra.mxu1 %v974_v7  ;;  %v1016_v41 = vld [vmem:[%s1276_s0 + $0xb0] ss:$12 sps:$4 sm:$0xff]   ;;  %v843_v58 = vld [vmem:[%s1277_s3 + $0x8] sm:$0xff]   ;;  %v772_v0 = vld [vmem:[%s1277_s3] sm:$0xff]  }
  0x10   :  { %865 = vmatprep.subr.bf16.mxu0 %v975_v8  ;;  %955 = vmatprep.subr.bf16.mxu1 %v975_v8  ;;  %v777_v3 = vunpack.c.l.bf16 %v843_v58  ;;  %v778_v12 = vunpack.c.h.bf16 %v843_v58 }
  0x13   :  { %866 = vmatpush3.bf16.msra.mxu0 %v976_v9  ;;  %963 = vmatpush3.bf16.msra.mxu1 %v976_v9  ;;  %v773_v9 = vunpack.c.l.bf16 %v772_v0 }
  0x14   :  { %867 = vmatprep.subr.bf16.mxu0 %v977_v10  ;;  %956 = vmatprep.subr.bf16.mxu1 %v977_v10 }
  0x17   :  { %868 = vmatpush3.bf16.msra.mxu0 %v978_v13  ;;  %964 = vmatpush3.bf16.msra.mxu1 %v978_v13 }
  0x18   :  { %869 = vmatprep.subr.bf16.mxu0 %v979_v14  ;;  %957 = vmatprep.subr.bf16.mxu1 %v979_v14 }
  0x1b   :  { %870 = vmatpush3.bf16.msra.mxu0 %v980_v15  ;;  %965 = vmatpush3.bf16.msra.mxu1 %v980_v15 }
  0x1c   :  { %871 = vmatprep.subr.bf16.mxu0 %v981_v16  ;;  %958 = vmatprep.subr.bf16.mxu1 %v981_v16 }
  0x1f   :  { %872 = vmatpush3.bf16.msra.mxu0 %v982_v17  ;;  %966 = vmatpush3.bf16.msra.mxu1 %v982_v17 }
  0x20   :  { %931 = vmatprep.subr.bf16.mxu1 %v989_v19 }
  0x22   :  { %379 = vmatmul.mubr.bf16.vlgmr.msra.gmra.mxu0 %v983_v18  ;;  %427 = vmatmul.mubr.bf16.vlgmr.msra.gmra.mxu1 %v986_v20 }
  0x23   :  { %932 = vmatpush3.bf16.msra.mxu1 %v989_v19  ;;  %386 = vmatprep.mubr.bf16.mxu0 %v990_v21  ;;  %v774_v19 = vunpack.c.h.bf16 %v772_v0 }
  0x24   :  { %434 = vmatprep.mubr.bf16.mxu1 %v992_v22  ;;  %933 = vmatprep.subr.bf16.mxu1 %v996_v23 }
  0x27   :  { %934 = vmatpush3.bf16.msra.mxu1 %v996_v23 }
  0x2a   :  { %387 = vmatmul.mubr.bf16.gmra.mxu0 %v994_v24  ;;  %435 = vmatmul.mubr.bf16.gmra.mxu1 %v995_v25  ;;  %v844_v25 = vld [vmem:[%s1277_s3 + $0x10] sm:$0xff]  }
  0x2b   :  { %394 = vmatprep.mubr.bf16.mxu0 %v997_v26  ;;  %935 = vmatprep.mubr.msk.bf16.mxu1 %vm321_vm0, %v999_v27 }
  0x32   :  { %395 = vmatmul.mubr.bf16.gmra.mxu0 %v1000_v28  ;;  %936 = vmatmul.mubr.msk.bf16.vlgmr.msra.gmra.mxu1 %vm321_vm0, %v1001_v29 }
  0x33   :  { %402 = vmatprep.mubr.bf16.mxu0 %v1002_v30  ;;  %939 = vmatprep.mubr.msk.bf16.mxu1 %vm321_vm0, %v1004_v31 }
  0x3a   :  { %403 = vmatmul.mubr.bf16.gmra.mxu0 %v1005_v32  ;;  %940 = vmatmul.mubr.msk.bf16.gmra.mxu1 %vm321_vm0, %v1006_v33 }
  0x3b   :  { %410 = vmatprep.mubr.bf16.mxu0 %v1007_v34  ;;  %943 = vmatprep.mubr.msk.bf16.mxu1 %vm321_vm0, %v1009_v35 }
  0x42   :  { %411 = vmatmul.mubr.bf16.gmra.mxu0 %v1010_v36  ;;  %944 = vmatmul.mubr.msk.bf16.gmra.mxu1 %vm321_vm0, %v1011_v37  ;;  %v781_v36 = vunpack.c.l.bf16 %v844_v25 }
  0x43   :  { %418 = vmatprep.mubr.bf16.mxu0 %v1012_v38  ;;  %947 = vmatprep.mubr.msk.bf16.mxu1 %vm321_vm0, %v1014_v39 }
  0x4a   :  { %419 = vmatmul.mubr.bf16.gmra.mxu0 %v1015_v40  ;;  %948 = vmatmul.mubr.msk.bf16.gmra.mxu1 %vm321_vm0, %v1016_v41  ;;  %v845_v41 = vld [vmem:[%s1277_s3 + $0x18] sm:$0xff]  }
  0xe2   :  { %v873_v42 = vpop.f32.mrf.mxu0  ;;  %v1176_v43 = vpop.f32.mrf.mxu1 }
  0xe4   :  { %v874_v44 = vpop.f32.mrf.mxu0  ;;  %v1178_v45 = vpop.f32.mrf.mxu1 }
  0xe5   :  { %v875_v57 = vadd.f32 %v874_v44, %v873_v42 }
  0xe6   :  { %v876_v46 = vpop.f32.mrf.mxu0  ;;  %v1180_v47 = vpop.f32.mrf.mxu1 }
  0xe7   :  { %v381_v6 = vadd.f32 %v875_v57, %v1198_v61 }
  0xe8   :  { %v877_v48 = vpop.f32.mrf.mxu0  ;;  %v1182_v49 = vpop.f32.mrf.mxu1 }
  0xe9   :  { %v878_v4 = vadd.f32 %v877_v48, %v876_v46 }
  0xea   :  { %v879_v50 = vpop.f32.mrf.mxu0  ;;  %v1184_v51 = vpop.f32.mrf.mxu1 }
  0xeb   :  { %v384_v18 = vadd.f32 %v878_v4, %v1198_v61 }
  0xec   :  { %v880_v52 = vpop.f32.mrf.mxu0  ;;  %v1186_v53 = vpop.f32.mrf.mxu1 }
  0xed   :  { %v881_v54 = vadd.f32 %v880_v52, %v879_v50  ;;  %v782_v52 = vunpack.c.h.bf16 %v844_v25 }
  0xee   :  { %v882_v55 = vpop.f32.mrf.mxu0  ;;  %v1188_v56 = vpop.f32.mrf.mxu1 }
  0xef   :  { %v389_v63 = vadd.f32 %v881_v54, %v1198_v61 }
  0xf0   :  { %v883_v59 = vpop.f32.mrf.mxu0  ;;  %v1193_v60 = vpop.f32.mrf.mxu1 }
  0xf1   :  { %v884_v62 = vadd.f32 %v883_v59, %v882_v55  ;;  %v785_v59 = vunpack.c.l.bf16 %v845_v41 }
  0xf2   :  { %v885_v1 = vpop.f32.mrf.mxu0  ;;  %v937_v2 = vpop.f32.mrf.mxu1 }
  0xf3   :  { %v486_v5 = vadd.f32 %v937_v2, %v389_v63  ;;  %v392_v11 = vadd.f32 %v884_v62, %v1198_v61 }
  0xf4   :  { %v886_v7 = vpop.f32.mrf.mxu0  ;;  %v477_v8 = vpop.f32.mrf.mxu1 }
  0xf5   :  { %v478_v10 = vadd.f32 %v477_v8, %v381_v6  ;;  %v574_v13 = vadd.f32 %v777_v3, %v486_v5  ;;  %v887_v16 = vadd.f32 %v886_v7, %v885_v1  ;;  %v786_v3 = vunpack.c.h.bf16 %v845_v41 }
  0xf6   :  { %v888_v14 = vpop.f32.mrf.mxu0  ;;  %v938_v15 = vpop.f32.mrf.mxu1  ;;  %v917_v5 = vadd.f32 %v1186_v53, %v1184_v51  ;;  %v849_v51 = vld [vmem:[%s1277_s3 + $0x38] sm:$0xff]   ;;  %v911_v53 = vadd.f32 %v1178_v45, %v1176_v43 }
  0xf7   :  { %v489_v17 = vadd.f32 %v938_v15, %v392_v11  ;;  %v572_v20 = vadd.f32 %v773_v9, %v478_v10  ;;  %v590_v26 = vmax.f32 %v574_v13, 0.0  ;;  %v397_v32 = vadd.f32 %v887_v16, %v1198_v61  ;;  %v846_v13 = vld [vmem:[%s1277_s3 + $0x20] sm:$0xff]  }
  0xf8   :  { %v889_v21 = vpop.f32.mrf.mxu0  ;;  %v480_v22 = vpop.f32.mrf.mxu1  ;;  %v802_v41 = vunpack.c.h.bf16 %v849_v51 }
  0xf9   :  { %v575_v23 = vadd.f32 %v778_v12, %v489_v17  ;;  %v481_v24 = vadd.f32 %v480_v22, %v384_v18  ;;  %v890_v30 = vadd.f32 %v889_v21, %v888_v14  ;;  %v588_v33 = vmax.f32 %v572_v20, 0.0 }
  0xfa   :  { %v891_v27 = vpop.f32.mrf.mxu0  ;;  %v941_v28 = vpop.f32.mrf.mxu1  ;;  %v789_v20 = vunpack.c.l.bf16 %v846_v13 }
  0xfb   :  { %v591_v29 = vmax.f32 %v575_v23, 0.0  ;;  %v573_v31 = vadd.f32 %v774_v19, %v481_v24  ;;  %v400_v50 = vadd.f32 %v890_v30, %v1198_v61  ;;  %v920_v19 = vadd.f32 %v1193_v60, %v1188_v56 }
  0xfc   :  { %v892_v34 = vpop.f32.mrf.mxu0  ;;  %v493_v35 = vpop.f32.mrf.mxu1  ;;  %v437_v23 = vadd.f32 %v917_v5, %v1198_v61  ;;  %v801_v30 = vunpack.c.l.bf16 %v849_v51  ;;  %v790_v56 = vunpack.c.h.bf16 %v846_v13 }
  0xfd   :  { %v811_v37 = vpack.c.bf16 %v591_v29, %v590_v26  ;;  %v589_v38 = vmax.f32 %v573_v31, 0.0  ;;  %v893_v39 = vadd.f32 %v892_v34, %v891_v27  ;;  %v494_v40 = vadd.f32 %v493_v35, %v397_v32  ;;  %v848_v31 = vld [vmem:[%s1277_s3 + $0x30] sm:$0xff]  }
  0xfe   :  { %v894_v42 = vpop.f32.mrf.mxu0  ;;  %v942_v44 = vpop.f32.mrf.mxu1  ;;  %v914_v32 = vadd.f32 %v1182_v49, %v1180_v47  ;;  %v429_v35 = vadd.f32 %v911_v53, %v1198_v61  ;;  %v797_v47 = vunpack.c.l.bf16 %v848_v31 }
  0xff   :  { %850 = vst [vmem:[%s1279_s4 + $0x8] sm:$0xff] %v811_v37   ;;  %v806_v46 = vpack.c.bf16 %v589_v38, %v588_v33  ;;  %v405_v48 = vadd.f32 %v893_v39, %v1198_v61  ;;  %v576_v54 = vadd.f32 %v781_v36, %v494_v40  ;;  %v847_v39 = vld [vmem:[%s1277_s3 + $0x28] sm:$0xff]   ;;  %v440_v40 = vadd.f32 %v920_v19, %v1198_v61 }
 0x100   :  { %v895_v55 = vpop.f32.mrf.mxu0  ;;  %v496_v57 = vpop.f32.mrf.mxu1  ;;  %v794_v5 = vunpack.c.h.bf16 %v847_v39 }
 0x101   :  { %807 = vst [vmem:[%s1279_s4] sm:$0xff] %v806_v46   ;;  %v502_v58 = vadd.f32 %v941_v28, %v405_v48  ;;  %v896_v62 = vadd.f32 %v895_v55, %v894_v42  ;;  %v497_v63 = vadd.f32 %v496_v57, %v400_v50  ;;  %v592_v6 = vmax.f32 %v576_v54, 0.0 }
 0x102   :  { %v897_v0 = vpop.f32.mrf.mxu0  ;;  %v1222_v1 = vpop.f32.mrf.mxu1  ;;  %v793_v55 = vunpack.c.l.bf16 %v847_v39 }
 0x103   :  { %v408_v2 = vadd.f32 %v896_v62, %v1198_v61  ;;  %v577_v4 = vadd.f32 %v782_v52, %v497_v63  ;;  %v578_v9 = vadd.f32 %v785_v59, %v502_v58  ;;  %v432_v58 = vadd.f32 %v914_v32, %v1198_v61 }
 0x104   :  { %v898_v7 = vpop.f32.mrf.mxu0  ;;  %v509_v8 = vpop.f32.mrf.mxu1  ;;  %v798_v62 = vunpack.c.h.bf16 %v848_v31 }
 0x105   :  { %v505_v10 = vadd.f32 %v942_v44, %v408_v2  ;;  %v593_v11 = vmax.f32 %v577_v4, 0.0  ;;  %v899_v12 = vadd.f32 %v898_v7, %v897_v0  ;;  %v594_v24 = vmax.f32 %v578_v9, 0.0 }
 0x106   :  { %v900_v14 = vpop.f32.mrf.mxu0  ;;  %v1230_v15 = vpop.f32.mrf.mxu1 }
 0x107   :  { %v579_v16 = vadd.f32 %v786_v3, %v505_v10  ;;  %v816_v17 = vpack.c.bf16 %v593_v11, %v592_v6  ;;  %v413_v18 = vadd.f32 %v899_v12, %v1198_v61 }
 0x108   :  { %v901_v21 = vpop.f32.mrf.mxu0  ;;  %v512_v22 = vpop.f32.mrf.mxu1 }
 0x109   :  { %v595_v25 = vmax.f32 %v579_v16, 0.0  ;;  %851 = vst [vmem:[%s1279_s4 + $0x10] sm:$0xff] %v816_v17   ;;  %v510_v26 = vadd.f32 %v509_v8, %v413_v18  ;;  %v902_v27 = vadd.f32 %v901_v21, %v900_v14 }
 0x10a   :  { %v903_v28 = vpop.f32.mrf.mxu0  ;;  %v949_v29 = vpop.f32.mrf.mxu1 }
 0x10b   :  { %v821_v43 = vpack.c.bf16 %v595_v25, %v594_v24  ;;  %v416_v45 = vadd.f32 %v902_v27, %v1198_v61  ;;  %v534_v60 = vadd.f32 %v949_v29, %v437_v23  ;;  %v580_v33 = vadd.f32 %v789_v20, %v510_v26 }
 0x10c   :  { %v904_v34 = vpop.f32.mrf.mxu0  ;;  %v525_v36 = vpop.f32.mrf.mxu1 }
 0x10d   :  { %852 = vst [vmem:[%s1279_s4 + $0x18] sm:$0xff] %v821_v43   ;;  %v513_v37 = vadd.f32 %v512_v22, %v416_v45  ;;  %v905_v38 = vadd.f32 %v904_v34, %v903_v28  ;;  %v526_v42 = vadd.f32 %v525_v36, %v429_v35  ;;  %v586_v48 = vadd.f32 %v801_v30, %v534_v60 }
 0x10e   :  { %v906_v49 = vpop.f32.mrf.mxu0  ;;  %v950_v44 = vpop.f32.mrf.mxu1  ;;  %v596_v54 = vmax.f32 %v580_v33, 0.0 }
 0x10f   :  { %v581_v46 = vadd.f32 %v790_v56, %v513_v37  ;;  %v421_v50 = vadd.f32 %v905_v38, %v1198_v61  ;;  %v537_v52 = vadd.f32 %v950_v44, %v440_v40  ;;  %v584_v4 = vadd.f32 %v797_v47, %v526_v42 }
 0x110   :  { %v907_v57 = vpop.f32.mrf.mxu0  ;;  %v528_v59 = vpop.f32.mrf.mxu1  ;;  %v602_v8 = vmax.f32 %v586_v48, 0.0 }
 0x111   :  { %v597_v63 = vmax.f32 %v581_v46, 0.0  ;;  %v518_v0 = vadd.f32 %v1222_v1, %v421_v50  ;;  %v587_v2 = vadd.f32 %v802_v41, %v537_v52  ;;  %v908_v3 = vadd.f32 %v907_v57, %v906_v49 }
 0x112   :  { %v529_v6 = vadd.f32 %v528_v59, %v432_v58  ;;  %v600_v1 = vmax.f32 %v584_v4, 0.0 }
 0x113   :  { %v826_v7 = vpack.c.bf16 %v597_v63, %v596_v54  ;;  %v603_v9 = vmax.f32 %v587_v2, 0.0  ;;  %v424_v10 = vadd.f32 %v908_v3, %v1198_v61  ;;  %v582_v12 = vadd.f32 %v793_v55, %v518_v0 }
 0x114   :  { %v585_v11 = vadd.f32 %v798_v62, %v529_v6 }
 0x115   :  { %853 = vst [vmem:[%s1279_s4 + $0x20] sm:$0xff] %v826_v7   ;;  %v841_v13 = vpack.c.bf16 %v603_v9, %v602_v8  ;;  %v521_v14 = vadd.f32 %v1230_v15, %v424_v10  ;;  %v598_v51 = vmax.f32 %v582_v12, 0.0 }
 0x116   :  { %v601_v16 = vmax.f32 %v585_v11, 0.0 }
 0x117   :  { %856 = vst [vmem:[%s1279_s4 + $0x38] sm:$0xff] %v841_v13   ;;  %v583_v17 = vadd.f32 %v794_v5, %v521_v14 }
 0x118   :  { %v836_v18 = vpack.c.bf16 %v601_v16, %v600_v1 }
 0x119   :  { %v599_v53 = vmax.f32 %v583_v17, 0.0 }
 0x11a   :  { %855 = vst [vmem:[%s1279_s4 + $0x30] sm:$0xff] %v836_v18  }
 0x11b   :  { %v831_v61 = vpack.c.bf16 %v599_v53, %v598_v51 }
 0x11d   :  { %854 = vst [vmem:[%s1279_s4 + $0x28] sm:$0xff] %v831_v61  }

// kernel: _lambda_.56
= control target key start
LH: loop header
LB: loop body
LE: loop exit
PB: predicated region body
PF: predicated region fallthrough
CT: control target
= control target key end

     0   :  { %vm134_vm0 = vcmask 916480   ;;  %s633_s1 = inlined_call_operand.vmem [shape: bf16[112,128], index: 1, kind: input, shape index: {}]   ;;  %s634_s0 = inlined_call_operand.vmem [shape: bf16[128,112], index: 0, kind: input, shape index: {}]   ;;  %s635_s2 = inlined_call_operand.vmem [shape: f32[1,128], index: 2, kind: input, shape index: {}]   ;;  %s636_s3 = inlined_call_operand.vmem [shape: bf16[128,128], index: 3, kind: output, shape index: {}]  }
   0x1   :  { %v518_v0 = vld [vmem:[%s633_s1 + $0x30] sm:$0xff]   ;;  %v519_v1 = vld [vmem:[%s633_s1 + $0x28] sm:$0xff]   ;;  %v520_v2 = vld [vmem:[%s633_s1 + $0x20] sm:$0xff]  }
   0x2   :  { %474 = vmatprep.subr.bf16.mxu0 %v518_v0  ;;  %504 = vmatprep.subr.bf16.mxu1 %v518_v0  ;;  %v521_v3 = vld [vmem:[%s633_s1 + $0x18] sm:$0xff]   ;;  %v525_v4 = vld [vmem:[%s634_s0] sm:$0xff]   ;;  %v522_v6 = vld [vmem:[%s633_s1 + $0x10] sm:$0xff]  }
   0x3   :  { %475 = vmatpush3.bf16.msra.mxu0 %v518_v0  ;;  %511 = vmatpush3.bf16.msra.mxu1 %v518_v0  ;;  %v526_v5 = vld [vmem:[%s634_s0 + $0x20] sm:$0xff]   ;;  %v523_v7 = vld [vmem:[%s633_s1 + $0x8] sm:$0xff]   ;;  %v529_v11 = vld [vmem:[%s634_s0 + $0x10] sm:$0xff]  }
   0x4   :  { %476 = vmatprep.subr.bf16.mxu0 %v519_v1  ;;  %505 = vmatprep.subr.bf16.mxu1 %v519_v1  ;;  %v524_v8 = vld [vmem:[%s633_s1] sm:$0xff]   ;;  %v527_v9 = vld [vmem:[%s634_s0 + $0x8] sm:$0xff]   ;;  %v530_v12 = vld [vmem:[%s634_s0 + $0x30] sm:$0xff]  }
   0x5   :  { %488 = vmatprep.mubr.msk.bf16.mxu0 %vm134_vm0, %v525_v4  ;;  %496 = vmatprep.mubr.msk.bf16.mxu1 %vm134_vm0, %v526_v5  ;;  %v528_v10 = vld [vmem:[%s634_s0 + $0x28] sm:$0xff]   ;;  %v531_v13 = vld [vmem:[%s634_s0 + $0x18] sm:$0xff]   ;;  %v356_v15 = vld [vmem:[%s635_s2] ss:$0 sm:$0xff] }
   0x6   :  { %v532_v14 = vld [vmem:[%s634_s0 + $0x38] sm:$0xff]  }
   0x7   :  { %477 = vmatpush3.bf16.msra.mxu0 %v519_v1  ;;  %512 = vmatpush3.bf16.msra.mxu1 %v519_v1 }
   0x8   :  { %478 = vmatprep.subr.bf16.mxu0 %v520_v2  ;;  %506 = vmatprep.subr.bf16.mxu1 %v520_v2 }
   0xb   :  { %479 = vmatpush3.bf16.msra.mxu0 %v520_v2  ;;  %513 = vmatpush3.bf16.msra.mxu1 %v520_v2 }
   0xc   :  { %480 = vmatprep.subr.bf16.mxu0 %v521_v3  ;;  %507 = vmatprep.subr.bf16.mxu1 %v521_v3 }
   0xf   :  { %481 = vmatpush3.bf16.msra.mxu0 %v521_v3  ;;  %514 = vmatpush3.bf16.msra.mxu1 %v521_v3 }
  0x10   :  { %482 = vmatprep.subr.bf16.mxu0 %v522_v6  ;;  %508 = vmatprep.subr.bf16.mxu1 %v522_v6 }
  0x13   :  { %483 = vmatpush3.bf16.msra.mxu0 %v522_v6  ;;  %515 = vmatpush3.bf16.msra.mxu1 %v522_v6 }
  0x14   :  { %484 = vmatprep.subr.bf16.mxu0 %v523_v7  ;;  %509 = vmatprep.subr.bf16.mxu1 %v523_v7 }
  0x17   :  { %485 = vmatpush3.bf16.msra.mxu0 %v523_v7  ;;  %516 = vmatpush3.bf16.msra.mxu1 %v523_v7 }
  0x18   :  { %486 = vmatprep.subr.bf16.mxu0 %v524_v8  ;;  %510 = vmatprep.subr.bf16.mxu1 %v524_v8 }
  0x1b   :  { %487 = vmatpush3.bf16.msra.mxu0 %v524_v8  ;;  %517 = vmatpush3.bf16.msra.mxu1 %v524_v8 }
  0x1e   :  { %489 = vmatmul.mubr.msk.bf16.vlgmr.msra.gmra.mxu0 %vm134_vm0, %v527_v9  ;;  %497 = vmatmul.mubr.msk.bf16.vlgmr.msra.gmra.mxu1 %vm134_vm0, %v528_v10 }
  0x1f   :  { %492 = vmatprep.mubr.msk.bf16.mxu0 %vm134_vm0, %v529_v11  ;;  %500 = vmatprep.mubr.msk.bf16.mxu1 %vm134_vm0, %v530_v12 }
  0x26   :  { %493 = vmatmul.mubr.msk.bf16.gmra.mxu0 %vm134_vm0, %v531_v13  ;;  %501 = vmatmul.mubr.msk.bf16.gmra.mxu1 %vm134_vm0, %v532_v14 }
  0xde   :  { %v490_v16 = vpop.f32.mrf.mxu0  ;;  %v498_v17 = vpop.f32.mrf.mxu1 }
  0xdf   :  { %v202_v18 = vadd.f32 %v490_v16, %v356_v15  ;;  %v234_v19 = vadd.f32 %v498_v17, %v356_v15 }
  0xe0   :  { %v193_v20 = vpop.f32.mrf.mxu0  ;;  %v225_v21 = vpop.f32.mrf.mxu1 }
  0xe1   :  { %v194_v22 = vadd.f32 %v356_v15, %v193_v20  ;;  %v226_v23 = vadd.f32 %v356_v15, %v225_v21  ;;  %v258_v28 = vmax.f32 %v202_v18, 0.0  ;;  %v266_v29 = vmax.f32 %v234_v19, 0.0 }
  0xe2   :  { %v491_v24 = vpop.f32.mrf.mxu0  ;;  %v499_v25 = vpop.f32.mrf.mxu1 }
  0xe3   :  { %v205_v26 = vadd.f32 %v491_v24, %v356_v15  ;;  %v237_v27 = vadd.f32 %v499_v25, %v356_v15  ;;  %v256_v36 = vmax.f32 %v194_v22, 0.0  ;;  %v264_v37 = vmax.f32 %v226_v23, 0.0 }
  0xe4   :  { %v196_v30 = vpop.f32.mrf.mxu0  ;;  %v228_v31 = vpop.f32.mrf.mxu1 }
  0xe5   :  { %v259_v32 = vmax.f32 %v205_v26, 0.0  ;;  %v267_v33 = vmax.f32 %v237_v27, 0.0  ;;  %v197_v34 = vadd.f32 %v356_v15, %v196_v30  ;;  %v229_v35 = vadd.f32 %v356_v15, %v228_v31 }
  0xe6   :  { %v494_v38 = vpop.f32.mrf.mxu0  ;;  %v502_v39 = vpop.f32.mrf.mxu1 }
  0xe7   :  { %v420_v40 = vpack.c.bf16 %v259_v32, %v258_v28  ;;  %v440_v41 = vpack.c.bf16 %v267_v33, %v266_v29  ;;  %v257_v42 = vmax.f32 %v197_v34, 0.0  ;;  %v265_v43 = vmax.f32 %v229_v35, 0.0 }
  0xe8   :  { %v218_v44 = vadd.f32 %v494_v38, %v356_v15  ;;  %v250_v45 = vadd.f32 %v502_v39, %v356_v15  ;;  %v209_v46 = vpop.f32.mrf.mxu0  ;;  %v241_v47 = vpop.f32.mrf.mxu1 }
  0xe9   :  { %452 = vst [vmem:[%s636_s3 + $0x8] sm:$0xff] %v420_v40   ;;  %456 = vst [vmem:[%s636_s3 + $0x28] sm:$0xff] %v440_v41   ;;  %v415_v48 = vpack.c.bf16 %v257_v42, %v256_v36  ;;  %v435_v49 = vpack.c.bf16 %v265_v43, %v264_v37  ;;  %v210_v50 = vadd.f32 %v356_v15, %v209_v46 }
  0xea   :  { %v242_v51 = vadd.f32 %v356_v15, %v241_v47  ;;  %v495_v52 = vpop.f32.mrf.mxu0  ;;  %v503_v53 = vpop.f32.mrf.mxu1  ;;  %v262_v56 = vmax.f32 %v218_v44, 0.0  ;;  %v270_v57 = vmax.f32 %v250_v45, 0.0 }
  0xeb   :  { %416 = vst [vmem:[%s636_s3] sm:$0xff] %v415_v48   ;;  %455 = vst [vmem:[%s636_s3 + $0x20] sm:$0xff] %v435_v49   ;;  %v221_v54 = vadd.f32 %v495_v52, %v356_v15  ;;  %v253_v55 = vadd.f32 %v503_v53, %v356_v15  ;;  %v260_v0 = vmax.f32 %v210_v50, 0.0 }
  0xec   :  { %v212_v58 = vpop.f32.mrf.mxu0  ;;  %v244_v59 = vpop.f32.mrf.mxu1  ;;  %v268_v1 = vmax.f32 %v242_v51, 0.0 }
  0xed   :  { %v263_v60 = vmax.f32 %v221_v54, 0.0  ;;  %v271_v61 = vmax.f32 %v253_v55, 0.0  ;;  %v213_v62 = vadd.f32 %v356_v15, %v212_v58  ;;  %v245_v63 = vadd.f32 %v356_v15, %v244_v59 }
  0xef   :  { %v430_v2 = vpack.c.bf16 %v263_v60, %v262_v56  ;;  %v450_v3 = vpack.c.bf16 %v271_v61, %v270_v57  ;;  %v261_v4 = vmax.f32 %v213_v62, 0.0  ;;  %v269_v5 = vmax.f32 %v245_v63, 0.0 }
  0xf1   :  { %454 = vst [vmem:[%s636_s3 + $0x18] sm:$0xff] %v430_v2   ;;  %458 = vst [vmem:[%s636_s3 + $0x38] sm:$0xff] %v450_v3   ;;  %v425_v6 = vpack.c.bf16 %v261_v4, %v260_v0  ;;  %v445_v7 = vpack.c.bf16 %v269_v5, %v268_v1 }
  0xf3   :  { %453 = vst [vmem:[%s636_s3 + $0x10] sm:$0xff] %v425_v6   ;;  %457 = vst [vmem:[%s636_s3 + $0x30] sm:$0xff] %v445_v7  }

// kernel: _lambda_.58
= control target key start
LH: loop header
LB: loop body
LE: loop exit
PB: predicated region body
PF: predicated region fallthrough
CT: control target
= control target key end

     0   :  { %vm207_vm0 = vcmask 261120   ;;  %s585_s1 = inlined_call_operand.vmem [shape: bf16[288,128], index: 1, kind: input, shape index: {}]   ;;  %s586_s0 = inlined_call_operand.vmem [shape: bf16[32,288], index: 0, kind: input, shape index: {}]   ;;  %s587_s2 = inlined_call_operand.vmem [shape: f32[1,128], index: 2, kind: input, shape index: {}]   ;;  %s588_s3 = inlined_call_operand.vmem [shape: bf16[32,128], index: 3, kind: input, shape index: {}]   ;;  %s589_s4 = inlined_call_operand.vmem [shape: bf16[32,128], index: 4, kind: output, shape index: {}]  }
   0x1   :  { %v447_v0 = vld [vmem:[%s585_s1 + $0x78] sm:$0xff]   ;;  %v449_v2 = vld [vmem:[%s585_s1 + $0x70] sm:$0xff]   ;;  %v451_v4 = vld [vmem:[%s585_s1 + $0x68] sm:$0xff]  }
   0x2   :  { %v448_v1 = vld [vmem:[%s585_s1 + $0x38] sm:$0xff]   ;;  %407 = vmatprep.subr.bf16.mxu0 %v447_v0  ;;  %v450_v3 = vld [vmem:[%s585_s1 + $0x30] sm:$0xff]   ;;  %v452_v5 = vld [vmem:[%s585_s1 + $0x28] sm:$0xff]  }
   0x3   :  { %408 = vmatpush3.bf16.msra.mxu0 %v448_v1  ;;  %v453_v6 = vld [vmem:[%s585_s1 + $0x60] sm:$0xff]   ;;  %v455_v8 = vld [vmem:[%s585_s1 + $0x58] sm:$0xff]   ;;  %v462_v10 = vld [vmem:[%s585_s1 + $0x88] sm:$0xff]  }
   0x4   :  { %409 = vmatprep.subr.bf16.mxu0 %v449_v2  ;;  %v454_v7 = vld [vmem:[%s585_s1 + $0x20] sm:$0xff]   ;;  %v456_v9 = vld [vmem:[%s585_s1 + $0x18] sm:$0xff]   ;;  %v457_v11 = vld [vmem:[%s585_s1 + $0x50] sm:$0xff]   ;;  %439 = vmatprep.subr.bf16.mxu1 %v462_v10 }
   0x5   :  { %v458_v12 = vld [vmem:[%s585_s1 + $0x10] sm:$0xff]   ;;  %v459_v13 = vld [vmem:[%s585_s1 + $0x48] sm:$0xff]   ;;  %440 = vmatpush3.bf16.msra.mxu1 %v462_v10  ;;  %v467_v15 = vld [vmem:[%s585_s1 + $0x80] sm:$0xff]  }
   0x6   :  { %v466_v14 = vld [vmem:[%s586_s0 + $0x4] ss:$12 sps:$4 sm:$0xff]   ;;  %v468_v16 = vld [vmem:[%s586_s0 + $0x8] ss:$12 sps:$4 sm:$0xff]   ;;  %441 = vmatprep.subr.bf16.mxu1 %v467_v15  ;;  %v469_v17 = vld [vmem:[%s586_s0 + $0x20] ss:$12 sps:$4 sm:$0xff]  }
   0x7   :  { %410 = vmatpush3.bf16.msra.mxu0 %v450_v3  ;;  %246 = vmatprep.mubr.bf16.mxu0 %v466_v14  ;;  %v460_v18 = vld [vmem:[%s585_s1 + $0x8] sm:$0xff]   ;;  %v461_v19 = vld [vmem:[%s585_s1 + $0x40] sm:$0xff]  }
   0x8   :  { %411 = vmatprep.subr.bf16.mxu0 %v451_v4  ;;  %443 = vmatprep.mubr.msk.bf16.mxu1 %vm207_vm0, %v468_v16  ;;  %v463_v20 = vld [vmem:[%s585_s1] sm:$0xff]   ;;  %v470_v22 = vld [vmem:[%s586_s0 + $0x1c] ss:$12 sps:$4 sm:$0xff]  }
   0x9   :  { %442 = vmatpush3.bf16.msra.mxu1 %v467_v15  ;;  %v464_v21 = vld [vmem:[%s586_s0] ss:$12 sps:$4 sm:$0xff]   ;;  %v472_v23 = vld [vmem:[%s586_s0 + $0x18] ss:$12 sps:$4 sm:$0xff]  }
   0xa   :  { %v352_v28 = vld [vmem:[%s587_s2] ss:$0 sm:$0xff]  ;;  %v405_v43 = vld [vmem:[%s588_s3 + $0x8] sm:$0xff]  }
   0xb   :  { %412 = vmatpush3.bf16.msra.mxu0 %v452_v5  ;;  %v388_v31 = vld [vmem:[%s588_s3] sm:$0xff]   ;;  %v393_v50 = vunpack.c.l.bf16 %v405_v43  ;;  %v394_v58 = vunpack.c.h.bf16 %v405_v43 }
   0xc   :  { %413 = vmatprep.subr.bf16.mxu0 %v453_v6  ;;  %444 = vmatmul.mubr.msk.bf16.vlgmr.msra.gmra.mxu1 %vm207_vm0, %v469_v17  ;;  %v389_v37 = vunpack.c.l.bf16 %v388_v31  ;;  %v390_v41 = vunpack.c.h.bf16 %v388_v31 }
   0xf   :  { %414 = vmatpush3.bf16.msra.mxu0 %v454_v7 }
  0x10   :  { %415 = vmatprep.subr.bf16.mxu0 %v455_v8 }
  0x13   :  { %416 = vmatpush3.bf16.msra.mxu0 %v456_v9 }
  0x14   :  { %417 = vmatprep.subr.bf16.mxu0 %v457_v11 }
  0x17   :  { %418 = vmatpush3.bf16.msra.mxu0 %v458_v12 }
  0x18   :  { %419 = vmatprep.subr.bf16.mxu0 %v459_v13 }
  0x1b   :  { %420 = vmatpush3.bf16.msra.mxu0 %v460_v18 }
  0x1c   :  { %421 = vmatprep.subr.bf16.mxu0 %v461_v19 }
  0x1f   :  { %422 = vmatpush3.bf16.msra.mxu0 %v463_v20 }
  0x22   :  { %247 = vmatmul.mubr.bf16.vlgmr.msra.gmra.mxu0 %v464_v21 }
  0x23   :  { %254 = vmatprep.mubr.bf16.mxu0 %v470_v22 }
  0x2a   :  { %255 = vmatmul.mubr.bf16.gmra.mxu0 %v472_v23 }
  0xcc   :  { %v445_v24 = vpop.f32.mrf.mxu1 }
  0xce   :  { %v297_v26 = vpop.f32.mrf.mxu1 }
  0xd0   :  { %v446_v32 = vpop.f32.mrf.mxu1 }
  0xd2   :  { %v300_v39 = vpop.f32.mrf.mxu1 }
  0xe2   :  { %v423_v25 = vpop.f32.mrf.mxu0 }
  0xe4   :  { %v424_v27 = vpop.f32.mrf.mxu0 }
  0xe5   :  { %v425_v29 = vadd.f32 %v424_v27, %v423_v25 }
  0xe6   :  { %v426_v30 = vpop.f32.mrf.mxu0 }
  0xe7   :  { %v249_v33 = vadd.f32 %v425_v29, %v352_v28 }
  0xe8   :  { %v427_v34 = vpop.f32.mrf.mxu0 }
  0xe9   :  { %v428_v35 = vadd.f32 %v427_v34, %v426_v30  ;;  %v298_v36 = vadd.f32 %v297_v26, %v249_v33 }
  0xea   :  { %v429_v38 = vpop.f32.mrf.mxu0 }
  0xeb   :  { %v252_v40 = vadd.f32 %v428_v35, %v352_v28  ;;  %v320_v44 = vadd.f32 %v389_v37, %v298_v36 }
  0xec   :  { %v430_v42 = vpop.f32.mrf.mxu0 }
  0xed   :  { %v431_v45 = vadd.f32 %v430_v42, %v429_v38  ;;  %v301_v46 = vadd.f32 %v300_v39, %v252_v40  ;;  %v324_v52 = vmax.f32 %v320_v44, 0.0 }
  0xee   :  { %v432_v47 = vpop.f32.mrf.mxu0 }
  0xef   :  { %v257_v48 = vadd.f32 %v431_v45, %v352_v28  ;;  %v321_v49 = vadd.f32 %v390_v41, %v301_v46 }
  0xf0   :  { %v433_v51 = vpop.f32.mrf.mxu0 }
  0xf1   :  { %v306_v53 = vadd.f32 %v445_v24, %v257_v48  ;;  %v325_v54 = vmax.f32 %v321_v49, 0.0  ;;  %v434_v55 = vadd.f32 %v433_v51, %v432_v47 }
  0xf3   :  { %v398_v56 = vpack.c.bf16 %v325_v54, %v324_v52  ;;  %v260_v57 = vadd.f32 %v434_v55, %v352_v28  ;;  %v322_v59 = vadd.f32 %v393_v50, %v306_v53 }
  0xf5   :  { %399 = vst [vmem:[%s589_s4] sm:$0xff] %v398_v56   ;;  %v309_v60 = vadd.f32 %v446_v32, %v260_v57  ;;  %v326_v62 = vmax.f32 %v322_v59, 0.0 }
  0xf7   :  { %v323_v61 = vadd.f32 %v394_v58, %v309_v60 }
  0xf9   :  { %v327_v63 = vmax.f32 %v323_v61, 0.0 }
  0xfb   :  { %v403_v0 = vpack.c.bf16 %v327_v63, %v326_v62 }
  0xfd   :  { %406 = vst [vmem:[%s589_s4 + $0x8] sm:$0xff] %v403_v0  }

// kernel: _lambda_.57
= control target key start
LH: loop header
LB: loop body
LE: loop exit
PB: predicated region body
PF: predicated region fallthrough
CT: control target
= control target key end

     0   :  { %vm204_vm0 = vcmask 261120   ;;  %s550_s1 = inlined_call_operand.vmem [shape: bf16[288,128], index: 1, kind: input, shape index: {}]   ;;  %s551_s0 = inlined_call_operand.vmem [shape: bf16[32,288], index: 0, kind: input, shape index: {}]   ;;  %s552_s2 = inlined_call_operand.vmem [shape: f32[1,128], index: 2, kind: input, shape index: {}]   ;;  %s553_s3 = inlined_call_operand.vmem [shape: bf16[32,128], index: 3, kind: output, shape index: {}]  }
   0x1   :  { %v423_v0 = vld [vmem:[%s550_s1 + $0x78] sm:$0xff]   ;;  %v425_v2 = vld [vmem:[%s550_s1 + $0x70] sm:$0xff]   ;;  %v427_v4 = vld [vmem:[%s550_s1 + $0x68] sm:$0xff]  }
   0x2   :  { %v424_v1 = vld [vmem:[%s550_s1 + $0x38] sm:$0xff]   ;;  %383 = vmatprep.subr.bf16.mxu0 %v423_v0  ;;  %v426_v3 = vld [vmem:[%s550_s1 + $0x30] sm:$0xff]   ;;  %v428_v5 = vld [vmem:[%s550_s1 + $0x28] sm:$0xff]  }
   0x3   :  { %384 = vmatpush3.bf16.msra.mxu0 %v424_v1  ;;  %v429_v6 = vld [vmem:[%s550_s1 + $0x60] sm:$0xff]   ;;  %v431_v8 = vld [vmem:[%s550_s1 + $0x58] sm:$0xff]   ;;  %v438_v10 = vld [vmem:[%s550_s1 + $0x88] sm:$0xff]  }
   0x4   :  { %385 = vmatprep.subr.bf16.mxu0 %v425_v2  ;;  %v430_v7 = vld [vmem:[%s550_s1 + $0x20] sm:$0xff]   ;;  %v432_v9 = vld [vmem:[%s550_s1 + $0x18] sm:$0xff]   ;;  %v433_v11 = vld [vmem:[%s550_s1 + $0x50] sm:$0xff]   ;;  %415 = vmatprep.subr.bf16.mxu1 %v438_v10 }
   0x5   :  { %v434_v12 = vld [vmem:[%s550_s1 + $0x10] sm:$0xff]   ;;  %v435_v13 = vld [vmem:[%s550_s1 + $0x48] sm:$0xff]   ;;  %416 = vmatpush3.bf16.msra.mxu1 %v438_v10  ;;  %v443_v15 = vld [vmem:[%s550_s1 + $0x80] sm:$0xff]  }
   0x6   :  { %v442_v14 = vld [vmem:[%s551_s0 + $0x4] ss:$12 sps:$4 sm:$0xff]   ;;  %v444_v16 = vld [vmem:[%s551_s0 + $0x8] ss:$12 sps:$4 sm:$0xff]   ;;  %417 = vmatprep.subr.bf16.mxu1 %v443_v15  ;;  %v445_v17 = vld [vmem:[%s551_s0 + $0x20] ss:$12 sps:$4 sm:$0xff]  }
   0x7   :  { %386 = vmatpush3.bf16.msra.mxu0 %v426_v3  ;;  %243 = vmatprep.mubr.bf16.mxu0 %v442_v14  ;;  %v436_v18 = vld [vmem:[%s550_s1 + $0x8] sm:$0xff]   ;;  %v437_v19 = vld [vmem:[%s550_s1 + $0x40] sm:$0xff]  }
   0x8   :  { %387 = vmatprep.subr.bf16.mxu0 %v427_v4  ;;  %419 = vmatprep.mubr.msk.bf16.mxu1 %vm204_vm0, %v444_v16  ;;  %v439_v20 = vld [vmem:[%s550_s1] sm:$0xff]   ;;  %v446_v22 = vld [vmem:[%s551_s0 + $0x1c] ss:$12 sps:$4 sm:$0xff]  }
   0x9   :  { %418 = vmatpush3.bf16.msra.mxu1 %v443_v15  ;;  %v440_v21 = vld [vmem:[%s551_s0] ss:$12 sps:$4 sm:$0xff]   ;;  %v448_v23 = vld [vmem:[%s551_s0 + $0x18] ss:$12 sps:$4 sm:$0xff]  }
   0xa   :  { %v337_v28 = vld [vmem:[%s552_s2] ss:$0 sm:$0xff] }
   0xb   :  { %388 = vmatpush3.bf16.msra.mxu0 %v428_v5 }
   0xc   :  { %389 = vmatprep.subr.bf16.mxu0 %v429_v6  ;;  %420 = vmatmul.mubr.msk.bf16.vlgmr.msra.gmra.mxu1 %vm204_vm0, %v445_v17 }
   0xf   :  { %390 = vmatpush3.bf16.msra.mxu0 %v430_v7 }
  0x10   :  { %391 = vmatprep.subr.bf16.mxu0 %v431_v8 }
  0x13   :  { %392 = vmatpush3.bf16.msra.mxu0 %v432_v9 }
  0x14   :  { %393 = vmatprep.subr.bf16.mxu0 %v433_v11 }
  0x17   :  { %394 = vmatpush3.bf16.msra.mxu0 %v434_v12 }
  0x18   :  { %395 = vmatprep.subr.bf16.mxu0 %v435_v13 }
  0x1b   :  { %396 = vmatpush3.bf16.msra.mxu0 %v436_v18 }
  0x1c   :  { %397 = vmatprep.subr.bf16.mxu0 %v437_v19 }
  0x1f   :  { %398 = vmatpush3.bf16.msra.mxu0 %v439_v20 }
  0x22   :  { %244 = vmatmul.mubr.bf16.vlgmr.msra.gmra.mxu0 %v440_v21 }
  0x23   :  { %251 = vmatprep.mubr.bf16.mxu0 %v446_v22 }
  0x2a   :  { %252 = vmatmul.mubr.bf16.gmra.mxu0 %v448_v23 }
  0xcc   :  { %v421_v24 = vpop.f32.mrf.mxu1 }
  0xce   :  { %v294_v26 = vpop.f32.mrf.mxu1 }
  0xd0   :  { %v422_v31 = vpop.f32.mrf.mxu1 }
  0xd2   :  { %v297_v36 = vpop.f32.mrf.mxu1 }
  0xe2   :  { %v399_v25 = vpop.f32.mrf.mxu0 }
  0xe4   :  { %v400_v27 = vpop.f32.mrf.mxu0 }
  0xe5   :  { %v401_v29 = vadd.f32 %v400_v27, %v399_v25 }
  0xe6   :  { %v402_v30 = vpop.f32.mrf.mxu0 }
  0xe7   :  { %v246_v32 = vadd.f32 %v401_v29, %v337_v28 }
  0xe8   :  { %v403_v33 = vpop.f32.mrf.mxu0 }
  0xe9   :  { %v404_v34 = vadd.f32 %v403_v33, %v402_v30  ;;  %v295_v37 = vadd.f32 %v294_v26, %v246_v32 }
  0xea   :  { %v405_v35 = vpop.f32.mrf.mxu0 }
  0xeb   :  { %v249_v38 = vadd.f32 %v404_v34, %v337_v28  ;;  %v309_v43 = vmax.f32 %v295_v37, 0.0 }
  0xec   :  { %v406_v39 = vpop.f32.mrf.mxu0 }
  0xed   :  { %v407_v40 = vadd.f32 %v406_v39, %v405_v35  ;;  %v298_v41 = vadd.f32 %v297_v36, %v249_v38 }
  0xee   :  { %v408_v42 = vpop.f32.mrf.mxu0 }
  0xef   :  { %v254_v44 = vadd.f32 %v407_v40, %v337_v28  ;;  %v310_v45 = vmax.f32 %v298_v41, 0.0 }
  0xf0   :  { %v409_v46 = vpop.f32.mrf.mxu0 }
  0xf1   :  { %v375_v47 = vpack.c.bf16 %v310_v45, %v309_v43  ;;  %v410_v48 = vadd.f32 %v409_v46, %v408_v42  ;;  %v303_v49 = vadd.f32 %v421_v24, %v254_v44 }
  0xf3   :  { %376 = vst [vmem:[%s553_s3] sm:$0xff] %v375_v47   ;;  %v257_v50 = vadd.f32 %v410_v48, %v337_v28  ;;  %v311_v52 = vmax.f32 %v303_v49, 0.0 }
  0xf5   :  { %v306_v51 = vadd.f32 %v422_v31, %v257_v50 }
  0xf7   :  { %v312_v53 = vmax.f32 %v306_v51, 0.0 }
  0xf9   :  { %v380_v54 = vpack.c.bf16 %v312_v53, %v311_v52 }
  0xfb   :  { %382 = vst [vmem:[%s553_s3 + $0x8] sm:$0xff] %v380_v54  }

// kernel: _lambda_.61
= control target key start
LH: loop header
LB: loop body
LE: loop exit
PB: predicated region body
PF: predicated region fallthrough
CT: control target
= control target key end

     0   :  { %vm68_vm0 = vcmask 523264   ;;  %s251_s1 = inlined_call_operand.vmem [shape: bf16[64,128], index: 1, kind: input, shape index: {}]   ;;  %s252_s0 = inlined_call_operand.vmem [shape: bf16[32,64], index: 0, kind: input, shape index: {}]   ;;  %s253_s2 = inlined_call_operand.vmem [shape: f32[1,128], index: 2, kind: input, shape index: {}]   ;;  %s254_s3 = inlined_call_operand.vmem [shape: bf16[32,128], index: 3, kind: output, shape index: {}]  }
   0x1   :  { %v198_v0 = vld [vmem:[%s251_s1 + $0x18] sm:$0xff]   ;;  %v199_v1 = vld [vmem:[%s251_s1 + $0x10] sm:$0xff]   ;;  %v200_v2 = vld [vmem:[%s251_s1 + $0x8] sm:$0xff]  }
   0x2   :  { %186 = vmatprep.subr.bf16.mxu0 %v198_v0  ;;  %v202_v3 = vld [vmem:[%s252_s0] sm:$0xff]   ;;  %v203_v5 = vld [vmem:[%s252_s0 + $0x8] sm:$0xff]  }
   0x3   :  { %187 = vmatpush3.bf16.msra.mxu0 %v198_v0  ;;  %194 = vmatprep.mubr.msk.bf16.mxu0 %vm68_vm0, %v202_v3  ;;  %v201_v4 = vld [vmem:[%s251_s1] sm:$0xff]  }
   0x4   :  { %188 = vmatprep.subr.bf16.mxu0 %v199_v1  ;;  %v152_v7 = vld [vmem:[%s253_s2] ss:$0 sm:$0xff] }
   0x7   :  { %189 = vmatpush3.bf16.msra.mxu0 %v199_v1 }
   0x8   :  { %190 = vmatprep.subr.bf16.mxu0 %v200_v2 }
   0xb   :  { %191 = vmatpush3.bf16.msra.mxu0 %v200_v2 }
   0xc   :  { %192 = vmatprep.subr.bf16.mxu0 %v201_v4 }
   0xf   :  { %193 = vmatpush3.bf16.msra.mxu0 %v201_v4 }
  0x12   :  { %195 = vmatmul.mubr.msk.bf16.vlgmr.msra.gmra.mxu0 %vm68_vm0, %v203_v5 }
  0xd2   :  { %v196_v6 = vpop.f32.mrf.mxu0 }
  0xd3   :  { %v118_v9 = vadd.f32 %v196_v6, %v152_v7 }
  0xd4   :  { %v109_v8 = vpop.f32.mrf.mxu0 }
  0xd5   :  { %v110_v11 = vadd.f32 %v152_v7, %v109_v8  ;;  %v126_v14 = vmax.f32 %v118_v9, 0.0 }
  0xd6   :  { %v197_v10 = vpop.f32.mrf.mxu0 }
  0xd7   :  { %v121_v12 = vadd.f32 %v197_v10, %v152_v7  ;;  %v124_v17 = vmax.f32 %v110_v11, 0.0 }
  0xd8   :  { %v112_v13 = vpop.f32.mrf.mxu0 }
  0xd9   :  { %v127_v15 = vmax.f32 %v121_v12, 0.0  ;;  %v113_v16 = vadd.f32 %v152_v7, %v112_v13 }
  0xdb   :  { %v177_v18 = vpack.c.bf16 %v127_v15, %v126_v14  ;;  %v125_v19 = vmax.f32 %v113_v16, 0.0 }
  0xdd   :  { %179 = vst [vmem:[%s254_s3 + $0x8] sm:$0xff] %v177_v18   ;;  %v172_v20 = vpack.c.bf16 %v125_v19, %v124_v17 }
  0xdf   :  { %173 = vst [vmem:[%s254_s3] sm:$0xff] %v172_v20  }

// kernel: _lambda_.66
= control target key start
LH: loop header
LB: loop body
LE: loop exit
PB: predicated region body
PF: predicated region fallthrough
CT: control target
= control target key end

     0   :  { %s308_s1 = inlined_call_operand.vmem [shape: bf16[128,128], index: 1, kind: input, shape index: {}]   ;;  %s309_s0 = inlined_call_operand.vmem [shape: bf16[32,128], index: 0, kind: input, shape index: {}]   ;;  %s310_s2 = inlined_call_operand.vmem [shape: f32[1,128], index: 2, kind: input, shape index: {}]   ;;  %s311_s3 = inlined_call_operand.vmem [shape: bf16[32,128], index: 3, kind: output, shape index: {}]  }
   0x1   :  { %v239_v0 = vld [vmem:[%s308_s1 + $0x38] sm:$0xff]   ;;  %v240_v1 = vld [vmem:[%s308_s1 + $0x30] sm:$0xff]   ;;  %v241_v2 = vld [vmem:[%s308_s1 + $0x28] sm:$0xff]  }
   0x2   :  { %219 = vmatprep.subr.bf16.mxu0 %v239_v0  ;;  %v242_v3 = vld [vmem:[%s308_s1 + $0x20] sm:$0xff]   ;;  %v243_v5 = vld [vmem:[%s308_s1 + $0x18] sm:$0xff]   ;;  %v244_v6 = vld [vmem:[%s308_s1 + $0x10] sm:$0xff]  }
   0x3   :  { %220 = vmatpush3.bf16.msra.mxu0 %v239_v0  ;;  %v247_v4 = vld [vmem:[%s309_s0] sm:$0xff]   ;;  %v245_v7 = vld [vmem:[%s308_s1 + $0x8] sm:$0xff]  }
   0x4   :  { %221 = vmatprep.subr.bf16.mxu0 %v240_v1  ;;  %235 = vmatprep.mubr.bf16.mxu0 %v247_v4  ;;  %v246_v8 = vld [vmem:[%s308_s1] sm:$0xff]   ;;  %v248_v9 = vld [vmem:[%s309_s0 + $0x8] sm:$0xff]  }
   0x5   :  { %v179_v11 = vld [vmem:[%s310_s2] ss:$0 sm:$0xff] }
   0x7   :  { %222 = vmatpush3.bf16.msra.mxu0 %v240_v1 }
   0x8   :  { %223 = vmatprep.subr.bf16.mxu0 %v241_v2 }
   0xb   :  { %224 = vmatpush3.bf16.msra.mxu0 %v241_v2 }
   0xc   :  { %225 = vmatprep.subr.bf16.mxu0 %v242_v3 }
   0xf   :  { %226 = vmatpush3.bf16.msra.mxu0 %v242_v3 }
  0x10   :  { %227 = vmatprep.subr.bf16.mxu0 %v243_v5 }
  0x13   :  { %228 = vmatpush3.bf16.msra.mxu0 %v243_v5 }
  0x14   :  { %229 = vmatprep.subr.bf16.mxu0 %v244_v6 }
  0x17   :  { %230 = vmatpush3.bf16.msra.mxu0 %v244_v6 }
  0x18   :  { %231 = vmatprep.subr.bf16.mxu0 %v245_v7 }
  0x1b   :  { %232 = vmatpush3.bf16.msra.mxu0 %v245_v7 }
  0x1c   :  { %233 = vmatprep.subr.bf16.mxu0 %v246_v8 }
  0x1f   :  { %234 = vmatpush3.bf16.msra.mxu0 %v246_v8 }
  0x22   :  { %236 = vmatmul.mubr.bf16.vlgmr.msra.gmra.mxu0 %v248_v9 }
  0xe2   :  { %v237_v10 = vpop.f32.mrf.mxu0 }
  0xe3   :  { %v145_v13 = vadd.f32 %v237_v10, %v179_v11 }
  0xe4   :  { %v136_v12 = vpop.f32.mrf.mxu0 }
  0xe5   :  { %v137_v15 = vadd.f32 %v179_v11, %v136_v12  ;;  %v153_v18 = vmax.f32 %v145_v13, 0.0 }
  0xe6   :  { %v238_v14 = vpop.f32.mrf.mxu0 }
  0xe7   :  { %v148_v16 = vadd.f32 %v238_v14, %v179_v11  ;;  %v151_v21 = vmax.f32 %v137_v15, 0.0 }
  0xe8   :  { %v139_v17 = vpop.f32.mrf.mxu0 }
  0xe9   :  { %v154_v19 = vmax.f32 %v148_v16, 0.0  ;;  %v140_v20 = vadd.f32 %v179_v11, %v139_v17 }
  0xeb   :  { %v206_v22 = vpack.c.bf16 %v154_v19, %v153_v18  ;;  %v152_v23 = vmax.f32 %v140_v20, 0.0 }
  0xed   :  { %208 = vst [vmem:[%s311_s3 + $0x8] sm:$0xff] %v206_v22   ;;  %v201_v24 = vpack.c.bf16 %v152_v23, %v151_v21 }
  0xef   :  { %202 = vst [vmem:[%s311_s3] sm:$0xff] %v201_v24  }

// kernel: _lambda_.67
= control target key start
LH: loop header
LB: loop body
LE: loop exit
PB: predicated region body
PF: predicated region fallthrough
CT: control target
= control target key end

     0   :  { %v108_v0 = vmov 0.0   ;;  %vm109_vm0 = vmmov 0   ;;  %vm39_vm1 = vcmask 261120   ;;  %s145_s1 = inlined_call_operand.vmem [shape: bf16[32,128], index: 1, kind: input, shape index: {}]   ;;  %s146_s0 = inlined_call_operand.vmem [shape: bf16[8,32], index: 0, kind: input, shape index: {}]   ;;  %s147_s2 = inlined_call_operand.vmem [shape: f32[1,128], index: 2, kind: input, shape index: {}]   ;;  %s148_s3 = inlined_call_operand.vmem [shape: bf16[8,128], index: 3, kind: output, shape index: {}]  }
   0x1   :  { %96 = vmatprep.subr.bf16.mxu0 %v108_v0  ;;  %v106_v1 = vld [vmem:[%s145_s1 + $0x8] sm:$0xff]   ;;  %100 = vmatprep.mubr.msk.bf16.mxu0 %vm109_vm0, %v108_v0  ;;  %v107_v2 = vld [vmem:[%s145_s1] sm:$0xff]  }
   0x2   :  { %97 = vmatpush3.bf16.msra.mxu0 %v106_v1  ;;  %v15_v3 = vld [vmem:[%s146_s0] sm:$0xf] }
   0x3   :  { %98 = vmatprep.subr.bf16.mxu0 %v108_v0  ;;  %v89_v4 = vld [vmem:[%s147_s2] ss:$0 sm:$0xff] }
   0x6   :  { %99 = vmatpush3.bf16.msra.mxu0 %v107_v2 }
   0x9   :  { %101 = vmatmul.mubr.msk.bf16.vlgmr.msra.gmra.mxu0 %vm39_vm1, %v15_v3 }
  0xc9   :  { %v77_v5 = vpop.f32.mrf.mxu0 }
  0xca   :  { %v78_v6 = vadd.f32 %v89_v4, %v77_v5 }
  0xcb   :  { %v102_v7 = vpop.f32.mrf.mxu0 }
  0xcc   :  { %v83_v8 = vpack.c.bf16 %v78_v6, %v78_v6 }
  0xcd   :  { %v80_v9 = vpop.f32.mrf.mxu0 }
  0xce   :  { %84 = vst [vmem:[%s148_s3] sm:$0xf] %v83_v8 }
  0xcf   :  { %v103_v10 = vpop.f32.mrf.mxu0 }

// kernel: _lambda_.68
= control target key start
LH: loop header
LB: loop body
LE: loop exit
PB: predicated region body
PF: predicated region fallthrough
CT: control target
= control target key end

     0   :  { %v348_v1 = vmov 0.0   ;;  %vm349_vm0 = vmmov 0   ;;  %vm178_vm1 = vcmask 261120   ;;  %s436_s1 = inlined_call_operand.vmem [shape: bf16[288,128], index: 1, kind: input, shape index: {}]   ;;  %s437_s0 = inlined_call_operand.vmem [shape: bf16[8,288], index: 0, kind: input, shape index: {}]   ;;  %s438_s2 = inlined_call_operand.vmem [shape: f32[1,128], index: 2, kind: input, shape index: {}]   ;;  %s439_s3 = inlined_call_operand.vmem [shape: bf16[8,128], index: 3, kind: output, shape index: {}]  }
   0x1   :  { %v327_v0 = vld [vmem:[%s436_s1 + $0x78] sm:$0xff]   ;;  %317 = vmatprep.subr.bf16.mxu1 %v348_v1  ;;  %321 = vmatprep.mubr.msk.bf16.mxu1 %vm349_vm0, %v348_v1  ;;  %v329_v3 = vld [vmem:[%s436_s1 + $0x70] sm:$0xff]   ;;  %v331_v5 = vld [vmem:[%s436_s1 + $0x68] sm:$0xff]  }
   0x2   :  { %v328_v2 = vld [vmem:[%s436_s1 + $0x38] sm:$0xff]   ;;  %292 = vmatprep.subr.bf16.mxu0 %v327_v0  ;;  %v330_v4 = vld [vmem:[%s436_s1 + $0x30] sm:$0xff]   ;;  %v332_v6 = vld [vmem:[%s436_s1 + $0x28] sm:$0xff]  }
   0x3   :  { %293 = vmatpush3.bf16.msra.mxu0 %v328_v2  ;;  %v333_v7 = vld [vmem:[%s436_s1 + $0x60] sm:$0xff]   ;;  %v335_v9 = vld [vmem:[%s436_s1 + $0x58] sm:$0xff]   ;;  %v341_v10 = vld [vmem:[%s436_s1 + $0x88] sm:$0xff]  }
   0x4   :  { %294 = vmatprep.subr.bf16.mxu0 %v329_v3  ;;  %v334_v8 = vld [vmem:[%s436_s1 + $0x20] sm:$0xff]   ;;  %v336_v11 = vld [vmem:[%s436_s1 + $0x18] sm:$0xff]   ;;  %v337_v12 = vld [vmem:[%s436_s1 + $0x50] sm:$0xff]   ;;  %318 = vmatpush3.bf16.msra.mxu1 %v341_v10 }
   0x5   :  { %319 = vmatprep.subr.bf16.mxu1 %v348_v1  ;;  %v344_v13 = vld [vmem:[%s436_s1 + $0x80] sm:$0xff]   ;;  %v338_v15 = vld [vmem:[%s436_s1 + $0x10] sm:$0xff]   ;;  %v347_v17 = vld [vmem:[%s437_s0 + $0x8] ss:$0 sps:$4 sm:$0xff]  }
   0x6   :  { %v15_v14 = vld [vmem:[%s437_s0] sm:$0xff]  ;;  %v339_v18 = vld [vmem:[%s436_s1 + $0x48] sm:$0xff]  }
   0x7   :  { %295 = vmatpush3.bf16.msra.mxu0 %v330_v4  ;;  %v271_v16 = vcombine.high %v15_v14, %v15_v14  ;;  %v340_v19 = vld [vmem:[%s436_s1 + $0x8] sm:$0xff]   ;;  %v342_v20 = vld [vmem:[%s436_s1 + $0x40] sm:$0xff]   ;;  %v270_v22 = vcombine.low %v15_v14, %v15_v14 }
   0x8   :  { %296 = vmatprep.subr.bf16.mxu0 %v331_v5  ;;  %320 = vmatpush3.bf16.msra.mxu1 %v344_v13  ;;  %v343_v21 = vld [vmem:[%s436_s1] sm:$0xff]  }
   0x9   :  { %214 = vmatprep.mubr.bf16.mxu0 %v271_v16  ;;  %v269_v28 = vld [vmem:[%s438_s2] ss:$0 sm:$0xff] }
   0xb   :  { %297 = vmatpush3.bf16.msra.mxu0 %v332_v6  ;;  %322 = vmatmul.mubr.msk.bf16.vlgmr.msra.gmra.mxu1 %vm178_vm1, %v347_v17 }
   0xc   :  { %298 = vmatprep.subr.bf16.mxu0 %v333_v7 }
   0xf   :  { %299 = vmatpush3.bf16.msra.mxu0 %v334_v8 }
  0x10   :  { %300 = vmatprep.subr.bf16.mxu0 %v335_v9 }
  0x13   :  { %301 = vmatpush3.bf16.msra.mxu0 %v336_v11 }
  0x14   :  { %302 = vmatprep.subr.bf16.mxu0 %v337_v12 }
  0x17   :  { %303 = vmatpush3.bf16.msra.mxu0 %v338_v15 }
  0x18   :  { %304 = vmatprep.subr.bf16.mxu0 %v339_v18 }
  0x1b   :  { %305 = vmatpush3.bf16.msra.mxu0 %v340_v19 }
  0x1c   :  { %306 = vmatprep.subr.bf16.mxu0 %v342_v20 }
  0x1f   :  { %307 = vmatpush3.bf16.msra.mxu0 %v343_v21 }
  0x22   :  { %215 = vmatmul.mubr.bf16.vlgmr.msra.gmra.mxu0 %v270_v22 }
  0xcb   :  { %v256_v23 = vpop.f32.mrf.mxu1 }
  0xcd   :  { %v323_v24 = vpop.f32.mrf.mxu1 }
  0xcf   :  { %v259_v25 = vpop.f32.mrf.mxu1 }
  0xd1   :  { %v324_v26 = vpop.f32.mrf.mxu1 }
  0xe2   :  { %v308_v27 = vpop.f32.mrf.mxu0 }
  0xe4   :  { %v309_v29 = vpop.f32.mrf.mxu0 }
  0xe5   :  { %v310_v30 = vadd.f32 %v309_v29, %v308_v27 }
  0xe6   :  { %v311_v31 = vpop.f32.mrf.mxu0 }
  0xe7   :  { %v217_v32 = vadd.f32 %v310_v30, %v269_v28 }
  0xe8   :  { %v312_v33 = vpop.f32.mrf.mxu0 }
  0xe9   :  { %v257_v34 = vadd.f32 %v256_v23, %v217_v32 }
  0xeb   :  { %v262_v35 = vmax.f32 %v257_v34, 0.0 }
  0xed   :  { %v263_v36 = vpack.c.bf16 %v262_v35, %v262_v35 }
  0xef   :  { %264 = vst [vmem:[%s439_s3] sm:$0xf] %v263_v36 }

// kernel: _lambda_.69
= control target key start
LH: loop header
LB: loop body
LE: loop exit
PB: predicated region body
PF: predicated region fallthrough
CT: control target
= control target key end

     0   :  { %v614_v35 = vmov 0.0   ;;  %vm615_vm0 = vmmov 0   ;;  %vm333_vm1 = vcmask 523264   ;;  %s767_s1 = inlined_call_operand.vmem [shape: bf16[576,128], index: 1, kind: input, shape index: {}]   ;;  %s768_s0 = inlined_call_operand.vmem [shape: bf16[8,576], index: 0, kind: input, shape index: {}]   ;;  %s769_s2 = inlined_call_operand.vmem [shape: f32[1,128], index: 2, kind: input, shape index: {}]   ;;  %s770_s3 = inlined_call_operand.vmem [shape: bf16[8,128], index: 3, kind: input, shape index: {}]   ;;  %s771_s4 = inlined_call_operand.vmem [shape: bf16[8,128], index: 4, kind: output, shape index: {}]  }
   0x1   :  { %v573_v0 = vld [vmem:[%s767_s1 + $0x78] sm:$0xff]   ;;  %v577_v4 = vld [vmem:[%s767_s1 + $0x70] sm:$0xff]   ;;  %v581_v8 = vld [vmem:[%s767_s1 + $0x68] sm:$0xff]  }
   0x2   :  { %v574_v1 = vld [vmem:[%s767_s1 + $0x38] sm:$0xff]   ;;  %510 = vmatprep.subr.bf16.mxu0 %v573_v0  ;;  %v578_v5 = vld [vmem:[%s767_s1 + $0x30] sm:$0xff]   ;;  %v582_v9 = vld [vmem:[%s767_s1 + $0x28] sm:$0xff]  }
   0x3   :  { %v575_v2 = vld [vmem:[%s767_s1 + $0xf8] sm:$0xff]   ;;  %511 = vmatpush3.bf16.msra.mxu0 %v574_v1  ;;  %v579_v6 = vld [vmem:[%s767_s1 + $0xf0] sm:$0xff]   ;;  %v583_v10 = vld [vmem:[%s767_s1 + $0xe8] sm:$0xff]  }
   0x4   :  { %v576_v3 = vld [vmem:[%s767_s1 + $0xb8] sm:$0xff]   ;;  %532 = vmatprep.subr.bf16.mxu1 %v575_v2  ;;  %512 = vmatprep.subr.bf16.mxu0 %v577_v4  ;;  %v580_v7 = vld [vmem:[%s767_s1 + $0xb0] sm:$0xff]   ;;  %v584_v11 = vld [vmem:[%s767_s1 + $0xa8] sm:$0xff]  }
   0x5   :  { %533 = vmatpush3.bf16.msra.mxu1 %v576_v3  ;;  %v585_v12 = vld [vmem:[%s767_s1 + $0x60] sm:$0xff]   ;;  %v589_v16 = vld [vmem:[%s767_s1 + $0x58] sm:$0xff]   ;;  %v593_v20 = vld [vmem:[%s767_s1 + $0x50] sm:$0xff]  }
   0x6   :  { %534 = vmatprep.subr.bf16.mxu1 %v579_v6  ;;  %v586_v13 = vld [vmem:[%s767_s1 + $0x20] sm:$0xff]   ;;  %v590_v17 = vld [vmem:[%s767_s1 + $0x18] sm:$0xff]   ;;  %v594_v21 = vld [vmem:[%s767_s1 + $0x10] sm:$0xff]  }
   0x7   :  { %513 = vmatpush3.bf16.msra.mxu0 %v578_v5  ;;  %v587_v14 = vld [vmem:[%s767_s1 + $0xe0] sm:$0xff]   ;;  %v591_v18 = vld [vmem:[%s767_s1 + $0xd8] sm:$0xff]   ;;  %v595_v22 = vld [vmem:[%s767_s1 + $0xd0] sm:$0xff]  }
   0x8   :  { %514 = vmatprep.subr.bf16.mxu0 %v581_v8  ;;  %v588_v15 = vld [vmem:[%s767_s1 + $0xa0] sm:$0xff]   ;;  %v592_v19 = vld [vmem:[%s767_s1 + $0x98] sm:$0xff]   ;;  %v596_v23 = vld [vmem:[%s767_s1 + $0x90] sm:$0xff]  }
   0x9   :  { %535 = vmatpush3.bf16.msra.mxu1 %v580_v7  ;;  %v597_v24 = vld [vmem:[%s767_s1 + $0x48] sm:$0xff]   ;;  %v601_v28 = vld [vmem:[%s767_s1 + $0x40] sm:$0xff]   ;;  %v610_v39 = vld [vmem:[%s767_s1 + $0x118] sm:$0xff]  }
   0xa   :  { %536 = vmatprep.subr.bf16.mxu1 %v583_v10  ;;  %v598_v25 = vld [vmem:[%s767_s1 + $0x8] sm:$0xff]   ;;  %v602_v29 = vld [vmem:[%s767_s1] sm:$0xff]   ;;  %v611_v40 = vld [vmem:[%s767_s1 + $0x110] sm:$0xff]  }
   0xb   :  { %515 = vmatpush3.bf16.msra.mxu0 %v582_v9  ;;  %v599_v26 = vld [vmem:[%s767_s1 + $0xc8] sm:$0xff]   ;;  %v603_v30 = vld [vmem:[%s767_s1 + $0xc0] sm:$0xff]   ;;  %v606_v43 = vld [vmem:[%s768_s0 + $0x10] ss:$0 sps:$4 sm:$0xff]  }
   0xc   :  { %516 = vmatprep.subr.bf16.mxu0 %v585_v12  ;;  %v600_v27 = vld [vmem:[%s767_s1 + $0x88] sm:$0xff]   ;;  %v18_v31 = vld [vmem:[%s768_s0] sm:$0xff] }
   0xd   :  { %537 = vmatpush3.bf16.msra.mxu1 %v584_v11  ;;  %v468_v32 = vcombine.low %v18_v31, %v18_v31  ;;  %v469_v33 = vcombine.high %v18_v31, %v18_v31  ;;  %v607_v34 = vld [vmem:[%s767_s1 + $0x80] sm:$0xff]   ;;  %v19_v36 = vld [vmem:[%s768_s0 + $0x8] sm:$0xff] }
   0xe   :  { %538 = vmatprep.subr.bf16.mxu1 %v587_v14  ;;  %v470_v37 = vcombine.low %v19_v36, %v19_v36  ;;  %v471_v38 = vcombine.high %v19_v36, %v19_v36  ;;  %v612_v41 = vld [vmem:[%s767_s1 + $0x108] sm:$0xff]   ;;  %v613_v42 = vld [vmem:[%s767_s1 + $0x100] sm:$0xff]  }
   0xf   :  { %517 = vmatpush3.bf16.msra.mxu0 %v586_v13  ;;  %369 = vmatprep.mubr.bf16.mxu0 %v469_v33  ;;  %v467_v52 = vld [vmem:[%s769_s2] ss:$0 sm:$0xff] }
  0x10   :  { %518 = vmatprep.subr.bf16.mxu0 %v589_v16  ;;  %409 = vmatprep.mubr.bf16.mxu1 %v471_v38  ;;  %v457_v56 = vld [vmem:[%s770_s3] sm:$0xf] }
  0x11   :  { %539 = vmatpush3.bf16.msra.mxu1 %v588_v15  ;;  %v458_v58 = vunpack.c.l.bf16 %v457_v56 }
  0x12   :  { %540 = vmatprep.subr.bf16.mxu1 %v591_v18 }
  0x13   :  { %519 = vmatpush3.bf16.msra.mxu0 %v590_v17 }
  0x14   :  { %520 = vmatprep.subr.bf16.mxu0 %v593_v20 }
  0x15   :  { %541 = vmatpush3.bf16.msra.mxu1 %v592_v19 }
  0x16   :  { %542 = vmatprep.subr.bf16.mxu1 %v595_v22 }
  0x17   :  { %521 = vmatpush3.bf16.msra.mxu0 %v594_v21 }
  0x18   :  { %522 = vmatprep.subr.bf16.mxu0 %v597_v24 }
  0x19   :  { %543 = vmatpush3.bf16.msra.mxu1 %v596_v23 }
  0x1a   :  { %544 = vmatprep.subr.bf16.mxu1 %v599_v26 }
  0x1b   :  { %523 = vmatpush3.bf16.msra.mxu0 %v598_v25 }
  0x1c   :  { %524 = vmatprep.subr.bf16.mxu0 %v601_v28 }
  0x1d   :  { %545 = vmatpush3.bf16.msra.mxu1 %v600_v27 }
  0x1e   :  { %546 = vmatprep.subr.bf16.mxu1 %v603_v30 }
  0x1f   :  { %525 = vmatpush3.bf16.msra.mxu0 %v602_v29 }
  0x20   :  { %559 = vmatprep.subr.bf16.mxu0 %v614_v35 }
  0x21   :  { %547 = vmatpush3.bf16.msra.mxu1 %v607_v34 }
  0x22   :  { %370 = vmatmul.mubr.bf16.vlgmr.msra.gmra.mxu0 %v468_v32 }
  0x23   :  { %560 = vmatpush3.bf16.msra.mxu0 %v610_v39  ;;  %567 = vmatprep.mubr.msk.bf16.mxu0 %vm615_vm0, %v614_v35 }
  0x24   :  { %410 = vmatmul.mubr.bf16.vlgmr.msra.gmra.mxu1 %v470_v37  ;;  %561 = vmatprep.subr.bf16.mxu0 %v614_v35 }
  0x27   :  { %562 = vmatpush3.bf16.msra.mxu0 %v611_v40 }
  0x28   :  { %563 = vmatprep.subr.bf16.mxu0 %v614_v35 }
  0x2b   :  { %564 = vmatpush3.bf16.msra.mxu0 %v612_v41 }
  0x2c   :  { %565 = vmatprep.subr.bf16.mxu0 %v614_v35 }
  0x2f   :  { %566 = vmatpush3.bf16.msra.mxu0 %v613_v42 }
  0x32   :  { %568 = vmatmul.mubr.msk.bf16.vlgmr.msra.gmra.mxu0 %vm333_vm1, %v606_v43 }
  0xe2   :  { %v526_v44 = vpop.f32.mrf.mxu0 }
  0xe4   :  { %v527_v45 = vpop.f32.mrf.mxu0  ;;  %v548_v46 = vpop.f32.mrf.mxu1 }
  0xe5   :  { %v528_v51 = vadd.f32 %v527_v45, %v526_v44 }
  0xe6   :  { %v529_v47 = vpop.f32.mrf.mxu0  ;;  %v549_v48 = vpop.f32.mrf.mxu1 }
  0xe7   :  { %v372_v54 = vadd.f32 %v528_v51, %v467_v52  ;;  %v550_v55 = vadd.f32 %v549_v48, %v548_v46 }
  0xe8   :  { %v530_v49 = vpop.f32.mrf.mxu0  ;;  %v551_v50 = vpop.f32.mrf.mxu1 }
  0xe9   :  { %v412_v57 = vadd.f32 %v550_v55, %v372_v54 }
  0xea   :  { %v552_v53 = vpop.f32.mrf.mxu1 }
  0xf2   :  { %v451_v59 = vpop.f32.mrf.mxu0 }
  0xf3   :  { %v452_v60 = vadd.f32 %v451_v59, %v412_v57 }
  0xf4   :  { %v569_v61 = vpop.f32.mrf.mxu0 }
  0xf5   :  { %v459_v62 = vadd.f32 %v458_v58, %v452_v60 }
  0xf6   :  { %v454_v63 = vpop.f32.mrf.mxu0 }
  0xf7   :  { %v460_v0 = vmax.f32 %v459_v62, 0.0 }
  0xf8   :  { %v570_v1 = vpop.f32.mrf.mxu0 }
  0xf9   :  { %v461_v2 = vpack.c.bf16 %v460_v0, %v460_v0 }
  0xfb   :  { %462 = vst [vmem:[%s771_s4] sm:$0xf] %v461_v2 }

// kernel: _lambda_.70
= control target key start
LH: loop header
LB: loop body
LE: loop exit
PB: predicated region body
PF: predicated region fallthrough
CT: control target
= control target key end

     0   :  { %v608_v35 = vmov 0.0   ;;  %vm609_vm0 = vmmov 0   ;;  %vm330_vm1 = vcmask 523264   ;;  %s753_s1 = inlined_call_operand.vmem [shape: bf16[576,128], index: 1, kind: input, shape index: {}]   ;;  %s754_s0 = inlined_call_operand.vmem [shape: bf16[8,576], index: 0, kind: input, shape index: {}]   ;;  %s755_s2 = inlined_call_operand.vmem [shape: f32[1,128], index: 2, kind: input, shape index: {}]   ;;  %s756_s3 = inlined_call_operand.vmem [shape: bf16[8,128], index: 3, kind: output, shape index: {}]  }
   0x1   :  { %v567_v0 = vld [vmem:[%s753_s1 + $0x78] sm:$0xff]   ;;  %v571_v4 = vld [vmem:[%s753_s1 + $0x70] sm:$0xff]   ;;  %v575_v8 = vld [vmem:[%s753_s1 + $0x68] sm:$0xff]  }
   0x2   :  { %v568_v1 = vld [vmem:[%s753_s1 + $0x38] sm:$0xff]   ;;  %504 = vmatprep.subr.bf16.mxu0 %v567_v0  ;;  %v572_v5 = vld [vmem:[%s753_s1 + $0x30] sm:$0xff]   ;;  %v576_v9 = vld [vmem:[%s753_s1 + $0x28] sm:$0xff]  }
   0x3   :  { %v569_v2 = vld [vmem:[%s753_s1 + $0xf8] sm:$0xff]   ;;  %505 = vmatpush3.bf16.msra.mxu0 %v568_v1  ;;  %v573_v6 = vld [vmem:[%s753_s1 + $0xf0] sm:$0xff]   ;;  %v577_v10 = vld [vmem:[%s753_s1 + $0xe8] sm:$0xff]  }
   0x4   :  { %v570_v3 = vld [vmem:[%s753_s1 + $0xb8] sm:$0xff]   ;;  %526 = vmatprep.subr.bf16.mxu1 %v569_v2  ;;  %506 = vmatprep.subr.bf16.mxu0 %v571_v4  ;;  %v574_v7 = vld [vmem:[%s753_s1 + $0xb0] sm:$0xff]   ;;  %v578_v11 = vld [vmem:[%s753_s1 + $0xa8] sm:$0xff]  }
   0x5   :  { %527 = vmatpush3.bf16.msra.mxu1 %v570_v3  ;;  %v579_v12 = vld [vmem:[%s753_s1 + $0x60] sm:$0xff]   ;;  %v583_v16 = vld [vmem:[%s753_s1 + $0x58] sm:$0xff]   ;;  %v587_v20 = vld [vmem:[%s753_s1 + $0x50] sm:$0xff]  }
   0x6   :  { %528 = vmatprep.subr.bf16.mxu1 %v573_v6  ;;  %v580_v13 = vld [vmem:[%s753_s1 + $0x20] sm:$0xff]   ;;  %v584_v17 = vld [vmem:[%s753_s1 + $0x18] sm:$0xff]   ;;  %v588_v21 = vld [vmem:[%s753_s1 + $0x10] sm:$0xff]  }
   0x7   :  { %507 = vmatpush3.bf16.msra.mxu0 %v572_v5  ;;  %v581_v14 = vld [vmem:[%s753_s1 + $0xe0] sm:$0xff]   ;;  %v585_v18 = vld [vmem:[%s753_s1 + $0xd8] sm:$0xff]   ;;  %v589_v22 = vld [vmem:[%s753_s1 + $0xd0] sm:$0xff]  }
   0x8   :  { %508 = vmatprep.subr.bf16.mxu0 %v575_v8  ;;  %v582_v15 = vld [vmem:[%s753_s1 + $0xa0] sm:$0xff]   ;;  %v586_v19 = vld [vmem:[%s753_s1 + $0x98] sm:$0xff]   ;;  %v590_v23 = vld [vmem:[%s753_s1 + $0x90] sm:$0xff]  }
   0x9   :  { %529 = vmatpush3.bf16.msra.mxu1 %v574_v7  ;;  %v591_v24 = vld [vmem:[%s753_s1 + $0x48] sm:$0xff]   ;;  %v595_v28 = vld [vmem:[%s753_s1 + $0x40] sm:$0xff]   ;;  %v604_v39 = vld [vmem:[%s753_s1 + $0x118] sm:$0xff]  }
   0xa   :  { %530 = vmatprep.subr.bf16.mxu1 %v577_v10  ;;  %v592_v25 = vld [vmem:[%s753_s1 + $0x8] sm:$0xff]   ;;  %v596_v29 = vld [vmem:[%s753_s1] sm:$0xff]   ;;  %v605_v40 = vld [vmem:[%s753_s1 + $0x110] sm:$0xff]  }
   0xb   :  { %509 = vmatpush3.bf16.msra.mxu0 %v576_v9  ;;  %v593_v26 = vld [vmem:[%s753_s1 + $0xc8] sm:$0xff]   ;;  %v597_v30 = vld [vmem:[%s753_s1 + $0xc0] sm:$0xff]   ;;  %v600_v43 = vld [vmem:[%s754_s0 + $0x10] ss:$0 sps:$4 sm:$0xff]  }
   0xc   :  { %510 = vmatprep.subr.bf16.mxu0 %v579_v12  ;;  %v594_v27 = vld [vmem:[%s753_s1 + $0x88] sm:$0xff]   ;;  %v15_v31 = vld [vmem:[%s754_s0] sm:$0xff] }
   0xd   :  { %531 = vmatpush3.bf16.msra.mxu1 %v578_v11  ;;  %v462_v32 = vcombine.low %v15_v31, %v15_v31  ;;  %v463_v33 = vcombine.high %v15_v31, %v15_v31  ;;  %v601_v34 = vld [vmem:[%s753_s1 + $0x80] sm:$0xff]   ;;  %v16_v36 = vld [vmem:[%s754_s0 + $0x8] sm:$0xff] }
   0xe   :  { %532 = vmatprep.subr.bf16.mxu1 %v581_v14  ;;  %v464_v37 = vcombine.low %v16_v36, %v16_v36  ;;  %v465_v38 = vcombine.high %v16_v36, %v16_v36  ;;  %v606_v41 = vld [vmem:[%s753_s1 + $0x108] sm:$0xff]   ;;  %v607_v42 = vld [vmem:[%s753_s1 + $0x100] sm:$0xff]  }
   0xf   :  { %511 = vmatpush3.bf16.msra.mxu0 %v580_v13  ;;  %366 = vmatprep.mubr.bf16.mxu0 %v463_v33  ;;  %v461_v52 = vld [vmem:[%s755_s2] ss:$0 sm:$0xff] }
  0x10   :  { %512 = vmatprep.subr.bf16.mxu0 %v583_v16  ;;  %406 = vmatprep.mubr.bf16.mxu1 %v465_v38 }
  0x11   :  { %533 = vmatpush3.bf16.msra.mxu1 %v582_v15 }
  0x12   :  { %534 = vmatprep.subr.bf16.mxu1 %v585_v18 }
  0x13   :  { %513 = vmatpush3.bf16.msra.mxu0 %v584_v17 }
  0x14   :  { %514 = vmatprep.subr.bf16.mxu0 %v587_v20 }
  0x15   :  { %535 = vmatpush3.bf16.msra.mxu1 %v586_v19 }
  0x16   :  { %536 = vmatprep.subr.bf16.mxu1 %v589_v22 }
  0x17   :  { %515 = vmatpush3.bf16.msra.mxu0 %v588_v21 }
  0x18   :  { %516 = vmatprep.subr.bf16.mxu0 %v591_v24 }
  0x19   :  { %537 = vmatpush3.bf16.msra.mxu1 %v590_v23 }
  0x1a   :  { %538 = vmatprep.subr.bf16.mxu1 %v593_v26 }
  0x1b   :  { %517 = vmatpush3.bf16.msra.mxu0 %v592_v25 }
  0x1c   :  { %518 = vmatprep.subr.bf16.mxu0 %v595_v28 }
  0x1d   :  { %539 = vmatpush3.bf16.msra.mxu1 %v594_v27 }
  0x1e   :  { %540 = vmatprep.subr.bf16.mxu1 %v597_v30 }
  0x1f   :  { %519 = vmatpush3.bf16.msra.mxu0 %v596_v29 }
  0x20   :  { %553 = vmatprep.subr.bf16.mxu0 %v608_v35 }
  0x21   :  { %541 = vmatpush3.bf16.msra.mxu1 %v601_v34 }
  0x22   :  { %367 = vmatmul.mubr.bf16.vlgmr.msra.gmra.mxu0 %v462_v32 }
  0x23   :  { %554 = vmatpush3.bf16.msra.mxu0 %v604_v39  ;;  %561 = vmatprep.mubr.msk.bf16.mxu0 %vm609_vm0, %v608_v35 }
  0x24   :  { %407 = vmatmul.mubr.bf16.vlgmr.msra.gmra.mxu1 %v464_v37  ;;  %555 = vmatprep.subr.bf16.mxu0 %v608_v35 }
  0x27   :  { %556 = vmatpush3.bf16.msra.mxu0 %v605_v40 }
  0x28   :  { %557 = vmatprep.subr.bf16.mxu0 %v608_v35 }
  0x2b   :  { %558 = vmatpush3.bf16.msra.mxu0 %v606_v41 }
  0x2c   :  { %559 = vmatprep.subr.bf16.mxu0 %v608_v35 }
  0x2f   :  { %560 = vmatpush3.bf16.msra.mxu0 %v607_v42 }
  0x32   :  { %562 = vmatmul.mubr.msk.bf16.vlgmr.msra.gmra.mxu0 %vm330_vm1, %v600_v43 }
  0xe2   :  { %v520_v44 = vpop.f32.mrf.mxu0 }
  0xe4   :  { %v521_v45 = vpop.f32.mrf.mxu0  ;;  %v542_v46 = vpop.f32.mrf.mxu1 }
  0xe5   :  { %v522_v51 = vadd.f32 %v521_v45, %v520_v44 }
  0xe6   :  { %v523_v47 = vpop.f32.mrf.mxu0  ;;  %v543_v48 = vpop.f32.mrf.mxu1 }
  0xe7   :  { %v369_v54 = vadd.f32 %v522_v51, %v461_v52  ;;  %v544_v55 = vadd.f32 %v543_v48, %v542_v46 }
  0xe8   :  { %v524_v49 = vpop.f32.mrf.mxu0  ;;  %v545_v50 = vpop.f32.mrf.mxu1 }
  0xe9   :  { %v409_v56 = vadd.f32 %v544_v55, %v369_v54 }
  0xea   :  { %v546_v53 = vpop.f32.mrf.mxu1 }
  0xf2   :  { %v448_v57 = vpop.f32.mrf.mxu0 }
  0xf3   :  { %v449_v58 = vadd.f32 %v448_v57, %v409_v56 }
  0xf4   :  { %v563_v59 = vpop.f32.mrf.mxu0 }
  0xf5   :  { %v454_v60 = vmax.f32 %v449_v58, 0.0 }
  0xf6   :  { %v451_v61 = vpop.f32.mrf.mxu0 }
  0xf7   :  { %v455_v62 = vpack.c.bf16 %v454_v60, %v454_v60 }
  0xf8   :  { %v564_v63 = vpop.f32.mrf.mxu0 }
  0xf9   :  { %456 = vst [vmem:[%s756_s3] sm:$0xf] %v455_v62 }

// kernel: _lambda_.72
= control target key start
LH: loop header
LB: loop body
LE: loop exit
PB: predicated region body
PF: predicated region fallthrough
CT: control target
= control target key end

     0   :  { %v187_v0 = vmov 0   ;;  %vm109_vm0 = vcmask 261120   ;;  %s247_s1 = inlined_call_operand.vmem [shape: bf16[160,128], index: 1, kind: input, shape index: {}]   ;;  %s248_s0 = inlined_call_operand.vmem [shape: bf16[8,160], index: 0, kind: input, shape index: {}]   ;;  %s249_s2 = inlined_call_operand.vmem [shape: f32[1,128], index: 2, kind: input, shape index: {}]   ;;  %s250_s3 = inlined_call_operand.vmem [shape: bf16[8,128], index: 3, kind: output, shape index: {}]  }
   0x1   :  { %113 = vmatprep.subr.bf16.mxu0 %v187_v0  ;;  %v175_v1 = vld [vmem:[%s247_s1 + $0x38] sm:$0xff]   ;;  %v176_v2 = vld [vmem:[%s247_s1 + $0x30] sm:$0xff]   ;;  %v177_v3 = vld [vmem:[%s247_s1 + $0x28] sm:$0xff]  }
   0x2   :  { %114 = vmatpush1.bf16.msra.mxu0 %v175_v1  ;;  %v178_v4 = vld [vmem:[%s247_s1 + $0x20] sm:$0xff]   ;;  %v179_v7 = vld [vmem:[%s247_s1 + $0x18] sm:$0xff]   ;;  %v180_v8 = vld [vmem:[%s247_s1 + $0x10] sm:$0xff]  }
   0x3   :  { %115 = vmatprep.subr.bf16.mxu0 %v187_v0  ;;  %v15_v5 = vld [vmem:[%s248_s0] sm:$0xff]  ;;  %v181_v9 = vld [vmem:[%s247_s1 + $0x8] sm:$0xff]  }
   0x4   :  { %v162_v6 = vcombine.high %v15_v5, %v15_v5  ;;  %v182_v10 = vld [vmem:[%s247_s1] sm:$0xff]   ;;  %v183_v11 = vld [vmem:[%s247_s1 + $0x48] sm:$0xff]   ;;  %v161_v13 = vcombine.low %v15_v5, %v15_v5 }
   0x5   :  { %v184_v12 = vld [vmem:[%s247_s1 + $0x40] sm:$0xff]  }
   0x6   :  { %116 = vmatpush1.bf16.msra.mxu0 %v176_v2  ;;  %173 = vmatprep.mubr.msk.bf16.mxu0 %vm109_vm0, %v162_v6  ;;  %v160_v14 = vld [vmem:[%s249_s2] ss:$0 sm:$0xff] }
   0x7   :  { %117 = vmatprep.subr.bf16.mxu0 %v187_v0 }
   0xa   :  { %118 = vmatpush1.bf16.msra.mxu0 %v177_v3 }
   0xb   :  { %119 = vmatprep.subr.bf16.mxu0 %v187_v0 }
   0xe   :  { %120 = vmatpush1.bf16.msra.mxu0 %v178_v4 }
   0xf   :  { %121 = vmatprep.subr.bf16.mxu0 %v187_v0 }
  0x12   :  { %122 = vmatpush1.bf16.msra.mxu0 %v179_v7 }
  0x13   :  { %123 = vmatprep.subr.bf16.mxu0 %v187_v0 }
  0x16   :  { %124 = vmatpush1.bf16.msra.mxu0 %v180_v8 }
  0x17   :  { %125 = vmatprep.subr.bf16.mxu0 %v187_v0 }
  0x1a   :  { %126 = vmatpush1.bf16.msra.mxu0 %v181_v9 }
  0x1b   :  { %127 = vmatprep.subr.bf16.mxu0 %v187_v0 }
  0x1e   :  { %128 = vmatpush1.bf16.msra.mxu0 %v182_v10 }
  0x1f   :  { %141 = vmatprep.subr.bf16.mxu0 %v187_v0 }
  0x22   :  { %142 = vmatpush2.bf16.msra.mxu0 %v183_v11 }
  0x23   :  { %143 = vmatprep.subr.bf16.mxu0 %v187_v0 }
  0x26   :  { %144 = vmatpush2.bf16.msra.mxu0 %v184_v12 }
  0x29   :  { %146 = vmatmul.mubr.bf16.vlgmr.msra.gmra.mxu0 %v161_v13 }
  0xe9   :  { %v147_v15 = vpop.f32.mrf.mxu0 }
  0xea   :  { %v148_v16 = vadd.f32 %v160_v14, %v147_v15 }
  0xeb   :  { %v149_v17 = vpop.f32.mrf.mxu0 }
  0xec   :  { %v153_v18 = vmax.f32 %v148_v16, 0.0 }
  0xed   :  { %v150_v19 = vpop.f32.mrf.mxu0 }
  0xee   :  { %v154_v20 = vpack.c.bf16 %v153_v18, %v153_v18 }
  0xef   :  { %v151_v21 = vpop.f32.mrf.mxu0 }
  0xf0   :  { %155 = vst [vmem:[%s250_s3] sm:$0xf] %v154_v20 }

// kernel: _lambda_.73
= control target key start
LH: loop header
LB: loop body
LE: loop exit
PB: predicated region body
PF: predicated region fallthrough
CT: control target
= control target key end

     0   :  { %v167_v1 = vmov 0.0   ;;  %vm168_vm0 = vmmov 0   ;;  %s211_s0 = inlined_call_operand.vmem [shape: bf16[2,64], index: 0, kind: input, shape index: {}]   ;;  %s212_s1 = inlined_call_operand.vmem [shape: bf16[64,128], index: 1, kind: input, shape index: {}]   ;;  %s213_s2 = inlined_call_operand.vmem [shape: f32[1,128], index: 2, kind: input, shape index: {}]   ;;  %s214_s3 = inlined_call_operand.hbm [shape: f32[2,128], index: 3, kind: output, shape index: {}]  }
   0x1   :  { %v141_v0 = vld [vmem:[%s212_s1 + $0x18] sm:$0xff]   ;;  %126 = vmatprep.subr.bf16.mxu0 %v167_v1  ;;  %v142_v2 = vld [vmem:[%s212_s1 + $0x10] sm:$0xff]   ;;  %134 = vmatprep.mubr.msk.bf16.mxu0 %vm168_vm0, %v167_v1 }
   0x2   :  { %127 = vmatpush3.bf16.msra.mxu0 %v141_v0 }
   0x3   :  { %128 = vmatprep.subr.bf16.mxu0 %v167_v1 }
   0x4   :  { %8 = vsyncpa [#allocation3], 0  ;;  %v143_v3 = vld [vmem:[%s212_s1 + $0x8] sm:$0xff]   ;;  %v144_v4 = vld [vmem:[%s212_s1] sm:$0xff]   ;;  %vm56_vm1 = vcmask 523264   ;;  %s169_s24 = smov [#allocation2]  }
   0x5   :  { %v16_v5 = vld [vmem:[%s211_s0] sm:$0x1]  ;;  %s107_s25 = sshll.u32 %s169_s24, 4  ;;  %s108_s25 = int_to_ptr.vmem [resolvable:$true] %s107_s25 }
   0x6   :  { %129 = vmatpush3.bf16.msra.mxu0 %v142_v2  ;;  %v115_v6 = vld [vmem:[%s213_s2] ss:$0 sm:$0xff]  ;;  %s145_s1 = scalar_lea.vmem %s108_s25, 32  ;;  %p150_p1 = scmp.lt.s32.totalorder %s108_s25, %s108_s25 }
   0x7   :  { %130 = vmatprep.subr.bf16.mxu0 %v167_v1  ;;  %p146_p0 = scmp.ne.s32.totalorder %s108_s25, %s145_s1  ;;  %p151_p2 = scmp.lt.s32.totalorder %s145_s1, %s145_s1 }
   0x9   :  { %p152_p3 = por %p151_p2, %p150_p1 }
   0xa   :  { %131 = vmatpush3.bf16.msra.mxu0 %v143_v3 }
   0xb   :  { %132 = vmatprep.subr.bf16.mxu0 %v167_v1  ;;  %p153_p4 = pnand %p152_p3, %p146_p0 }
   0xe   :  { %133 = vmatpush3.bf16.msra.mxu0 %v144_v4 }
  0x11   :  { %135 = vmatmul.mubr.msk.bf16.vlgmr.msra.gmra.mxu0 %vm56_vm1, %v16_v5 }
  0xd1   :  { %v94_v7 = vpop.f32.mrf.mxu0 }
  0xd2   :  { %v95_v8 = vadd.f32 %v115_v6, %v94_v7 }
  0xd3   :  { %v136_v9 = vpop.f32.mrf.mxu0 }
  0xd4   :  { %100 = vst [vmem:[#allocation2] sm:$0x3] %v95_v8 }
  0xd5   :  { %v97_v10 = vpop.f32.mrf.mxu0 }
  0xd6   :  { %156 = shalt.err (!%p153_p4)
}
  0xd7   :  { %110 = dma.vmem_to_hbm [thread:$0]  %s108_s25, 32, %s214_s3, [#allocation3]   ;;  %v137_v11 = vpop.f32.mrf.mxu0 }
  0xd8   :  { %165 = dma.done.wait [#allocation3], 32  }
  0xd9   :  { %166 = vsyncadd [#allocation3], 4294967264 }
  0xda   :  { %114 = vsyncpa [#allocation3], 1 }

</bundles_post_ra>
